<compile_context>
chip_gen: v7x
topology: tpu7x:2x2x1
jax: 0.10.0
libtpu: 0.0.40
codegen_flags: <defaults>
</compile_context>

<pallas_src>
import functools

import jax
import jax.numpy as jnp
from jax import lax
from jax.experimental import pallas as pl
from jax.experimental.pallas import tpu as pltpu

LN_EPS = 1e-5     # LayerNorm eps (matches the module)
L2_EPS = 1e-12    # torch.nn.functional.normalize default eps
KTAPS = 21        # fused depthwise kernel length


# --------------------------------------------------------------------------- helpers
def _center_pad_taps(wk, K):
    """Zero-pad a (C, k) depthwise kernel symmetrically to (C, K)."""
    pad = (K - wk.shape[1]) // 2
    return jnp.pad(wk, ((0, 0), (pad, pad)))


def _pick_rows(rows, row_bytes, target_bytes=2 << 20, min_steps=4):
    """Row tile that divides `rows`, is sublane-aligned, stays under ~target_bytes and
    leaves >= min_steps grid steps (so v7x's two TensorCores both get >= 2 steps)."""
    cap = max(1, target_bytes // max(1, row_bytes))
    if rows >= 8 * min_steps:
        cap = min(cap, rows // min_steps)
    cap = min(cap, rows)
    for d in range(cap, 0, -1):
        if rows % d == 0 and (d % 8 == 0 or d == rows):
            return d
    return rows


def _pick_group(total, bytes_per_item, target_bytes=2 << 20, min_steps=4):
    """Largest divisor of `total` whose block stays under target bytes and keeps >= min_steps
    grid steps (falls back to 1)."""
    for g in range(total, 0, -1):
        if total % g:
            continue
        if g != 1 and g * bytes_per_item > target_bytes:
            continue
        if g != 1 and total // g < min_steps:
            continue
        return g
    return 1


# ------------------- Kernel A: fused LayerNorm + dual depthwise conv + project_out -----
def ln_conv_proj(x_cl, x_cw, ln_w, ln_b, wh_t, wv_t, pw, cb1, cb2):
    """x_cl: (B, H, W, C) channels-last image, x_cw: (B, W, H, C) spatially transposed view.
    wh_t / wv_t: (K, C) fused horizontal / vertical depthwise taps.
    pw: (Cout, Cin) 1x1-conv weight (torch layout); cb1/cb2: (C, 1) combined biases
    (conv bias folded through project_out plus the projection bias).

    Returns:
      o1: (B, C, W*H)  project_out(horizontal branch), pixel order (w, h)
      o2: (B, C, H*W)  project_out(vertical branch),   pixel order (h, w)
    """
    B, H, W, C = x_cl.shape
    K = wh_t.shape[0]
    PAD = (K - 1) // 2

    def _ln(x, w, b):
        mu = jnp.mean(x, axis=-1, keepdims=True)
        xc = x - mu
        var = jnp.mean(xc * xc, axis=-1, keepdims=True)
        return xc * lax.rsqrt(var + LN_EPS) * w + b

    def kernel(xhw_ref, xwh_ref, lnw_ref, lnb_ref, wh_ref, wv_ref, pw_ref,
               cb1_ref, cb2_ref, o1_ref, o2_ref, pad_h_ref, pad_v_ref):
        lnw = lnw_ref[...]
        lnb = lnb_ref[...]
        # zero halos + interior (interior is overwritten right below; zeroing is cheap
        # and keeps the scratch state step-independent, so "parallel" semantics are safe)
        pad_v_ref[...] = jnp.zeros_like(pad_v_ref)
        pad_h_ref[...] = jnp.zeros_like(pad_h_ref)
        # LayerNorm'd tile written into the padded VMEM scratch (no HBM pad copy).
        pad_v_ref[PAD:PAD + H, :, :] = _ln(xhw_ref[0].astype(jnp.float32), lnw, lnb)
        pad_h_ref[PAD:PAD + W, :, :] = _ln(xwh_ref[0].astype(jnp.float32), lnw, lnb)

        wh = wh_ref[...]                       # (K, C) horizontal taps
        wv = wv_ref[...]                       # (K, C) vertical taps
        acc1 = jnp.zeros((W, H, C), jnp.float32)   # horizontal conv, (w, h) pixel order
        acc2 = jnp.zeros((H, W, C), jnp.float32)   # vertical conv,   (h, w) pixel order
        for k in range(K):                     # unrolled taps; only major-axis slices
            acc1 = acc1 + wh[k:k + 1] * pad_h_ref[k:k + W]
            acc2 = acc2 + wv[k:k + 1] * pad_v_ref[k:k + H]

        pw_f = pw_ref[...]
        # project_out, channels-first so stores are 256-lane dense:
        # (Cout, N) = pw (Cout, Cin)  contracted with  acc (N, Cin)
        p1 = lax.dot_general(pw_f, acc1.reshape(W * H, C),
                             (((1,), (1,)), ((), ())),
                             preferred_element_type=jnp.float32) + cb1_ref[...]
        p2 = lax.dot_general(pw_f, acc2.reshape(H * W, C),
                             (((1,), (1,)), ((), ())),
                             preferred_element_type=jnp.float32) + cb2_ref[...]
        o1_ref[0] = p1.astype(o1_ref.dtype)
        o2_ref[0] = p2.astype(o2_ref.dtype)

    N = H * W
    return pl.pallas_call(
        kernel,
        out_shape=(jax.ShapeDtypeStruct((B, C, N), x_cl.dtype),
                   jax.ShapeDtypeStruct((B, C, N), x_cl.dtype)),
        grid_spec=pltpu.PrefetchScalarGridSpec(
            num_scalar_prefetch=0,
            grid=(B,),
            in_specs=[
                pl.BlockSpec((1, H, W, C), lambda i: (i, 0, 0, 0)),
                pl.BlockSpec((1, W, H, C), lambda i: (i, 0, 0, 0)),
                pl.BlockSpec((1, C), lambda i: (0, 0)),
                pl.BlockSpec((1, C), lambda i: (0, 0)),
                pl.BlockSpec((K, C), lambda i: (0, 0)),
                pl.BlockSpec((K, C), lambda i: (0, 0)),
                pl.BlockSpec((C, C), lambda i: (0, 0)),
                pl.BlockSpec((C, 1), lambda i: (0, 0)),
                pl.BlockSpec((C, 1), lambda i: (0, 0)),
            ],
            out_specs=(pl.BlockSpec((1, C, N), lambda i: (i, 0, 0)),
                       pl.BlockSpec((1, C, N), lambda i: (i, 0, 0))),
            scratch_shapes=[pltpu.VMEM((W + 2 * PAD, H, C), jnp.float32),
                            pltpu.VMEM((H + 2 * PAD, W, C), jnp.float32)],
        ),
        compiler_params=pltpu.CompilerParams(dimension_semantics=("parallel",)),
    )(x_cl, x_cw, ln_w, ln_b, wh_t, wv_t, pw, cb1, cb2)


# ------------------------------------ Kernel B: head-batched L2-normalized attention ---
def l2_attention(q, kv):
    """q, kv: (B*heads, N, D).  Returns softmax(norm(q) @ norm(kv)^T) @ kv + norm(q).
    kv (un-normalized) is used as the attention values, matching the PyTorch module."""
    BH, N, D = q.shape
    G = _pick_group(BH, N * D * 4 * 3)         # ~ q + kv + out block bytes per head

    def kernel(q_ref, kv_ref, o_ref):
        qf = q_ref[...].astype(jnp.float32)
        kf = kv_ref[...].astype(jnp.float32)
        qn = qf * lax.rsqrt(jnp.maximum(jnp.sum(qf * qf, -1, keepdims=True),
                                        L2_EPS * L2_EPS))
        kn = kf * lax.rsqrt(jnp.maximum(jnp.sum(kf * kf, -1, keepdims=True),
                                        L2_EPS * L2_EPS))
        s = jnp.einsum("gnd,gmd->gnm", qn, kn, preferred_element_type=jnp.float32)
        # q, k rows are L2-normalized so |s| <= 1: exp cannot overflow, skip max-subtract.
        p = jnp.exp(s)
        p = p * pl.reciprocal(jnp.sum(p, -1, keepdims=True), approx=True)
        o = jnp.einsum("gnm,gmd->gnd", p, kf, preferred_element_type=jnp.float32) + qn
        o_ref[...] = o.astype(o_ref.dtype)

    return pl.pallas_call(
        kernel,
        out_shape=jax.ShapeDtypeStruct((BH, N, D), q.dtype),
        grid_spec=pltpu.PrefetchScalarGridSpec(
            num_scalar_prefetch=0,
            grid=(BH // G,),
            in_specs=[pl.BlockSpec((G, N, D), lambda i: (i, 0, 0))] * 2,
            out_specs=pl.BlockSpec((G, N, D), lambda i: (i, 0, 0)),
        ),
        compiler_params=pltpu.CompilerParams(dimension_semantics=("parallel",)),
    )(q, kv)


# --------------------------- Kernel C: fused final projection + residual (lane-packed) --
def final_proj_residual(a_rows, b_rows, x_rows, w, bias2):
    """(a + b) @ w + bias2 + x, rows over pixels.  a/b/x: (R, C), w: (Cin, Cout),
    bias2: (Cout,) (already doubled).  When 128 % C == 0, 128//C rows are folded onto the
    lane axis (block-diagonal kron weight) so blocks and stores are 128-lane dense."""
    R, Cin = a_rows.shape
    Cout = w.shape[1]
    G = 1
    if Cin == Cout and Cin < 128 and 128 % Cin == 0 and R % (128 // Cin) == 0:
        G = 128 // Cin
    L = G * Cin
    Rp = R // G

    wk = jnp.kron(jnp.eye(G, dtype=jnp.float32), w.astype(jnp.float32))   # (L, L)
    bk = jnp.tile(bias2.astype(jnp.float32).reshape(1, Cout), (1, G))     # (1, L)
    av = a_rows.reshape(Rp, L)
    bv = b_rows.reshape(Rp, L)
    xv = x_rows.reshape(Rp, L)
    tr = _pick_rows(Rp, 4 * L * 4)

    def kernel(a_ref, b_ref, x_ref, w_ref, bias_ref, o_ref):
        s = a_ref[...].astype(jnp.float32) + b_ref[...].astype(jnp.float32)
        y = jnp.dot(s, w_ref[...], preferred_element_type=jnp.float32)
        o_ref[...] = (y + bias_ref[...] + x_ref[...].astype(jnp.float32)).astype(o_ref.dtype)

    out = pl.pallas_call(
        kernel,
        out_shape=jax.ShapeDtypeStruct((Rp, L), a_rows.dtype),
        grid_spec=pltpu.PrefetchScalarGridSpec(
            num_scalar_prefetch=0,
            grid=(Rp // tr,),
            in_specs=[
                pl.BlockSpec((tr, L), lambda i: (i, 0)),
                pl.BlockSpec((tr, L), lambda i: (i, 0)),
                pl.BlockSpec((tr, L), lambda i: (i, 0)),
                pl.BlockSpec((L, L), lambda i: (0, 0)),   # constant: fetched once
                pl.BlockSpec((1, L), lambda i: (0, 0)),
            ],
            out_specs=pl.BlockSpec((tr, L), lambda i: (i, 0)),
        ),
        compiler_params=pltpu.CompilerParams(dimension_semantics=("parallel",)),
    )(av, bv, xv, wk, bk)
    return out.reshape(R, Cin)


# ------------------------------------------------------------------ full MSCAttention --
def msca_forward(x, p, *, num_heads):
    B, C, H, W = x.shape
    cph = C // num_heads
    N = H * W

    x_cl = jnp.transpose(x, (0, 2, 3, 1))      # (B, H, W, C) channels-last
    x_cw = jnp.transpose(x, (0, 3, 2, 1))      # (B, W, H, C) spatially transposed view

    # fused multi-scale depthwise taps: zero-padding the 7/11-tap kernels to 21 taps and
    # summing weights/biases equals summing the three separate 'same' convolutions.
    wh = _center_pad_taps(p["w0_1"], KTAPS) + _center_pad_taps(p["w1_1"], KTAPS) + p["w2_1"]
    bh = p["b0_1"] + p["b1_1"] + p["b2_1"]
    wv = _center_pad_taps(p["w0_2"], KTAPS) + _center_pad_taps(p["w1_2"], KTAPS) + p["w2_2"]
    bv = p["b0_2"] + p["b1_2"] + p["b2_2"]

    pw = p["po_w"].astype(jnp.float32)                       # (Cout, Cin)
    pb = p["po_b"].astype(jnp.float32)
    cb1 = (pw @ bh.astype(jnp.float32) + pb).reshape(C, 1)   # conv bias folded through proj
    cb2 = (pw @ bv.astype(jnp.float32) + pb).reshape(C, 1)

    # 1-3) LayerNorm + depthwise convs + project_out, fused.
    o1_cf, o2_cf = ln_conv_proj(
        x_cl, x_cw,
        p["ln_w"].astype(jnp.float32).reshape(1, C),
        p["ln_b"].astype(jnp.float32).reshape(1, C),
        wh.T.astype(jnp.float32), wv.T.astype(jnp.float32),
        pw, cb1, cb2)
    # o1_cf: (B, C, W*H) pixel order (w, h) -- horizontal branch (out1), spatially transposed
    # o2_cf: (B, C, H*W) pixel order (h, w) -- vertical branch (out2)

    # 4) head-layout rearranges (small XLA transposes) + dual attention.
    o1_5 = o1_cf.reshape(B, num_heads, cph, W, H)
    o2_5 = o2_cf.reshape(B, num_heads, cph, H, W)
    kv1 = jnp.transpose(o1_5, (0, 1, 4, 3, 2)).reshape(B * num_heads, H, W * cph)  # out1 hwc
    q1 = jnp.transpose(o2_5, (0, 1, 3, 4, 2)).reshape(B * num_heads, H, W * cph)   # out2 hwc
    kv2 = jnp.transpose(o2_5, (0, 1, 4, 3, 2)).reshape(B * num_heads, W, H * cph)  # out2 whc
    q2 = jnp.transpose(o1_5, (0, 1, 3, 4, 2)).reshape(B * num_heads, W, H * cph)   # out1 whc

    out3 = l2_attention(q1, kv1)               # (B*heads, H, W*cph)
    out4 = l2_attention(q2, kv2)               # (B*heads, W, H*cph)

    out3_rows = jnp.transpose(out3.reshape(B, num_heads, H, W, cph),
                              (0, 2, 3, 1, 4)).reshape(B * N, C)
    out4_rows = jnp.transpose(out4.reshape(B, num_heads, W, H, cph),
                              (0, 3, 2, 1, 4)).reshape(B * N, C)
    x_rows = x_cl.reshape(B * N, C)

    # 5) fused:  proj(out3) + proj(out4) + x  ==  (out3 + out4) @ W^T + 2*bias + x
    out_rows = final_proj_residual(out3_rows, out4_rows, x_rows, pw.T, 2.0 * pb)
    return jnp.transpose(out_rows.reshape(B, H, W, C), (0, 3, 1, 2))


# ------------------------------------------------------- pure-JAX reference (correctness)
def reference_forward(x, p, num_heads):
    B, C, H, W = x.shape
    cph = C // num_heads
    hi = lax.Precision.HIGHEST

    x3 = jnp.transpose(x, (0, 2, 3, 1)).reshape(B, H * W, C)
    mu = jnp.mean(x3, -1, keepdims=True)
    var = jnp.mean((x3 - mu) ** 2, -1, keepdims=True)
    xn = (x3 - mu) / jnp.sqrt(var + LN_EPS) * p["ln_w"] + p["ln_b"]
    x1 = jnp.transpose(xn.reshape(B, H, W, C), (0, 3, 1, 2))

    def dw(xin, wk, bk, horizontal):
        klen = wk.shape[1]
        if horizontal:
            w4 = wk.reshape(C, 1, 1, klen)
            padding = ((0, 0), (klen // 2, klen // 2))
        else:
            w4 = wk.reshape(C, 1, klen, 1)
            padding = ((klen // 2, klen // 2), (0, 0))
        y = lax.conv_general_dilated(
            xin, w4, window_strides=(1, 1), padding=padding,
            feature_group_count=C,
            dimension_numbers=("NCHW", "OIHW", "NCHW"), precision=hi)
        return y + bk[None, :, None, None]

    out1 = (dw(x1, p["w0_1"], p["b0_1"], True) + dw(x1, p["w1_1"], p["b1_1"], True)
            + dw(x1, p["w2_1"], p["b2_1"], True))
    out2 = (dw(x1, p["w0_2"], p["b0_2"], False) + dw(x1, p["w1_2"], p["b1_2"], False)
            + dw(x1, p["w2_2"], p["b2_2"], False))

    def proj(t):
        return (jnp.einsum("bchw,oc->bohw", t, p["po_w"], precision=hi)
                + p["po_b"][None, :, None, None])

    out1 = proj(out1)
    out2 = proj(out2)

    def r_hwc(t):
        return jnp.transpose(t.reshape(B, num_heads, cph, H, W),
                             (0, 1, 3, 4, 2)).reshape(B, num_heads, H, W * cph)

    def r_whc(t):
        return jnp.transpose(t.reshape(B, num_heads, cph, H, W),
                             (0, 1, 4, 3, 2)).reshape(B, num_heads, W, H * cph)

    def l2n(t):
        return t / jnp.maximum(jnp.linalg.norm(t, axis=-1, keepdims=True), L2_EPS)

    k1, v1, q1 = l2n(r_hwc(out1)), r_hwc(out1), l2n(r_hwc(out2))
    k2, v2, q2 = l2n(r_whc(out2)), r_whc(out2), l2n(r_whc(out1))

    attn1 = jax.nn.softmax(jnp.einsum("bhnd,bhmd->bhnm", q1, k1, precision=hi), axis=-1)
    out3 = jnp.einsum("bhnm,bhmd->bhnd", attn1, v1, precision=hi) + q1
    attn2 = jax.nn.softmax(jnp.einsum("bhnd,bhmd->bhnm", q2, k2, precision=hi), axis=-1)
    out4 = jnp.einsum("bhnm,bhmd->bhnd", attn2, v2, precision=hi) + q2

    out3 = jnp.transpose(out3.reshape(B, num_heads, H, W, cph),
                         (0, 1, 4, 2, 3)).reshape(B, C, H, W)
    out4 = jnp.transpose(out4.reshape(B, num_heads, W, H, cph),
                         (0, 1, 4, 3, 2)).reshape(B, C, H, W)
    return proj(out3) + proj(out4) + x


if __name__ == "__main__":
    B, C, H, W = 2, 32, 16, 16
    NUM_HEADS = 8

    key = jax.random.PRNGKey(0)
    ks = jax.random.split(key, 16)
    x = jax.random.normal(ks[0], (B, C, H, W), dtype=jnp.float32)

    def w_init(k, shape, scale=0.1):
        return scale * jax.random.normal(k, shape, dtype=jnp.float32)

    params = {
        "ln_w": jnp.ones((C,), jnp.float32),    # module init: weight = ones
        "ln_b": jnp.zeros((C,), jnp.float32),   # module init: bias = zeros
        "w0_1": w_init(ks[1], (C, 7)),  "b0_1": w_init(ks[2], (C,), 0.05),
        "w0_2": w_init(ks[3], (C, 7)),  "b0_2": w_init(ks[4], (C,), 0.05),
        "w1_1": w_init(ks[5], (C, 11)), "b1_1": w_init(ks[6], (C,), 0.05),
        "w1_2": w_init(ks[7], (C, 11)), "b1_2": w_init(ks[8], (C,), 0.05),
        "w2_1": w_init(ks[9], (C, 21)), "b2_1": w_init(ks[10], (C,), 0.05),
        "w2_2": w_init(ks[11], (C, 21)), "b2_2": w_init(ks[12], (C,), 0.05),
        "po_w": w_init(ks[13], (C, C)),          # (C_out, C_in), torch 1x1 Conv2d layout
        "po_b": w_init(ks[14], (C,), 0.05),
    }

    fwd = jax.jit(functools.partial(msca_forward, num_heads=NUM_HEADS))
    out = jax.block_until_ready(fwd(x, params))

    ref = jax.block_until_ready(reference_forward(x, params, NUM_HEADS))

    assert out.shape == x.shape and out.dtype == x.dtype
    # kernels accumulate in f32; approx EUP reciprocal in the softmax gives ~1e-4-level
    # relative error, far below this tolerance.  Semantic bugs would give O(0.1-1) errors.
    err = float(jnp.max(jnp.abs(out - ref)))
    assert err < 1e-2, f"max abs error vs reference: {err}"
    print("KERNEL_OK")
</pallas_src>

<mosaic_0001>
module attributes {stable_mosaic.version = 11 : i64} {
  func.func @kernel(%arg0: i32, %arg1: memref<1x16x16x32xf32, #tpu.memory_space<vmem>>, %arg2: memref<1x16x16x32xf32, #tpu.memory_space<vmem>>, %arg3: memref<1x32xf32, #tpu.memory_space<vmem>>, %arg4: memref<1x32xf32, #tpu.memory_space<vmem>>, %arg5: memref<21x32xf32, #tpu.memory_space<vmem>>, %arg6: memref<21x32xf32, #tpu.memory_space<vmem>>, %arg7: memref<32x32xf32, #tpu.memory_space<vmem>>, %arg8: memref<32x1xf32, #tpu.memory_space<vmem>>, %arg9: memref<32x1xf32, #tpu.memory_space<vmem>>, %arg10: memref<1x32x256xf32, #tpu.memory_space<vmem>>, %arg11: memref<1x32x256xf32, #tpu.memory_space<vmem>>, %arg12: memref<36x16x32xf32, #tpu.memory_space<vmem>>, %arg13: memref<36x16x32xf32, #tpu.memory_space<vmem>>) attributes {dimension_semantics = [#tpu.dimension_semantics<parallel>], iteration_bounds = array<i64: 2>, scalar_prefetch = 0 : i64, scratch_operands = 2 : i64, tpu.core_type = #tpu.core_type<tc>, window_params = [{transform_indices = @transform_0, window_bounds = array<i64: 1, 16, 16, 32>}, {transform_indices = @transform_1, window_bounds = array<i64: 1, 16, 16, 32>}, {pipeline_mode = #tpu.pipeline_mode<synchronous>, transform_indices = @transform_2, window_bounds = array<i64: 1, 32>}, {pipeline_mode = #tpu.pipeline_mode<synchronous>, transform_indices = @transform_3, window_bounds = array<i64: 1, 32>}, {pipeline_mode = #tpu.pipeline_mode<synchronous>, transform_indices = @transform_4, window_bounds = array<i64: 21, 32>}, {pipeline_mode = #tpu.pipeline_mode<synchronous>, transform_indices = @transform_5, window_bounds = array<i64: 21, 32>}, {pipeline_mode = #tpu.pipeline_mode<synchronous>, transform_indices = @transform_6, window_bounds = array<i64: 32, 32>}, {pipeline_mode = #tpu.pipeline_mode<synchronous>, transform_indices = @transform_7, window_bounds = array<i64: 32, 1>}, {pipeline_mode = #tpu.pipeline_mode<synchronous>, transform_indices = @transform_8, window_bounds = array<i64: 32, 1>}, {transform_indices = @transform_9, window_bounds = array<i64: 1, 32, 256>}, {transform_indices = @transform_10, window_bounds = array<i64: 1, 32, 256>}]} {
    %c0 = arith.constant 0 : index
    %c0_0 = arith.constant 0 : index
    %0 = vector.load %arg3[%c0, %c0_0] : memref<1x32xf32, #tpu.memory_space<vmem>>, vector<1x32xf32>
    %c0_1 = arith.constant 0 : index
    %c0_2 = arith.constant 0 : index
    %1 = vector.load %arg4[%c0_1, %c0_2] : memref<1x32xf32, #tpu.memory_space<vmem>>, vector<1x32xf32>
    %cst = arith.constant 0.000000e+00 : f32
    %2 = vector.broadcast %cst : f32 to vector<36x16x32xf32>
    %c0_3 = arith.constant 0 : index
    %c0_4 = arith.constant 0 : index
    %c0_5 = arith.constant 0 : index
    %3 = vector.load %arg13[%c0_3, %c0_4, %c0_5] : memref<36x16x32xf32, #tpu.memory_space<vmem>>, vector<36x16x32xf32>
    tpu.vector_store %arg13[%c0_3, %c0_4, %c0_5], %2 {strides = array<i32>} : memref<36x16x32xf32, #tpu.memory_space<vmem>>, vector<36x16x32xf32>,
    %cst_6 = arith.constant 0.000000e+00 : f32
    %4 = vector.broadcast %cst_6 : f32 to vector<36x16x32xf32>
    %c0_7 = arith.constant 0 : index
    %c0_8 = arith.constant 0 : index
    %c0_9 = arith.constant 0 : index
    %5 = vector.load %arg12[%c0_7, %c0_8, %c0_9] : memref<36x16x32xf32, #tpu.memory_space<vmem>>, vector<36x16x32xf32>
    tpu.vector_store %arg12[%c0_7, %c0_8, %c0_9], %4 {strides = array<i32>} : memref<36x16x32xf32, #tpu.memory_space<vmem>>, vector<36x16x32xf32>,
    %c0_10 = arith.constant 0 : index
    %c0_11 = arith.constant 0 : index
    %c0_12 = arith.constant 0 : index
    %c0_13 = arith.constant 0 : index
    %6 = vector.load %arg1[%c0_10, %c0_11, %c0_12, %c0_13] : memref<1x16x16x32xf32, #tpu.memory_space<vmem>>, vector<1x16x16x32xf32>
    %7 = vector.shape_cast %6 : vector<1x16x16x32xf32> to vector<16x16x32xf32>
    %cst_14 = arith.constant dense<0.000000e+00> : vector<16x16xf32>
    %8 = vector.multi_reduction <add>, %7, %cst_14 [2] : vector<16x16x32xf32> to vector<16x16xf32>
    %9 = vector.shape_cast %8 : vector<16x16xf32> to vector<16x16x1xf32>
    %cst_15 = arith.constant 3.200000e+01 : f32
    %10 = vector.broadcast %cst_15 : f32 to vector<16x16x1xf32>
    %11 = arith.divf %9, %10 : vector<16x16x1xf32>
    %12 = vector.broadcast %11 : vector<16x16x1xf32> to vector<16x16x32xf32>
    %13 = arith.subf %7, %12 : vector<16x16x32xf32>
    %14 = arith.mulf %13, %13 : vector<16x16x32xf32>
    %cst_16 = arith.constant dense<0.000000e+00> : vector<16x16xf32>
    %15 = vector.multi_reduction <add>, %14, %cst_16 [2] : vector<16x16x32xf32> to vector<16x16xf32>
    %16 = vector.shape_cast %15 : vector<16x16xf32> to vector<16x16x1xf32>
    %cst_17 = arith.constant 3.200000e+01 : f32
    %17 = vector.broadcast %cst_17 : f32 to vector<16x16x1xf32>
    %18 = arith.divf %16, %17 : vector<16x16x1xf32>
    %cst_18 = arith.constant 9.99999974E-6 : f32
    %19 = vector.broadcast %cst_18 : f32 to vector<16x16x1xf32>
    %20 = arith.addf %18, %19 : vector<16x16x1xf32>
    %21 = math.rsqrt %20 : vector<16x16x1xf32>
    %22 = vector.broadcast %21 : vector<16x16x1xf32> to vector<16x16x32xf32>
    %23 = arith.mulf %13, %22 : vector<16x16x32xf32>
    %24 = vector.shape_cast %0 : vector<1x32xf32> to vector<1x1x32xf32>
    %25 = vector.broadcast %24 : vector<1x1x32xf32> to vector<16x16x32xf32>
    %26 = arith.mulf %23, %25 : vector<16x16x32xf32>
    %27 = vector.shape_cast %1 : vector<1x32xf32> to vector<1x1x32xf32>
    %28 = vector.broadcast %27 : vector<1x1x32xf32> to vector<16x16x32xf32>
    %29 = arith.addf %26, %28 : vector<16x16x32xf32>
    %c10 = arith.constant 10 : index
    %c0_19 = arith.constant 0 : index
    %c0_20 = arith.constant 0 : index
    %30 = vector.load %arg13[%c10, %c0_19, %c0_20] : memref<36x16x32xf32, #tpu.memory_space<vmem>>, vector<16x16x32xf32>
    tpu.vector_store %arg13[%c10, %c0_19, %c0_20], %29 {strides = array<i32>} : memref<36x16x32xf32, #tpu.memory_space<vmem>>, vector<16x16x32xf32>,
    %c0_21 = arith.constant 0 : index
    %c0_22 = arith.constant 0 : index
    %c0_23 = arith.constant 0 : index
    %c0_24 = arith.constant 0 : index
    %31 = vector.load %arg2[%c0_21, %c0_22, %c0_23, %c0_24] : memref<1x16x16x32xf32, #tpu.memory_space<vmem>>, vector<1x16x16x32xf32>
    %32 = vector.shape_cast %31 : vector<1x16x16x32xf32> to vector<16x16x32xf32>
    %cst_25 = arith.constant dense<0.000000e+00> : vector<16x16xf32>
    %33 = vector.multi_reduction <add>, %32, %cst_25 [2] : vector<16x16x32xf32> to vector<16x16xf32>
    %34 = vector.shape_cast %33 : vector<16x16xf32> to vector<16x16x1xf32>
    %cst_26 = arith.constant 3.200000e+01 : f32
    %35 = vector.broadcast %cst_26 : f32 to vector<16x16x1xf32>
    %36 = arith.divf %34, %35 : vector<16x16x1xf32>
    %37 = vector.broadcast %36 : vector<16x16x1xf32> to vector<16x16x32xf32>
    %38 = arith.subf %32, %37 : vector<16x16x32xf32>
    %39 = arith.mulf %38, %38 : vector<16x16x32xf32>
    %cst_27 = arith.constant dense<0.000000e+00> : vector<16x16xf32>
    %40 = vector.multi_reduction <add>, %39, %cst_27 [2] : vector<16x16x32xf32> to vector<16x16xf32>
    %41 = vector.shape_cast %40 : vector<16x16xf32> to vector<16x16x1xf32>
    %cst_28 = arith.constant 3.200000e+01 : f32
    %42 = vector.broadcast %cst_28 : f32 to vector<16x16x1xf32>
    %43 = arith.divf %41, %42 : vector<16x16x1xf32>
    %cst_29 = arith.constant 9.99999974E-6 : f32
    %44 = vector.broadcast %cst_29 : f32 to vector<16x16x1xf32>
    %45 = arith.addf %43, %44 : vector<16x16x1xf32>
    %46 = math.rsqrt %45 : vector<16x16x1xf32>
    %47 = vector.broadcast %46 : vector<16x16x1xf32> to vector<16x16x32xf32>
    %48 = arith.mulf %38, %47 : vector<16x16x32xf32>
    %49 = vector.shape_cast %0 : vector<1x32xf32> to vector<1x1x32xf32>
    %50 = vector.broadcast %49 : vector<1x1x32xf32> to vector<16x16x32xf32>
    %51 = arith.mulf %48, %50 : vector<16x16x32xf32>
    %52 = vector.shape_cast %1 : vector<1x32xf32> to vector<1x1x32xf32>
    %53 = vector.broadcast %52 : vector<1x1x32xf32> to vector<16x16x32xf32>
    %54 = arith.addf %51, %53 : vector<16x16x32xf32>
    %c10_30 = arith.constant 10 : index
    %c0_31 = arith.constant 0 : index
    %c0_32 = arith.constant 0 : index
    %55 = vector.load %arg12[%c10_30, %c0_31, %c0_32] : memref<36x16x32xf32, #tpu.memory_space<vmem>>, vector<16x16x32xf32>
    tpu.vector_store %arg12[%c10_30, %c0_31, %c0_32], %54 {strides = array<i32>} : memref<36x16x32xf32, #tpu.memory_space<vmem>>, vector<16x16x32xf32>,
    %c0_33 = arith.constant 0 : index
    %c0_34 = arith.constant 0 : index
    %56 = vector.load %arg5[%c0_33, %c0_34] : memref<21x32xf32, #tpu.memory_space<vmem>>, vector<21x32xf32>
    %c0_35 = arith.constant 0 : index
    %c0_36 = arith.constant 0 : index
    %57 = vector.load %arg6[%c0_35, %c0_36] : memref<21x32xf32, #tpu.memory_space<vmem>>, vector<21x32xf32>
    %cst_37 = arith.constant 0.000000e+00 : f32
    %58 = vector.broadcast %cst_37 : f32 to vector<16x16x32xf32>
    %cst_38 = arith.constant 0.000000e+00 : f32
    %59 = vector.broadcast %cst_38 : f32 to vector<16x16x32xf32>
    %60 = vector.extract_strided_slice %56 {offsets = [0, 0], sizes = [1, 32], strides = [1, 1]} : vector<21x32xf32> to vector<1x32xf32>
    %c0_39 = arith.constant 0 : index
    %c0_40 = arith.constant 0 : index
    %c0_41 = arith.constant 0 : index
    %61 = vector.load %arg12[%c0_39, %c0_40, %c0_41] : memref<36x16x32xf32, #tpu.memory_space<vmem>>, vector<16x16x32xf32>
    %62 = vector.shape_cast %60 : vector<1x32xf32> to vector<1x1x32xf32>
    %63 = vector.broadcast %62 : vector<1x1x32xf32> to vector<16x16x32xf32>
    %64 = arith.mulf %63, %61 : vector<16x16x32xf32>
    %65 = arith.addf %58, %64 : vector<16x16x32xf32>
    %66 = vector.extract_strided_slice %57 {offsets = [0, 0], sizes = [1, 32], strides = [1, 1]} : vector<21x32xf32> to vector<1x32xf32>
    %c0_42 = arith.constant 0 : index
    %c0_43 = arith.constant 0 : index
    %c0_44 = arith.constant 0 : index
    %67 = vector.load %arg13[%c0_42, %c0_43, %c0_44] : memref<36x16x32xf32, #tpu.memory_space<vmem>>, vector<16x16x32xf32>
    %68 = vector.shape_cast %66 : vector<1x32xf32> to vector<1x1x32xf32>
    %69 = vector.broadcast %68 : vector<1x1x32xf32> to vector<16x16x32xf32>
    %70 = arith.mulf %69, %67 : vector<16x16x32xf32>
    %71 = arith.addf %59, %70 : vector<16x16x32xf32>
    %72 = vector.extract_strided_slice %56 {offsets = [1, 0], sizes = [1, 32], strides = [1, 1]} : vector<21x32xf32> to vector<1x32xf32>
    %c1 = arith.constant 1 : index
    %c0_45 = arith.constant 0 : index
    %c0_46 = arith.constant 0 : index
    %73 = vector.load %arg12[%c1, %c0_45, %c0_46] : memref<36x16x32xf32, #tpu.memory_space<vmem>>, vector<16x16x32xf32>
    %74 = vector.shape_cast %72 : vector<1x32xf32> to vector<1x1x32xf32>
    %75 = vector.broadcast %74 : vector<1x1x32xf32> to vector<16x16x32xf32>
    %76 = arith.mulf %75, %73 : vector<16x16x32xf32>
    %77 = arith.addf %65, %76 : vector<16x16x32xf32>
    %78 = vector.extract_strided_slice %57 {offsets = [1, 0], sizes = [1, 32], strides = [1, 1]} : vector<21x32xf32> to vector<1x32xf32>
    %c1_47 = arith.constant 1 : index
    %c0_48 = arith.constant 0 : index
    %c0_49 = arith.constant 0 : index
    %79 = vector.load %arg13[%c1_47, %c0_48, %c0_49] : memref<36x16x32xf32, #tpu.memory_space<vmem>>, vector<16x16x32xf32>
    %80 = vector.shape_cast %78 : vector<1x32xf32> to vector<1x1x32xf32>
    %81 = vector.broadcast %80 : vector<1x1x32xf32> to vector<16x16x32xf32>
    %82 = arith.mulf %81, %79 : vector<16x16x32xf32>
    %83 = arith.addf %71, %82 : vector<16x16x32xf32>
    %84 = vector.extract_strided_slice %56 {offsets = [2, 0], sizes = [1, 32], strides = [1, 1]} : vector<21x32xf32> to vector<1x32xf32>
    %c2 = arith.constant 2 : index
    %c0_50 = arith.constant 0 : index
    %c0_51 = arith.constant 0 : index
    %85 = vector.load %arg12[%c2, %c0_50, %c0_51] : memref<36x16x32xf32, #tpu.memory_space<vmem>>, vector<16x16x32xf32>
    %86 = vector.shape_cast %84 : vector<1x32xf32> to vector<1x1x32xf32>
    %87 = vector.broadcast %86 : vector<1x1x32xf32> to vector<16x16x32xf32>
    %88 = arith.mulf %87, %85 : vector<16x16x32xf32>
    %89 = arith.addf %77, %88 : vector<16x16x32xf32>
    %90 = vector.extract_strided_slice %57 {offsets = [2, 0], sizes = [1, 32], strides = [1, 1]} : vector<21x32xf32> to vector<1x32xf32>
    %c2_52 = arith.constant 2 : index
    %c0_53 = arith.constant 0 : index
    %c0_54 = arith.constant 0 : index
    %91 = vector.load %arg13[%c2_52, %c0_53, %c0_54] : memref<36x16x32xf32, #tpu.memory_space<vmem>>, vector<16x16x32xf32>
    %92 = vector.shape_cast %90 : vector<1x32xf32> to vector<1x1x32xf32>
    %93 = vector.broadcast %92 : vector<1x1x32xf32> to vector<16x16x32xf32>
    %94 = arith.mulf %93, %91 : vector<16x16x32xf32>
    %95 = arith.addf %83, %94 : vector<16x16x32xf32>
    %96 = vector.extract_strided_slice %56 {offsets = [3, 0], sizes = [1, 32], strides = [1, 1]} : vector<21x32xf32> to vector<1x32xf32>
    %c3 = arith.constant 3 : index
    %c0_55 = arith.constant 0 : index
    %c0_56 = arith.constant 0 : index
    %97 = vector.load %arg12[%c3, %c0_55, %c0_56] : memref<36x16x32xf32, #tpu.memory_space<vmem>>, vector<16x16x32xf32>
    %98 = vector.shape_cast %96 : vector<1x32xf32> to vector<1x1x32xf32>
    %99 = vector.broadcast %98 : vector<1x1x32xf32> to vector<16x16x32xf32>
    %100 = arith.mulf %99, %97 : vector<16x16x32xf32>
    %101 = arith.addf %89, %100 : vector<16x16x32xf32>
    %102 = vector.extract_strided_slice %57 {offsets = [3, 0], sizes = [1, 32], strides = [1, 1]} : vector<21x32xf32> to vector<1x32xf32>
    %c3_57 = arith.constant 3 : index
    %c0_58 = arith.constant 0 : index
    %c0_59 = arith.constant 0 : index
    %103 = vector.load %arg13[%c3_57, %c0_58, %c0_59] : memref<36x16x32xf32, #tpu.memory_space<vmem>>, vector<16x16x32xf32>
    %104 = vector.shape_cast %102 : vector<1x32xf32> to vector<1x1x32xf32>
    %105 = vector.broadcast %104 : vector<1x1x32xf32> to vector<16x16x32xf32>
    %106 = arith.mulf %105, %103 : vector<16x16x32xf32>
    %107 = arith.addf %95, %106 : vector<16x16x32xf32>
    %108 = vector.extract_strided_slice %56 {offsets = [4, 0], sizes = [1, 32], strides = [1, 1]} : vector<21x32xf32> to vector<1x32xf32>
    %c4 = arith.constant 4 : index
    %c0_60 = arith.constant 0 : index
    %c0_61 = arith.constant 0 : index
    %109 = vector.load %arg12[%c4, %c0_60, %c0_61] : memref<36x16x32xf32, #tpu.memory_space<vmem>>, vector<16x16x32xf32>
    %110 = vector.shape_cast %108 : vector<1x32xf32> to vector<1x1x32xf32>
    %111 = vector.broadcast %110 : vector<1x1x32xf32> to vector<16x16x32xf32>
    %112 = arith.mulf %111, %109 : vector<16x16x32xf32>
    %113 = arith.addf %101, %112 : vector<16x16x32xf32>
    %114 = vector.extract_strided_slice %57 {offsets = [4, 0], sizes = [1, 32], strides = [1, 1]} : vector<21x32xf32> to vector<1x32xf32>
    %c4_62 = arith.constant 4 : index
    %c0_63 = arith.constant 0 : index
    %c0_64 = arith.constant 0 : index
    %115 = vector.load %arg13[%c4_62, %c0_63, %c0_64] : memref<36x16x32xf32, #tpu.memory_space<vmem>>, vector<16x16x32xf32>
    %116 = vector.shape_cast %114 : vector<1x32xf32> to vector<1x1x32xf32>
    %117 = vector.broadcast %116 : vector<1x1x32xf32> to vector<16x16x32xf32>
    %118 = arith.mulf %117, %115 : vector<16x16x32xf32>
    %119 = arith.addf %107, %118 : vector<16x16x32xf32>
    %120 = vector.extract_strided_slice %56 {offsets = [5, 0], sizes = [1, 32], strides = [1, 1]} : vector<21x32xf32> to vector<1x32xf32>
    %c5 = arith.constant 5 : index
    %c0_65 = arith.constant 0 : index
    %c0_66 = arith.constant 0 : index
    %121 = vector.load %arg12[%c5, %c0_65, %c0_66] : memref<36x16x32xf32, #tpu.memory_space<vmem>>, vector<16x16x32xf32>
    %122 = vector.shape_cast %120 : vector<1x32xf32> to vector<1x1x32xf32>
    %123 = vector.broadcast %122 : vector<1x1x32xf32> to vector<16x16x32xf32>
    %124 = arith.mulf %123, %121 : vector<16x16x32xf32>
    %125 = arith.addf %113, %124 : vector<16x16x32xf32>
    %126 = vector.extract_strided_slice %57 {offsets = [5, 0], sizes = [1, 32], strides = [1, 1]} : vector<21x32xf32> to vector<1x32xf32>
    %c5_67 = arith.constant 5 : index
    %c0_68 = arith.constant 0 : index
    %c0_69 = arith.constant 0 : index
    %127 = vector.load %arg13[%c5_67, %c0_68, %c0_69] : memref<36x16x32xf32, #tpu.memory_space<vmem>>, vector<16x16x32xf32>
    %128 = vector.shape_cast %126 : vector<1x32xf32> to vector<1x1x32xf32>
    %129 = vector.broadcast %128 : vector<1x1x32xf32> to vector<16x16x32xf32>
    %130 = arith.mulf %129, %127 : vector<16x16x32xf32>
    %131 = arith.addf %119, %130 : vector<16x16x32xf32>
    %132 = vector.extract_strided_slice %56 {offsets = [6, 0], sizes = [1, 32], strides = [1, 1]} : vector<21x32xf32> to vector<1x32xf32>
    %c6 = arith.constant 6 : index
    %c0_70 = arith.constant 0 : index
    %c0_71 = arith.constant 0 : index
    %133 = vector.load %arg12[%c6, %c0_70, %c0_71] : memref<36x16x32xf32, #tpu.memory_space<vmem>>, vector<16x16x32xf32>
    %134 = vector.shape_cast %132 : vector<1x32xf32> to vector<1x1x32xf32>
    %135 = vector.broadcast %134 : vector<1x1x32xf32> to vector<16x16x32xf32>
    %136 = arith.mulf %135, %133 : vector<16x16x32xf32>
    %137 = arith.addf %125, %136 : vector<16x16x32xf32>
    %138 = vector.extract_strided_slice %57 {offsets = [6, 0], sizes = [1, 32], strides = [1, 1]} : vector<21x32xf32> to vector<1x32xf32>
    %c6_72 = arith.constant 6 : index
    %c0_73 = arith.constant 0 : index
    %c0_74 = arith.constant 0 : index
    %139 = vector.load %arg13[%c6_72, %c0_73, %c0_74] : memref<36x16x32xf32, #tpu.memory_space<vmem>>, vector<16x16x32xf32>
    %140 = vector.shape_cast %138 : vector<1x32xf32> to vector<1x1x32xf32>
    %141 = vector.broadcast %140 : vector<1x1x32xf32> to vector<16x16x32xf32>
    %142 = arith.mulf %141, %139 : vector<16x16x32xf32>
    %143 = arith.addf %131, %142 : vector<16x16x32xf32>
    %144 = vector.extract_strided_slice %56 {offsets = [7, 0], sizes = [1, 32], strides = [1, 1]} : vector<21x32xf32> to vector<1x32xf32>
    %c7 = arith.constant 7 : index
    %c0_75 = arith.constant 0 : index
    %c0_76 = arith.constant 0 : index
    %145 = vector.load %arg12[%c7, %c0_75, %c0_76] : memref<36x16x32xf32, #tpu.memory_space<vmem>>, vector<16x16x32xf32>
    %146 = vector.shape_cast %144 : vector<1x32xf32> to vector<1x1x32xf32>
    %147 = vector.broadcast %146 : vector<1x1x32xf32> to vector<16x16x32xf32>
    %148 = arith.mulf %147, %145 : vector<16x16x32xf32>
    %149 = arith.addf %137, %148 : vector<16x16x32xf32>
    %150 = vector.extract_strided_slice %57 {offsets = [7, 0], sizes = [1, 32], strides = [1, 1]} : vector<21x32xf32> to vector<1x32xf32>
    %c7_77 = arith.constant 7 : index
    %c0_78 = arith.constant 0 : index
    %c0_79 = arith.constant 0 : index
    %151 = vector.load %arg13[%c7_77, %c0_78, %c0_79] : memref<36x16x32xf32, #tpu.memory_space<vmem>>, vector<16x16x32xf32>
    %152 = vector.shape_cast %150 : vector<1x32xf32> to vector<1x1x32xf32>
    %153 = vector.broadcast %152 : vector<1x1x32xf32> to vector<16x16x32xf32>
    %154 = arith.mulf %153, %151 : vector<16x16x32xf32>
    %155 = arith.addf %143, %154 : vector<16x16x32xf32>
    %156 = vector.extract_strided_slice %56 {offsets = [8, 0], sizes = [1, 32], strides = [1, 1]} : vector<21x32xf32> to vector<1x32xf32>
    %c8 = arith.constant 8 : index
    %c0_80 = arith.constant 0 : index
    %c0_81 = arith.constant 0 : index
    %157 = vector.load %arg12[%c8, %c0_80, %c0_81] : memref<36x16x32xf32, #tpu.memory_space<vmem>>, vector<16x16x32xf32>
    %158 = vector.shape_cast %156 : vector<1x32xf32> to vector<1x1x32xf32>
    %159 = vector.broadcast %158 : vector<1x1x32xf32> to vector<16x16x32xf32>
    %160 = arith.mulf %159, %157 : vector<16x16x32xf32>
    %161 = arith.addf %149, %160 : vector<16x16x32xf32>
    %162 = vector.extract_strided_slice %57 {offsets = [8, 0], sizes = [1, 32], strides = [1, 1]} : vector<21x32xf32> to vector<1x32xf32>
    %c8_82 = arith.constant 8 : index
    %c0_83 = arith.constant 0 : index
    %c0_84 = arith.constant 0 : index
    %163 = vector.load %arg13[%c8_82, %c0_83, %c0_84] : memref<36x16x32xf32, #tpu.memory_space<vmem>>, vector<16x16x32xf32>
    %164 = vector.shape_cast %162 : vector<1x32xf32> to vector<1x1x32xf32>
    %165 = vector.broadcast %164 : vector<1x1x32xf32> to vector<16x16x32xf32>
    %166 = arith.mulf %165, %163 : vector<16x16x32xf32>
    %167 = arith.addf %155, %166 : vector<16x16x32xf32>
    %168 = vector.extract_strided_slice %56 {offsets = [9, 0], sizes = [1, 32], strides = [1, 1]} : vector<21x32xf32> to vector<1x32xf32>
    %c9 = arith.constant 9 : index
    %c0_85 = arith.constant 0 : index
    %c0_86 = arith.constant 0 : index
    %169 = vector.load %arg12[%c9, %c0_85, %c0_86] : memref<36x16x32xf32, #tpu.memory_space<vmem>>, vector<16x16x32xf32>
    %170 = vector.shape_cast %168 : vector<1x32xf32> to vector<1x1x32xf32>
    %171 = vector.broadcast %170 : vector<1x1x32xf32> to vector<16x16x32xf32>
    %172 = arith.mulf %171, %169 : vector<16x16x32xf32>
    %173 = arith.addf %161, %172 : vector<16x16x32xf32>
    %174 = vector.extract_strided_slice %57 {offsets = [9, 0], sizes = [1, 32], strides = [1, 1]} : vector<21x32xf32> to vector<1x32xf32>
    %c9_87 = arith.constant 9 : index
    %c0_88 = arith.constant 0 : index
    %c0_89 = arith.constant 0 : index
    %175 = vector.load %arg13[%c9_87, %c0_88, %c0_89] : memref<36x16x32xf32, #tpu.memory_space<vmem>>, vector<16x16x32xf32>
    %176 = vector.shape_cast %174 : vector<1x32xf32> to vector<1x1x32xf32>
    %177 = vector.broadcast %176 : vector<1x1x32xf32> to vector<16x16x32xf32>
    %178 = arith.mulf %177, %175 : vector<16x16x32xf32>
    %179 = arith.addf %167, %178 : vector<16x16x32xf32>
    %180 = vector.extract_strided_slice %56 {offsets = [10, 0], sizes = [1, 32], strides = [1, 1]} : vector<21x32xf32> to vector<1x32xf32>
    %c10_90 = arith.constant 10 : index
    %c0_91 = arith.constant 0 : index
    %c0_92 = arith.constant 0 : index
    %181 = vector.load %arg12[%c10_90, %c0_91, %c0_92] : memref<36x16x32xf32, #tpu.memory_space<vmem>>, vector<16x16x32xf32>
    %182 = vector.shape_cast %180 : vector<1x32xf32> to vector<1x1x32xf32>
    %183 = vector.broadcast %182 : vector<1x1x32xf32> to vector<16x16x32xf32>
    %184 = arith.mulf %183, %181 : vector<16x16x32xf32>
    %185 = arith.addf %173, %184 : vector<16x16x32xf32>
    %186 = vector.extract_strided_slice %57 {offsets = [10, 0], sizes = [1, 32], strides = [1, 1]} : vector<21x32xf32> to vector<1x32xf32>
    %c10_93 = arith.constant 10 : index
    %c0_94 = arith.constant 0 : index
    %c0_95 = arith.constant 0 : index
    %187 = vector.load %arg13[%c10_93, %c0_94, %c0_95] : memref<36x16x32xf32, #tpu.memory_space<vmem>>, vector<16x16x32xf32>
    %188 = vector.shape_cast %186 : vector<1x32xf32> to vector<1x1x32xf32>
    %189 = vector.broadcast %188 : vector<1x1x32xf32> to vector<16x16x32xf32>
    %190 = arith.mulf %189, %187 : vector<16x16x32xf32>
    %191 = arith.addf %179, %190 : vector<16x16x32xf32>
    %192 = vector.extract_strided_slice %56 {offsets = [11, 0], sizes = [1, 32], strides = [1, 1]} : vector<21x32xf32> to vector<1x32xf32>
    %c11 = arith.constant 11 : index
    %c0_96 = arith.constant 0 : index
    %c0_97 = arith.constant 0 : index
    %193 = vector.load %arg12[%c11, %c0_96, %c0_97] : memref<36x16x32xf32, #tpu.memory_space<vmem>>, vector<16x16x32xf32>
    %194 = vector.shape_cast %192 : vector<1x32xf32> to vector<1x1x32xf32>
    %195 = vector.broadcast %194 : vector<1x1x32xf32> to vector<16x16x32xf32>
    %196 = arith.mulf %195, %193 : vector<16x16x32xf32>
    %197 = arith.addf %185, %196 : vector<16x16x32xf32>
    %198 = vector.extract_strided_slice %57 {offsets = [11, 0], sizes = [1, 32], strides = [1, 1]} : vector<21x32xf32> to vector<1x32xf32>
    %c11_98 = arith.constant 11 : index
    %c0_99 = arith.constant 0 : index
    %c0_100 = arith.constant 0 : index
    %199 = vector.load %arg13[%c11_98, %c0_99, %c0_100] : memref<36x16x32xf32, #tpu.memory_space<vmem>>, vector<16x16x32xf32>
    %200 = vector.shape_cast %198 : vector<1x32xf32> to vector<1x1x32xf32>
    %201 = vector.broadcast %200 : vector<1x1x32xf32> to vector<16x16x32xf32>
    %202 = arith.mulf %201, %199 : vector<16x16x32xf32>
    %203 = arith.addf %191, %202 : vector<16x16x32xf32>
    %204 = vector.extract_strided_slice %56 {offsets = [12, 0], sizes = [1, 32], strides = [1, 1]} : vector<21x32xf32> to vector<1x32xf32>
    %c12 = arith.constant 12 : index
    %c0_101 = arith.constant 0 : index
    %c0_102 = arith.constant 0 : index
    %205 = vector.load %arg12[%c12, %c0_101, %c0_102] : memref<36x16x32xf32, #tpu.memory_space<vmem>>, vector<16x16x32xf32>
    %206 = vector.shape_cast %204 : vector<1x32xf32> to vector<1x1x32xf32>
    %207 = vector.broadcast %206 : vector<1x1x32xf32> to vector<16x16x32xf32>
    %208 = arith.mulf %207, %205 : vector<16x16x32xf32>
    %209 = arith.addf %197, %208 : vector<16x16x32xf32>
    %210 = vector.extract_strided_slice %57 {offsets = [12, 0], sizes = [1, 32], strides = [1, 1]} : vector<21x32xf32> to vector<1x32xf32>
    %c12_103 = arith.constant 12 : index
    %c0_104 = arith.constant 0 : index
    %c0_105 = arith.constant 0 : index
    %211 = vector.load %arg13[%c12_103, %c0_104, %c0_105] : memref<36x16x32xf32, #tpu.memory_space<vmem>>, vector<16x16x32xf32>
    %212 = vector.shape_cast %210 : vector<1x32xf32> to vector<1x1x32xf32>
    %213 = vector.broadcast %212 : vector<1x1x32xf32> to vector<16x16x32xf32>
    %214 = arith.mulf %213, %211 : vector<16x16x32xf32>
    %215 = arith.addf %203, %214 : vector<16x16x32xf32>
    %216 = vector.extract_strided_slice %56 {offsets = [13, 0], sizes = [1, 32], strides = [1, 1]} : vector<21x32xf32> to vector<1x32xf32>
    %c13 = arith.constant 13 : index
    %c0_106 = arith.constant 0 : index
    %c0_107 = arith.constant 0 : index
    %217 = vector.load %arg12[%c13, %c0_106, %c0_107] : memref<36x16x32xf32, #tpu.memory_space<vmem>>, vector<16x16x32xf32>
    %218 = vector.shape_cast %216 : vector<1x32xf32> to vector<1x1x32xf32>
    %219 = vector.broadcast %218 : vector<1x1x32xf32> to vector<16x16x32xf32>
    %220 = arith.mulf %219, %217 : vector<16x16x32xf32>
    %221 = arith.addf %209, %220 : vector<16x16x32xf32>
    %222 = vector.extract_strided_slice %57 {offsets = [13, 0], sizes = [1, 32], strides = [1, 1]} : vector<21x32xf32> to vector<1x32xf32>
    %c13_108 = arith.constant 13 : index
    %c0_109 = arith.constant 0 : index
    %c0_110 = arith.constant 0 : index
    %223 = vector.load %arg13[%c13_108, %c0_109, %c0_110] : memref<36x16x32xf32, #tpu.memory_space<vmem>>, vector<16x16x32xf32>
    %224 = vector.shape_cast %222 : vector<1x32xf32> to vector<1x1x32xf32>
    %225 = vector.broadcast %224 : vector<1x1x32xf32> to vector<16x16x32xf32>
    %226 = arith.mulf %225, %223 : vector<16x16x32xf32>
    %227 = arith.addf %215, %226 : vector<16x16x32xf32>
    %228 = vector.extract_strided_slice %56 {offsets = [14, 0], sizes = [1, 32], strides = [1, 1]} : vector<21x32xf32> to vector<1x32xf32>
    %c14 = arith.constant 14 : index
    %c0_111 = arith.constant 0 : index
    %c0_112 = arith.constant 0 : index
    %229 = vector.load %arg12[%c14, %c0_111, %c0_112] : memref<36x16x32xf32, #tpu.memory_space<vmem>>, vector<16x16x32xf32>
    %230 = vector.shape_cast %228 : vector<1x32xf32> to vector<1x1x32xf32>
    %231 = vector.broadcast %230 : vector<1x1x32xf32> to vector<16x16x32xf32>
    %232 = arith.mulf %231, %229 : vector<16x16x32xf32>
    %233 = arith.addf %221, %232 : vector<16x16x32xf32>
    %234 = vector.extract_strided_slice %57 {offsets = [14, 0], sizes = [1, 32], strides = [1, 1]} : vector<21x32xf32> to vector<1x32xf32>
    %c14_113 = arith.constant 14 : index
    %c0_114 = arith.constant 0 : index
    %c0_115 = arith.constant 0 : index
    %235 = vector.load %arg13[%c14_113, %c0_114, %c0_115] : memref<36x16x32xf32, #tpu.memory_space<vmem>>, vector<16x16x32xf32>
    %236 = vector.shape_cast %234 : vector<1x32xf32> to vector<1x1x32xf32>
    %237 = vector.broadcast %236 : vector<1x1x32xf32> to vector<16x16x32xf32>
    %238 = arith.mulf %237, %235 : vector<16x16x32xf32>
    %239 = arith.addf %227, %238 : vector<16x16x32xf32>
    %240 = vector.extract_strided_slice %56 {offsets = [15, 0], sizes = [1, 32], strides = [1, 1]} : vector<21x32xf32> to vector<1x32xf32>
    %c15 = arith.constant 15 : index
    %c0_116 = arith.constant 0 : index
    %c0_117 = arith.constant 0 : index
    %241 = vector.load %arg12[%c15, %c0_116, %c0_117] : memref<36x16x32xf32, #tpu.memory_space<vmem>>, vector<16x16x32xf32>
    %242 = vector.shape_cast %240 : vector<1x32xf32> to vector<1x1x32xf32>
    %243 = vector.broadcast %242 : vector<1x1x32xf32> to vector<16x16x32xf32>
    %244 = arith.mulf %243, %241 : vector<16x16x32xf32>
    %245 = arith.addf %233, %244 : vector<16x16x32xf32>
    %246 = vector.extract_strided_slice %57 {offsets = [15, 0], sizes = [1, 32], strides = [1, 1]} : vector<21x32xf32> to vector<1x32xf32>
    %c15_118 = arith.constant 15 : index
    %c0_119 = arith.constant 0 : index
    %c0_120 = arith.constant 0 : index
    %247 = vector.load %arg13[%c15_118, %c0_119, %c0_120] : memref<36x16x32xf32, #tpu.memory_space<vmem>>, vector<16x16x32xf32>
    %248 = vector.shape_cast %246 : vector<1x32xf32> to vector<1x1x32xf32>
    %249 = vector.broadcast %248 : vector<1x1x32xf32> to vector<16x16x32xf32>
    %250 = arith.mulf %249, %247 : vector<16x16x32xf32>
    %251 = arith.addf %239, %250 : vector<16x16x32xf32>
    %252 = vector.extract_strided_slice %56 {offsets = [16, 0], sizes = [1, 32], strides = [1, 1]} : vector<21x32xf32> to vector<1x32xf32>
    %c16 = arith.constant 16 : index
    %c0_121 = arith.constant 0 : index
    %c0_122 = arith.constant 0 : index
    %253 = vector.load %arg12[%c16, %c0_121, %c0_122] : memref<36x16x32xf32, #tpu.memory_space<vmem>>, vector<16x16x32xf32>
    %254 = vector.shape_cast %252 : vector<1x32xf32> to vector<1x1x32xf32>
    %255 = vector.broadcast %254 : vector<1x1x32xf32> to vector<16x16x32xf32>
    %256 = arith.mulf %255, %253 : vector<16x16x32xf32>
    %257 = arith.addf %245, %256 : vector<16x16x32xf32>
    %258 = vector.extract_strided_slice %57 {offsets = [16, 0], sizes = [1, 32], strides = [1, 1]} : vector<21x32xf32> to vector<1x32xf32>
    %c16_123 = arith.constant 16 : index
    %c0_124 = arith.constant 0 : index
    %c0_125 = arith.constant 0 : index
    %259 = vector.load %arg13[%c16_123, %c0_124, %c0_125] : memref<36x16x32xf32, #tpu.memory_space<vmem>>, vector<16x16x32xf32>
    %260 = vector.shape_cast %258 : vector<1x32xf32> to vector<1x1x32xf32>
    %261 = vector.broadcast %260 : vector<1x1x32xf32> to vector<16x16x32xf32>
    %262 = arith.mulf %261, %259 : vector<16x16x32xf32>
    %263 = arith.addf %251, %262 : vector<16x16x32xf32>
    %264 = vector.extract_strided_slice %56 {offsets = [17, 0], sizes = [1, 32], strides = [1, 1]} : vector<21x32xf32> to vector<1x32xf32>
    %c17 = arith.constant 17 : index
    %c0_126 = arith.constant 0 : index
    %c0_127 = arith.constant 0 : index
    %265 = vector.load %arg12[%c17, %c0_126, %c0_127] : memref<36x16x32xf32, #tpu.memory_space<vmem>>, vector<16x16x32xf32>
    %266 = vector.shape_cast %264 : vector<1x32xf32> to vector<1x1x32xf32>
    %267 = vector.broadcast %266 : vector<1x1x32xf32> to vector<16x16x32xf32>
    %268 = arith.mulf %267, %265 : vector<16x16x32xf32>
    %269 = arith.addf %257, %268 : vector<16x16x32xf32>
    %270 = vector.extract_strided_slice %57 {offsets = [17, 0], sizes = [1, 32], strides = [1, 1]} : vector<21x32xf32> to vector<1x32xf32>
    %c17_128 = arith.constant 17 : index
    %c0_129 = arith.constant 0 : index
    %c0_130 = arith.constant 0 : index
    %271 = vector.load %arg13[%c17_128, %c0_129, %c0_130] : memref<36x16x32xf32, #tpu.memory_space<vmem>>, vector<16x16x32xf32>
    %272 = vector.shape_cast %270 : vector<1x32xf32> to vector<1x1x32xf32>
    %273 = vector.broadcast %272 : vector<1x1x32xf32> to vector<16x16x32xf32>
    %274 = arith.mulf %273, %271 : vector<16x16x32xf32>
    %275 = arith.addf %263, %274 : vector<16x16x32xf32>
    %276 = vector.extract_strided_slice %56 {offsets = [18, 0], sizes = [1, 32], strides = [1, 1]} : vector<21x32xf32> to vector<1x32xf32>
    %c18 = arith.constant 18 : index
    %c0_131 = arith.constant 0 : index
    %c0_132 = arith.constant 0 : index
    %277 = vector.load %arg12[%c18, %c0_131, %c0_132] : memref<36x16x32xf32, #tpu.memory_space<vmem>>, vector<16x16x32xf32>
    %278 = vector.shape_cast %276 : vector<1x32xf32> to vector<1x1x32xf32>
    %279 = vector.broadcast %278 : vector<1x1x32xf32> to vector<16x16x32xf32>
    %280 = arith.mulf %279, %277 : vector<16x16x32xf32>
    %281 = arith.addf %269, %280 : vector<16x16x32xf32>
    %282 = vector.extract_strided_slice %57 {offsets = [18, 0], sizes = [1, 32], strides = [1, 1]} : vector<21x32xf32> to vector<1x32xf32>
    %c18_133 = arith.constant 18 : index
    %c0_134 = arith.constant 0 : index
    %c0_135 = arith.constant 0 : index
    %283 = vector.load %arg13[%c18_133, %c0_134, %c0_135] : memref<36x16x32xf32, #tpu.memory_space<vmem>>, vector<16x16x32xf32>
    %284 = vector.shape_cast %282 : vector<1x32xf32> to vector<1x1x32xf32>
    %285 = vector.broadcast %284 : vector<1x1x32xf32> to vector<16x16x32xf32>
    %286 = arith.mulf %285, %283 : vector<16x16x32xf32>
    %287 = arith.addf %275, %286 : vector<16x16x32xf32>
    %288 = vector.extract_strided_slice %56 {offsets = [19, 0], sizes = [1, 32], strides = [1, 1]} : vector<21x32xf32> to vector<1x32xf32>
    %c19 = arith.constant 19 : index
    %c0_136 = arith.constant 0 : index
    %c0_137 = arith.constant 0 : index
    %289 = vector.load %arg12[%c19, %c0_136, %c0_137] : memref<36x16x32xf32, #tpu.memory_space<vmem>>, vector<16x16x32xf32>
    %290 = vector.shape_cast %288 : vector<1x32xf32> to vector<1x1x32xf32>
    %291 = vector.broadcast %290 : vector<1x1x32xf32> to vector<16x16x32xf32>
    %292 = arith.mulf %291, %289 : vector<16x16x32xf32>
    %293 = arith.addf %281, %292 : vector<16x16x32xf32>
    %294 = vector.extract_strided_slice %57 {offsets = [19, 0], sizes = [1, 32], strides = [1, 1]} : vector<21x32xf32> to vector<1x32xf32>
    %c19_138 = arith.constant 19 : index
    %c0_139 = arith.constant 0 : index
    %c0_140 = arith.constant 0 : index
    %295 = vector.load %arg13[%c19_138, %c0_139, %c0_140] : memref<36x16x32xf32, #tpu.memory_space<vmem>>, vector<16x16x32xf32>
    %296 = vector.shape_cast %294 : vector<1x32xf32> to vector<1x1x32xf32>
    %297 = vector.broadcast %296 : vector<1x1x32xf32> to vector<16x16x32xf32>
    %298 = arith.mulf %297, %295 : vector<16x16x32xf32>
    %299 = arith.addf %287, %298 : vector<16x16x32xf32>
    %300 = vector.extract_strided_slice %56 {offsets = [20, 0], sizes = [1, 32], strides = [1, 1]} : vector<21x32xf32> to vector<1x32xf32>
    %c20 = arith.constant 20 : index
    %c0_141 = arith.constant 0 : index
    %c0_142 = arith.constant 0 : index
    %301 = vector.load %arg12[%c20, %c0_141, %c0_142] : memref<36x16x32xf32, #tpu.memory_space<vmem>>, vector<16x16x32xf32>
    %302 = vector.shape_cast %300 : vector<1x32xf32> to vector<1x1x32xf32>
    %303 = vector.broadcast %302 : vector<1x1x32xf32> to vector<16x16x32xf32>
    %304 = arith.mulf %303, %301 : vector<16x16x32xf32>
    %305 = arith.addf %293, %304 : vector<16x16x32xf32>
    %306 = vector.extract_strided_slice %57 {offsets = [20, 0], sizes = [1, 32], strides = [1, 1]} : vector<21x32xf32> to vector<1x32xf32>
    %c20_143 = arith.constant 20 : index
    %c0_144 = arith.constant 0 : index
    %c0_145 = arith.constant 0 : index
    %307 = vector.load %arg13[%c20_143, %c0_144, %c0_145] : memref<36x16x32xf32, #tpu.memory_space<vmem>>, vector<16x16x32xf32>
    %308 = vector.shape_cast %306 : vector<1x32xf32> to vector<1x1x32xf32>
    %309 = vector.broadcast %308 : vector<1x1x32xf32> to vector<16x16x32xf32>
    %310 = arith.mulf %309, %307 : vector<16x16x32xf32>
    %311 = arith.addf %299, %310 : vector<16x16x32xf32>
    %c0_146 = arith.constant 0 : index
    %c0_147 = arith.constant 0 : index
    %312 = vector.load %arg7[%c0_146, %c0_147] : memref<32x32xf32, #tpu.memory_space<vmem>>, vector<32x32xf32>
    %313 = vector.shape_cast %305 : vector<16x16x32xf32> to vector<256x32xf32>
    %cst_148 = arith.constant dense<0.000000e+00> : vector<32x256xf32>
    %314 = tpu.matmul %312, %313, %cst_148 {dimension_numbers = #tpu.dot_dimension_numbers<[1], [1], [0], [0], [0, 0, 1, 0], [], []>} : vector<32x32xf32>, vector<256x32xf32>, vector<32x256xf32> -> vector<32x256xf32>
    %c0_149 = arith.constant 0 : index
    %c0_150 = arith.constant 0 : index
    %315 = vector.load %arg8[%c0_149, %c0_150] : memref<32x1xf32, #tpu.memory_space<vmem>>, vector<32x1xf32>
    %316 = vector.broadcast %315 : vector<32x1xf32> to vector<32x256xf32>
    %317 = arith.addf %314, %316 : vector<32x256xf32>
    %318 = vector.shape_cast %311 : vector<16x16x32xf32> to vector<256x32xf32>
    %cst_151 = arith.constant dense<0.000000e+00> : vector<32x256xf32>
    %319 = tpu.matmul %312, %318, %cst_151 {dimension_numbers = #tpu.dot_dimension_numbers<[1], [1], [0], [0], [0, 0, 1, 0], [], []>} : vector<32x32xf32>, vector<256x32xf32>, vector<32x256xf32> -> vector<32x256xf32>
    %c0_152 = arith.constant 0 : index
    %c0_153 = arith.constant 0 : index
    %320 = vector.load %arg9[%c0_152, %c0_153] : memref<32x1xf32, #tpu.memory_space<vmem>>, vector<32x1xf32>
    %321 = vector.broadcast %320 : vector<32x1xf32> to vector<32x256xf32>
    %322 = arith.addf %319, %321 : vector<32x256xf32>
    %c0_154 = arith.constant 0 : index
    %c0_155 = arith.constant 0 : index
    %c0_156 = arith.constant 0 : index
    %323 = vector.load %arg10[%c0_154, %c0_155, %c0_156] : memref<1x32x256xf32, #tpu.memory_space<vmem>>, vector<1x32x256xf32>
    %324 = vector.shape_cast %323 : vector<1x32x256xf32> to vector<32x256xf32>
    %325 = vector.shape_cast %317 : vector<32x256xf32> to vector<1x32x256xf32>
    tpu.vector_store %arg10[%c0_154, %c0_155, %c0_156], %325 {strides = array<i32>} : memref<1x32x256xf32, #tpu.memory_space<vmem>>, vector<1x32x256xf32>,
    %c0_157 = arith.constant 0 : index
    %c0_158 = arith.constant 0 : index
    %c0_159 = arith.constant 0 : index
    %326 = vector.load %arg11[%c0_157, %c0_158, %c0_159] : memref<1x32x256xf32, #tpu.memory_space<vmem>>, vector<1x32x256xf32>
    %327 = vector.shape_cast %326 : vector<1x32x256xf32> to vector<32x256xf32>
    %328 = vector.shape_cast %322 : vector<32x256xf32> to vector<1x32x256xf32>
    tpu.vector_store %arg11[%c0_157, %c0_158, %c0_159], %328 {strides = array<i32>} : memref<1x32x256xf32, #tpu.memory_space<vmem>>, vector<1x32x256xf32>,
    return
  }
  func.func @transform_0(%arg0: i32) -> (i32, i32, i32, i32) {
    %c0_i32 = arith.constant 0 : i32
    %c0_i32_0 = arith.constant 0 : i32
    %c0_i32_1 = arith.constant 0 : i32
    %c0_i32_2 = arith.constant 0 : i32
    return %arg0, %c0_i32, %c0_i32_0, %c0_i32_1 : i32, i32, i32, i32
  }
  func.func @transform_1(%arg0: i32) -> (i32, i32, i32, i32) {
    %c0_i32 = arith.constant 0 : i32
    %c0_i32_0 = arith.constant 0 : i32
    %c0_i32_1 = arith.constant 0 : i32
    %c0_i32_2 = arith.constant 0 : i32
    return %arg0, %c0_i32, %c0_i32_0, %c0_i32_1 : i32, i32, i32, i32
  }
  func.func @transform_2(%arg0: i32) -> (i32, i32) {
    %c0_i32 = arith.constant 0 : i32
    %c0_i32_0 = arith.constant 0 : i32
    %c0_i32_1 = arith.constant 0 : i32
    return %c0_i32, %c0_i32_0 : i32, i32
  }
  func.func @transform_3(%arg0: i32) -> (i32, i32) {
    %c0_i32 = arith.constant 0 : i32
    %c0_i32_0 = arith.constant 0 : i32
    %c0_i32_1 = arith.constant 0 : i32
    return %c0_i32, %c0_i32_0 : i32, i32
  }
  func.func @transform_4(%arg0: i32) -> (i32, i32) {
    %c0_i32 = arith.constant 0 : i32
    %c0_i32_0 = arith.constant 0 : i32
    %c0_i32_1 = arith.constant 0 : i32
    return %c0_i32, %c0_i32_0 : i32, i32
  }
  func.func @transform_5(%arg0: i32) -> (i32, i32) {
    %c0_i32 = arith.constant 0 : i32
    %c0_i32_0 = arith.constant 0 : i32
    %c0_i32_1 = arith.constant 0 : i32
    return %c0_i32, %c0_i32_0 : i32, i32
  }
  func.func @transform_6(%arg0: i32) -> (i32, i32) {
    %c0_i32 = arith.constant 0 : i32
    %c0_i32_0 = arith.constant 0 : i32
    %c0_i32_1 = arith.constant 0 : i32
    return %c0_i32, %c0_i32_0 : i32, i32
  }
  func.func @transform_7(%arg0: i32) -> (i32, i32) {
    %c0_i32 = arith.constant 0 : i32
    %c0_i32_0 = arith.constant 0 : i32
    %c0_i32_1 = arith.constant 0 : i32
    return %c0_i32, %c0_i32_0 : i32, i32
  }
  func.func @transform_8(%arg0: i32) -> (i32, i32) {
    %c0_i32 = arith.constant 0 : i32
    %c0_i32_0 = arith.constant 0 : i32
    %c0_i32_1 = arith.constant 0 : i32
    return %c0_i32, %c0_i32_0 : i32, i32
  }
  func.func @transform_9(%arg0: i32) -> (i32, i32, i32) {
    %c0_i32 = arith.constant 0 : i32
    %c0_i32_0 = arith.constant 0 : i32
    %c0_i32_1 = arith.constant 0 : i32
    return %arg0, %c0_i32, %c0_i32_0 : i32, i32, i32
  }
  func.func @transform_10(%arg0: i32) -> (i32, i32, i32) {
    %c0_i32 = arith.constant 0 : i32
    %c0_i32_0 = arith.constant 0 : i32
    %c0_i32_1 = arith.constant 0 : i32
    return %arg0, %c0_i32, %c0_i32_0 : i32, i32, i32
  }
}

module attributes {stable_mosaic.version = 11 : i64} {
  func.func @kernel(%arg0: i32, %arg1: memref<4x16x64xf32, #tpu.memory_space<vmem>>, %arg2: memref<4x16x64xf32, #tpu.memory_space<vmem>>, %arg3: memref<4x16x64xf32, #tpu.memory_space<vmem>>) attributes {dimension_semantics = [#tpu.dimension_semantics<parallel>], iteration_bounds = array<i64: 4>, scalar_prefetch = 0 : i64, scratch_operands = 0 : i64, tpu.core_type = #tpu.core_type<tc>, window_params = [{transform_indices = @transform_0, window_bounds = array<i64: 4, 16, 64>}, {transform_indices = @transform_1, window_bounds = array<i64: 4, 16, 64>}, {transform_indices = @transform_2, window_bounds = array<i64: 4, 16, 64>}]} {
    %c0 = arith.constant 0 : index
    %c0_0 = arith.constant 0 : index
    %c0_1 = arith.constant 0 : index
    %0 = vector.load %arg1[%c0, %c0_0, %c0_1] : memref<4x16x64xf32, #tpu.memory_space<vmem>>, vector<4x16x64xf32>
    %c0_2 = arith.constant 0 : index
    %c0_3 = arith.constant 0 : index
    %c0_4 = arith.constant 0 : index
    %1 = vector.load %arg2[%c0_2, %c0_3, %c0_4] : memref<4x16x64xf32, #tpu.memory_space<vmem>>, vector<4x16x64xf32>
    %2 = arith.mulf %0, %0 : vector<4x16x64xf32>
    %cst = arith.constant dense<0.000000e+00> : vector<4x16xf32>
    %3 = vector.multi_reduction <add>, %2, %cst [2] : vector<4x16x64xf32> to vector<4x16xf32>
    %4 = vector.shape_cast %3 : vector<4x16xf32> to vector<4x16x1xf32>
    %cst_5 = arith.constant 1.000000e-24 : f32
    %5 = vector.broadcast %cst_5 : f32 to vector<4x16x1xf32>
    %6 = arith.maximumf %4, %5 : vector<4x16x1xf32>
    %7 = math.rsqrt %6 : vector<4x16x1xf32>
    %8 = vector.broadcast %7 : vector<4x16x1xf32> to vector<4x16x64xf32>
    %9 = arith.mulf %0, %8 : vector<4x16x64xf32>
    %10 = arith.mulf %1, %1 : vector<4x16x64xf32>
    %cst_6 = arith.constant dense<0.000000e+00> : vector<4x16xf32>
    %11 = vector.multi_reduction <add>, %10, %cst_6 [2] : vector<4x16x64xf32> to vector<4x16xf32>
    %12 = vector.shape_cast %11 : vector<4x16xf32> to vector<4x16x1xf32>
    %cst_7 = arith.constant 1.000000e-24 : f32
    %13 = vector.broadcast %cst_7 : f32 to vector<4x16x1xf32>
    %14 = arith.maximumf %12, %13 : vector<4x16x1xf32>
    %15 = math.rsqrt %14 : vector<4x16x1xf32>
    %16 = vector.broadcast %15 : vector<4x16x1xf32> to vector<4x16x64xf32>
    %17 = arith.mulf %1, %16 : vector<4x16x64xf32>
    "tpu.trace_start"() <{level = 10 : i32, message = "gnd,gmd->gnm"}> : () -> ()
    %cst_8 = arith.constant dense<0.000000e+00> : vector<4x16x16xf32>
    %18 = tpu.matmul %9, %17, %cst_8 {dimension_numbers = #tpu.dot_dimension_numbers<[2], [2], [1], [1], [0, 0, 0, 1, 1, 1], [0], [0]>} : vector<4x16x64xf32>, vector<4x16x64xf32>, vector<4x16x16xf32> -> vector<4x16x16xf32>
    "tpu.trace_stop"() : () -> ()
    %19 = math.exp %18 : vector<4x16x16xf32>
    %cst_9 = arith.constant dense<0.000000e+00> : vector<4x16xf32>
    %20 = vector.multi_reduction <add>, %19, %cst_9 [2] : vector<4x16x16xf32> to vector<4x16xf32>
    %21 = vector.shape_cast %20 : vector<4x16xf32> to vector<4x16x1xf32>
    %22 = tpu.reciprocal %21 {approx = true} : vector<4x16x1xf32> -> vector<4x16x1xf32>
    %23 = vector.broadcast %22 : vector<4x16x1xf32> to vector<4x16x16xf32>
    %24 = arith.mulf %19, %23 : vector<4x16x16xf32>
    "tpu.trace_start"() <{level = 10 : i32, message = "gnm,gmd->gnd"}> : () -> ()
    %cst_10 = arith.constant dense<0.000000e+00> : vector<4x16x64xf32>
    %25 = tpu.matmul %24, %1, %cst_10 {dimension_numbers = #tpu.dot_dimension_numbers<[2], [1], [1], [2], [0, 0, 0, 1, 1, 2], [0], [0]>} : vector<4x16x16xf32>, vector<4x16x64xf32>, vector<4x16x64xf32> -> vector<4x16x64xf32>
    "tpu.trace_stop"() : () -> ()
    %26 = arith.addf %25, %9 : vector<4x16x64xf32>
    %c0_11 = arith.constant 0 : index
    %c0_12 = arith.constant 0 : index
    %c0_13 = arith.constant 0 : index
    %27 = vector.load %arg3[%c0_11, %c0_12, %c0_13] : memref<4x16x64xf32, #tpu.memory_space<vmem>>, vector<4x16x64xf32>
    tpu.vector_store %arg3[%c0_11, %c0_12, %c0_13], %26 {strides = array<i32>} : memref<4x16x64xf32, #tpu.memory_space<vmem>>, vector<4x16x64xf32>,
    return
  }
  func.func @transform_0(%arg0: i32) -> (i32, i32, i32) {
    %c0_i32 = arith.constant 0 : i32
    %c0_i32_0 = arith.constant 0 : i32
    %c0_i32_1 = arith.constant 0 : i32
    return %arg0, %c0_i32, %c0_i32_0 : i32, i32, i32
  }
  func.func @transform_1(%arg0: i32) -> (i32, i32, i32) {
    %c0_i32 = arith.constant 0 : i32
    %c0_i32_0 = arith.constant 0 : i32
    %c0_i32_1 = arith.constant 0 : i32
    return %arg0, %c0_i32, %c0_i32_0 : i32, i32, i32
  }
  func.func @transform_2(%arg0: i32) -> (i32, i32, i32) {
    %c0_i32 = arith.constant 0 : i32
    %c0_i32_0 = arith.constant 0 : i32
    %c0_i32_1 = arith.constant 0 : i32
    return %arg0, %c0_i32, %c0_i32_0 : i32, i32, i32
  }
}

module attributes {stable_mosaic.version = 11 : i64} {
  func.func @kernel(%arg0: i32, %arg1: memref<32x128xf32, #tpu.memory_space<vmem>>, %arg2: memref<32x128xf32, #tpu.memory_space<vmem>>, %arg3: memref<32x128xf32, #tpu.memory_space<vmem>>, %arg4: memref<128x128xf32, #tpu.memory_space<vmem>>, %arg5: memref<1x128xf32, #tpu.memory_space<vmem>>, %arg6: memref<32x128xf32, #tpu.memory_space<vmem>>) attributes {dimension_semantics = [#tpu.dimension_semantics<parallel>], iteration_bounds = array<i64: 4>, scalar_prefetch = 0 : i64, scratch_operands = 0 : i64, tpu.core_type = #tpu.core_type<tc>, window_params = [{transform_indices = @transform_0, window_bounds = array<i64: 32, 128>}, {transform_indices = @transform_1, window_bounds = array<i64: 32, 128>}, {transform_indices = @transform_2, window_bounds = array<i64: 32, 128>}, {pipeline_mode = #tpu.pipeline_mode<synchronous>, transform_indices = @transform_3, window_bounds = array<i64: 128, 128>}, {pipeline_mode = #tpu.pipeline_mode<synchronous>, transform_indices = @transform_4, window_bounds = array<i64: 1, 128>}, {transform_indices = @transform_5, window_bounds = array<i64: 32, 128>}]} {
    %c0 = arith.constant 0 : index
    %c0_0 = arith.constant 0 : index
    %0 = vector.load %arg1[%c0, %c0_0] : memref<32x128xf32, #tpu.memory_space<vmem>>, vector<32x128xf32>
    %c0_1 = arith.constant 0 : index
    %c0_2 = arith.constant 0 : index
    %1 = vector.load %arg2[%c0_1, %c0_2] : memref<32x128xf32, #tpu.memory_space<vmem>>, vector<32x128xf32>
    %2 = arith.addf %0, %1 : vector<32x128xf32>
    %c0_3 = arith.constant 0 : index
    %c0_4 = arith.constant 0 : index
    %3 = vector.load %arg4[%c0_3, %c0_4] : memref<128x128xf32, #tpu.memory_space<vmem>>, vector<128x128xf32>
    %cst = arith.constant dense<0.000000e+00> : vector<32x128xf32>
    %4 = tpu.matmul %2, %3, %cst {dimension_numbers = #tpu.dot_dimension_numbers<[1], [0], [0], [1], [0, 0, 1, 1], [], []>} : vector<32x128xf32>, vector<128x128xf32>, vector<32x128xf32> -> vector<32x128xf32>
    %c0_5 = arith.constant 0 : index
    %c0_6 = arith.constant 0 : index
    %5 = vector.load %arg5[%c0_5, %c0_6] : memref<1x128xf32, #tpu.memory_space<vmem>>, vector<1x128xf32>
    %6 = vector.broadcast %5 : vector<1x128xf32> to vector<32x128xf32>
    %7 = arith.addf %4, %6 : vector<32x128xf32>
    %c0_7 = arith.constant 0 : index
    %c0_8 = arith.constant 0 : index
    %8 = vector.load %arg3[%c0_7, %c0_8] : memref<32x128xf32, #tpu.memory_space<vmem>>, vector<32x128xf32>
    %9 = arith.addf %7, %8 : vector<32x128xf32>
    %c0_9 = arith.constant 0 : index
    %c0_10 = arith.constant 0 : index
    %10 = vector.load %arg6[%c0_9, %c0_10] : memref<32x128xf32, #tpu.memory_space<vmem>>, vector<32x128xf32>
    tpu.vector_store %arg6[%c0_9, %c0_10], %9 {strides = array<i32>} : memref<32x128xf32, #tpu.memory_space<vmem>>, vector<32x128xf32>,
    return
  }
  func.func @transform_0(%arg0: i32) -> (i32, i32) {
    %c0_i32 = arith.constant 0 : i32
    %c0_i32_0 = arith.constant 0 : i32
    return %arg0, %c0_i32 : i32, i32
  }
  func.func @transform_1(%arg0: i32) -> (i32, i32) {
    %c0_i32 = arith.constant 0 : i32
    %c0_i32_0 = arith.constant 0 : i32
    return %arg0, %c0_i32 : i32, i32
  }
  func.func @transform_2(%arg0: i32) -> (i32, i32) {
    %c0_i32 = arith.constant 0 : i32
    %c0_i32_0 = arith.constant 0 : i32
    return %arg0, %c0_i32 : i32, i32
  }
  func.func @transform_3(%arg0: i32) -> (i32, i32) {
    %c0_i32 = arith.constant 0 : i32
    %c0_i32_0 = arith.constant 0 : i32
    %c0_i32_1 = arith.constant 0 : i32
    return %c0_i32, %c0_i32_0 : i32, i32
  }
  func.func @transform_4(%arg0: i32) -> (i32, i32) {
    %c0_i32 = arith.constant 0 : i32
    %c0_i32_0 = arith.constant 0 : i32
    %c0_i32_1 = arith.constant 0 : i32
    return %c0_i32, %c0_i32_0 : i32, i32
  }
  func.func @transform_5(%arg0: i32) -> (i32, i32) {
    %c0_i32 = arith.constant 0 : i32
    %c0_i32_0 = arith.constant 0 : i32
    return %arg0, %c0_i32 : i32, i32
  }
}

</mosaic_0001>

<bundles_post_ra>
// kernel: msca_forward.5
= control target key start
LH: loop header
LB: loop body
LE: loop exit
PB: predicated region body
PF: predicated region fallthrough
CT: control target
= control target key end

     0   :  { %s1379_s9 = smov 0   ;;  %s1604_s0 = inlined_call_operand.vmem [shape: f32[16,16,64], index: 0, kind: input, shape index: {}]   ;;  %s1605_s1 = inlined_call_operand.vmem [shape: f32[16,16,64], index: 1, kind: input, shape index: {}]   ;;  %s1606_s2 = inlined_call_operand.vmem [shape: f32[16,16,64], index: 2, kind: output, shape index: {}]  }
   0x1 LB: > { %s1113_s10 = sadd.s32 4294967295, %s1362_s9   ;;  %p1117_p0 = scmp.ge.s32.totalorder %s1362_s9, 1  ;;  %s1362_s9 = sphi %s1379_s9, %s12_s9  }
   0x2   : > { %p126_p1 = scmp.lt.s32.totalorder %s1362_s9, 5 }
   0x4   : > { %p127_p2 = pnand %p1117_p0, %p126_p1 }
   0x5   : > { %s1118_s11 = sshll.u32 (!%p127_p2), %s1113_s10, 2  ;;  %vm201_vm0 = vcmask (!%p127_p2), 523264   ;;  %vm670_vm2 = vcmask (!%p127_p2), 130048  }
   0x6   : > { %130 = sbr.rel (%p127_p2) target bundleno = 809 (0x329), region = 28  ;;  %p157_p3 = scmp.lt.s32.totalorder (!%p127_p2), %s1118_s11, 15  ;;  %vm1493_vm1 = vmpackc.low (!%p127_p2), %vm201_vm0, %vm201_vm0 }
   0xd   : > { %s1610_s11 = smov (!%p157_p3, %s1118_s11), 15 }
   0xe   : > { %s1387_s12 = sshll.u32 %s1610_s11, 4 }
   0xf   : > { %s168_s15 = scalar_lea.vmem %s1605_s1, %s1387_s12  ;;  %s1429_s18 = scalar_lea.vmem %s1604_s0, %s1387_s12 }
  0x10   : > { %v1393_v0 = vld [vmem:[%s168_s15 + $0x10] sm:$0xff]  ;;  %v1395_v1 = vld [vmem:[%s168_s15] sm:$0xff]  ;;  %v1397_v2 = vld [vmem:[%s168_s15 + $0x18] sm:$0xff]  ;;  %s175_s21 = scalar_lea.vmem %s1606_s2, %s1387_s12 }
  0x11   : > { %v252_v3 = vmul.f32 %v1393_v0, %v1393_v0  ;;  %v250_v4 = vmul.f32 %v1395_v1, %v1395_v1  ;;  %v253_v5 = vmul.f32 %v1397_v2, %v1397_v2  ;;  %v1405_v6 = vld [vmem:[%s168_s15 + $0x8] sm:$0xff]  ;;  %v1411_v9 = vld [vmem:[%s168_s15 + $0x20] sm:$0xff]  ;;  %v1421_v16 = vld [vmem:[%s168_s15 + $0x38] sm:$0xff] }
  0x12   : > { %v251_v7 = vmul.f32 %v1405_v6, %v1405_v6  ;;  %v1409_v8 = vld [vmem:[%s168_s15 + $0x28] sm:$0xff]  ;;  %v254_v15 = vmul.f32 %v1411_v9, %v1411_v9  ;;  %v1423_v17 = vld [vmem:[%s168_s15 + $0x30] sm:$0xff]  ;;  %v257_v20 = vmul.f32 %v1421_v16, %v1421_v16  ;;  %v1441_v23 = vld [vmem:[%s1429_s18] sm:$0xff] }
  0x13   : > { %v264_v10 = vsel %vm201_vm0, %v252_v3, 0.0  ;;  %v258_v11 = vsel %vm201_vm0, %v250_v4, 0.0  ;;  %v267_v12 = vsel %vm201_vm0, %v253_v5, 0.0  ;;  %v255_v14 = vmul.f32 %v1409_v8, %v1409_v8  ;;  %v1438_v22 = vld [vmem:[%s1429_s18 + $0x10] sm:$0xff]  ;;  %v1450_v28 = vld [vmem:[%s1429_s18 + $0x18] sm:$0xff]  ;;  %v1453_v29 = vld [vmem:[%s1429_s18 + $0x8] sm:$0xff] }
  0x14   : > { %265 = vadd.xlane.f32.xlu1 %v264_v10  ;;  %259 = vadd.xlane.f32.xlu0 %v258_v11  ;;  %v261_v13 = vsel %vm201_vm0, %v251_v7, 0.0  ;;  %v270_v19 = vsel %vm201_vm0, %v254_v15, 0.0  ;;  %v256_v21 = vmul.f32 %v1423_v17, %v1423_v17  ;;  %v279_v24 = vsel %vm201_vm0, %v257_v20, 0.0  ;;  %v1462_v34 = vld [vmem:[%s1429_s18 + $0x30] sm:$0xff]  ;;  %v1465_v35 = vld [vmem:[%s1429_s18 + $0x20] sm:$0xff]  ;;  %v1474_v40 = vld [vmem:[%s1429_s18 + $0x38] sm:$0xff] }
  0x15   : > { %v273_v18 = vsel %vm201_vm0, %v255_v14, 0.0  ;;  %v195_v26 = vmul.f32 %v1438_v22, %v1438_v22  ;;  %v193_v27 = vmul.f32 %v1441_v23, %v1441_v23  ;;  %v196_v32 = vmul.f32 %v1450_v28, %v1450_v28  ;;  %v1477_v41 = vld [vmem:[%s1429_s18 + $0x28] sm:$0xff] }
  0x16   : > { %v276_v25 = vsel %vm201_vm0, %v256_v21, 0.0  ;;  %v194_v33 = vmul.f32 %v1453_v29, %v1453_v29  ;;  %v199_v38 = vmul.f32 %v1462_v34, %v1462_v34  ;;  %v197_v39 = vmul.f32 %v1465_v35, %v1465_v35 }
  0x17   : > { %v208_v30 = vsel %vm201_vm0, %v195_v26, 0.0  ;;  %v202_v31 = vsel %vm201_vm0, %v193_v27, 0.0  ;;  %v211_v36 = vsel %vm201_vm0, %v196_v32, 0.0  ;;  %v200_v44 = vmul.f32 %v1474_v40, %v1474_v40 }
  0x18   : > { %268 = vadd.xlane.f32.xlu1 %v267_v12  ;;  %262 = vadd.xlane.f32.xlu0 %v261_v13  ;;  %v205_v37 = vsel %vm201_vm0, %v194_v33, 0.0  ;;  %v220_v42 = vsel %vm201_vm0, %v199_v38, 0.0  ;;  %v214_v43 = vsel %vm201_vm0, %v197_v39, 0.0  ;;  %v198_v45 = vmul.f32 %v1477_v41, %v1477_v41 }
  0x19   : > { %v223_v46 = vsel %vm201_vm0, %v200_v44, 0.0 }
  0x1a   : > { %v217_v47 = vsel %vm201_vm0, %v198_v45, 0.0 }
  0x1c   : > { %274 = vadd.xlane.f32.xlu1 %v273_v18  ;;  %271 = vadd.xlane.f32.xlu0 %v270_v19 }
  0x20   : > { %280 = vadd.xlane.f32.xlu1 %v279_v24  ;;  %277 = vadd.xlane.f32.xlu0 %v276_v25 }
  0x24   : > { %209 = vadd.xlane.f32.xlu1 %v208_v30  ;;  %203 = vadd.xlane.f32.xlu0 %v202_v31 }
  0x28   : > { %212 = vadd.xlane.f32.xlu1 %v211_v36  ;;  %206 = vadd.xlane.f32.xlu0 %v205_v37 }
  0x2c   : > { %221 = vadd.xlane.f32.xlu1 %v220_v42  ;;  %215 = vadd.xlane.f32.xlu0 %v214_v43 }
  0x30   : > { %224 = vadd.xlane.f32.xlu1 %v223_v46  ;;  %218 = vadd.xlane.f32.xlu0 %v217_v47 }
  0xa1   : > { %v266_v48 = vpop.xlane.xlu1 %265  ;;  %v260_v49 = vpop.xlane.xlu0 %259 }
  0xa2   : > { %v284_v50 = vmax.f32 %v266_v48, 1e-24  ;;  %v282_v51 = vmax.f32 %v260_v49, 1e-24 }
  0xa4   : > { %1292 = vrsqrt.f32 %v284_v50 }
  0xa5   : > { %v269_v52 = vpop.xlane.xlu1 %268  ;;  %v263_v53 = vpop.xlane.xlu0 %262  ;;  %1294 = vrsqrt.f32 %v282_v51 }
  0xa6   : > { %v285_v54 = vmax.f32 %v269_v52, 1e-24  ;;  %v283_v55 = vmax.f32 %v263_v53, 1e-24 }
  0xa8   : > { %1296 = vrsqrt.f32 %v285_v54 }
  0xa9   : > { %1298 = vrsqrt.f32 %v283_v55  ;;  %v275_v56 = vpop.xlane.xlu1 %274  ;;  %v272_v57 = vpop.xlane.xlu0 %271 }
  0xaa   : > { %v287_v58 = vmax.f32 %v275_v56, 1e-24  ;;  %v286_v59 = vmax.f32 %v272_v57, 1e-24 }
  0xac   : > { %1300 = vrsqrt.f32 %v287_v58 }
  0xad   : > { %1302 = vrsqrt.f32 %v286_v59  ;;  %v281_v60 = vpop.xlane.xlu1 %280  ;;  %v278_v61 = vpop.xlane.xlu0 %277 }
  0xae   : > { %v289_v62 = vmax.f32 %v281_v60, 1e-24  ;;  %v288_v63 = vmax.f32 %v278_v61, 1e-24  ;;  %v1293_v3 = vpop.eup %1292 }
  0xaf   : > { %v1295_v4 = vpop.eup %1294  ;;  %v300_v14 = vmul.f32 %v1293_v3, %v1393_v0 }
  0xb0   : > { %1304 = vrsqrt.f32 %v289_v62  ;;  %v298_v18 = vmul.f32 %v1295_v4, %v1395_v1 }
  0xb1   : > { %1306 = vrsqrt.f32 %v288_v63  ;;  %v210_v5 = vpop.xlane.xlu1 %209  ;;  %v204_v7 = vpop.xlane.xlu0 %203 }
  0xb2   : > { %v1297_v10 = vpop.eup %1296  ;;  %v228_v11 = vmax.f32 %v210_v5, 1e-24  ;;  %v226_v12 = vmax.f32 %v204_v7, 1e-24 }
  0xb3   : > { %v1299_v13 = vpop.eup %1298  ;;  %v301_v15 = vmul.f32 %v1297_v10, %v1397_v2 }
  0xb4   : > { %1308 = vrsqrt.f32 %v228_v11  ;;  %v299_v19 = vmul.f32 %v1299_v13, %v1405_v6 }
  0xb5   : > { %1310 = vrsqrt.f32 %v226_v12  ;;  %v213_v21 = vpop.xlane.xlu1 %212  ;;  %v207_v24 = vpop.xlane.xlu0 %206  ;;  %v1250_v25 = vpack.c.bf16 %v301_v15, %v300_v14 }
  0xb6   : > { %v1301_v26 = vpop.eup %1300  ;;  %v229_v27 = vmax.f32 %v213_v21, 1e-24  ;;  %v227_v30 = vmax.f32 %v207_v24, 1e-24  ;;  %v1244_v31 = vpack.c.bf16 %v299_v19, %v298_v18 }
  0xb7   : > { %v1303_v32 = vpop.eup %1302  ;;  %1252 = vmatprep.subr.msk.bf16.mxu1 %vm1493_vm1, %v1250_v25  ;;  %v303_v33 = vmul.f32 %v1301_v26, %v1409_v8 }
  0xb8   : > { %1312 = vrsqrt.f32 %v229_v27  ;;  %1246 = vmatprep.subr.msk.bf16.mxu0 %vm1493_vm1, %v1244_v31  ;;  %1255 = vmatpush3.bf16.xpose.msk.msra.mxu1 %vm1493_vm1, %v1250_v25  ;;  %v302_v36 = vmul.f32 %v1303_v32, %v1411_v9 }
  0xb9   : > { %1314 = vrsqrt.f32 %v227_v30  ;;  %1249 = vmatpush3.bf16.xpose.msk.msra.mxu0 %vm1493_vm1, %v1244_v31  ;;  %v222_v37 = vpop.xlane.xlu1 %221  ;;  %v216_v38 = vpop.xlane.xlu0 %215 }
  0xba   : > { %v1305_v39 = vpop.eup %1304  ;;  %v232_v42 = vmax.f32 %v222_v37, 1e-24  ;;  %v230_v43 = vmax.f32 %v216_v38, 1e-24  ;;  %v1256_v44 = vpack.c.bf16 %v303_v33, %v302_v36 }
  0xbb   : > { %v1307_v45 = vpop.eup %1306  ;;  %v305_v46 = vmul.f32 %v1305_v39, %v1421_v16 }
  0xbc   : > { %1316 = vrsqrt.f32 %v232_v42  ;;  %1258 = vmatprep.subr.msk.bf16.mxu0 %vm1493_vm1, %v1256_v44  ;;  %v304_v47 = vmul.f32 %v1307_v45, %v1423_v17  ;;  %v1268_v45 = vpack.c.bf16 %v1405_v6, %v1395_v1 }
  0xbd   : > { %1318 = vrsqrt.f32 %v230_v43  ;;  %v225_v48 = vpop.xlane.xlu1 %224  ;;  %v219_v49 = vpop.xlane.xlu0 %218 }
  0xbe   : > { %v1309_v50 = vpop.eup %1308  ;;  %v233_v51 = vmax.f32 %v225_v48, 1e-24  ;;  %v231_v52 = vmax.f32 %v219_v49, 1e-24  ;;  %v1262_v53 = vpack.c.bf16 %v305_v46, %v304_v47  ;;  %v1272_v46 = vpack.c.bf16 %v1397_v2, %v1393_v0 }
  0xbf   : > { %v1311_v54 = vpop.eup %1310  ;;  %v1512_v55 = vmul.f32 %v1309_v50, %v1438_v22  ;;  %v1276_v47 = vpack.c.bf16 %v1409_v8, %v1411_v9  ;;  %v1280_v48 = vpack.c.bf16 %v1421_v16, %v1423_v17 }
  0xc0   : > { %1320 = vrsqrt.f32 %v233_v51  ;;  %1264 = vmatprep.subr.msk.bf16.mxu1 %vm1493_vm1, %v1262_v53  ;;  %v1517_v56 = vmul.f32 %v1311_v54, %v1441_v23 }
  0xc1   : > { %1322 = vrsqrt.f32 %v231_v52  ;;  %1199 = vmatprep.mubr.msk.f32.mxu1 %vm201_vm0, %v1512_v55 }
  0xc2   : > { %v1313_v57 = vpop.eup %1312  ;;  %1192 = vmatprep.mubr.msk.f32.mxu0 %vm201_vm0, %v1517_v56 }
  0xc3   : > { %v1315_v58 = vpop.eup %1314  ;;  %v1524_v59 = vmul.f32 %v1313_v57, %v1450_v28 }
  0xc4   : > { %v1527_v22 = vmul.f32 %v1315_v58, %v1453_v29 }
  0xc5   : > { %1200 = vmatmul.mubr.msk.f32.vlgmr.msra.gmra.mrb[0].mxu1 %vm201_vm0, %v1524_v59 }
  0xc6   : > { %v1317_v23 = vpop.eup %1316  ;;  %1193 = vmatmul.mubr.msk.f32.vlgmr.msra.gmra.mrb[0].mxu0 %vm201_vm0, %v1527_v22  ;;  %1267 = vmatpush3.bf16.xpose.msk.msra.mxu1 %vm1493_vm1, %v1262_v53 }
  0xc7   : > { %v1319_v60 = vpop.eup %1318  ;;  %1261 = vmatpush3.bf16.xpose.msk.msra.mxu0 %vm1493_vm1, %v1256_v44  ;;  %v1538_v28 = vmul.f32 %v1317_v23, %v1462_v34  ;;  %1273 = vmatprep.subr.bf16.mxu1 %v1272_v46 }
  0xc8   : > { %v1541_v29 = vmul.f32 %v1319_v60, %v1465_v35  ;;  %1269 = vmatprep.subr.bf16.mxu0 %v1268_v45 }
  0xc9   : > { %1213 = vmatprep.mubr.msk.f32.mxu1 %vm201_vm0, %v1538_v28 }
  0xca   : > { %v1321_v61 = vpop.eup %1320  ;;  %1206 = vmatprep.mubr.msk.f32.mxu0 %vm201_vm0, %v1541_v29 }
  0xcb   : > { %v1323_v62 = vpop.eup %1322  ;;  %v1548_v63 = vmul.f32 %v1321_v61, %v1474_v40 }
  0xcc   : > { %v1551_v3 = vmul.f32 %v1323_v62, %v1477_v41 }
  0xcd   : > { %1214 = vmatmul.mubr.msk.f32.vlgmr.msra.gmra.mrb[2].mxu1 %vm201_vm0, %v1548_v63 }
  0xce   : > { %1207 = vmatmul.mubr.msk.f32.vlgmr.msra.gmra.mrb[2].mxu0 %vm201_vm0, %v1551_v3  ;;  %1275 = vmatpush3.bf16.msra.mxu1 %v1272_v46 }
  0xcf   : > { %1271 = vmatpush3.bf16.msra.mxu0 %v1268_v45  ;;  %1281 = vmatprep.subr.bf16.mxu1 %v1280_v48 }
  0xd0   : > { %1277 = vmatprep.subr.bf16.mxu0 %v1276_v47 }
 0x198   : > { %v1201_v34 = vpop.f32.mrb[0].mxu1 }
 0x199   : > { %v1194_v35 = vpop.f32.mrb[0].mxu0  ;;  %v660_v4 = vmul.f32 1.442695, %v1201_v34  ;;  %v471_v5 = vpop.f32.mrb[1].mxu1 }
 0x19a   : > { %v656_v7 = vmul.f32 1.442695, %v1194_v35  ;;  %v384_v10 = vpop.f32.mrb[1].mxu0  ;;  %v658_v11 = vmul.f32 1.442695, %v471_v5 }
 0x19b   : > { %1324 = vpow2.f32 %v660_v4  ;;  %v654_v12 = vmul.f32 1.442695, %v384_v10 }
 0x19c   : > { %1326 = vpow2.f32 %v656_v7 }
 0x19d   : > { %1328 = vpow2.f32 %v654_v12 }
 0x19e   : > { %1330 = vpow2.f32 %v658_v11 }
 0x1a0   : > { %v1215_v40 = vpop.f32.mrb[2].mxu1 }
 0x1a1   : > { %v1208_v41 = vpop.f32.mrb[2].mxu0  ;;  %v645_v13 = vpop.f32.mrb[3].mxu1  ;;  %v668_v20 = vmul.f32 1.442695, %v1215_v40 }
 0x1a2   : > { %v558_v14 = vpop.f32.mrb[3].mxu0  ;;  %v666_v15 = vmul.f32 1.442695, %v645_v13  ;;  %v664_v18 = vmul.f32 1.442695, %v1208_v41 }
 0x1a3   : > { %v662_v19 = vmul.f32 1.442695, %v558_v14 }
 0x1a5   : > { %v1325_v21 = vpop.eup %1324  ;;  %1332 = vpow2.f32 %v662_v19 }
 0x1a6   : > { %v1327_v24 = vpop.eup %1326  ;;  %1334 = vpow2.f32 %v666_v15  ;;  %v680_v25 = vsel %vm670_vm2, %v1325_v21, 0.0 }
 0x1a7   : > { %v1329_v26 = vpop.eup %1328  ;;  %1336 = vpow2.f32 %v664_v18  ;;  %681 = vadd.xlane.f32.xlu1 %v680_v25  ;;  %v674_v27 = vsel %vm670_vm2, %v1327_v24, 0.0 }
 0x1a8   : > { %v1331_v30 = vpop.eup %1330  ;;  %1338 = vpow2.f32 %v668_v20  ;;  %675 = vadd.xlane.f32.xlu0 %v674_v27  ;;  %v671_v32 = vsel %vm670_vm2, %v1329_v26, 0.0 }
 0x1a9   : > { %v677_v31 = vsel %vm670_vm2, %v1331_v30, 0.0 }
 0x1ab   : > { %678 = vadd.xlane.f32.xlu1 %v677_v31 }
 0x1ac   : > { %672 = vadd.xlane.f32.xlu0 %v671_v32 }
 0x1af   : > { %v1333_v33 = vpop.eup %1332 }
 0x1b0   : > { %v1335_v36 = vpop.eup %1334  ;;  %v683_v37 = vsel %vm670_vm2, %v1333_v33, 0.0 }
 0x1b1   : > { %v1337_v38 = vpop.eup %1336  ;;  %v689_v39 = vsel %vm670_vm2, %v1335_v36, 0.0  ;;  %684 = vadd.xlane.f32.xlu0 %v683_v37 }
 0x1b2   : > { %v1339_v42 = vpop.eup %1338  ;;  %690 = vadd.xlane.f32.xlu1 %v689_v39  ;;  %v686_v43 = vsel %vm670_vm2, %v1337_v38, 0.0 }
 0x1b3   : > { %v692_v44 = vsel %vm670_vm2, %v1339_v42, 0.0 }
 0x1b5   : > { %687 = vadd.xlane.f32.xlu0 %v686_v43 }
 0x1b6   : > { %693 = vadd.xlane.f32.xlu1 %v692_v44 }
 0x234   : > { %v682_v49 = vpop.xlane.xlu1 %681 }
 0x235   : > { %v676_v50 = vpop.xlane.xlu0 %675  ;;  %1340 = vrcp.f32 %v682_v49 }
 0x236   : > { %1342 = vrcp.f32 %v676_v50 }
 0x238   : > { %v679_v1 = vpop.xlane.xlu1 %678 }
 0x239   : > { %1344 = vrcp.f32 %v679_v1  ;;  %v673_v6 = vpop.xlane.xlu0 %672 }
 0x23a   : > { %1346 = vrcp.f32 %v673_v6 }
 0x23e   : > { %v685_v0 = vpop.xlane.xlu0 %684 }
 0x23f   : > { %v691_v2 = vpop.xlane.xlu1 %690  ;;  %1348 = vrcp.f32 %v685_v0  ;;  %v1341_v51 = vpop.eup %1340 }
 0x240   : > { %1350 = vrcp.f32 %v691_v2  ;;  %v1343_v52 = vpop.eup %1342  ;;  %v706_v54 = vmul.f32 %v1341_v51, %v1325_v21 }
 0x241   : > { %v704_v58 = vmul.f32 %v1343_v52, %v1327_v24 }
 0x242   : > { %v688_v8 = vpop.xlane.xlu0 %687 }
 0x243   : > { %v1345_v9 = vpop.eup %1344  ;;  %v694_v53 = vpop.xlane.xlu1 %693  ;;  %1352 = vrcp.f32 %v688_v8 }
 0x244   : > { %v1347_v16 = vpop.eup %1346  ;;  %1354 = vrcp.f32 %v694_v53  ;;  %v705_v17 = vmul.f32 %v1345_v9, %v1331_v30 }
 0x245   : > { %v703_v57 = vmul.f32 %v1347_v16, %v1329_v26 }
 0x246   : > { %1227 = vmatprep.mubr.msk.f32.mxu1 %vm670_vm2, %v705_v17 }
 0x247   : > { %1220 = vmatprep.mubr.msk.f32.mxu0 %vm670_vm2, %v703_v57  ;;  %1228 = vmatmul.mubr.msk.f32.vlgmr.msra.gmra.mrb[4].mxu1 %vm670_vm2, %v706_v54 }
 0x248   : > { %1221 = vmatmul.mubr.msk.f32.vlgmr.msra.gmra.mrb[4].mxu0 %vm670_vm2, %v704_v58  ;;  %1283 = vmatpush3.bf16.msra.mxu1 %v1280_v48 }
 0x249   : > { %v1349_v23 = vpop.eup %1348  ;;  %1279 = vmatpush3.bf16.msra.mxu0 %v1276_v47 }
 0x24a   : > { %v1351_v60 = vpop.eup %1350  ;;  %v707_v61 = vmul.f32 %v1349_v23, %v1333_v33 }
 0x24b   : > { %v709_v62 = vmul.f32 %v1351_v60, %v1335_v36 }
 0x24c   : > { %1234 = vmatprep.mubr.msk.f32.mxu0 %vm670_vm2, %v707_v61 }
 0x24d   : > { %v1353_v34 = vpop.eup %1352  ;;  %1241 = vmatprep.mubr.msk.f32.mxu1 %vm670_vm2, %v709_v62 }
 0x24e   : > { %v1355_v35 = vpop.eup %1354  ;;  %v708_v4 = vmul.f32 %v1353_v34, %v1337_v38 }
 0x24f   : > { %v710_v5 = vmul.f32 %v1355_v35, %v1339_v42 }
 0x250   : > { %1235 = vmatmul.mubr.msk.f32.vlgmr.msra.gmra.mrb[6].mxu0 %vm670_vm2, %v708_v4 }
 0x251   : > { %1242 = vmatmul.mubr.msk.f32.vlgmr.msra.gmra.mrb[6].mxu1 %vm670_vm2, %v710_v5 }
 0x31a   : > { %v1229_v7 = vpop.f32.mrb[4].mxu1 }
 0x31b   : > { %v1222_v10 = vpop.f32.mrb[4].mxu0  ;;  %v870_v11 = vadd.f32 %v1229_v7, %v1524_v59  ;;  %v864_v12 = vpop.f32.mrb[5].mxu1 }
 0x31c   : > { %v789_v40 = vadd.f32 %v1222_v10, %v1527_v22  ;;  %v783_v41 = vpop.f32.mrb[5].mxu0  ;;  %v865_v13 = vadd.f32 %v864_v12, %v1512_v55 }
 0x31d   : > { %1038 = vst.msk [vmem:[%s175_s21 + $0x18] sm:$0xff] %vm201_vm0, %v870_v11  ;;  %v784_v14 = vadd.f32 %v783_v41, %v1517_v56 }
 0x31e   : > { %1036 = vst.msk [vmem:[%s175_s21 + $0x8] sm:$0xff] %vm201_vm0, %v789_v40  ;;  %1037 = vst.msk [vmem:[%s175_s21 + $0x10] sm:$0xff] %vm201_vm0, %v865_v13 }
 0x31f   : > { %1035 = vst.msk [vmem:[%s175_s21] sm:$0xff] %vm201_vm0, %v784_v14 }
 0x323   : > { %v1236_v15 = vpop.f32.mrb[6].mxu0 }
 0x324   : > { %v951_v18 = vadd.f32 %v1236_v15, %v1551_v3  ;;  %v1243_v59 = vpop.f32.mrb[6].mxu1  ;;  %v945_v19 = vpop.f32.mrb[7].mxu0 }
 0x325   : > { %v1032_v22 = vadd.f32 %v1243_v59, %v1548_v63  ;;  %v946_v20 = vadd.f32 %v945_v19, %v1541_v29  ;;  %v1026_v55 = vpop.f32.mrb[7].mxu1 }
 0x326   : > { %1040 = vst.msk [vmem:[%s175_s21 + $0x28] sm:$0xff] %vm201_vm0, %v951_v18  ;;  %v1027_v56 = vadd.f32 %v1026_v55, %v1538_v28 }
 0x327   : > { %1042 = vst.msk [vmem:[%s175_s21 + $0x38] sm:$0xff] %vm201_vm0, %v1032_v22  ;;  %1039 = vst.msk [vmem:[%s175_s21 + $0x20] sm:$0xff] %vm201_vm0, %v946_v20 }
 0x328   : > { %1041 = vst.msk [vmem:[%s175_s21 + $0x30] sm:$0xff] %vm201_vm0, %v1027_v56 }
 0x329 PF: > { %s12_s9 = sadd.s32 1, %s1362_s9  }
 0x32a   : > { %p9_p4 = scmp.ge.s32.totalorder %s12_s9, 6  }
 0x32c   :  { %11 = sbr.rel (!%p9_p4) target bundleno = 1 (0x1), region = 61 }

// kernel: msca_forward.4
= control target key start
LH: loop header
LB: loop body
LE: loop exit
PB: predicated region body
PF: predicated region fallthrough
CT: control target
= control target key end

     0   :  { %16 = vsyncpa [#allocation5], 0  ;;  %s12635_s0 = inlined_call_operand.hbm [shape: f32[2,16,16,32], index: 0, kind: input, shape index: {}]   ;;  %s12636_s1 = inlined_call_operand.vmem [shape: f32[2,16,16,32], index: 1, kind: input, shape index: {}]   ;;  %s12637_s2 = inlined_call_operand.hbm [shape: f32[1,32], index: 2, kind: input, shape index: {}]   ;;  %s12638_s3 = inlined_call_operand.hbm [shape: f32[1,32], index: 3, kind: input, shape index: {}]   ;;  %s12639_s4 = inlined_call_operand.vmem [shape: f32[21,32], index: 4, kind: input, shape index: {}]   ;;  %s12640_s5 = inlined_call_operand.vmem [shape: f32[21,32], index: 5, kind: input, shape index: {}]   ;;  %s12641_s6 = inlined_call_operand.hbm [shape: f32[32,32], index: 6, kind: input, shape index: {}]   ;;  %s12642_s7 = inlined_call_operand.vmem [shape: f32[32,1], index: 7, kind: input, shape index: {}]   ;;  %s12643_s8 = inlined_call_operand.vmem [shape: f32[32,1], index: 8, kind: input, shape index: {}]   ;;  %s12644_s9 = inlined_call_operand.vmem [shape: f32[2,32,256], index: 9, kind: output, shape index: {0}]   ;;  %s12645_s10 = inlined_call_operand.vmem [shape: f32[2,32,256], index: 10, kind: output, shape index: {1}]  }
   0x1   :  { %18 = vsyncpa [#allocation5 + $0x1], 0 }
   0x2   :  { %19 = vsyncpa [#allocation7], 0 }
   0x3   :  { %20 = vsyncpa [#allocation10], 0  ;;  %s7267_s13 = smov 0   ;;  %s7269_s14 = smov 0  }
   0x4   :  { %s7271_s15 = smov 0   ;;  %s7273_s16 = smov 0  }
   0x5 LB: > { %s7286_s17 = sadd.s32 4294967295, %s7202_s16   ;;  %p46_p0 = scmp.ne.s32.totalorder %s7194_s14, %s7190_s13  ;;  %s7202_s16 = sphi %s7273_s16, %s14677_s16   ;;  %s7198_s15 = sphi %s7271_s15, %s14676_s15   ;;  %s7194_s14 = sphi %s7269_s14, %s14675_s14   ;;  %s7190_s13 = sphi %s7267_s13, %s14674_s13  }
   0x6   : > { %p12646_p1 = scmp.eq.s32.totalorder %s7286_s17, 0  ;;  %p6539_p2 = scmp.ge.s32.totalorder %s7202_s16, 1 }
   0x7   : > { %p282_p3 = scmp.lt.s32.totalorder %s7202_s16, 3  ;;  %s7204_s20 = smov [#allocation6]  }
   0x8   : > { %p7294_p4 = por %p12646_p1, %p46_p0  ;;  %s295_s21 = sshll.u32 %s7204_s20, 4  ;;  %s296_s21 = int_to_ptr.vmem [resolvable:$true] %s295_s21 }
   0x9   : > { %p7298_p5 = pnand %p6539_p2, %p282_p3  ;;  %s7205_s22 = smov [#allocation8]  }
   0xa   : > { %s13436_s18 = scalar_select %p7294_p4, 1, 0 }
   0xb   : > { %s13437_s19 = scalar_select %p7298_p5, 1, 0 }
   0xc   : > { %p6828_p6 = pneg %p7298_p5  ;;  %s306_s23 = sshll.u32 %s7205_s22, 4  ;;  %s7310_s23 = int_to_ptr.vmem [resolvable:$true] %s306_s23 }
   0xd   : > { %s7206_s25 = smov [#allocation9]   ;;  %s7046_s29 = scalar_lea.hbm %s12637_s2, 16 }
   0xe   : > { %p7306_p7 = pnand %p6828_p6, %p12646_p1  ;;  %s322_s26 = sshll.u32 %s7206_s25, 4  ;;  %s7312_s26 = int_to_ptr.vmem [resolvable:$true] %s322_s26 }
   0xf   : > { %p7047_p8 = scmp.ne.s32.totalorder %s12637_s2, %s7046_s29  ;;  %p7053_p12 = scmp.lt.u32.totalorder %s7046_s29, %s12637_s2 }
  0x10   : > { %p7322_p9 = pneg %p7306_p7 }
  0x12   : > { %p7049_p10 = pnand %p7322_p9, %p7047_p8 }
  0x14   : > { %p7050_p11 = pneg %p7049_p10 }
  0x16   : > { %p7055_p13 = pnand %p7053_p12, %p7050_p11 }
  0x18   : > { %7058 = shalt.err (!%p7055_p13)
}
  0x19   : > { %s7059_s22 = scalar_lea.vmem %s296_s21, 16  ;;  %s7066_s25 = scalar_lea.vmem %s296_s21, 32 }
  0x1a   : > { %p7060_p0 = scmp.ne.s32.totalorder %s296_s21, %s7059_s22  ;;  %p7067_p6 = scmp.lt.s32.totalorder %s296_s21, %s296_s21 }
  0x1b   : > { %p7068_p1 = scmp.lt.s32.totalorder %s7066_s25, %s7059_s22 }
  0x1c   : > { %p7062_p2 = pnand %p7060_p0, %p7322_p9 }
  0x1d   : > { %p7069_p4 = por %p7068_p1, %p7067_p6 }
  0x1e   : > { %p7063_p3 = pneg %p7062_p2 }
  0x20   : > { %p7070_p5 = pnand %p7069_p4, %p7063_p3 }
  0x22   : > { %7073 = shalt.err (!%p7070_p5)
}
  0x23   : > { %6831 = dma.hbm_to_vmem [thread:$0]  (!%p7306_p7), %s12637_s2, 16, %s296_s21, [#allocation7]  }
  0x24   : > { %s7074_s11 = scalar_lea.hbm %s12638_s3, 16 }
  0x25   : > { %p7075_p8 = scmp.ne.s32.totalorder %s12638_s3, %s7074_s11  ;;  %p7081_p4 = scmp.lt.u32.totalorder %s7074_s11, %s12638_s3 }
  0x27   : > { %p7077_p10 = pnand %p7075_p8, %p7322_p9 }
  0x29   : > { %p7078_p1 = pneg %p7077_p10 }
  0x2b   : > { %p7083_p5 = pnand %p7081_p4, %p7078_p1 }
  0x2d   : > { %7086 = shalt.err (!%p7083_p5)
}
  0x2e   : > { %s7087_s21 = scalar_lea.vmem %s7310_s23, 16  ;;  %s7094_s27 = scalar_lea.vmem %s7310_s23, 32 }
  0x2f   : > { %p7088_p11 = scmp.ne.s32.totalorder %s7310_s23, %s7087_s21  ;;  %p7095_p0 = scmp.lt.s32.totalorder %s7310_s23, %s7310_s23 }
  0x30   : > { %p7096_p2 = scmp.lt.s32.totalorder %s7094_s27, %s7087_s21 }
  0x31   : > { %p7090_p12 = pnand %p7088_p11, %p7322_p9 }
  0x32   : > { %p7097_p3 = por %p7096_p2, %p7095_p0 }
  0x33   : > { %p7091_p13 = pneg %p7090_p12 }
  0x35   : > { %p7098_p6 = pnand %p7097_p3, %p7091_p13 }
  0x37   : > { %7101 = shalt.err (!%p7098_p6)
}
  0x38   : > { %6834 = dma.hbm_to_vmem [thread:$0]  (!%p7306_p7), %s12638_s3, 16, %s7310_s23, [#allocation7]  }
  0x39   : > { %s7102_s13 = scalar_lea.hbm %s12641_s6, 512 }
  0x3a   : > { %p7103_p8 = scmp.ne.s32.totalorder %s12641_s6, %s7102_s13  ;;  %p7109_p4 = scmp.lt.u32.totalorder %s7102_s13, %s12641_s6 }
  0x3c   : > { %p7105_p10 = pnand %p7103_p8, %p7322_p9 }
  0x3e   : > { %p7106_p1 = pneg %p7105_p10 }
  0x40   : > { %p7111_p5 = pnand %p7109_p4, %p7106_p1 }
  0x42   : > { %7114 = shalt.err (!%p7111_p5)
}
  0x43   : > { %s7115_s23 = scalar_lea.vmem %s7312_s26, 512  ;;  %p7123_p0 = scmp.lt.s32.totalorder %s7312_s26, %s7312_s26 }
  0x44   : > { %p7116_p11 = scmp.ne.s32.totalorder %s7312_s26, %s7115_s23  ;;  %p7124_p2 = scmp.lt.s32.totalorder %s7115_s23, %s7115_s23 }
  0x46   : > { %p7118_p12 = pnand %p7116_p11, %p7322_p9  ;;  %p7125_p3 = por %p7124_p2, %p7123_p0 }
  0x48   : > { %p7119_p13 = pneg %p7118_p12 }
  0x4a   : > { %p7126_p6 = pnand %p7125_p3, %p7119_p13 }
  0x4c   : > { %7129 = shalt.err (!%p7126_p6)
}
  0x4d   : > { %s7207_s27 = smov 128   ;;  %s7208_s12 = smov 8  }
  0x4e   : > { %6837 = dma.hbm_to_vmem [thread:$0]  (!%p7306_p7), %s12641_s6, 512, %s7312_s26, [#allocation10], %s7207_s27, %s7207_s27, %s7208_s12  }
  0x4f   : > { %s7389_s30 = sadd.s32 1, %s7202_s16   ;;  %s33_s13 = sadd.s32 1, %s7198_s15 }
  0x50   : > { %s30_s11 = ssub.s32 %s7202_s16, %s7389_s30  ;;  %p40_p8 = scmp.ne.s32.totalorder %s7198_s15, %s7194_s14 }
  0x51   : > { %p31_p9 = scmp.eq.s32.totalorder %s30_s11, 0  ;;  %p41_p10 = scmp.eq.s32.totalorder %s7202_s16, 0 }
  0x52   : > { %p6845_p1 = scmp.lt.s32.totalorder %s7202_s16, 2  ;;  %s342_s24 = sand.u32 1, %s7198_s15  }
  0x53   : > { %s7399_s20 = scalar_select %p31_p9, %s7198_s15, %s33_s13  }
  0x54   : > { %p42_p4 = por %p41_p10, %p40_p8  ;;  %s6544_s22 = sshll.u32 %s342_s24, 8 }
  0x55   : > { %s6634_s25 = sshll.u32 %s7202_s16, 12  ;;  %s346_s26 = scalar_lea.vmem [#allocation4], %s6544_s22 }
  0x56   : > { %s7406_s28 = scalar_lea.hbm %s12635_s0, %s6634_s25  ;;  %s353_s29 = sshll.u32 %s346_s26, 4  ;;  %s7408_s29 = int_to_ptr.vmem [resolvable:$true] %s353_s29 }
  0x57   : > { %p7410_p7 = pnand %p6845_p1, %p42_p4  ;;  %s7414_s16 = scalar_lea.sflag [#allocation5], %s342_s24 }
  0x58   : > { %s7130_s13 = scalar_lea.hbm %s7406_s28, 4096  ;;  %s7135_s21 = scalar_lea.hbm %s12635_s0, 8192 }
  0x59   : > { %p7131_p5 = scmp.ne.s32.totalorder %s7406_s28, %s7130_s13  ;;  %p7132_p11 = pneg %p7410_p7 }
  0x5a   : > { %p7136_p0 = scmp.lt.u32.totalorder %s7406_s28, %s12635_s0  ;;  %p7137_p2 = scmp.lt.u32.totalorder %s7135_s21, %s7130_s13 }
  0x5b   : > { %p7133_p12 = pnand %p7132_p11, %p7131_p5  ;;  %p7139_p6 = scmp.lt.u32.totalorder %s7130_s13, %s7406_s28 }
  0x5c   : > { %p7138_p3 = por %p7137_p2, %p7136_p0 }
  0x5d   : > { %p7134_p13 = pneg %p7133_p12 }
  0x5e   : > { %p7140_p9 = por %p7139_p6, %p7138_p3 }
  0x60   : > { %p7141_p8 = pnand %p7140_p9, %p7134_p13 }
  0x62   : > { %7144 = shalt.err (!%p7141_p8)
}
  0x63   : > { %s7145_s24 = scalar_lea.vmem %s7408_s29, 4096  ;;  %s7209_s22 = smov [#allocation4]  }
  0x64   : > { %p7146_p10 = scmp.ne.s32.totalorder %s7408_s29, %s7145_s24  ;;  %s7150_s25 = sshll.u32 %s7209_s22, 4  ;;  %s7151_s25 = int_to_ptr.vmem [resolvable:$false] %s7150_s25 }
  0x65   : > { %s7152_s23 = scalar_lea.vmem %s7151_s25, 8192  ;;  %p7153_p5 = scmp.lt.s32.totalorder %s7408_s29, %s7151_s25 }
  0x66   : > { %p7148_p1 = pnand %p7146_p10, %p7132_p11  ;;  %p7154_p12 = scmp.lt.s32.totalorder %s7152_s23, %s7145_s24 }
  0x68   : > { %p7149_p4 = pneg %p7148_p1  ;;  %p7155_p0 = por %p7154_p12, %p7153_p5 }
  0x6a   : > { %p7156_p2 = pnand %p7155_p0, %p7149_p4 }
  0x6c   : > { %7159 = shalt.err (!%p7156_p2)
}
  0x6d   : > { %6841 = dma.hbm_to_vmem [thread:$0]  (!%p7410_p7), %s7406_s28, 4096, %s7408_s29, %s7414_s16, %s7207_s27, %s7207_s27, %s7208_s12  }
  0x6e   : > { %p13441_p11 = scmp.ne.s32.totalorder %s13437_s19, 0 }
  0x70   : > { %373 = sbr.rel (%p13441_p11) target bundleno = 1519 (0x5ef), region = 56 }
  0x77   : > { %s375_s13 = sand.u32 1, %s7194_s14   ;;  %p13442_p13 = scmp.ne.s32.totalorder %s13436_s18, 0 }
  0x78   : > { %s6548_s21 = sshll.u32 %s375_s13, 8  ;;  %s376_s26 = scalar_lea.sflag [#allocation5], %s375_s13 }
  0x79   : > { %s7448_s24 = scalar_lea.vmem [#allocation4], %s6548_s21 }
  0x7a   : > { %7177 = dma.done.wait (%p13442_p13), %s376_s26, 4096  }
  0x7b   : > { %7179 = vsyncadd (%p13442_p13), %s376_s26, 4294963200  ;;  %p13443_p3 = scmp.eq.s32.totalorder %s7286_s17, 0 }
  0x7d   : > { %7181 = dma.done.wait (%p13443_p3), [#allocation7], 32   ;;  %p13444_p7 = pmov %p13443_p3 }
  0x7e   : > { %p13445_p6 = pmov %p13443_p3 }
  0x7f   : > { %7183 = vsyncadd (%p13444_p7), [#allocation7], 4294967264 }
  0x80   : > { %7185 = dma.done.wait (%p13445_p6), [#allocation10], 512   ;;  %p13446_p9 = pmov %p13443_p3 }
  0x81   : > { %p438_p8 = scmp.lt.s32.totalorder %s7286_s17, 1  ;;  %vm455_vm0 = vcmask 261120   ;;  %v7473_v0 = vld [vmem:[%s7448_s24] sm:$0xff]  ;;  %v7479_v2 = vld [vmem:[%s7448_s24 + $0x8] sm:$0xff]  ;;  %v7493_v8 = vld [vmem:[%s7448_s24 + $0x10] sm:$0xff] }
  0x82   : > { %7187 = vsyncadd (%p13446_p9), [#allocation10], 4294966784  ;;  %v632_v3 = vsel %vm455_vm0, %v7473_v0, 0.0  ;;  %v635_v6 = vsel %vm455_vm0, %v7479_v2, 0.0  ;;  %v7496_v9 = vld [vmem:[%s7448_s24 + $0x18] sm:$0xff]  ;;  %v638_v10 = vsel %vm455_vm0, %v7493_v8, 0.0 }
  0x83   : > { %s14679_s17 = smov (!%p438_p8, %s7286_s17), 1  ;;  %633 = vadd.xlane.f32.xlu0 %v632_v3  ;;  %v641_v11 = vsel %vm455_vm0, %v7496_v9, 0.0  ;;  %v7513_v16 = vld [vmem:[%s7448_s24 + $0x20] sm:$0xff]  ;;  %v7516_v17 = vld [vmem:[%s7448_s24 + $0x28] sm:$0xff]  ;;  %v7533_v24 = vld [vmem:[%s7448_s24 + $0x30] sm:$0xff] }
  0x84   : > { %s6635_s18 = sshll.u32 %s14679_s17, 8  ;;  %v644_v18 = vsel %vm455_vm0, %v7513_v16, 0.0  ;;  %v647_v19 = vsel %vm455_vm0, %v7516_v17, 0.0  ;;  %v7536_v25 = vld [vmem:[%s7448_s24 + $0x38] sm:$0xff]  ;;  %v650_v26 = vsel %vm455_vm0, %v7533_v24, 0.0  ;;  %v7553_v32 = vld [vmem:[%s7448_s24 + $0x40] sm:$0xff]  ;;  %vm9262_vm1 = vmpackc.low %vm455_vm0, %vm455_vm0 }
  0x85   : > { %s7470_s12 = scalar_lea.vmem %s12636_s1, %s6635_s18  ;;  %v653_v27 = vsel %vm455_vm0, %v7536_v25, 0.0  ;;  %v7556_v33 = vld [vmem:[%s7448_s24 + $0x48] sm:$0xff]  ;;  %v656_v34 = vsel %vm455_vm0, %v7553_v32, 0.0  ;;  %v7573_v40 = vld [vmem:[%s7448_s24 + $0x50] sm:$0xff]  ;;  %v7576_v41 = vld [vmem:[%s7448_s24 + $0x58] sm:$0xff]  ;;  %s6636_s28 = sshll.u32 %s14679_s17, 6 }
  0x86   : > { %v7476_v1 = vld [vmem:[%s7470_s12] sm:$0xff]  ;;  %v7486_v5 = vld [vmem:[%s7470_s12 + $0x8] sm:$0xff]  ;;  %v7503_v12 = vld [vmem:[%s7470_s12 + $0x10] sm:$0xff]  ;;  %v659_v35 = vsel %vm455_vm0, %v7556_v33, 0.0  ;;  %v662_v42 = vsel %vm455_vm0, %v7573_v40, 0.0  ;;  %v665_v43 = vsel %vm455_vm0, %v7576_v41, 0.0  ;;  %s452_s16 = scalar_lea.vmem %s12645_s10, %s6636_s28  ;;  %s447_s23 = scalar_lea.vmem %s12644_s9, %s6636_s28 }
  0x87   : > { %v1190_v4 = vsel %vm455_vm0, %v7476_v1, 0.0  ;;  %v1193_v7 = vsel %vm455_vm0, %v7486_v5, 0.0  ;;  %636 = vadd.xlane.f32.xlu0 %v635_v6  ;;  %v7506_v13 = vld [vmem:[%s7470_s12 + $0x18] sm:$0xff]  ;;  %v1196_v14 = vsel %vm455_vm0, %v7503_v12, 0.0  ;;  %v7523_v20 = vld [vmem:[%s7470_s12 + $0x20] sm:$0xff]  ;;  %v7526_v21 = vld [vmem:[%s7470_s12 + $0x28] sm:$0xff] }
  0x88   : > { %1191 = vadd.xlane.f32.xlu1 %v1190_v4  ;;  %v1199_v15 = vsel %vm455_vm0, %v7506_v13, 0.0  ;;  %v1202_v22 = vsel %vm455_vm0, %v7523_v20, 0.0  ;;  %v1205_v23 = vsel %vm455_vm0, %v7526_v21, 0.0  ;;  %v7543_v28 = vld [vmem:[%s7470_s12 + $0x30] sm:$0xff]  ;;  %v7546_v29 = vld [vmem:[%s7470_s12 + $0x38] sm:$0xff]  ;;  %v7563_v36 = vld [vmem:[%s7470_s12 + $0x40] sm:$0xff] }
  0x89   : > { %v1208_v30 = vsel %vm455_vm0, %v7543_v28, 0.0  ;;  %v1211_v31 = vsel %vm455_vm0, %v7546_v29, 0.0  ;;  %v7566_v37 = vld [vmem:[%s7470_s12 + $0x48] sm:$0xff]  ;;  %v1214_v38 = vsel %vm455_vm0, %v7563_v36, 0.0  ;;  %v7583_v44 = vld [vmem:[%s7470_s12 + $0x50] sm:$0xff]  ;;  %v7586_v45 = vld [vmem:[%s7470_s12 + $0x58] sm:$0xff] }
  0x8a   : > { %v1217_v39 = vsel %vm455_vm0, %v7566_v37, 0.0  ;;  %v1220_v46 = vsel %vm455_vm0, %v7583_v44, 0.0  ;;  %v1223_v47 = vsel %vm455_vm0, %v7586_v45, 0.0  ;;  %v7593_v48 = vld [vmem:[%s7448_s24 + $0x60] sm:$0xff]  ;;  %v7596_v49 = vld [vmem:[%s7448_s24 + $0x68] sm:$0xff]  ;;  %v7613_v56 = vld [vmem:[%s7448_s24 + $0x70] sm:$0xff] }
  0x8b   : > { %639 = vadd.xlane.f32.xlu0 %v638_v10  ;;  %v668_v50 = vsel %vm455_vm0, %v7593_v48, 0.0  ;;  %v671_v51 = vsel %vm455_vm0, %v7596_v49, 0.0  ;;  %v7603_v52 = vld [vmem:[%s7470_s12 + $0x60] sm:$0xff]  ;;  %v7606_v53 = vld [vmem:[%s7470_s12 + $0x68] sm:$0xff]  ;;  %v7616_v57 = vld [vmem:[%s7448_s24 + $0x78] sm:$0xff]  ;;  %v674_v58 = vsel %vm455_vm0, %v7613_v56, 0.0 }
  0x8c   : > { %1194 = vadd.xlane.f32.xlu1 %v1193_v7  ;;  %v1226_v54 = vsel %vm455_vm0, %v7603_v52, 0.0  ;;  %v1229_v55 = vsel %vm455_vm0, %v7606_v53, 0.0  ;;  %v677_v59 = vsel %vm455_vm0, %v7616_v57, 0.0  ;;  %v7623_v60 = vld [vmem:[%s7470_s12 + $0x70] sm:$0xff]  ;;  %v7626_v61 = vld [vmem:[%s7470_s12 + $0x78] sm:$0xff]  ;;  %v7633_v3 = vld [vmem:[%s7448_s24 + $0x80] sm:$0xff] }
  0x8d   : > { %v1232_v62 = vsel %vm455_vm0, %v7623_v60, 0.0  ;;  %v1235_v63 = vsel %vm455_vm0, %v7626_v61, 0.0  ;;  %v7636_v4 = vld [vmem:[%s7448_s24 + $0x88] sm:$0xff]  ;;  %v680_v6 = vsel %vm455_vm0, %v7633_v3, 0.0  ;;  %v7643_v10 = vld [vmem:[%s7470_s12 + $0x80] sm:$0xff] }
  0x8e   : > { %v683_v7 = vsel %vm455_vm0, %v7636_v4, 0.0 }
  0x8f   : > { %1197 = vadd.xlane.f32.xlu0 %v1196_v14  ;;  %v1238_v14 = vsel %vm455_vm0, %v7643_v10, 0.0 }
  0x90   : > { %642 = vadd.xlane.f32.xlu1 %v641_v11  ;;  %v7646_v11 = vld [vmem:[%s7470_s12 + $0x88] sm:$0xff] }
  0x93   : > { %645 = vadd.xlane.f32.xlu0 %v644_v18  ;;  %v7653_v18 = vld [vmem:[%s7448_s24 + $0x90] sm:$0xff] }
  0x94   : > { %1200 = vadd.xlane.f32.xlu1 %v1199_v15  ;;  %v1241_v15 = vsel %vm455_vm0, %v7646_v11, 0.0 }
  0x97   : > { %1203 = vadd.xlane.f32.xlu0 %v1202_v22  ;;  %v686_v22 = vsel %vm455_vm0, %v7653_v18, 0.0 }
  0x98   : > { %648 = vadd.xlane.f32.xlu1 %v647_v19  ;;  %v7656_v19 = vld [vmem:[%s7448_s24 + $0x98] sm:$0xff] }
  0x9b   : > { %651 = vadd.xlane.f32.xlu0 %v650_v26  ;;  %v7663_v26 = vld [vmem:[%s7470_s12 + $0x90] sm:$0xff] }
  0x9c   : > { %1206 = vadd.xlane.f32.xlu1 %v1205_v23  ;;  %v689_v23 = vsel %vm455_vm0, %v7656_v19, 0.0 }
  0x9f   : > { %1209 = vadd.xlane.f32.xlu0 %v1208_v30  ;;  %v1244_v30 = vsel %vm455_vm0, %v7663_v26, 0.0 }
  0xa0   : > { %654 = vadd.xlane.f32.xlu1 %v653_v27  ;;  %v7666_v27 = vld [vmem:[%s7470_s12 + $0x98] sm:$0xff] }
  0xa3   : > { %657 = vadd.xlane.f32.xlu0 %v656_v34  ;;  %v7673_v34 = vld [vmem:[%s7448_s24 + $0xa0] sm:$0xff] }
  0xa4   : > { %1212 = vadd.xlane.f32.xlu1 %v1211_v31  ;;  %v1247_v31 = vsel %vm455_vm0, %v7666_v27, 0.0 }
  0xa7   : > { %1215 = vadd.xlane.f32.xlu0 %v1214_v38  ;;  %v692_v38 = vsel %vm455_vm0, %v7673_v34, 0.0 }
  0xa8   : > { %660 = vadd.xlane.f32.xlu1 %v659_v35  ;;  %v7676_v35 = vld [vmem:[%s7448_s24 + $0xa8] sm:$0xff] }
  0xab   : > { %663 = vadd.xlane.f32.xlu0 %v662_v42  ;;  %v7683_v42 = vld [vmem:[%s7470_s12 + $0xa0] sm:$0xff] }
  0xac   : > { %1218 = vadd.xlane.f32.xlu1 %v1217_v39  ;;  %v695_v39 = vsel %vm455_vm0, %v7676_v35, 0.0 }
  0xaf   : > { %1221 = vadd.xlane.f32.xlu0 %v1220_v46  ;;  %v1250_v46 = vsel %vm455_vm0, %v7683_v42, 0.0 }
  0xb0   : > { %666 = vadd.xlane.f32.xlu1 %v665_v43  ;;  %v7686_v43 = vld [vmem:[%s7470_s12 + $0xa8] sm:$0xff] }
  0xb3   : > { %669 = vadd.xlane.f32.xlu0 %v668_v50  ;;  %v7693_v50 = vld [vmem:[%s7448_s24 + $0xb0] sm:$0xff] }
  0xb4   : > { %1224 = vadd.xlane.f32.xlu1 %v1223_v47  ;;  %v1253_v47 = vsel %vm455_vm0, %v7686_v43, 0.0 }
  0xb7   : > { %1227 = vadd.xlane.f32.xlu0 %v1226_v54  ;;  %v698_v54 = vsel %vm455_vm0, %v7693_v50, 0.0 }
  0xb8   : > { %672 = vadd.xlane.f32.xlu1 %v671_v51  ;;  %v7696_v51 = vld [vmem:[%s7448_s24 + $0xb8] sm:$0xff] }
  0xbb   : > { %675 = vadd.xlane.f32.xlu0 %v674_v58  ;;  %v7703_v58 = vld [vmem:[%s7470_s12 + $0xb0] sm:$0xff] }
  0xbc   : > { %1230 = vadd.xlane.f32.xlu1 %v1229_v55  ;;  %v701_v55 = vsel %vm455_vm0, %v7696_v51, 0.0 }
  0xbf   : > { %1233 = vadd.xlane.f32.xlu0 %v1232_v62  ;;  %v1256_v62 = vsel %vm455_vm0, %v7703_v58, 0.0 }
  0xc0   : > { %678 = vadd.xlane.f32.xlu1 %v677_v59  ;;  %v7706_v59 = vld [vmem:[%s7470_s12 + $0xb8] sm:$0xff] }
  0xc3   : > { %681 = vadd.xlane.f32.xlu0 %v680_v6  ;;  %v7713_v6 = vld [vmem:[%s7448_s24 + $0xc0] sm:$0xff] }
  0xc4   : > { %1236 = vadd.xlane.f32.xlu1 %v1235_v63  ;;  %v1259_v63 = vsel %vm455_vm0, %v7706_v59, 0.0 }
  0xc7   : > { %1239 = vadd.xlane.f32.xlu0 %v1238_v14  ;;  %v704_v14 = vsel %vm455_vm0, %v7713_v6, 0.0 }
  0xc8   : > { %684 = vadd.xlane.f32.xlu1 %v683_v7  ;;  %v7716_v7 = vld [vmem:[%s7448_s24 + $0xc8] sm:$0xff] }
  0xcb   : > { %687 = vadd.xlane.f32.xlu0 %v686_v22  ;;  %v7723_v22 = vld [vmem:[%s7470_s12 + $0xc0] sm:$0xff] }
  0xcc   : > { %1242 = vadd.xlane.f32.xlu1 %v1241_v15  ;;  %v707_v15 = vsel %vm455_vm0, %v7716_v7, 0.0  ;;  %13447 = vst [vmem:[#allocation14_spill] sm:$0xff] %v7723_v22 }
  0xcf   : > { %1245 = vadd.xlane.f32.xlu0 %v1244_v30  ;;  %v1262_v30 = vsel %vm455_vm0, %v7723_v22, 0.0 }
  0xd0   : > { %690 = vadd.xlane.f32.xlu1 %v689_v23  ;;  %v7726_v23 = vld [vmem:[%s7470_s12 + $0xc8] sm:$0xff] }
  0xd1   : > { %13448 = vst [vmem:[#allocation15_spill] sm:$0xff] %v7726_v23 }
  0xd3   : > { %693 = vadd.xlane.f32.xlu0 %v692_v38  ;;  %v7733_v38 = vld [vmem:[%s7448_s24 + $0xd0] sm:$0xff] }
  0xd4   : > { %1248 = vadd.xlane.f32.xlu1 %v1247_v31  ;;  %v1265_v31 = vsel %vm455_vm0, %v7726_v23, 0.0  ;;  %13449 = vst [vmem:[#allocation16_spill] sm:$0xff] %v7733_v38  ;;  %v1189_v23 = vld [vmem:[%s7470_s12 + $0xf8] sm:$0xff] }
  0xd7   : > { %1251 = vadd.xlane.f32.xlu0 %v1250_v46  ;;  %v710_v46 = vsel %vm455_vm0, %v7733_v38, 0.0  ;;  %v631_v38 = vld [vmem:[%s7448_s24 + $0xf8] sm:$0xff] }
  0xd8   : > { %696 = vadd.xlane.f32.xlu1 %v695_v39  ;;  %v7736_v39 = vld [vmem:[%s7448_s24 + $0xd8] sm:$0xff] }
  0xd9   : > { %13450 = vst [vmem:[#allocation17_spill] sm:$0xff] %v7736_v39 }
  0xdb   : > { %699 = vadd.xlane.f32.xlu0 %v698_v54  ;;  %v7743_v54 = vld [vmem:[%s7470_s12 + $0xd0] sm:$0xff] }
  0xdc   : > { %1254 = vadd.xlane.f32.xlu1 %v1253_v47  ;;  %v713_v47 = vsel %vm455_vm0, %v7736_v39, 0.0  ;;  %13451 = vst [vmem:[#allocation18_spill] sm:$0xff] %v7743_v54  ;;  %v630_v39 = vld [vmem:[%s7448_s24 + $0xf0] sm:$0xff] }
  0xdf   : > { %1257 = vadd.xlane.f32.xlu0 %v1256_v62  ;;  %v1268_v62 = vsel %vm455_vm0, %v7743_v54, 0.0 }
  0xe0   : > { %702 = vadd.xlane.f32.xlu1 %v701_v55  ;;  %v7746_v55 = vld [vmem:[%s7470_s12 + $0xd8] sm:$0xff] }
  0xe1   : > { %13452 = vst [vmem:[#allocation19_spill] sm:$0xff] %v7746_v55 }
  0xe3   : > { %705 = vadd.xlane.f32.xlu0 %v704_v14  ;;  %v7753_v14 = vld [vmem:[%s7448_s24 + $0xe0] sm:$0xff] }
  0xe4   : > { %1260 = vadd.xlane.f32.xlu1 %v1259_v63  ;;  %v1271_v63 = vsel %vm455_vm0, %v7746_v55, 0.0  ;;  %13453 = vst [vmem:[#allocation20_spill] sm:$0xff] %v7753_v14 }
  0xe7   : > { %1263 = vadd.xlane.f32.xlu0 %v1262_v30  ;;  %v716_v30 = vsel %vm455_vm0, %v7753_v14, 0.0  ;;  %v1188_v14 = vld [vmem:[%s7470_s12 + $0xf0] sm:$0xff] }
  0xe8   : > { %708 = vadd.xlane.f32.xlu1 %v707_v15  ;;  %v7756_v15 = vld [vmem:[%s7448_s24 + $0xe8] sm:$0xff] }
  0xe9   : > { %13454 = vst [vmem:[#allocation21_spill] sm:$0xff] %v7756_v15 }
  0xeb   : > { %711 = vadd.xlane.f32.xlu0 %v710_v46  ;;  %v1186_v46 = vld [vmem:[%s7470_s12 + $0xe0] sm:$0xff] }
  0xec   : > { %1266 = vadd.xlane.f32.xlu1 %v1265_v31  ;;  %v719_v31 = vsel %vm455_vm0, %v7756_v15, 0.0  ;;  %v1274_v55 = vsel %vm455_vm0, %v1186_v46, 0.0  ;;  %v1280_v15 = vsel %vm455_vm0, %v1188_v14, 0.0 }
  0xef   : > { %1269 = vadd.xlane.f32.xlu0 %v1268_v62  ;;  %v722_v62 = vsel %vm455_vm0, %v630_v39, 0.0 }
  0xf0   : > { %714 = vadd.xlane.f32.xlu1 %v713_v47  ;;  %v1187_v47 = vld [vmem:[%s7470_s12 + $0xe8] sm:$0xff] }
  0xf1   : > { %v1277_v54 = vsel %vm455_vm0, %v1187_v47, 0.0 }
  0xf3   : > { %717 = vadd.xlane.f32.xlu0 %v716_v30  ;;  %v1283_v30 = vsel %vm455_vm0, %v1189_v23, 0.0 }
  0xf4   : > { %1272 = vadd.xlane.f32.xlu1 %v1271_v63  ;;  %v725_v63 = vsel %vm455_vm0, %v631_v38, 0.0 }
  0xf7   : > { %1275 = vadd.xlane.f32.xlu0 %v1274_v55 }
  0xf8   : > { %720 = vadd.xlane.f32.xlu1 %v719_v31 }
  0xfb   : > { %723 = vadd.xlane.f32.xlu0 %v722_v62 }
  0xfc   : > { %1278 = vadd.xlane.f32.xlu1 %v1277_v54 }
  0xff   : > { %1281 = vadd.xlane.f32.xlu0 %v1280_v15 }
 0x100   : > { %726 = vadd.xlane.f32.xlu1 %v725_v63 }
 0x104   : > { %1284 = vadd.xlane.f32.xlu1 %v1283_v30 }
 0x110   : > { %v634_v31 = vpop.xlane.xlu0 %633 }
 0x111   : > { %v729_v47 = vmul.f32 0.03125, %v634_v31 }
 0x113   : > { %v7775_v54 = vsub.f32 %v7473_v0, %v729_v47 }
 0x114   : > { %v637_v38 = vpop.xlane.xlu0 %636 }
 0x115   : > { %v1192_v46 = vpop.xlane.xlu1 %1191  ;;  %v730_v62 = vmul.f32 0.03125, %v637_v38  ;;  %v793_v14 = vmul.f32 %v7775_v54, %v7775_v54 }
 0x116   : > { %v1286_v22 = vmul.f32 0.03125, %v1192_v46 }
 0x117   : > { %v7785_v15 = vsub.f32 %v7479_v2, %v730_v62  ;;  %v825_v0 = vsel %vm455_vm0, %v793_v14, 0.0 }
 0x118   : > { %v7778_v39 = vsub.f32 %v7476_v1, %v1286_v22  ;;  %826 = vadd.xlane.f32.xlu0 %v825_v0  ;;  %v640_v1 = vpop.xlane.xlu0 %639 }
 0x119   : > { %v1195_v55 = vpop.xlane.xlu1 %1194  ;;  %v7794_v46 = vmul.f32 0.03125, %v640_v1  ;;  %v7800_v38 = vmul.f32 %v7785_v15, %v7785_v15 }
 0x11a   : > { %v1287_v63 = vmul.f32 0.03125, %v1195_v55  ;;  %v1350_v23 = vmul.f32 %v7778_v39, %v7778_v39 }
 0x11b   : > { %v8096_v55 = vsub.f32 %v7493_v8, %v7794_v46 }
 0x11c   : > { %v7788_v30 = vsub.f32 %v7486_v5, %v1287_v63  ;;  %v7792_v31 = vsel %vm455_vm0, %v1350_v23, 0.0  ;;  %v7210_v5 = vmov 0.0   ;;  %v828_v63 = vsel %vm455_vm0, %v7800_v38, 0.0  ;;  %v1198_v14 = vpop.xlane.xlu0 %1197 }
 0x11d   : > { %v643_v22 = vpop.xlane.xlu1 %642  ;;  %476 = vst.msk [vmem:[#allocation3 + $0xa0] sm:$0xff] %vm455_vm0, %v7210_v5  ;;  %456 = vst.msk [vmem:[#allocation3] sm:$0xff] %vm455_vm0, %v7210_v5  ;;  %1383 = vadd.xlane.f32.xlu0 %v7792_v31  ;;  %829 = vadd.xlane.f32.xlu1 %v828_v63  ;;  %v1288_v1 = vmul.f32 0.03125, %v1198_v14  ;;  %v795_v8 = vmul.f32 %v8096_v55, %v8096_v55 }
 0x11e   : > { %v7796_v47 = vmul.f32 0.03125, %v643_v22  ;;  %v7804_v2 = vmul.f32 %v7788_v30, %v7788_v30  ;;  %457 = vst.msk [vmem:[#allocation3 + $0x8] sm:$0xff] %vm455_vm0, %v7210_v5  ;;  %458 = vst.msk [vmem:[#allocation3 + $0x10] sm:$0xff] %vm455_vm0, %v7210_v5 }
 0x11f   : > { %459 = vst.msk [vmem:[#allocation3 + $0x18] sm:$0xff] %vm455_vm0, %v7210_v5  ;;  %460 = vst.msk [vmem:[#allocation3 + $0x20] sm:$0xff] %vm455_vm0, %v7210_v5  ;;  %v8112_v46 = vsub.f32 %v7503_v12, %v1288_v1  ;;  %v831_v31 = vsel %vm455_vm0, %v795_v8, 0.0 }
 0x120   : > { %461 = vst.msk [vmem:[#allocation3 + $0x28] sm:$0xff] %vm455_vm0, %v7210_v5  ;;  %462 = vst.msk [vmem:[#allocation3 + $0x30] sm:$0xff] %vm455_vm0, %v7210_v5  ;;  %v8100_v62 = vsub.f32 %v7496_v9, %v7796_v47  ;;  %v1385_v0 = vsel %vm455_vm0, %v7804_v2, 0.0  ;;  %v646_v38 = vpop.xlane.xlu0 %645 }
 0x121   : > { %463 = vst.msk [vmem:[#allocation3 + $0x38] sm:$0xff] %vm455_vm0, %v7210_v5  ;;  %464 = vst.msk [vmem:[#allocation3 + $0x40] sm:$0xff] %vm455_vm0, %v7210_v5  ;;  %v1201_v23 = vpop.xlane.xlu1 %1200  ;;  %1386 = vadd.xlane.f32.xlu1 %v1385_v0  ;;  %832 = vadd.xlane.f32.xlu0 %v831_v31  ;;  %v733_v63 = vmul.f32 0.03125, %v646_v38 }
 0x122   : > { %465 = vst.msk [vmem:[#allocation3 + $0x48] sm:$0xff] %vm455_vm0, %v7210_v5  ;;  %466 = vst.msk [vmem:[#allocation3 + $0x50] sm:$0xff] %vm455_vm0, %v7210_v5  ;;  %v1289_v22 = vmul.f32 0.03125, %v1201_v23  ;;  %v796_v9 = vmul.f32 %v8100_v62, %v8100_v62  ;;  %v1352_v23 = vmul.f32 %v8112_v46, %v8112_v46 }
 0x123   : > { %467 = vst.msk [vmem:[#allocation3 + $0x58] sm:$0xff] %vm455_vm0, %v7210_v5  ;;  %468 = vst.msk [vmem:[#allocation3 + $0x60] sm:$0xff] %vm455_vm0, %v7210_v5  ;;  %v8124_v1 = vsub.f32 %v7513_v16, %v733_v63 }
 0x124   : > { %469 = vst.msk [vmem:[#allocation3 + $0x68] sm:$0xff] %vm455_vm0, %v7210_v5  ;;  %470 = vst.msk [vmem:[#allocation3 + $0x70] sm:$0xff] %vm455_vm0, %v7210_v5  ;;  %v8115_v47 = vsub.f32 %v7506_v13, %v1289_v22  ;;  %v1388_v0 = vsel %vm455_vm0, %v1352_v23, 0.0  ;;  %v1204_v22 = vpop.xlane.xlu0 %1203 }
 0x125   : > { %471 = vst.msk [vmem:[#allocation3 + $0x78] sm:$0xff] %vm455_vm0, %v7210_v5  ;;  %472 = vst.msk [vmem:[#allocation3 + $0x80] sm:$0xff] %vm455_vm0, %v7210_v5  ;;  %v649_v2 = vpop.xlane.xlu1 %648  ;;  %1389 = vadd.xlane.f32.xlu0 %v1388_v0  ;;  %v1290_v31 = vmul.f32 0.03125, %v1204_v22 }
 0x126   : > { %473 = vst.msk [vmem:[#allocation3 + $0x88] sm:$0xff] %vm455_vm0, %v7210_v5  ;;  %474 = vst.msk [vmem:[#allocation3 + $0x90] sm:$0xff] %vm455_vm0, %v7210_v5  ;;  %v734_v14 = vmul.f32 0.03125, %v649_v2  ;;  %v1353_v12 = vmul.f32 %v8115_v47, %v8115_v47  ;;  %v797_v2 = vmul.f32 %v8124_v1, %v8124_v1 }
 0x127   : > { %475 = vst.msk [vmem:[#allocation3 + $0x98] sm:$0xff] %vm455_vm0, %v7210_v5  ;;  %477 = vst.msk [vmem:[#allocation3 + $0xa8] sm:$0xff] %vm455_vm0, %v7210_v5  ;;  %v8136_v63 = vsub.f32 %v7523_v20, %v1290_v31 }
 0x128   : > { %478 = vst.msk [vmem:[#allocation3 + $0xb0] sm:$0xff] %vm455_vm0, %v7210_v5  ;;  %479 = vst.msk [vmem:[#allocation3 + $0xb8] sm:$0xff] %vm455_vm0, %v7210_v5  ;;  %v8127_v13 = vsub.f32 %v7516_v17, %v734_v14  ;;  %v652_v14 = vpop.xlane.xlu0 %651 }
 0x129   : > { %480 = vst.msk [vmem:[#allocation3 + $0xc0] sm:$0xff] %vm455_vm0, %v7210_v5  ;;  %481 = vst.msk [vmem:[#allocation3 + $0xc8] sm:$0xff] %vm455_vm0, %v7210_v5  ;;  %v1207_v8 = vpop.xlane.xlu1 %1206  ;;  %v735_v0 = vmul.f32 0.03125, %v652_v14 }
 0x12a   : > { %482 = vst.msk [vmem:[#allocation3 + $0xd0] sm:$0xff] %vm455_vm0, %v7210_v5  ;;  %483 = vst.msk [vmem:[#allocation3 + $0xd8] sm:$0xff] %vm455_vm0, %v7210_v5  ;;  %v1291_v38 = vmul.f32 0.03125, %v1207_v8  ;;  %v798_v16 = vmul.f32 %v8127_v13, %v8127_v13  ;;  %v1354_v8 = vmul.f32 %v8136_v63, %v8136_v63 }
 0x12b   : > { %484 = vst.msk [vmem:[#allocation3 + $0xe0] sm:$0xff] %vm455_vm0, %v7210_v5  ;;  %485 = vst.msk [vmem:[#allocation3 + $0xe8] sm:$0xff] %vm455_vm0, %v7210_v5  ;;  %v8148_v31 = vsub.f32 %v7533_v24, %v735_v0 }
 0x12c   : > { %486 = vst.msk [vmem:[#allocation3 + $0xf0] sm:$0xff] %vm455_vm0, %v7210_v5  ;;  %487 = vst.msk [vmem:[#allocation3 + $0xf8] sm:$0xff] %vm455_vm0, %v7210_v5  ;;  %v8139_v17 = vsub.f32 %v7526_v21, %v1291_v38  ;;  %v1210_v38 = vpop.xlane.xlu0 %1209 }
 0x12d   : > { %488 = vst.msk [vmem:[#allocation3 + $0x100] sm:$0xff] %vm455_vm0, %v7210_v5  ;;  %489 = vst.msk [vmem:[#allocation3 + $0x108] sm:$0xff] %vm455_vm0, %v7210_v5  ;;  %v655_v23 = vpop.xlane.xlu1 %654 }
 0x12e   : > { %490 = vst.msk [vmem:[#allocation3 + $0x110] sm:$0xff] %vm455_vm0, %v7210_v5  ;;  %491 = vst.msk [vmem:[#allocation3 + $0x118] sm:$0xff] %vm455_vm0, %v7210_v5  ;;  %v736_v22 = vmul.f32 0.03125, %v655_v23  ;;  %v1355_v20 = vmul.f32 %v8139_v17, %v8139_v17  ;;  %v799_v23 = vmul.f32 %v8148_v31, %v8148_v31 }
 0x12f   : > { %492 = vst.msk [vmem:[#allocation3 + $0x120] sm:$0xff] %vm455_vm0, %v7210_v5  ;;  %493 = vst.msk [vmem:[#allocation3 + $0x128] sm:$0xff] %vm455_vm0, %v7210_v5 }
 0x130   : > { %494 = vst.msk [vmem:[#allocation3 + $0x130] sm:$0xff] %vm455_vm0, %v7210_v5  ;;  %495 = vst.msk [vmem:[#allocation3 + $0x138] sm:$0xff] %vm455_vm0, %v7210_v5  ;;  %v8151_v21 = vsub.f32 %v7536_v25, %v736_v22  ;;  %v658_v22 = vpop.xlane.xlu0 %657 }
 0x131   : > { %496 = vst.msk [vmem:[#allocation3 + $0x140] sm:$0xff] %vm455_vm0, %v7210_v5  ;;  %497 = vst.msk [vmem:[#allocation3 + $0x148] sm:$0xff] %vm455_vm0, %v7210_v5 }
 0x132   : > { %498 = vst.msk [vmem:[#allocation3 + $0x150] sm:$0xff] %vm455_vm0, %v7210_v5  ;;  %499 = vst.msk [vmem:[#allocation3 + $0x158] sm:$0xff] %vm455_vm0, %v7210_v5  ;;  %v800_v24 = vmul.f32 %v8151_v21, %v8151_v21 }
 0x133   : > { %500 = vst.msk [vmem:[#allocation3 + $0x160] sm:$0xff] %vm455_vm0, %v7210_v5  ;;  %501 = vst.msk [vmem:[#allocation3 + $0x168] sm:$0xff] %vm455_vm0, %v7210_v5 }
 0x134   : > { %502 = vst.msk [vmem:[#allocation3 + $0x170] sm:$0xff] %vm455_vm0, %v7210_v5  ;;  %503 = vst.msk [vmem:[#allocation3 + $0x178] sm:$0xff] %vm455_vm0, %v7210_v5 }
 0x135   : > { %504 = vst.msk [vmem:[#allocation3 + $0x180] sm:$0xff] %vm455_vm0, %v7210_v5  ;;  %505 = vst.msk [vmem:[#allocation3 + $0x188] sm:$0xff] %vm455_vm0, %v7210_v5 }
 0x136   : > { %506 = vst.msk [vmem:[#allocation3 + $0x190] sm:$0xff] %vm455_vm0, %v7210_v5  ;;  %507 = vst.msk [vmem:[#allocation3 + $0x198] sm:$0xff] %vm455_vm0, %v7210_v5 }
 0x137   : > { %508 = vst.msk [vmem:[#allocation3 + $0x1a0] sm:$0xff] %vm455_vm0, %v7210_v5  ;;  %509 = vst.msk [vmem:[#allocation3 + $0x1a8] sm:$0xff] %vm455_vm0, %v7210_v5 }
 0x138   : > { %510 = vst.msk [vmem:[#allocation3 + $0x1b0] sm:$0xff] %vm455_vm0, %v7210_v5  ;;  %511 = vst.msk [vmem:[#allocation3 + $0x1b8] sm:$0xff] %vm455_vm0, %v7210_v5 }
 0x139   : > { %512 = vst.msk [vmem:[#allocation3 + $0x1c0] sm:$0xff] %vm455_vm0, %v7210_v5  ;;  %513 = vst.msk [vmem:[#allocation3 + $0x1c8] sm:$0xff] %vm455_vm0, %v7210_v5 }
 0x13a   : > { %514 = vst.msk [vmem:[#allocation3 + $0x1d0] sm:$0xff] %vm455_vm0, %v7210_v5  ;;  %515 = vst.msk [vmem:[#allocation3 + $0x1d8] sm:$0xff] %vm455_vm0, %v7210_v5 }
 0x13b   : > { %516 = vst.msk [vmem:[#allocation3 + $0x1e0] sm:$0xff] %vm455_vm0, %v7210_v5  ;;  %517 = vst.msk [vmem:[#allocation3 + $0x1e8] sm:$0xff] %vm455_vm0, %v7210_v5 }
 0x13c   : > { %518 = vst.msk [vmem:[#allocation3 + $0x1f0] sm:$0xff] %vm455_vm0, %v7210_v5  ;;  %519 = vst.msk [vmem:[#allocation3 + $0x1f8] sm:$0xff] %vm455_vm0, %v7210_v5 }
 0x13d   : > { %520 = vst.msk [vmem:[#allocation3 + $0x200] sm:$0xff] %vm455_vm0, %v7210_v5  ;;  %521 = vst.msk [vmem:[#allocation3 + $0x208] sm:$0xff] %vm455_vm0, %v7210_v5 }
 0x13e   : > { %522 = vst.msk [vmem:[#allocation3 + $0x210] sm:$0xff] %vm455_vm0, %v7210_v5  ;;  %523 = vst.msk [vmem:[#allocation3 + $0x218] sm:$0xff] %vm455_vm0, %v7210_v5 }
 0x13f   : > { %524 = vst.msk [vmem:[#allocation3 + $0x220] sm:$0xff] %vm455_vm0, %v7210_v5  ;;  %525 = vst.msk [vmem:[#allocation3 + $0x228] sm:$0xff] %vm455_vm0, %v7210_v5 }
 0x140   : > { %526 = vst.msk [vmem:[#allocation3 + $0x230] sm:$0xff] %vm455_vm0, %v7210_v5  ;;  %527 = vst.msk [vmem:[#allocation3 + $0x238] sm:$0xff] %vm455_vm0, %v7210_v5 }
 0x141   : > { %528 = vst.msk [vmem:[#allocation2] sm:$0xff] %vm455_vm0, %v7210_v5  ;;  %529 = vst.msk [vmem:[#allocation2 + $0x8] sm:$0xff] %vm455_vm0, %v7210_v5 }
 0x142   : > { %530 = vst.msk [vmem:[#allocation2 + $0x10] sm:$0xff] %vm455_vm0, %v7210_v5  ;;  %531 = vst.msk [vmem:[#allocation2 + $0x18] sm:$0xff] %vm455_vm0, %v7210_v5 }
 0x143   : > { %532 = vst.msk [vmem:[#allocation2 + $0x20] sm:$0xff] %vm455_vm0, %v7210_v5  ;;  %533 = vst.msk [vmem:[#allocation2 + $0x28] sm:$0xff] %vm455_vm0, %v7210_v5 }
 0x144   : > { %534 = vst.msk [vmem:[#allocation2 + $0x30] sm:$0xff] %vm455_vm0, %v7210_v5  ;;  %535 = vst.msk [vmem:[#allocation2 + $0x38] sm:$0xff] %vm455_vm0, %v7210_v5 }
 0x145   : > { %536 = vst.msk [vmem:[#allocation2 + $0x40] sm:$0xff] %vm455_vm0, %v7210_v5  ;;  %537 = vst.msk [vmem:[#allocation2 + $0x48] sm:$0xff] %vm455_vm0, %v7210_v5 }
 0x146   : > { %538 = vst.msk [vmem:[#allocation2 + $0x50] sm:$0xff] %vm455_vm0, %v7210_v5  ;;  %539 = vst.msk [vmem:[#allocation2 + $0x58] sm:$0xff] %vm455_vm0, %v7210_v5 }
 0x147   : > { %540 = vst.msk [vmem:[#allocation2 + $0x60] sm:$0xff] %vm455_vm0, %v7210_v5  ;;  %541 = vst.msk [vmem:[#allocation2 + $0x68] sm:$0xff] %vm455_vm0, %v7210_v5 }
 0x148   : > { %542 = vst.msk [vmem:[#allocation2 + $0x70] sm:$0xff] %vm455_vm0, %v7210_v5  ;;  %543 = vst.msk [vmem:[#allocation2 + $0x78] sm:$0xff] %vm455_vm0, %v7210_v5 }
 0x149   : > { %544 = vst.msk [vmem:[#allocation2 + $0x80] sm:$0xff] %vm455_vm0, %v7210_v5  ;;  %545 = vst.msk [vmem:[#allocation2 + $0x88] sm:$0xff] %vm455_vm0, %v7210_v5 }
 0x14a   : > { %546 = vst.msk [vmem:[#allocation2 + $0x90] sm:$0xff] %vm455_vm0, %v7210_v5  ;;  %547 = vst.msk [vmem:[#allocation2 + $0x98] sm:$0xff] %vm455_vm0, %v7210_v5 }
 0x14b   : > { %548 = vst.msk [vmem:[#allocation2 + $0xa0] sm:$0xff] %vm455_vm0, %v7210_v5  ;;  %549 = vst.msk [vmem:[#allocation2 + $0xa8] sm:$0xff] %vm455_vm0, %v7210_v5 }
 0x14c   : > { %550 = vst.msk [vmem:[#allocation2 + $0xb0] sm:$0xff] %vm455_vm0, %v7210_v5  ;;  %551 = vst.msk [vmem:[#allocation2 + $0xb8] sm:$0xff] %vm455_vm0, %v7210_v5 }
 0x14d   : > { %552 = vst.msk [vmem:[#allocation2 + $0xc0] sm:$0xff] %vm455_vm0, %v7210_v5  ;;  %553 = vst.msk [vmem:[#allocation2 + $0xc8] sm:$0xff] %vm455_vm0, %v7210_v5 }
 0x14e   : > { %554 = vst.msk [vmem:[#allocation2 + $0xd0] sm:$0xff] %vm455_vm0, %v7210_v5  ;;  %555 = vst.msk [vmem:[#allocation2 + $0xd8] sm:$0xff] %vm455_vm0, %v7210_v5 }
 0x14f   : > { %556 = vst.msk [vmem:[#allocation2 + $0xe0] sm:$0xff] %vm455_vm0, %v7210_v5  ;;  %557 = vst.msk [vmem:[#allocation2 + $0xe8] sm:$0xff] %vm455_vm0, %v7210_v5 }
 0x150   : > { %558 = vst.msk [vmem:[#allocation2 + $0xf0] sm:$0xff] %vm455_vm0, %v7210_v5  ;;  %559 = vst.msk [vmem:[#allocation2 + $0xf8] sm:$0xff] %vm455_vm0, %v7210_v5 }
 0x151   : > { %560 = vst.msk [vmem:[#allocation2 + $0x100] sm:$0xff] %vm455_vm0, %v7210_v5  ;;  %561 = vst.msk [vmem:[#allocation2 + $0x108] sm:$0xff] %vm455_vm0, %v7210_v5 }
 0x152   : > { %562 = vst.msk [vmem:[#allocation2 + $0x110] sm:$0xff] %vm455_vm0, %v7210_v5  ;;  %563 = vst.msk [vmem:[#allocation2 + $0x118] sm:$0xff] %vm455_vm0, %v7210_v5 }
 0x153   : > { %564 = vst.msk [vmem:[#allocation2 + $0x120] sm:$0xff] %vm455_vm0, %v7210_v5  ;;  %565 = vst.msk [vmem:[#allocation2 + $0x128] sm:$0xff] %vm455_vm0, %v7210_v5 }
 0x154   : > { %566 = vst.msk [vmem:[#allocation2 + $0x130] sm:$0xff] %vm455_vm0, %v7210_v5  ;;  %567 = vst.msk [vmem:[#allocation2 + $0x138] sm:$0xff] %vm455_vm0, %v7210_v5 }
 0x155   : > { %568 = vst.msk [vmem:[#allocation2 + $0x140] sm:$0xff] %vm455_vm0, %v7210_v5  ;;  %569 = vst.msk [vmem:[#allocation2 + $0x148] sm:$0xff] %vm455_vm0, %v7210_v5 }
 0x156   : > { %570 = vst.msk [vmem:[#allocation2 + $0x150] sm:$0xff] %vm455_vm0, %v7210_v5  ;;  %571 = vst.msk [vmem:[#allocation2 + $0x158] sm:$0xff] %vm455_vm0, %v7210_v5 }
 0x157   : > { %572 = vst.msk [vmem:[#allocation2 + $0x160] sm:$0xff] %vm455_vm0, %v7210_v5  ;;  %573 = vst.msk [vmem:[#allocation2 + $0x168] sm:$0xff] %vm455_vm0, %v7210_v5 }
 0x158   : > { %574 = vst.msk [vmem:[#allocation2 + $0x170] sm:$0xff] %vm455_vm0, %v7210_v5  ;;  %575 = vst.msk [vmem:[#allocation2 + $0x178] sm:$0xff] %vm455_vm0, %v7210_v5 }
 0x159   : > { %576 = vst.msk [vmem:[#allocation2 + $0x180] sm:$0xff] %vm455_vm0, %v7210_v5  ;;  %577 = vst.msk [vmem:[#allocation2 + $0x188] sm:$0xff] %vm455_vm0, %v7210_v5 }
 0x15a   : > { %578 = vst.msk [vmem:[#allocation2 + $0x190] sm:$0xff] %vm455_vm0, %v7210_v5  ;;  %579 = vst.msk [vmem:[#allocation2 + $0x198] sm:$0xff] %vm455_vm0, %v7210_v5 }
 0x15b   : > { %580 = vst.msk [vmem:[#allocation2 + $0x1a0] sm:$0xff] %vm455_vm0, %v7210_v5  ;;  %581 = vst.msk [vmem:[#allocation2 + $0x1a8] sm:$0xff] %vm455_vm0, %v7210_v5 }
 0x15c   : > { %582 = vst.msk [vmem:[#allocation2 + $0x1b0] sm:$0xff] %vm455_vm0, %v7210_v5  ;;  %583 = vst.msk [vmem:[#allocation2 + $0x1b8] sm:$0xff] %vm455_vm0, %v7210_v5 }
 0x15d   : > { %584 = vst.msk [vmem:[#allocation2 + $0x1c0] sm:$0xff] %vm455_vm0, %v7210_v5  ;;  %585 = vst.msk [vmem:[#allocation2 + $0x1c8] sm:$0xff] %vm455_vm0, %v7210_v5 }
 0x15e   : > { %586 = vst.msk [vmem:[#allocation2 + $0x1d0] sm:$0xff] %vm455_vm0, %v7210_v5  ;;  %587 = vst.msk [vmem:[#allocation2 + $0x1d8] sm:$0xff] %vm455_vm0, %v7210_v5 }
 0x15f   : > { %588 = vst.msk [vmem:[#allocation2 + $0x1e0] sm:$0xff] %vm455_vm0, %v7210_v5  ;;  %589 = vst.msk [vmem:[#allocation2 + $0x1e8] sm:$0xff] %vm455_vm0, %v7210_v5 }
 0x160   : > { %590 = vst.msk [vmem:[#allocation2 + $0x1f0] sm:$0xff] %vm455_vm0, %v7210_v5  ;;  %591 = vst.msk [vmem:[#allocation2 + $0x1f8] sm:$0xff] %vm455_vm0, %v7210_v5 }
 0x161   : > { %592 = vst.msk [vmem:[#allocation2 + $0x200] sm:$0xff] %vm455_vm0, %v7210_v5  ;;  %593 = vst.msk [vmem:[#allocation2 + $0x208] sm:$0xff] %vm455_vm0, %v7210_v5 }
 0x162   : > { %594 = vst.msk [vmem:[#allocation2 + $0x210] sm:$0xff] %vm455_vm0, %v7210_v5  ;;  %595 = vst.msk [vmem:[#allocation2 + $0x218] sm:$0xff] %vm455_vm0, %v7210_v5 }
 0x163   : > { %596 = vst.msk [vmem:[#allocation2 + $0x220] sm:$0xff] %vm455_vm0, %v7210_v5  ;;  %597 = vst.msk [vmem:[#allocation2 + $0x228] sm:$0xff] %vm455_vm0, %v7210_v5 }
 0x164   : > { %598 = vst.msk [vmem:[#allocation2 + $0x230] sm:$0xff] %vm455_vm0, %v7210_v5  ;;  %599 = vst.msk [vmem:[#allocation2 + $0x238] sm:$0xff] %vm455_vm0, %v7210_v5  ;;  %v834_v5 = vsel %vm455_vm0, %v796_v9, 0.0  ;;  %v1391_v9 = vsel %vm455_vm0, %v1353_v12, 0.0  ;;  %v840_v12 = vsel %vm455_vm0, %v798_v16, 0.0  ;;  %v1397_v16 = vsel %vm455_vm0, %v1355_v20, 0.0 }
 0x165   : > { %835 = vadd.xlane.f32.xlu1 %v834_v5  ;;  %v837_v5 = vsel %vm455_vm0, %v797_v2, 0.0  ;;  %v1213_v2 = vpop.xlane.xlu1 %1212  ;;  %v846_v20 = vsel %vm455_vm0, %v800_v24, 0.0 }
 0x166   : > { %838 = vadd.xlane.f32.xlu0 %v837_v5  ;;  %v1292_v5 = vmul.f32 0.03125, %v1210_v38  ;;  %v1293_v14 = vmul.f32 0.03125, %v1213_v2 }
 0x168   : > { %v8160_v0 = vsub.f32 %v7543_v28, %v1292_v5  ;;  %v8163_v25 = vsub.f32 %v7546_v29, %v1293_v14  ;;  %v1216_v14 = vpop.xlane.xlu0 %1215 }
 0x169   : > { %1392 = vadd.xlane.f32.xlu1 %v1391_v9  ;;  %v1394_v9 = vsel %vm455_vm0, %v1354_v8, 0.0  ;;  %v661_v8 = vpop.xlane.xlu1 %660 }
 0x16a   : > { %1395 = vadd.xlane.f32.xlu0 %v1394_v9  ;;  %v737_v9 = vmul.f32 0.03125, %v658_v22  ;;  %v738_v38 = vmul.f32 0.03125, %v661_v8  ;;  %v1356_v2 = vmul.f32 %v8160_v0, %v8160_v0  ;;  %v1357_v28 = vmul.f32 %v8163_v25, %v8163_v25 }
 0x16c   : > { %v8172_v5 = vsub.f32 %v7553_v32, %v737_v9  ;;  %v8175_v29 = vsub.f32 %v7556_v33, %v738_v38  ;;  %v1403_v24 = vsel %vm455_vm0, %v1357_v28, 0.0  ;;  %v664_v38 = vpop.xlane.xlu0 %663 }
 0x16d   : > { %841 = vadd.xlane.f32.xlu1 %v840_v12  ;;  %v843_v12 = vsel %vm455_vm0, %v799_v23, 0.0  ;;  %v1219_v23 = vpop.xlane.xlu1 %1218 }
 0x16e   : > { %844 = vadd.xlane.f32.xlu0 %v843_v12  ;;  %v1294_v12 = vmul.f32 0.03125, %v1216_v14  ;;  %v1295_v22 = vmul.f32 0.03125, %v1219_v23  ;;  %v801_v8 = vmul.f32 %v8172_v5, %v8172_v5  ;;  %v802_v32 = vmul.f32 %v8175_v29, %v8175_v29 }
 0x170   : > { %v8184_v9 = vsub.f32 %v7563_v36, %v1294_v12  ;;  %v8187_v33 = vsub.f32 %v7566_v37, %v1295_v22  ;;  %v852_v28 = vsel %vm455_vm0, %v802_v32, 0.0  ;;  %v1222_v22 = vpop.xlane.xlu0 %1221 }
 0x171   : > { %1398 = vadd.xlane.f32.xlu1 %v1397_v16  ;;  %v1400_v16 = vsel %vm455_vm0, %v1356_v2, 0.0  ;;  %v667_v2 = vpop.xlane.xlu1 %666 }
 0x172   : > { %1401 = vadd.xlane.f32.xlu0 %v1400_v16  ;;  %13455 = vst [vmem:[#allocation22_spill] sm:$0xff] %v8184_v9  ;;  %13456 = vst [vmem:[#allocation23_spill] sm:$0xff] %v8187_v33  ;;  %v739_v16 = vmul.f32 0.03125, %v664_v38  ;;  %v740_v14 = vmul.f32 0.03125, %v667_v2  ;;  %v1358_v23 = vmul.f32 %v8184_v9, %v8184_v9  ;;  %v1359_v36 = vmul.f32 %v8187_v33, %v8187_v33 }
 0x174   : > { %v8196_v12 = vsub.f32 %v7573_v40, %v739_v16  ;;  %v8199_v37 = vsub.f32 %v7576_v41, %v740_v14  ;;  %v1409_v32 = vsel %vm455_vm0, %v1359_v36, 0.0  ;;  %v670_v14 = vpop.xlane.xlu0 %669 }
 0x175   : > { %847 = vadd.xlane.f32.xlu1 %v846_v20  ;;  %v849_v20 = vsel %vm455_vm0, %v801_v8, 0.0  ;;  %v1225_v8 = vpop.xlane.xlu1 %1224 }
 0x176   : > { %850 = vadd.xlane.f32.xlu0 %v849_v20  ;;  %13457 = vst [vmem:[#allocation24_spill] sm:$0xff] %v8196_v12  ;;  %13458 = vst [vmem:[#allocation25_spill] sm:$0xff] %v8199_v37  ;;  %v1296_v20 = vmul.f32 0.03125, %v1222_v22  ;;  %v1297_v38 = vmul.f32 0.03125, %v1225_v8  ;;  %v803_v2 = vmul.f32 %v8196_v12, %v8196_v12  ;;  %v804_v40 = vmul.f32 %v8199_v37, %v8199_v37 }
 0x178   : > { %v8208_v16 = vsub.f32 %v7583_v44, %v1296_v20  ;;  %v8211_v41 = vsub.f32 %v7586_v45, %v1297_v38  ;;  %v858_v36 = vsel %vm455_vm0, %v804_v40, 0.0  ;;  %v1228_v38 = vpop.xlane.xlu0 %1227 }
 0x179   : > { %1404 = vadd.xlane.f32.xlu1 %v1403_v24  ;;  %v1406_v24 = vsel %vm455_vm0, %v1358_v23, 0.0  ;;  %v673_v23 = vpop.xlane.xlu1 %672 }
 0x17a   : > { %1407 = vadd.xlane.f32.xlu0 %v1406_v24  ;;  %13459 = vst [vmem:[#allocation26_spill] sm:$0xff] %v8208_v16  ;;  %13460 = vst [vmem:[#allocation27_spill] sm:$0xff] %v8211_v41  ;;  %v741_v24 = vmul.f32 0.03125, %v670_v14  ;;  %v742_v22 = vmul.f32 0.03125, %v673_v23  ;;  %v1360_v8 = vmul.f32 %v8208_v16, %v8208_v16  ;;  %v1361_v44 = vmul.f32 %v8211_v41, %v8211_v41 }
 0x17c   : > { %v8220_v20 = vsub.f32 %v7593_v48, %v741_v24  ;;  %v8223_v45 = vsub.f32 %v7596_v49, %v742_v22  ;;  %v1415_v40 = vsel %vm455_vm0, %v1361_v44, 0.0  ;;  %v676_v22 = vpop.xlane.xlu0 %675 }
 0x17d   : > { %853 = vadd.xlane.f32.xlu1 %v852_v28  ;;  %v855_v28 = vsel %vm455_vm0, %v803_v2, 0.0  ;;  %v1231_v2 = vpop.xlane.xlu1 %1230 }
 0x17e   : > { %856 = vadd.xlane.f32.xlu0 %v855_v28  ;;  %13461 = vst [vmem:[#allocation28_spill] sm:$0xff] %v8220_v20  ;;  %13462 = vst [vmem:[#allocation29_spill] sm:$0xff] %v8223_v45  ;;  %v1298_v28 = vmul.f32 0.03125, %v1228_v38  ;;  %v1299_v14 = vmul.f32 0.03125, %v1231_v2  ;;  %v805_v23 = vmul.f32 %v8220_v20, %v8220_v20  ;;  %v806_v48 = vmul.f32 %v8223_v45, %v8223_v45 }
 0x180   : > { %v8232_v24 = vsub.f32 %v7603_v52, %v1298_v28  ;;  %v8235_v49 = vsub.f32 %v7606_v53, %v1299_v14  ;;  %v864_v44 = vsel %vm455_vm0, %v806_v48, 0.0  ;;  %v1234_v14 = vpop.xlane.xlu0 %1233 }
 0x181   : > { %1410 = vadd.xlane.f32.xlu1 %v1409_v32  ;;  %v1412_v32 = vsel %vm455_vm0, %v1360_v8, 0.0  ;;  %v679_v8 = vpop.xlane.xlu1 %678 }
 0x182   : > { %1413 = vadd.xlane.f32.xlu0 %v1412_v32  ;;  %13463 = vst [vmem:[#allocation30_spill] sm:$0xff] %v8232_v24  ;;  %13464 = vst [vmem:[#allocation31_spill] sm:$0xff] %v8235_v49  ;;  %v743_v32 = vmul.f32 0.03125, %v676_v22  ;;  %v744_v38 = vmul.f32 0.03125, %v679_v8  ;;  %v1362_v2 = vmul.f32 %v8232_v24, %v8232_v24  ;;  %v1363_v52 = vmul.f32 %v8235_v49, %v8235_v49 }
 0x184   : > { %v8244_v28 = vsub.f32 %v7613_v56, %v743_v32  ;;  %v8247_v53 = vsub.f32 %v7616_v57, %v744_v38  ;;  %v1421_v48 = vsel %vm455_vm0, %v1363_v52, 0.0  ;;  %v682_v38 = vpop.xlane.xlu0 %681 }
 0x185   : > { %859 = vadd.xlane.f32.xlu1 %v858_v36  ;;  %v861_v36 = vsel %vm455_vm0, %v805_v23, 0.0  ;;  %v1237_v23 = vpop.xlane.xlu1 %1236 }
 0x186   : > { %862 = vadd.xlane.f32.xlu0 %v861_v36  ;;  %13465 = vst [vmem:[#allocation32_spill] sm:$0xff] %v8244_v28  ;;  %13466 = vst [vmem:[#allocation33_spill] sm:$0xff] %v8247_v53  ;;  %v1300_v36 = vmul.f32 0.03125, %v1234_v14  ;;  %v1301_v22 = vmul.f32 0.03125, %v1237_v23  ;;  %v807_v8 = vmul.f32 %v8244_v28, %v8244_v28  ;;  %v808_v56 = vmul.f32 %v8247_v53, %v8247_v53  ;;  %v2027_v28 = vld [vmem:[#allocation3 + $0x90] sm:$0xff] }
 0x188   : > { %v8256_v32 = vsub.f32 %v7623_v60, %v1300_v36  ;;  %v8259_v57 = vsub.f32 %v7626_v61, %v1301_v22  ;;  %v870_v52 = vsel %vm455_vm0, %v808_v56, 0.0  ;;  %v1240_v22 = vpop.xlane.xlu0 %1239 }
 0x189   : > { %1416 = vadd.xlane.f32.xlu1 %v1415_v40  ;;  %v1418_v40 = vsel %vm455_vm0, %v1362_v2, 0.0  ;;  %v685_v2 = vpop.xlane.xlu1 %684 }
 0x18a   : > { %1419 = vadd.xlane.f32.xlu0 %v1418_v40  ;;  %13467 = vst [vmem:[#allocation34_spill] sm:$0xff] %v8256_v32  ;;  %13468 = vst [vmem:[#allocation35_spill] sm:$0xff] %v8259_v57  ;;  %v745_v40 = vmul.f32 0.03125, %v682_v38  ;;  %v746_v14 = vmul.f32 0.03125, %v685_v2  ;;  %v1364_v23 = vmul.f32 %v8256_v32, %v8256_v32  ;;  %v1365_v60 = vmul.f32 %v8259_v57, %v8259_v57  ;;  %v1826_v32 = vld [vmem:[#allocation3 + $0x88] sm:$0xff] }
 0x18c   : > { %v8268_v36 = vsub.f32 %v7633_v3, %v745_v40  ;;  %v8271_v61 = vsub.f32 %v7636_v4, %v746_v14  ;;  %v1427_v56 = vsel %vm455_vm0, %v1365_v60, 0.0  ;;  %v688_v14 = vpop.xlane.xlu0 %687 }
 0x18d   : > { %865 = vadd.xlane.f32.xlu1 %v864_v44  ;;  %v867_v44 = vsel %vm455_vm0, %v807_v8, 0.0  ;;  %v1243_v8 = vpop.xlane.xlu1 %1242 }
 0x18e   : > { %868 = vadd.xlane.f32.xlu0 %v867_v44  ;;  %13469 = vst [vmem:[#allocation36_spill] sm:$0xff] %v8268_v36  ;;  %13470 = vst [vmem:[#allocation37_spill] sm:$0xff] %v8271_v61  ;;  %v1302_v44 = vmul.f32 0.03125, %v1240_v22  ;;  %v1303_v38 = vmul.f32 0.03125, %v1243_v8  ;;  %v809_v2 = vmul.f32 %v8268_v36, %v8268_v36  ;;  %v810_v3 = vmul.f32 %v8271_v61, %v8271_v61  ;;  %v2415_v36 = vld [vmem:[#allocation3 + $0x30] sm:$0xff] }
 0x190   : > { %v8280_v40 = vsub.f32 %v7643_v10, %v1302_v44  ;;  %v8283_v4 = vsub.f32 %v7646_v11, %v1303_v38  ;;  %v876_v60 = vsel %vm455_vm0, %v810_v3, 0.0  ;;  %v1246_v38 = vpop.xlane.xlu0 %1245 }
 0x191   : > { %1422 = vadd.xlane.f32.xlu1 %v1421_v48  ;;  %v1424_v48 = vsel %vm455_vm0, %v1364_v23, 0.0  ;;  %v691_v23 = vpop.xlane.xlu1 %690 }
 0x192   : > { %1425 = vadd.xlane.f32.xlu0 %v1424_v48  ;;  %13471 = vst [vmem:[#allocation38_spill] sm:$0xff] %v8280_v40  ;;  %13472 = vst [vmem:[#allocation39_spill] sm:$0xff] %v8283_v4  ;;  %v747_v48 = vmul.f32 0.03125, %v688_v14  ;;  %v748_v22 = vmul.f32 0.03125, %v691_v23  ;;  %v1366_v8 = vmul.f32 %v8280_v40, %v8280_v40  ;;  %v1367_v10 = vmul.f32 %v8283_v4, %v8283_v4  ;;  %v7022_v4 = vld [vmem:[%s7470_s12 + $0xf0] sm:$0xff] }
 0x194   : > { %v8292_v44 = vsub.f32 %v7653_v18, %v747_v48  ;;  %v8295_v11 = vsub.f32 %v7656_v19, %v748_v22  ;;  %v1433_v3 = vsel %vm455_vm0, %v1367_v10, 0.0  ;;  %v694_v22 = vpop.xlane.xlu0 %693 }
 0x195   : > { %871 = vadd.xlane.f32.xlu1 %v870_v52  ;;  %v873_v52 = vsel %vm455_vm0, %v809_v2, 0.0  ;;  %v1249_v2 = vpop.xlane.xlu1 %1248 }
 0x196   : > { %874 = vadd.xlane.f32.xlu0 %v873_v52  ;;  %13473 = vst [vmem:[#allocation40_spill] sm:$0xff] %v8292_v44  ;;  %13474 = vst [vmem:[#allocation41_spill] sm:$0xff] %v8295_v11  ;;  %v1304_v52 = vmul.f32 0.03125, %v1246_v38  ;;  %v1305_v14 = vmul.f32 0.03125, %v1249_v2  ;;  %v811_v23 = vmul.f32 %v8292_v44, %v8292_v44  ;;  %v812_v18 = vmul.f32 %v8295_v11, %v8295_v11  ;;  %v2214_v44 = vld [vmem:[#allocation3 + $0x28] sm:$0xff] }
 0x198   : > { %v8304_v48 = vsub.f32 %v7663_v26, %v1304_v52  ;;  %v8307_v19 = vsub.f32 %v7666_v27, %v1305_v14  ;;  %v882_v10 = vsel %vm455_vm0, %v812_v18, 0.0  ;;  %v1252_v14 = vpop.xlane.xlu0 %1251 }
 0x199   : > { %1428 = vadd.xlane.f32.xlu1 %v1427_v56  ;;  %v1430_v56 = vsel %vm455_vm0, %v1366_v8, 0.0  ;;  %v697_v8 = vpop.xlane.xlu1 %696 }
 0x19a   : > { %1431 = vadd.xlane.f32.xlu0 %v1430_v56  ;;  %13475 = vst [vmem:[#allocation42_spill] sm:$0xff] %v8304_v48  ;;  %13476 = vst [vmem:[#allocation43_spill] sm:$0xff] %v8307_v19  ;;  %v749_v56 = vmul.f32 0.03125, %v694_v22  ;;  %v750_v38 = vmul.f32 0.03125, %v697_v8  ;;  %v1368_v2 = vmul.f32 %v8304_v48, %v8304_v48  ;;  %v1369_v26 = vmul.f32 %v8307_v19, %v8307_v19  ;;  %v7020_v19 = vld [vmem:[%s7448_s24 + $0xf0] sm:$0xff] }
 0x19c   : > { %v8316_v52 = vsub.f32 %v7673_v34, %v749_v56  ;;  %v8319_v27 = vsub.f32 %v7676_v35, %v750_v38  ;;  %v1439_v18 = vsel %vm455_vm0, %v1369_v26, 0.0  ;;  %v700_v38 = vpop.xlane.xlu0 %699 }
 0x19d   : > { %877 = vadd.xlane.f32.xlu1 %v876_v60  ;;  %v879_v60 = vsel %vm455_vm0, %v811_v23, 0.0  ;;  %v1255_v23 = vpop.xlane.xlu1 %1254 }
 0x19e   : > { %880 = vadd.xlane.f32.xlu0 %v879_v60  ;;  %13477 = vst [vmem:[#allocation44_spill] sm:$0xff] %v8316_v52  ;;  %13478 = vst [vmem:[#allocation45_spill] sm:$0xff] %v8319_v27  ;;  %v1306_v60 = vmul.f32 0.03125, %v1252_v14  ;;  %v1307_v22 = vmul.f32 0.03125, %v1255_v23  ;;  %v813_v8 = vmul.f32 %v8316_v52, %v8316_v52  ;;  %v814_v34 = vmul.f32 %v8319_v27, %v8319_v27  ;;  %v2012_v27 = vld [vmem:[#allocation3 + $0x18] sm:$0xff] }
 0x1a0   : > { %v8328_v56 = vsub.f32 %v7683_v42, %v1306_v60  ;;  %v8331_v35 = vsub.f32 %v7686_v43, %v1307_v22  ;;  %v888_v26 = vsel %vm455_vm0, %v814_v34, 0.0  ;;  %v1258_v22 = vpop.xlane.xlu0 %1257 }
 0x1a1   : > { %1434 = vadd.xlane.f32.xlu1 %v1433_v3  ;;  %v1436_v3 = vsel %vm455_vm0, %v1368_v2, 0.0  ;;  %v703_v2 = vpop.xlane.xlu1 %702 }
 0x1a2   : > { %1437 = vadd.xlane.f32.xlu0 %v1436_v3  ;;  %13479 = vst [vmem:[#allocation46_spill] sm:$0xff] %v8328_v56  ;;  %13480 = vst [vmem:[#allocation47_spill] sm:$0xff] %v8331_v35  ;;  %v751_v3 = vmul.f32 0.03125, %v700_v38  ;;  %v752_v14 = vmul.f32 0.03125, %v703_v2  ;;  %v1370_v23 = vmul.f32 %v8328_v56, %v8328_v56  ;;  %v1371_v42 = vmul.f32 %v8331_v35, %v8331_v35 }
 0x1a4   : > { %v8340_v60 = vsub.f32 %v7693_v50, %v751_v3  ;;  %v8343_v43 = vsub.f32 %v7696_v51, %v752_v14  ;;  %v1445_v34 = vsel %vm455_vm0, %v1371_v42, 0.0  ;;  %v706_v14 = vpop.xlane.xlu0 %705 }
 0x1a5   : > { %883 = vadd.xlane.f32.xlu1 %v882_v10  ;;  %v885_v10 = vsel %vm455_vm0, %v813_v8, 0.0  ;;  %v1261_v8 = vpop.xlane.xlu1 %1260 }
 0x1a6   : > { %886 = vadd.xlane.f32.xlu0 %v885_v10  ;;  %13481 = vst [vmem:[#allocation48_spill] sm:$0xff] %v8340_v60  ;;  %13482 = vst [vmem:[#allocation49_spill] sm:$0xff] %v8343_v43  ;;  %v1308_v10 = vmul.f32 0.03125, %v1258_v22  ;;  %v1309_v38 = vmul.f32 0.03125, %v1261_v8  ;;  %v815_v2 = vmul.f32 %v8340_v60, %v8340_v60  ;;  %v816_v50 = vmul.f32 %v8343_v43, %v8343_v43  ;;  %v2011_v43 = vld [vmem:[#allocation3 + $0x10] sm:$0xff] }
 0x1a8   : > { %v8352_v3 = vsub.f32 %v7703_v58, %v1308_v10  ;;  %v8355_v51 = vsub.f32 %v7706_v59, %v1309_v38  ;;  %v894_v42 = vsel %vm455_vm0, %v816_v50, 0.0  ;;  %v1264_v38 = vpop.xlane.xlu0 %1263 }
 0x1a9   : > { %1440 = vadd.xlane.f32.xlu1 %v1439_v18  ;;  %v1442_v18 = vsel %vm455_vm0, %v1370_v23, 0.0  ;;  %v709_v23 = vpop.xlane.xlu1 %708 }
 0x1aa   : > { %1443 = vadd.xlane.f32.xlu0 %v1442_v18  ;;  %13483 = vst [vmem:[#allocation50_spill] sm:$0xff] %v8352_v3  ;;  %13484 = vst [vmem:[#allocation51_spill] sm:$0xff] %v8355_v51  ;;  %v753_v18 = vmul.f32 0.03125, %v706_v14  ;;  %v754_v22 = vmul.f32 0.03125, %v709_v23  ;;  %v1372_v8 = vmul.f32 %v8352_v3, %v8352_v3  ;;  %v1373_v58 = vmul.f32 %v8355_v51, %v8355_v51 }
 0x1ac   : > { %v8364_v10 = vsub.f32 %v7713_v6, %v753_v18  ;;  %v8367_v59 = vsub.f32 %v7716_v7, %v754_v22  ;;  %v1451_v50 = vsel %vm455_vm0, %v1373_v58, 0.0  ;;  %v13487_v18 = vld [vmem:[#allocation14_spill] sm:$0xff]  ;;  %v13489_v7 = vld [vmem:[#allocation15_spill] sm:$0xff] }
 0x1ad   : > { %889 = vadd.xlane.f32.xlu1 %v888_v26  ;;  %v891_v26 = vsel %vm455_vm0, %v815_v2, 0.0  ;;  %v1267_v2 = vpop.xlane.xlu1 %1266 }
 0x1ae   : > { %892 = vadd.xlane.f32.xlu0 %v891_v26  ;;  %13485 = vst [vmem:[#allocation52_spill] sm:$0xff] %v8364_v10  ;;  %13486 = vst [vmem:[#allocation53_spill] sm:$0xff] %v8367_v59  ;;  %v1310_v26 = vmul.f32 0.03125, %v1264_v38  ;;  %v1311_v14 = vmul.f32 0.03125, %v1267_v2  ;;  %v817_v23 = vmul.f32 %v8364_v10, %v8364_v10  ;;  %v818_v6 = vmul.f32 %v8367_v59, %v8367_v59  ;;  %v13491_v59 = vld [vmem:[#allocation16_spill] sm:$0xff] }
 0x1b0   : > { %v8376_v51 = vsub.f32 %v13487_v18, %v1310_v26  ;;  %v8379_v22 = vsub.f32 %v13489_v7, %v1311_v14  ;;  %v1741_v18 = vlaneseq  ;;  %v13493_v7 = vld [vmem:[#allocation17_spill] sm:$0xff] }
 0x1b1   : > { %1446 = vadd.xlane.f32.xlu1 %v1445_v34  ;;  %v1448_v34 = vsel %vm455_vm0, %v1372_v8, 0.0  ;;  %v712_v8 = vpop.xlane.xlu0 %711  ;;  %v715_v58 = vpop.xlane.xlu1 %714 }
 0x1b2   : > { %1449 = vadd.xlane.f32.xlu0 %v1448_v34  ;;  %13488 = vst [vmem:[#allocation14_spill] sm:$0xff] %v8376_v51  ;;  %13490 = vst [vmem:[#allocation15_spill] sm:$0xff] %v8379_v22  ;;  %v900_v34 = vsel %vm455_vm0, %v818_v6, 0.0  ;;  %v755_v38 = vmul.f32 0.03125, %v712_v8  ;;  %v756_v2 = vmul.f32 0.03125, %v715_v58  ;;  %v1374_v10 = vmul.f32 %v8376_v51, %v8376_v51 }
 0x1b3   : > { %v1375_v26 = vmul.f32 %v8379_v22, %v8379_v22 }
 0x1b4   : > { %v8388_v14 = vsub.f32 %v13491_v59, %v755_v38  ;;  %v8399_v38 = vshrl.u32 %v1741_v18, 7 }
 0x1b5   : > { %895 = vadd.xlane.f32.xlu1 %v894_v42  ;;  %v897_v42 = vsel %vm455_vm0, %v817_v23, 0.0  ;;  %v8391_v23 = vsub.f32 %v13493_v7, %v756_v2  ;;  %v1270_v6 = vpop.xlane.xlu0 %1269  ;;  %v1457_v8 = vsel %vm455_vm0, %v1375_v26, 0.0  ;;  %v13495_v2 = vld [vmem:[#allocation18_spill] sm:$0xff] }
 0x1b6   : > { %898 = vadd.xlane.f32.xlu0 %v897_v42  ;;  %13492 = vst [vmem:[#allocation16_spill] sm:$0xff] %v8388_v14  ;;  %v1273_v42 = vpop.xlane.xlu1 %1272  ;;  %v1312_v58 = vmul.f32 0.03125, %v1270_v6  ;;  %v819_v22 = vmul.f32 %v8388_v14, %v8388_v14  ;;  %v8460_v52 = vsub.s32 3, %v8399_v38 }
 0x1b7   : > { %13494 = vst [vmem:[#allocation17_spill] sm:$0xff] %v8391_v23  ;;  %v1313_v51 = vmul.f32 0.03125, %v1273_v42  ;;  %v820_v59 = vmul.f32 %v8391_v23, %v8391_v23 }
 0x1b8   : > { %v8402_v7 = vsub.f32 %v13495_v2, %v1312_v58  ;;  %v8414_v2 = vsub.s32 0, %v8399_v38  ;;  %13510 = vst [vmem:[#allocation61_spill] sm:$0xff] %v8460_v52 }
 0x1b9   : > { %1452 = vadd.xlane.f32.xlu1 %v1451_v50  ;;  %v1454_v50 = vsel %vm455_vm0, %v1374_v10, 0.0  ;;  %v13497_v10 = vld [vmem:[#allocation19_spill] sm:$0xff]  ;;  %v718_v26 = vpop.xlane.xlu0 %717  ;;  %v906_v42 = vsel %vm455_vm0, %v820_v59, 0.0 }
 0x1ba   : > { %1455 = vadd.xlane.f32.xlu0 %v1454_v50  ;;  %13496 = vst [vmem:[#allocation18_spill] sm:$0xff] %v8402_v7  ;;  %v903_v50 = vsel %vm455_vm0, %v819_v22, 0.0  ;;  %v721_v6 = vpop.xlane.xlu1 %720  ;;  %v757_v14 = vmul.f32 0.03125, %v718_v26  ;;  %v1376_v18 = vmul.f32 %v8402_v7, %v8402_v7  ;;  %13499 = vst [vmem:[#allocation54_spill] sm:$0xff] %v8414_v2  ;;  %v13501_v22 = vld [vmem:[#allocation20_spill] sm:$0xff]  ;;  %v8429_v26 = vld [vmem:[%s12640_s5] sm:$0xff] }
 0x1bb   : > { %v758_v3 = vmul.f32 0.03125, %v721_v6 }
 0x1bd   : > { %901 = vadd.xlane.f32.xlu1 %v900_v34  ;;  %v8405_v34 = vsub.f32 %v13497_v10, %v1313_v51  ;;  %v8417_v51 = vsub.s32 1, %v8399_v38  ;;  %v13503_v10 = vld [vmem:[#allocation21_spill] sm:$0xff]  ;;  %v1276_v6 = vpop.xlane.xlu0 %1275 }
 0x1be   : > { %904 = vadd.xlane.f32.xlu0 %v903_v50  ;;  %v8423_v59 = vsub.f32 %v13503_v10, %v758_v3  ;;  %v1460_v50 = vsel %vm455_vm0, %v1376_v18, 0.0  ;;  %v1314_v23 = vmul.f32 0.03125, %v1276_v6  ;;  %v8438_v18 = vrot.slane %v8429_v26, %v8414_v2  ;;  %v7018_v10 = vld [vmem:[%s7470_s12 + $0xe0] sm:$0xff] }
 0x1bf   : > { %13498 = vst [vmem:[#allocation19_spill] sm:$0xff] %v8405_v34  ;;  %v1377_v58 = vmul.f32 %v8405_v34, %v8405_v34  ;;  %13500 = vst [vmem:[#allocation55_spill] sm:$0xff] %v8417_v51  ;;  %v1279_v34 = vpop.xlane.xlu1 %1278 }
 0x1c0   : > { %13504 = vst [vmem:[#allocation21_spill] sm:$0xff] %v8423_v59  ;;  %13505 = vst [vmem:[#allocation56_spill] sm:$0xff] %v8438_v18 }
 0x1c1   : > { %1458 = vadd.xlane.f32.xlu1 %v1457_v8  ;;  %v8420_v8 = vsub.f32 %v13501_v22, %v757_v14  ;;  %v1463_v7 = vsel %vm455_vm0, %v1377_v58, 0.0  ;;  %v1315_v14 = vmul.f32 0.03125, %v1279_v34  ;;  %v822_v22 = vmul.f32 %v8423_v59, %v8423_v59  ;;  %v7019_v58 = vld [vmem:[%s7470_s12 + $0xe8] sm:$0xff]  ;;  %v1809_v59 = vld [vmem:[#allocation3] sm:$0xff]  ;;  %v724_v60 = vpop.xlane.xlu0 %723 }
 0x1c2   : > { %1461 = vadd.xlane.f32.xlu0 %v1460_v50  ;;  %v8445_v50 = vsub.f32 %v7018_v10, %v1314_v23  ;;  %v759_v23 = vmul.f32 0.03125, %v724_v60  ;;  %v7021_v60 = vld [vmem:[%s7448_s24 + $0xf8] sm:$0xff] }
 0x1c3   : > { %13502 = vst [vmem:[#allocation20_spill] sm:$0xff] %v8420_v8  ;;  %v821_v3 = vmul.f32 %v8420_v8, %v8420_v8  ;;  %v8448_v6 = vsub.f32 %v7019_v58, %v1315_v14  ;;  %v8452_v8 = vsub.s32 2, %v8399_v38  ;;  %v727_v35 = vpop.xlane.xlu1 %726  ;;  %v912_v56 = vsel %vm455_vm0, %v822_v22, 0.0  ;;  %v1810_v58 = vld [vmem:[#allocation3 + $0x8] sm:$0xff] }
 0x1c4   : > { %13507 = vst [vmem:[#allocation58_spill] sm:$0xff] %v8445_v50  ;;  %v760_v10 = vmul.f32 0.03125, %v727_v35  ;;  %v1378_v14 = vmul.f32 %v8445_v50, %v8445_v50  ;;  %v8465_v48 = vsub.f32 %v7020_v19, %v759_v23  ;;  %v1846_v19 = vmul.f32 %v8438_v18, %v1810_v58 }
 0x1c5   : > { %907 = vadd.xlane.f32.xlu1 %v906_v42  ;;  %v8442_v42 = vrot.slane %v8429_v26, %v8417_v51  ;;  %13508 = vst [vmem:[#allocation59_spill] sm:$0xff] %v8448_v6  ;;  %v909_v34 = vsel %vm455_vm0, %v821_v3, 0.0  ;;  %13509 = vst [vmem:[#allocation60_spill] sm:$0xff] %v8452_v8  ;;  %v1379_v3 = vmul.f32 %v8448_v6, %v8448_v6  ;;  %v1282_v50 = vpop.xlane.xlu0 %1281 }
 0x1c6   : > { %910 = vadd.xlane.f32.xlu0 %v909_v34  ;;  %13511 = vst [vmem:[#allocation62_spill] sm:$0xff] %v8465_v48  ;;  %v8468_v35 = vsub.f32 %v7021_v60, %v760_v10  ;;  %v1466_v22 = vsel %vm455_vm0, %v1378_v14, 0.0  ;;  %v8473_v6 = vrot.slane %v8429_v26, %v8452_v8  ;;  %v2213_v10 = vld [vmem:[#allocation3 + $0x20] sm:$0xff]  ;;  %v1316_v60 = vmul.f32 0.03125, %v1282_v50  ;;  %v7023_v50 = vld [vmem:[%s7470_s12 + $0xf8] sm:$0xff] }
 0x1c7   : > { %13506 = vst [vmem:[#allocation57_spill] sm:$0xff] %v8442_v42  ;;  %v2047_v34 = vmul.f32 %v8442_v42, %v2011_v43  ;;  %v1469_v43 = vsel %vm455_vm0, %v1379_v3, 0.0  ;;  %v2048_v23 = vmul.f32 %v8442_v42, %v2012_v27  ;;  %v823_v14 = vmul.f32 %v8465_v48, %v8465_v48 }
 0x1c8   : > { %13512 = vst [vmem:[#allocation63_spill] sm:$0xff] %v8468_v35  ;;  %13513 = vst [vmem:[#allocation64_spill] sm:$0xff] %v8473_v6  ;;  %v8487_v3 = vsub.s32 4, %v8399_v38  ;;  %v8490_v27 = vsub.f32 %v7022_v4, %v1316_v60  ;;  %v2249_v40 = vmul.f32 %v8473_v6, %v2213_v10  ;;  %v2250_v61 = vmul.f32 %v8473_v6, %v2214_v44  ;;  %v2617_v60 = vld [vmem:[#allocation3 + $0x40] sm:$0xff] }
 0x1c9   : > { %1464 = vadd.xlane.f32.xlu1 %v1463_v7  ;;  %v1845_v7 = vmul.f32 %v8438_v18, %v1809_v59  ;;  %v1285_v59 = vpop.xlane.xlu1 %1284  ;;  %v915_v48 = vsel %vm455_vm0, %v823_v14, 0.0 }
 0x1ca   : > { %1467 = vadd.xlane.f32.xlu0 %v1466_v22  ;;  %v1317_v11 = vmul.f32 0.03125, %v1285_v59  ;;  %v8484_v22 = vrot.slane %v8429_v26, %v8460_v52  ;;  %13515 = vst [vmem:[#allocation66_spill] sm:$0xff] %v8487_v3  ;;  %13516 = vst [vmem:[#allocation67_spill] sm:$0xff] %v8490_v27 }
 0x1cb   : > { %v2079_v58 = vadd.f32 %v2047_v34, %v1845_v7  ;;  %v1380_v7 = vmul.f32 %v8490_v27, %v8490_v27  ;;  %v8505_v34 = vrot.slane %v8429_v26, %v8487_v3 }
 0x1cc   : > { %13514 = vst [vmem:[#allocation65_spill] sm:$0xff] %v8484_v22  ;;  %v8493_v59 = vsub.f32 %v7023_v50, %v1317_v11  ;;  %v2416_v11 = vld [vmem:[#allocation3 + $0x38] sm:$0xff] }
 0x1cd   : > { %913 = vadd.xlane.f32.xlu1 %v912_v56  ;;  %v824_v56 = vmul.f32 %v8468_v35, %v8468_v35  ;;  %v2080_v35 = vadd.f32 %v2048_v23, %v1846_v19  ;;  %13518 = vst [vmem:[#allocation69_spill] sm:$0xff] %v8505_v34  ;;  %v2281_v44 = vadd.f32 %v2249_v40, %v2079_v58 }
 0x1ce   : > { %13517 = vst [vmem:[#allocation68_spill] sm:$0xff] %v8493_v59  ;;  %916 = vadd.xlane.f32.xlu0 %v915_v48  ;;  %v1381_v4 = vmul.f32 %v8493_v59, %v8493_v59  ;;  %v8509_v48 = vsub.s32 5, %v8399_v38  ;;  %v2451_v19 = vmul.f32 %v8484_v22, %v2415_v36  ;;  %v2452_v10 = vmul.f32 %v8484_v22, %v2416_v11 }
 0x1cf   : > { %v918_v57 = vsel %vm455_vm0, %v824_v56, 0.0  ;;  %v2282_v23 = vadd.f32 %v2250_v61, %v2080_v35  ;;  %v2618_v56 = vld [vmem:[#allocation3 + $0x48] sm:$0xff]  ;;  %v2653_v40 = vmul.f32 %v8505_v34, %v2617_v60  ;;  %v2819_v61 = vld [vmem:[#allocation3 + $0x50] sm:$0xff]  ;;  %v2820_v35 = vld [vmem:[#allocation3 + $0x58] sm:$0xff] }
 0x1d0   : > { %13519 = vst [vmem:[#allocation70_spill] sm:$0xff] %v8509_v48  ;;  %v1475_v14 = vsel %vm455_vm0, %v1381_v4, 0.0  ;;  %v8516_v50 = vrot.slane %v8429_v26, %v8509_v48  ;;  %v2483_v59 = vadd.f32 %v2451_v19, %v2281_v44  ;;  %v2654_v36 = vmul.f32 %v8505_v34, %v2618_v56  ;;  %v3021_v19 = vld [vmem:[#allocation3 + $0x60] sm:$0xff]  ;;  %v3022_v60 = vld [vmem:[#allocation3 + $0x68] sm:$0xff] }
 0x1d1   : > { %1470 = vadd.xlane.f32.xlu1 %v1469_v43  ;;  %v1472_v43 = vsel %vm455_vm0, %v1380_v7, 0.0  ;;  %v8519_v7 = vsub.s32 6, %v8399_v38  ;;  %v8528_v4 = vsub.s32 7, %v8399_v38  ;;  %v8540_v38 = vld [vmem:[%s12640_s5 + $0x8] sm:$0xff] }
 0x1d2   : > { %1473 = vadd.xlane.f32.xlu0 %v1472_v43  ;;  %13520 = vst [vmem:[#allocation71_spill] sm:$0xff] %v8516_v50  ;;  %v2685_v11 = vadd.f32 %v2653_v40, %v2483_v59  ;;  %v2855_v43 = vmul.f32 %v8516_v50, %v2819_v61  ;;  %v2856_v44 = vmul.f32 %v8516_v50, %v2820_v35  ;;  %v3223_v40 = vld [vmem:[#allocation3 + $0x70] sm:$0xff]  ;;  %v1825_v35 = vld [vmem:[#allocation3 + $0x80] sm:$0xff] }
 0x1d3   : > { %13521 = vst [vmem:[#allocation72_spill] sm:$0xff] %v8519_v7  ;;  %v8525_v58 = vrot.slane %v8429_v26, %v8519_v7  ;;  %13523 = vst [vmem:[#allocation74_spill] sm:$0xff] %v8528_v4 }
 0x1d5   : > { %919 = vadd.xlane.f32.xlu1 %v918_v57  ;;  %v2484_v57 = vadd.f32 %v2452_v10, %v2282_v23  ;;  %13522 = vst [vmem:[#allocation73_spill] sm:$0xff] %v8525_v58  ;;  %v8534_v23 = vrot.slane %v8429_v26, %v8528_v4  ;;  %v2887_v10 = vadd.f32 %v2855_v43, %v2685_v11 }
 0x1d6   : > { %v3058_v56 = vmul.f32 %v8525_v58, %v3022_v60 }
 0x1d7   : > { %v2686_v27 = vadd.f32 %v2654_v36, %v2484_v57  ;;  %13524 = vst [vmem:[#allocation75_spill] sm:$0xff] %v8534_v23  ;;  %v3224_v57 = vld [vmem:[#allocation3 + $0x78] sm:$0xff]  ;;  %v8545_v36 = vrot.slane %v8540_v38, %v8414_v2  ;;  %v3259_v26 = vmul.f32 %v8534_v23, %v3223_v40  ;;  %v830_v40 = vpop.xlane.xlu1 %829 }
 0x1d8   : > { %v3260_v43 = vmul.f32 %v8534_v23, %v3224_v57  ;;  %v1862_v57 = vmul.f32 %v8438_v18, %v1826_v32  ;;  %v922_v23 = vmul.f32 0.03125, %v830_v40 }
 0x1d9   : > { %1476 = vadd.xlane.f32.xlu1 %v1475_v14  ;;  %v3057_v14 = vmul.f32 %v8525_v58, %v3021_v19  ;;  %v2888_v59 = vadd.f32 %v2856_v44, %v2686_v27  ;;  %13525 = vst [vmem:[#allocation76_spill] sm:$0xff] %v8545_v36  ;;  %v827_v19 = vpop.xlane.xlu0 %826  ;;  %v2028_v27 = vld [vmem:[#allocation3 + $0x98] sm:$0xff]  ;;  %v8551_v44 = vrot.slane %v8540_v38, %v8417_v51 }
 0x1da   : > { %v921_v53 = vmul.f32 0.03125, %v827_v19  ;;  %v3461_v49 = vmul.f32 %v8545_v36, %v1825_v35  ;;  %v2063_v19 = vmul.f32 %v8442_v42, %v2027_v28  ;;  %v2064_v58 = vmul.f32 %v8442_v42, %v2028_v27 }
 0x1db   : > { %v3089_v61 = vadd.f32 %v3057_v14, %v2887_v10  ;;  %v3090_v11 = vadd.f32 %v3058_v56, %v2888_v59  ;;  %13526 = vst [vmem:[#allocation77_spill] sm:$0xff] %v8551_v44  ;;  %v3462_v14 = vmul.f32 %v8545_v36, %v1826_v32  ;;  %v1861_v56 = vmul.f32 %v8438_v18, %v1825_v35  ;;  %v1387_v20 = vpop.xlane.xlu1 %1386 }
 0x1dc   : > { %v953_v24 = vadd.f32 1e-05, %v921_v53  ;;  %v954_v53 = vadd.f32 1e-05, %v922_v23  ;;  %v3664_v36 = vmul.f32 %v8551_v44, %v2028_v27  ;;  %v8565_v32 = vrot.slane %v8540_v38, %v8452_v8 }
 0x1dd   : > { %v3291_v60 = vadd.f32 %v3259_v26, %v3089_v61  ;;  %v3292_v10 = vadd.f32 %v3260_v43, %v3090_v11  ;;  %v1384_v59 = vpop.xlane.xlu0 %1383  ;;  %v3663_v26 = vmul.f32 %v8551_v44, %v2027_v28  ;;  %v8561_v35 = vadd.f32 %v2063_v19, %v1861_v56 }
 0x1de   : > { %6890 = vrsqrt.f32 %v953_v24  ;;  %v1478_v45 = vmul.f32 0.03125, %v1384_v59  ;;  %13527 = vst [vmem:[#allocation78_spill] sm:$0xff] %v8565_v32  ;;  %v1479_v24 = vmul.f32 0.03125, %v1387_v20  ;;  %v8567_v59 = vadd.f32 %v2064_v58, %v1862_v57 }
 0x1df   : > { %v3493_v61 = vadd.f32 %v3461_v49, %v3291_v60  ;;  %v3494_v43 = vadd.f32 %v3462_v14, %v3292_v10  ;;  %6892 = vrsqrt.f32 %v954_v53  ;;  %v8576_v49 = vrot.slane %v8540_v38, %v8460_v52  ;;  %v1926_v14 = vld [vmem:[#allocation2 + $0x90] sm:$0xff] }
 0x1e0   : > { %v1510_v11 = vadd.f32 1e-05, %v1478_v45  ;;  %v8572_v45 = vld [vmem:[%s12639_s4] sm:$0xff]  ;;  %v8581_v60 = vmul.f32 %v2027_v28, %v8438_v18  ;;  %v1511_v10 = vadd.f32 1e-05, %v1479_v24  ;;  %v8591_v19 = vrot.slane %v8540_v38, %v8509_v48 }
 0x1e1   : > { %v833_v41 = vpop.xlane.xlu0 %832  ;;  %13528 = vst [vmem:[#allocation79_spill] sm:$0xff] %v8576_v49  ;;  %v8578_v23 = vadd.f32 %v3663_v26, %v3493_v61  ;;  %v8587_v58 = vadd.f32 %v3664_v36, %v3494_v43  ;;  %v8594_v61 = vmul.f32 %v2028_v27, %v8438_v18  ;;  %v8598_v28 = vrot.slane %v8572_v45, %v8414_v2  ;;  %v1927_v26 = vld [vmem:[#allocation2 + $0x98] sm:$0xff]  ;;  %v1708_v43 = vld [vmem:[%s12640_s5 + $0x10] sm:$0x1f]  ;;  %v1725_v24 = vld [vmem:[#allocation2 + $0x80] sm:$0xff] }
 0x1e2   : > { %v923_v40 = vmul.f32 0.03125, %v833_v41  ;;  %6894 = vrsqrt.f32 %v1510_v11  ;;  %13529 = vst [vmem:[#allocation80_spill] sm:$0xff] %v8581_v60  ;;  %v8585_v41 = vrot.slane %v8540_v38, %v8487_v3  ;;  %13531 = vst [vmem:[#allocation82_spill] sm:$0xff] %v8591_v19  ;;  %v8602_v53 = vrot.slane %v8572_v45, %v8417_v51  ;;  %v1726_v18 = vld [vmem:[#allocation2 + $0x88] sm:$0xff] }
 0x1e3   : > { %13532 = vst [vmem:[#allocation83_spill] sm:$0xff] %v8594_v61  ;;  %13533 = vst [vmem:[#allocation84_spill] sm:$0xff] %v8598_v28  ;;  %6896 = vrsqrt.f32 %v1511_v10  ;;  %v8609_v27 = vrot.slane %v8540_v38, %v8519_v7  ;;  %v1761_v61 = vmul.f32 %v8598_v28, %v1725_v24  ;;  %v1762_v44 = vmul.f32 %v8598_v28, %v1726_v18 }
 0x1e4   : > { %v955_v20 = vadd.f32 1e-05, %v923_v40  ;;  %13530 = vst [vmem:[#allocation81_spill] sm:$0xff] %v8585_v41  ;;  %13534 = vst [vmem:[#allocation85_spill] sm:$0xff] %v8602_v53  ;;  %v8613_v40 = vrot.slane %v8540_v38, %v8528_v4  ;;  %v1962_v10 = vmul.f32 %v8602_v53, %v1926_v14  ;;  %v8623_v38 = vrot.slane %v1708_v43, %v8414_v2 }
 0x1e5   : > { %v1390_v57 = vpop.xlane.xlu0 %1389  ;;  %13535 = vst [vmem:[#allocation86_spill] sm:$0xff] %v8609_v27  ;;  %v1963_v27 = vmul.f32 %v8602_v53, %v1927_v26  ;;  %v8626_v24 = vrot.slane %v1708_v43, %v8417_v51  ;;  %v8629_v14 = vrot.slane %v1708_v43, %v8452_v8  ;;  %v8634_v26 = vrot.slane %v1708_v43, %v8460_v52 }
 0x1e6   : > { %v1480_v11 = vmul.f32 0.03125, %v1390_v57  ;;  %6898 = vrsqrt.f32 %v955_v20  ;;  %13536 = vst [vmem:[#allocation87_spill] sm:$0xff] %v8613_v40  ;;  %v8617_v57 = vld [vmem:[#allocation6] ss:$0 sm:$0xff]  ;;  %13537 = vst [vmem:[#allocation88_spill] sm:$0xff] %v8623_v38  ;;  %v8638_v38 = vrot.slane %v1708_v43, %v8487_v3 }
 0x1e7   : > { %13538 = vst [vmem:[#allocation89_spill] sm:$0xff] %v8626_v24  ;;  %13539 = vst [vmem:[#allocation90_spill] sm:$0xff] %v8629_v14  ;;  %v8631_v40 = vld [vmem:[#allocation8] ss:$0 sm:$0xff]  ;;  %v8642_v24 = vrot.slane %v8572_v45, %v8452_v8 }
 0x1e8   : > { %v1512_v42 = vadd.f32 1e-05, %v1480_v11  ;;  %13540 = vst [vmem:[#allocation91_spill] sm:$0xff] %v8634_v26  ;;  %v1910_v11 = vld [vmem:[#allocation2 + $0x10] sm:$0xff]  ;;  %13541 = vst [vmem:[#allocation92_spill] sm:$0xff] %v8638_v38 }
 0x1e9   : > { %13542 = vst [vmem:[#allocation93_spill] sm:$0xff] %v8642_v24  ;;  %v1946_v9 = vmul.f32 %v8602_v53, %v1910_v11 }
 0x1f2   : > { %v836_v56 = vpop.xlane.xlu1 %835 }
 0x1f3   : > { %v924_v36 = vmul.f32 0.03125, %v836_v56  ;;  %v6891_v56 = vpop.eup %6890  ;;  %v839_v16 = vpop.xlane.xlu0 %838 }
 0x1f4   : > { %v1017_v20 = vmul.f32 %v6891_v56, %v7775_v54  ;;  %v925_v18 = vmul.f32 0.03125, %v839_v16  ;;  %v1709_v54 = vld [vmem:[#allocation2] sm:$0xff]  ;;  %v6893_v41 = vpop.eup %6892  ;;  %v8646_v16 = vadd.f32 %v1963_v27, %v1762_v44 }
 0x1f5   : > { %v956_v60 = vadd.f32 1e-05, %v924_v36  ;;  %v6895_v50 = vpop.eup %6894  ;;  %v1745_v43 = vmul.f32 %v8598_v28, %v1709_v54 }
 0x1f6   : > { %v1393_v19 = vpop.xlane.xlu1 %1392  ;;  %v1055_v56 = vmul.f32 %v8617_v57, %v1017_v20  ;;  %13544 = vst [vmem:[#allocation95_spill] sm:$0xff] %v8646_v16  ;;  %v1018_v20 = vmul.f32 %v6893_v41, %v7785_v15  ;;  %v1574_v49 = vmul.f32 %v6895_v50, %v7778_v39  ;;  %v8661_v15 = vrot.slane %v8572_v45, %v8487_v3  ;;  %v6897_v41 = vpop.eup %6896 }
 0x1f7   : > { %6900 = vrsqrt.f32 %v956_v60  ;;  %v1481_v36 = vmul.f32 0.03125, %v1393_v19  ;;  %v957_v60 = vadd.f32 1e-05, %v925_v18  ;;  %v8644_v19 = vadd.f32 %v1962_v10, %v1761_v61  ;;  %v1396_v33 = vpop.xlane.xlu0 %1395  ;;  %v6899_v50 = vpop.eup %6898 }
 0x1f8   : > { %6902 = vrsqrt.f32 %v1512_v42  ;;  %v1093_v12 = vadd.f32 %v8631_v40, %v1055_v56  ;;  %v1482_v18 = vmul.f32 0.03125, %v1396_v33  ;;  %v1056_v44 = vmul.f32 %v8617_v57, %v1018_v20  ;;  %13546 = vst [vmem:[#allocation97_spill] sm:$0xff] %v8661_v15  ;;  %v1710_v20 = vld [vmem:[#allocation2 + $0x8] sm:$0xff] }
 0x1f9   : > { %v1513_v37 = vadd.f32 1e-05, %v1481_v36  ;;  %13543 = vst [vmem:[#allocation94_spill] sm:$0xff] %v8644_v19  ;;  %v8657_v61 = vrot.slane %v8572_v45, %v8460_v52  ;;  %v1606_v27 = vmul.f32 %v8617_v57, %v1574_v49  ;;  %v8666_v33 = vrot.slane %v8572_v45, %v8509_v48  ;;  %v5864_v48 = vld [vmem:[#allocation3 + $0x1c8] sm:$0xff]  ;;  %v13597_v19 = vld [vmem:[#allocation44_spill] sm:$0xff] }
 0x1fa   : > { %v842_v42 = vpop.xlane.xlu1 %841  ;;  %1126 = vst.msk [vmem:[#allocation3 + $0xa0] sm:$0xff] %vm455_vm0, %v1093_v12  ;;  %v2112_v12 = vld [vmem:[#allocation2 + $0x20] sm:$0xff]  ;;  %v1094_v10 = vadd.f32 %v8631_v40, %v1056_v44  ;;  %v1575_v54 = vmul.f32 %v6897_v41, %v7788_v30  ;;  %v8674_v49 = vadd.f32 %v1946_v9, %v1745_v43  ;;  %v1704_v44 = vld [vmem:[%s12639_s4 + $0x8] sm:$0xff] }
 0x1fb   : > { %6904 = vrsqrt.f32 %v1513_v37  ;;  %v926_v36 = vmul.f32 0.03125, %v842_v42  ;;  %13545 = vst [vmem:[#allocation96_spill] sm:$0xff] %v8657_v61  ;;  %v1514_v37 = vadd.f32 1e-05, %v1482_v18  ;;  %13547 = vst [vmem:[#allocation98_spill] sm:$0xff] %v8666_v33  ;;  %v845_v56 = vpop.xlane.xlu0 %844  ;;  %v1638_v42 = vadd.f32 %v8631_v40, %v1606_v27 }
 0x1fc   : > { %6906 = vrsqrt.f32 %v957_v60  ;;  %v8672_v60 = vrot.slane %v8572_v45, %v8519_v7  ;;  %13549 = vst [vmem:[#allocation100_spill] sm:$0xff] %v8674_v49  ;;  %1127 = vst.msk [vmem:[#allocation3 + $0xa8] sm:$0xff] %vm455_vm0, %v1094_v10  ;;  %v1607_v30 = vmul.f32 %v8617_v57, %v1575_v54  ;;  %v927_v41 = vmul.f32 0.03125, %v845_v56  ;;  %v13573_v49 = vld [vmem:[#allocation28_spill] sm:$0xff]  ;;  %v8994_v61 = vld [vmem:[#allocation8] ss:$0 sm:$0xff] }
 0x1fd   : > { %v958_v39 = vadd.f32 1e-05, %v926_v36  ;;  %v1019_v36 = vmul.f32 %v6899_v50, %v8096_v55  ;;  %v8684_v7 = vmul.f32 %v8642_v24, %v2112_v12  ;;  %1671 = vst.msk [vmem:[#allocation2 + $0xa0] sm:$0xff] %vm455_vm0, %v1638_v42  ;;  %v8690_v27 = vrot.slane %v8572_v45, %v8528_v4  ;;  %v1911_v50 = vld [vmem:[#allocation2 + $0x18] sm:$0xff] }
 0x1fe   : > { %v1399_v11 = vpop.xlane.xlu1 %1398  ;;  %13548 = vst [vmem:[#allocation99_spill] sm:$0xff] %v8672_v60  ;;  %v959_v54 = vadd.f32 1e-05, %v927_v41  ;;  %v8698_v42 = vrot.slane %v1704_v44, %v8414_v2 }
 0x1ff   : > { %6908 = vrsqrt.f32 %v958_v39  ;;  %v1483_v18 = vmul.f32 0.03125, %v1399_v11  ;;  %13550 = vst [vmem:[#allocation101_spill] sm:$0xff] %v8684_v7  ;;  %v1057_v55 = vmul.f32 %v8617_v57, %v1019_v36  ;;  %13551 = vst [vmem:[#allocation102_spill] sm:$0xff] %v8690_v27  ;;  %v8693_v39 = vmul.f32 %v8598_v28, %v1710_v20  ;;  %v1402_v56 = vpop.xlane.xlu0 %1401  ;;  %v2113_v36 = vld [vmem:[#allocation2 + $0x28] sm:$0xff]  ;;  %v13585_v27 = vld [vmem:[#allocation36_spill] sm:$0xff] }
 0x200   : > { %6910 = vrsqrt.f32 %v1514_v37  ;;  %v1639_v37 = vadd.f32 %v8631_v40, %v1607_v30  ;;  %13553 = vst [vmem:[#allocation104_spill] sm:$0xff] %v8698_v42  ;;  %v1484_v30 = vmul.f32 0.03125, %v1402_v56 }
 0x201   : > { %v6901_v9 = vpop.eup %6900  ;;  %v1515_v43 = vadd.f32 1e-05, %v1483_v18  ;;  %13552 = vst [vmem:[#allocation103_spill] sm:$0xff] %v8693_v39  ;;  %v1095_v18 = vadd.f32 %v8631_v40, %v1057_v55  ;;  %v5459_v55 = vld [vmem:[#allocation3 + $0x1a0] sm:$0xff] }
 0x202   : > { %v6903_v10 = vpop.eup %6902  ;;  %v1020_v12 = vmul.f32 %v6901_v9, %v8100_v62  ;;  %v848_v11 = vpop.xlane.xlu1 %847  ;;  %1672 = vst.msk [vmem:[#allocation2 + $0xa8] sm:$0xff] %vm455_vm0, %v1639_v37  ;;  %v8705_v62 = vmul.f32 %v8602_v53, %v1911_v50  ;;  %v1516_v50 = vadd.f32 1e-05, %v1484_v30  ;;  %v8717_v56 = vld [vmem:[#allocation3 + $0xa0] sm:$0xff]  ;;  %v8727_v30 = vmul.f32 %v8629_v14, %v5459_v55 }
 0x203   : > { %v1576_v45 = vmul.f32 %v6903_v10, %v8112_v46  ;;  %6912 = vrsqrt.f32 %v1515_v43  ;;  %v928_v20 = vmul.f32 0.03125, %v848_v11  ;;  %1128 = vst.msk [vmem:[#allocation3 + $0xb0] sm:$0xff] %vm455_vm0, %v1095_v18  ;;  %v8710_v46 = vrot.slane %v1704_v44, %v8417_v51  ;;  %v851_v11 = vpop.xlane.xlu0 %850  ;;  %v5460_v18 = vld [vmem:[#allocation3 + $0x1a8] sm:$0xff]  ;;  %v5661_v51 = vld [vmem:[#allocation3 + $0x1b0] sm:$0xff] }
 0x204   : > { %v1058_v28 = vmul.f32 %v8617_v57, %v1020_v12  ;;  %6914 = vrsqrt.f32 %v959_v54  ;;  %13554 = vst [vmem:[#allocation105_spill] sm:$0xff] %v8705_v62  ;;  %v8713_v43 = vmul.f32 %v8642_v24, %v2113_v36  ;;  %13558 = vst [vmem:[#allocation109_spill] sm:$0xff] %v8727_v30  ;;  %v13579_v62 = vld [vmem:[#allocation32_spill] sm:$0xff] }
 0x205   : > { %v6905_v41 = vpop.eup %6904  ;;  %v1608_v9 = vmul.f32 %v8617_v57, %v1576_v45  ;;  %v960_v2 = vadd.f32 1e-05, %v928_v20  ;;  %13555 = vst [vmem:[#allocation106_spill] sm:$0xff] %v8710_v46  ;;  %v8720_v45 = vrot.slane %v1704_v44, %v8452_v8  ;;  %v8731_v8 = vld [vmem:[#allocation3 + $0xa8] sm:$0xff]  ;;  %v13606_v30 = vld [vmem:[#allocation52_spill] sm:$0xff] }
 0x206   : > { %13556 = vst [vmem:[#allocation107_spill] sm:$0xff] %v8713_v43  ;;  %v6907_v10 = vpop.eup %6906  ;;  %v1096_v37 = vadd.f32 %v8631_v40, %v1058_v28  ;;  %v1577_v12 = vmul.f32 %v6905_v41, %v8115_v47  ;;  %v1405_v54 = vpop.xlane.xlu1 %1404  ;;  %v929_v28 = vmul.f32 0.03125, %v851_v11  ;;  %v5662_v11 = vld [vmem:[#allocation3 + $0x1b8] sm:$0xff] }
 0x207   : > { %13557 = vst [vmem:[#allocation108_spill] sm:$0xff] %v8720_v45  ;;  %v1640_v20 = vadd.f32 %v8631_v40, %v1608_v9  ;;  %v1021_v53 = vmul.f32 %v6907_v10, %v8124_v1  ;;  %6916 = vrsqrt.f32 %v960_v2  ;;  %v1485_v36 = vmul.f32 0.03125, %v1405_v54  ;;  %v1408_v54 = vpop.xlane.xlu0 %1407 }
 0x208   : > { %1129 = vst.msk [vmem:[#allocation3 + $0xb8] sm:$0xff] %vm455_vm0, %v1096_v37  ;;  %v1609_v47 = vmul.f32 %v8617_v57, %v1577_v12  ;;  %6918 = vrsqrt.f32 %v1516_v50  ;;  %v2265_v1 = vmul.f32 %v8473_v6, %v8717_v56  ;;  %v8736_v2 = vmul.f32 %v8629_v14, %v5460_v18  ;;  %v5863_v18 = vld [vmem:[#allocation3 + $0x1c0] sm:$0xff] }
 0x209   : > { %v6909_v41 = vpop.eup %6908  ;;  %1673 = vst.msk [vmem:[#allocation2 + $0xb0] sm:$0xff] %vm455_vm0, %v1640_v20  ;;  %v1059_v44 = vmul.f32 %v8617_v57, %v1021_v53  ;;  %v1517_v9 = vadd.f32 1e-05, %v1485_v36  ;;  %v961_v12 = vadd.f32 1e-05, %v929_v28  ;;  %v8741_v53 = vmul.f32 %v8634_v26, %v5661_v51 }
 0x20a   : > { %13559 = vst [vmem:[#allocation110_spill] sm:$0xff] %v8736_v2  ;;  %v6911_v10 = vpop.eup %6910  ;;  %v1641_v37 = vadd.f32 %v8631_v40, %v1609_v47  ;;  %v1022_v55 = vmul.f32 %v6909_v41, %v8127_v13  ;;  %v854_v50 = vpop.xlane.xlu1 %853  ;;  %v1486_v13 = vmul.f32 0.03125, %v1408_v54  ;;  %v2266_v28 = vmul.f32 %v8473_v6, %v8731_v8  ;;  %v8757_v43 = vld [vmem:[#allocation3 + $0xb0] sm:$0xff] }
 0x20b   : > { %13560 = vst [vmem:[#allocation111_spill] sm:$0xff] %v8741_v53  ;;  %v1097_v20 = vadd.f32 %v8631_v40, %v1059_v44  ;;  %v1578_v36 = vmul.f32 %v6911_v10, %v8136_v63  ;;  %6920 = vrsqrt.f32 %v1517_v9  ;;  %v930_v4 = vmul.f32 0.03125, %v854_v50  ;;  %v857_v54 = vpop.xlane.xlu0 %856 }
 0x20c   : > { %1674 = vst.msk [vmem:[#allocation2 + $0xb8] sm:$0xff] %vm455_vm0, %v1641_v37  ;;  %v1060_v47 = vmul.f32 %v8617_v57, %v1022_v55  ;;  %6922 = vrsqrt.f32 %v961_v12  ;;  %v2297_v63 = vadd.f32 %v2265_v1, %v8561_v35  ;;  %v8753_v9 = vmul.f32 %v8634_v26, %v5662_v11 }
 0x20d   : > { %v6913_v41 = vpop.eup %6912  ;;  %1130 = vst.msk [vmem:[#allocation3 + $0xc0] sm:$0xff] %vm455_vm0, %v1097_v20  ;;  %v1610_v51 = vmul.f32 %v8617_v57, %v1578_v36  ;;  %v962_v44 = vadd.f32 1e-05, %v930_v4  ;;  %v1518_v12 = vadd.f32 1e-05, %v1486_v13  ;;  %v8760_v20 = vmul.f32 %v8638_v38, %v5863_v18 }
 0x20e   : > { %13561 = vst [vmem:[#allocation112_spill] sm:$0xff] %v8753_v9  ;;  %v6915_v10 = vpop.eup %6914  ;;  %v1098_v37 = vadd.f32 %v8631_v40, %v1060_v47  ;;  %v1579_v55 = vmul.f32 %v6913_v41, %v8139_v17  ;;  %v1411_v50 = vpop.xlane.xlu1 %1410  ;;  %v931_v17 = vmul.f32 0.03125, %v857_v54  ;;  %v2298_v36 = vadd.f32 %v2266_v28, %v8567_v59  ;;  %v13591_v9 = vld [vmem:[#allocation40_spill] sm:$0xff] }
 0x20f   : > { %13562 = vst [vmem:[#allocation113_spill] sm:$0xff] %v8760_v20  ;;  %v1642_v4 = vadd.f32 %v8631_v40, %v1610_v51  ;;  %v1023_v35 = vmul.f32 %v6915_v10, %v8148_v31  ;;  %6924 = vrsqrt.f32 %v962_v44  ;;  %v1487_v1 = vmul.f32 0.03125, %v1411_v50  ;;  %v8769_v41 = vld [vmem:[#allocation3 + $0xb8] sm:$0xff] }
 0x210   : > { %1131 = vst.msk [vmem:[#allocation3 + $0xc8] sm:$0xff] %vm455_vm0, %v1098_v37  ;;  %v1611_v11 = vmul.f32 %v8617_v57, %v1579_v55  ;;  %6926 = vrsqrt.f32 %v1518_v12  ;;  %v2467_v31 = vmul.f32 %v8484_v22, %v8757_v43  ;;  %v8774_v51 = vmul.f32 %v8638_v38, %v5864_v48  ;;  %v1414_v55 = vpop.xlane.xlu0 %1413 }
 0x211   : > { %v6917_v47 = vpop.eup %6916  ;;  %1675 = vst.msk [vmem:[#allocation2 + $0xc0] sm:$0xff] %vm455_vm0, %v1642_v4  ;;  %v1061_v18 = vmul.f32 %v8617_v57, %v1023_v35  ;;  %v1519_v13 = vadd.f32 1e-05, %v1487_v1  ;;  %v963_v59 = vadd.f32 1e-05, %v931_v17  ;;  %v3863_v12 = vmul.f32 %v8565_v32, %v8717_v56 }
 0x212   : > { %13563 = vst [vmem:[#allocation114_spill] sm:$0xff] %v8774_v51  ;;  %v6919_v44 = vpop.eup %6918  ;;  %v1643_v10 = vadd.f32 %v8631_v40, %v1611_v11  ;;  %v1024_v37 = vmul.f32 %v6917_v47, %v8151_v21  ;;  %v860_v28 = vpop.xlane.xlu1 %859  ;;  %v1488_v35 = vmul.f32 0.03125, %v1414_v55  ;;  %v2468_v21 = vmul.f32 %v8484_v22, %v8769_v41 }
 0x213   : > { %v1099_v50 = vadd.f32 %v8631_v40, %v1061_v18  ;;  %v1580_v54 = vmul.f32 %v6919_v44, %v8160_v0  ;;  %6928 = vrsqrt.f32 %v1519_v13  ;;  %v932_v4 = vmul.f32 0.03125, %v860_v28 }
 0x214   : > { %1676 = vst.msk [vmem:[#allocation2 + $0xc8] sm:$0xff] %vm455_vm0, %v1643_v10  ;;  %v1062_v48 = vmul.f32 %v8617_v57, %v1024_v37  ;;  %6930 = vrsqrt.f32 %v963_v59  ;;  %v2499_v17 = vadd.f32 %v2467_v31, %v2297_v63  ;;  %v3864_v0 = vmul.f32 %v8565_v32, %v8731_v8  ;;  %v863_v37 = vpop.xlane.xlu0 %862  ;;  %v8792_v59 = vld [vmem:[#allocation3 + $0xc0] sm:$0xff] }
 0x215   : > { %v6921_v1 = vpop.eup %6920  ;;  %1132 = vst.msk [vmem:[#allocation3 + $0xd0] sm:$0xff] %vm455_vm0, %v1099_v50  ;;  %v1612_v56 = vmul.f32 %v8617_v57, %v1580_v54  ;;  %v964_v11 = vadd.f32 1e-05, %v932_v4  ;;  %v1520_v44 = vadd.f32 1e-05, %v1488_v35  ;;  %v3895_v28 = vadd.f32 %v3863_v12, %v8578_v23 }
 0x216   : > { %v6923_v47 = vpop.eup %6922  ;;  %v1100_v18 = vadd.f32 %v8631_v40, %v1062_v48  ;;  %v1581_v13 = vmul.f32 %v6921_v1, %v8163_v25  ;;  %v1417_v10 = vpop.xlane.xlu1 %1416  ;;  %v933_v31 = vmul.f32 0.03125, %v863_v37  ;;  %v2500_v25 = vadd.f32 %v2468_v21, %v2298_v36 }
 0x217   : > { %v1644_v55 = vadd.f32 %v8631_v40, %v1612_v56  ;;  %v1025_v50 = vmul.f32 %v6923_v47, %v8172_v5  ;;  %6932 = vrsqrt.f32 %v964_v11  ;;  %v1489_v63 = vmul.f32 0.03125, %v1417_v10  ;;  %v8801_v23 = vld [vmem:[#allocation3 + $0xc8] sm:$0xff] }
 0x218   : > { %1133 = vst.msk [vmem:[#allocation3 + $0xd8] sm:$0xff] %vm455_vm0, %v1100_v18  ;;  %v1613_v8 = vmul.f32 %v8617_v57, %v1581_v13  ;;  %6934 = vrsqrt.f32 %v1520_v44  ;;  %v2669_v5 = vmul.f32 %v8505_v34, %v8792_v59  ;;  %v3896_v12 = vadd.f32 %v3864_v0, %v8587_v58  ;;  %v1420_v21 = vpop.xlane.xlu0 %1419  ;;  %v13564_v47 = vld [vmem:[#allocation79_spill] sm:$0xff]  ;;  %v13565_v44 = vld [vmem:[#allocation22_spill] sm:$0xff] }
 0x219   : > { %v6925_v54 = vpop.eup %6924  ;;  %1677 = vst.msk [vmem:[#allocation2 + $0xd0] sm:$0xff] %vm455_vm0, %v1644_v55  ;;  %v1063_v4 = vmul.f32 %v8617_v57, %v1025_v50  ;;  %v1521_v48 = vadd.f32 1e-05, %v1489_v63  ;;  %v965_v11 = vadd.f32 1e-05, %v933_v31  ;;  %v4065_v18 = vmul.f32 %v13564_v47, %v8757_v43 }
 0x21a   : > { %v6927_v35 = vpop.eup %6926  ;;  %v1645_v1 = vadd.f32 %v8631_v40, %v1613_v8  ;;  %v1026_v56 = vmul.f32 %v6925_v54, %v8175_v29  ;;  %v866_v36 = vpop.xlane.xlu1 %865  ;;  %v1490_v0 = vmul.f32 0.03125, %v1420_v21  ;;  %v2670_v29 = vmul.f32 %v8505_v34, %v8801_v23 }
 0x21b   : > { %v1101_v13 = vadd.f32 %v8631_v40, %v1063_v4  ;;  %v1582_v10 = vmul.f32 %v6927_v35, %v13565_v44  ;;  %6936 = vrsqrt.f32 %v1521_v48  ;;  %v934_v37 = vmul.f32 0.03125, %v866_v36  ;;  %v13566_v4 = vld [vmem:[#allocation23_spill] sm:$0xff] }
 0x21c   : > { %1678 = vst.msk [vmem:[#allocation2 + $0xd8] sm:$0xff] %vm455_vm0, %v1645_v1  ;;  %v1064_v58 = vmul.f32 %v8617_v57, %v1026_v56  ;;  %6938 = vrsqrt.f32 %v965_v11  ;;  %v2701_v63 = vadd.f32 %v2669_v5, %v2499_v17  ;;  %v4066_v8 = vmul.f32 %v13564_v47, %v8769_v41  ;;  %v869_v56 = vpop.xlane.xlu0 %868  ;;  %v8822_v11 = vld [vmem:[#allocation3 + $0xd0] sm:$0xff] }
 0x21d   : > { %v6929_v55 = vpop.eup %6928  ;;  %1134 = vst.msk [vmem:[#allocation3 + $0xe0] sm:$0xff] %vm455_vm0, %v1101_v13  ;;  %v1614_v43 = vmul.f32 %v8617_v57, %v1582_v10  ;;  %v966_v50 = vadd.f32 1e-05, %v934_v37  ;;  %v1522_v35 = vadd.f32 1e-05, %v1490_v0  ;;  %v4097_v36 = vadd.f32 %v4065_v18, %v3895_v28  ;;  %v13567_v13 = vld [vmem:[#allocation24_spill] sm:$0xff] }
 0x21e   : > { %v6931_v31 = vpop.eup %6930  ;;  %v1102_v54 = vadd.f32 %v8631_v40, %v1064_v58  ;;  %v1583_v48 = vmul.f32 %v6929_v55, %v13566_v4  ;;  %v1423_v1 = vpop.xlane.xlu1 %1422  ;;  %v935_v5 = vmul.f32 0.03125, %v869_v56  ;;  %v2702_v10 = vadd.f32 %v2670_v29, %v2500_v25  ;;  %v13568_v18 = vld [vmem:[#allocation71_spill] sm:$0xff]  ;;  %v13570_v29 = vld [vmem:[#allocation81_spill] sm:$0xff] }
 0x21f   : > { %v1646_v21 = vadd.f32 %v8631_v40, %v1614_v43  ;;  %v1027_v44 = vmul.f32 %v6931_v31, %v13567_v13  ;;  %6940 = vrsqrt.f32 %v966_v50  ;;  %v1491_v17 = vmul.f32 0.03125, %v1423_v1  ;;  %v8830_v28 = vld [vmem:[#allocation3 + $0xd8] sm:$0xff] }
 0x220   : > { %1135 = vst.msk [vmem:[#allocation3 + $0xe8] sm:$0xff] %vm455_vm0, %v1102_v54  ;;  %v1615_v41 = vmul.f32 %v8617_v57, %v1583_v48  ;;  %6942 = vrsqrt.f32 %v1522_v35  ;;  %v2871_v55 = vmul.f32 %v13568_v18, %v8822_v11  ;;  %v4098_v43 = vadd.f32 %v4066_v8, %v3896_v12  ;;  %v13569_v54 = vld [vmem:[#allocation25_spill] sm:$0xff]  ;;  %v1426_v25 = vpop.xlane.xlu0 %1425 }
 0x221   : > { %v6933_v37 = vpop.eup %6932  ;;  %1679 = vst.msk [vmem:[#allocation2 + $0xe0] sm:$0xff] %vm455_vm0, %v1646_v21  ;;  %v1065_v58 = vmul.f32 %v8617_v57, %v1027_v44  ;;  %v1523_v0 = vadd.f32 1e-05, %v1491_v17  ;;  %v967_v48 = vadd.f32 1e-05, %v935_v5  ;;  %v4267_v1 = vmul.f32 %v13570_v29, %v8792_v59  ;;  %v13571_v21 = vld [vmem:[#allocation26_spill] sm:$0xff] }
 0x222   : > { %v6935_v50 = vpop.eup %6934  ;;  %v1647_v31 = vadd.f32 %v8631_v40, %v1615_v41  ;;  %v1028_v4 = vmul.f32 %v6933_v37, %v13569_v54  ;;  %v872_v35 = vpop.xlane.xlu1 %871  ;;  %v1492_v8 = vmul.f32 0.03125, %v1426_v25  ;;  %v2872_v17 = vmul.f32 %v13568_v18, %v8830_v28  ;;  %v13572_v54 = vld [vmem:[#allocation27_spill] sm:$0xff] }
 0x223   : > { %v1103_v56 = vadd.f32 %v8631_v40, %v1065_v58  ;;  %v1584_v13 = vmul.f32 %v6935_v50, %v13571_v21  ;;  %6944 = vrsqrt.f32 %v1523_v0  ;;  %v936_v44 = vmul.f32 0.03125, %v872_v35 }
 0x224   : > { %1680 = vst.msk [vmem:[#allocation2 + $0xe8] sm:$0xff] %vm455_vm0, %v1647_v31  ;;  %v1066_v12 = vmul.f32 %v8617_v57, %v1028_v4  ;;  %6946 = vrsqrt.f32 %v967_v48  ;;  %v2903_v58 = vadd.f32 %v2871_v55, %v2701_v63  ;;  %v4268_v0 = vmul.f32 %v13570_v29, %v8801_v23  ;;  %v875_v25 = vpop.xlane.xlu0 %874  ;;  %v8850_v21 = vld [vmem:[#allocation3 + $0xe0] sm:$0xff] }
 0x225   : > { %v6937_v41 = vpop.eup %6936  ;;  %1136 = vst.msk [vmem:[#allocation3 + $0xf0] sm:$0xff] %vm455_vm0, %v1103_v56  ;;  %v1616_v5 = vmul.f32 %v8617_v57, %v1584_v13  ;;  %v968_v37 = vadd.f32 1e-05, %v936_v44  ;;  %v1524_v48 = vadd.f32 1e-05, %v1492_v8  ;;  %v4299_v7 = vadd.f32 %v4267_v1, %v4097_v36  ;;  %v13574_v1 = vld [vmem:[#allocation73_spill] sm:$0xff] }
 0x226   : > { %v6939_v50 = vpop.eup %6938  ;;  %v1104_v31 = vadd.f32 %v8631_v40, %v1066_v12  ;;  %v1585_v4 = vmul.f32 %v6937_v41, %v13572_v54  ;;  %v1429_v35 = vpop.xlane.xlu1 %1428  ;;  %v937_v44 = vmul.f32 0.03125, %v875_v25  ;;  %v2904_v12 = vadd.f32 %v2872_v17, %v2702_v10  ;;  %v13576_v17 = vld [vmem:[#allocation82_spill] sm:$0xff] }
 0x227   : > { %v1648_v56 = vadd.f32 %v8631_v40, %v1616_v5  ;;  %v1029_v13 = vmul.f32 %v6939_v50, %v13573_v49  ;;  %6948 = vrsqrt.f32 %v968_v37  ;;  %v1493_v63 = vmul.f32 0.03125, %v1429_v35  ;;  %v8858_v36 = vld [vmem:[#allocation3 + $0xe8] sm:$0xff] }
 0x228   : > { %1137 = vst.msk [vmem:[#allocation3 + $0xf8] sm:$0xff] %vm455_vm0, %v1104_v31  ;;  %v1617_v55 = vmul.f32 %v8617_v57, %v1585_v4  ;;  %6950 = vrsqrt.f32 %v1524_v48  ;;  %v3073_v49 = vmul.f32 %v13574_v1, %v8850_v21  ;;  %v4300_v5 = vadd.f32 %v4268_v0, %v4098_v43  ;;  %v13575_v31 = vld [vmem:[#allocation29_spill] sm:$0xff]  ;;  %v1432_v10 = vpop.xlane.xlu0 %1431 }
 0x229   : > { %v6941_v41 = vpop.eup %6940  ;;  %1681 = vst.msk [vmem:[#allocation2 + $0xf0] sm:$0xff] %vm455_vm0, %v1648_v56  ;;  %v1067_v8 = vmul.f32 %v8617_v57, %v1029_v13  ;;  %v1525_v54 = vadd.f32 1e-05, %v1493_v63  ;;  %v969_v48 = vadd.f32 1e-05, %v937_v44  ;;  %v4469_v25 = vmul.f32 %v13576_v17, %v8822_v11  ;;  %v13577_v13 = vld [vmem:[#allocation30_spill] sm:$0xff] }
 0x22a   : > { %v6943_v37 = vpop.eup %6942  ;;  %v1649_v50 = vadd.f32 %v8631_v40, %v1617_v55  ;;  %v1030_v4 = vmul.f32 %v6941_v41, %v13575_v31  ;;  %v878_v35 = vpop.xlane.xlu1 %877  ;;  %v1494_v0 = vmul.f32 0.03125, %v1432_v10  ;;  %v3074_v55 = vmul.f32 %v13574_v1, %v8858_v36 }
 0x22b   : > { %v1105_v56 = vadd.f32 %v8631_v40, %v1067_v8  ;;  %v1586_v63 = vmul.f32 %v6943_v37, %v13577_v13  ;;  %6952 = vrsqrt.f32 %v1525_v54  ;;  %v938_v3 = vmul.f32 0.03125, %v878_v35  ;;  %v13578_v35 = vld [vmem:[#allocation31_spill] sm:$0xff] }
 0x22c   : > { %1682 = vst.msk [vmem:[#allocation2 + $0xf8] sm:$0xff] %vm455_vm0, %v1649_v50  ;;  %v1068_v43 = vmul.f32 %v8617_v57, %v1030_v4  ;;  %6954 = vrsqrt.f32 %v969_v48  ;;  %v3105_v8 = vadd.f32 %v3073_v49, %v2903_v58  ;;  %v4470_v54 = vmul.f32 %v13576_v17, %v8830_v28  ;;  %v881_v13 = vpop.xlane.xlu0 %880  ;;  %v8878_v52 = vld [vmem:[#allocation3 + $0xf0] sm:$0xff] }
 0x22d   : > { %v6945_v44 = vpop.eup %6944  ;;  %1138 = vst.msk [vmem:[#allocation3 + $0x100] sm:$0xff] %vm455_vm0, %v1105_v56  ;;  %v1618_v41 = vmul.f32 %v8617_v57, %v1586_v63  ;;  %v970_v31 = vadd.f32 1e-05, %v938_v3  ;;  %v1526_v48 = vadd.f32 1e-05, %v1494_v0  ;;  %v4501_v45 = vadd.f32 %v4469_v25, %v4299_v7  ;;  %v13580_v25 = vld [vmem:[#allocation75_spill] sm:$0xff] }
 0x22e   : > { %v6947_v37 = vpop.eup %6946  ;;  %v1106_v50 = vadd.f32 %v8631_v40, %v1068_v43  ;;  %v1587_v4 = vmul.f32 %v6945_v44, %v13578_v35  ;;  %v1435_v10 = vpop.xlane.xlu1 %1434  ;;  %v939_v49 = vmul.f32 0.03125, %v881_v13  ;;  %v3106_v43 = vadd.f32 %v3074_v55, %v2904_v12  ;;  %v13582_v55 = vld [vmem:[#allocation86_spill] sm:$0xff] }
 0x22f   : > { %v1650_v56 = vadd.f32 %v8631_v40, %v1618_v41  ;;  %v1031_v63 = vmul.f32 %v6947_v37, %v13579_v62  ;;  %6956 = vrsqrt.f32 %v970_v31  ;;  %v1495_v3 = vmul.f32 0.03125, %v1435_v10  ;;  %v8886_v7 = vld [vmem:[#allocation3 + $0xf8] sm:$0xff] }
 0x230   : > { %1139 = vst.msk [vmem:[#allocation3 + $0x108] sm:$0xff] %vm455_vm0, %v1106_v50  ;;  %v1619_v58 = vmul.f32 %v8617_v57, %v1587_v4  ;;  %6958 = vrsqrt.f32 %v1526_v48  ;;  %v3275_v62 = vmul.f32 %v13580_v25, %v8878_v52  ;;  %v4502_v41 = vadd.f32 %v4470_v54, %v4300_v5  ;;  %v13581_v50 = vld [vmem:[#allocation33_spill] sm:$0xff]  ;;  %v1438_v12 = vpop.xlane.xlu0 %1437 }
 0x231   : > { %v6949_v44 = vpop.eup %6948  ;;  %1683 = vst.msk [vmem:[#allocation2 + $0x100] sm:$0xff] %vm455_vm0, %v1650_v56  ;;  %v1069_v0 = vmul.f32 %v8617_v57, %v1031_v63  ;;  %v1527_v35 = vadd.f32 1e-05, %v1495_v3  ;;  %v971_v48 = vadd.f32 1e-05, %v939_v49  ;;  %v4671_v13 = vmul.f32 %v13582_v55, %v8850_v21  ;;  %v13583_v63 = vld [vmem:[#allocation34_spill] sm:$0xff] }
 0x232   : > { %v6951_v31 = vpop.eup %6950  ;;  %v1651_v37 = vadd.f32 %v8631_v40, %v1619_v58  ;;  %v1032_v4 = vmul.f32 %v6949_v44, %v13581_v50  ;;  %v884_v10 = vpop.xlane.xlu1 %883  ;;  %v1496_v54 = vmul.f32 0.03125, %v1438_v12  ;;  %v3276_v58 = vmul.f32 %v13580_v25, %v8886_v7 }
 0x233   : > { %v1107_v56 = vadd.f32 %v8631_v40, %v1069_v0  ;;  %v1588_v3 = vmul.f32 %v6951_v31, %v13583_v63  ;;  %6960 = vrsqrt.f32 %v1527_v35  ;;  %v940_v39 = vmul.f32 0.03125, %v884_v10  ;;  %v13584_v10 = vld [vmem:[#allocation35_spill] sm:$0xff] }
 0x234   : > { %1684 = vst.msk [vmem:[#allocation2 + $0x108] sm:$0xff] %vm455_vm0, %v1651_v37  ;;  %v1070_v5 = vmul.f32 %v8617_v57, %v1032_v4  ;;  %6962 = vrsqrt.f32 %v971_v48  ;;  %v3307_v0 = vadd.f32 %v3275_v62, %v3105_v8  ;;  %v4672_v35 = vmul.f32 %v13582_v55, %v8858_v36  ;;  %v887_v63 = vpop.xlane.xlu0 %886  ;;  %v8906_v46 = vld [vmem:[#allocation3 + $0x100] sm:$0xff] }
 0x235   : > { %v6953_v49 = vpop.eup %6952  ;;  %1140 = vst.msk [vmem:[#allocation3 + $0x110] sm:$0xff] %vm455_vm0, %v1107_v56  ;;  %v1620_v44 = vmul.f32 %v8617_v57, %v1588_v3  ;;  %v972_v50 = vadd.f32 1e-05, %v940_v39  ;;  %v1528_v48 = vadd.f32 1e-05, %v1496_v54  ;;  %v4703_v42 = vadd.f32 %v4671_v13, %v4501_v45  ;;  %v13586_v13 = vld [vmem:[#allocation76_spill] sm:$0xff] }
 0x236   : > { %v6955_v31 = vpop.eup %6954  ;;  %v1108_v37 = vadd.f32 %v8631_v40, %v1070_v5  ;;  %v1589_v4 = vmul.f32 %v6953_v49, %v13584_v10  ;;  %v1441_v12 = vpop.xlane.xlu1 %1440  ;;  %v941_v62 = vmul.f32 0.03125, %v887_v63  ;;  %v3308_v5 = vadd.f32 %v3276_v58, %v3106_v43  ;;  %v13588_v58 = vld [vmem:[#allocation87_spill] sm:$0xff] }
 0x237   : > { %v1652_v56 = vadd.f32 %v8631_v40, %v1620_v44  ;;  %v1033_v3 = vmul.f32 %v6955_v31, %v13585_v27  ;;  %6964 = vrsqrt.f32 %v972_v50  ;;  %v1497_v39 = vmul.f32 0.03125, %v1441_v12  ;;  %v8914_v45 = vld [vmem:[#allocation3 + $0x108] sm:$0xff] }
 0x238   : > { %1141 = vst.msk [vmem:[#allocation3 + $0x118] sm:$0xff] %vm455_vm0, %v1108_v37  ;;  %v1621_v8 = vmul.f32 %v8617_v57, %v1589_v4  ;;  %6966 = vrsqrt.f32 %v1528_v48  ;;  %v3477_v27 = vmul.f32 %v13586_v13, %v8906_v46  ;;  %v4704_v44 = vadd.f32 %v4672_v35, %v4502_v41  ;;  %v13587_v37 = vld [vmem:[#allocation37_spill] sm:$0xff]  ;;  %v1444_v43 = vpop.xlane.xlu0 %1443 }
 0x239   : > { %v6957_v49 = vpop.eup %6956  ;;  %1685 = vst.msk [vmem:[#allocation2 + $0x110] sm:$0xff] %vm455_vm0, %v1652_v56  ;;  %v1071_v54 = vmul.f32 %v8617_v57, %v1033_v3  ;;  %v1529_v10 = vadd.f32 1e-05, %v1497_v39  ;;  %v973_v48 = vadd.f32 1e-05, %v941_v62  ;;  %v4873_v63 = vmul.f32 %v13588_v58, %v8878_v52  ;;  %v13589_v3 = vld [vmem:[#allocation38_spill] sm:$0xff] }
 0x23a   : > { %v6959_v50 = vpop.eup %6958  ;;  %v1653_v31 = vadd.f32 %v8631_v40, %v1621_v8  ;;  %v1034_v4 = vmul.f32 %v6957_v49, %v13587_v37  ;;  %v890_v12 = vpop.xlane.xlu1 %889  ;;  %v1498_v35 = vmul.f32 0.03125, %v1444_v43  ;;  %v3478_v8 = vmul.f32 %v13586_v13, %v8914_v45 }
 0x23b   : > { %v1109_v56 = vadd.f32 %v8631_v40, %v1071_v54  ;;  %v1590_v39 = vmul.f32 %v6959_v50, %v13589_v3  ;;  %6968 = vrsqrt.f32 %v1529_v10  ;;  %v942_v60 = vmul.f32 0.03125, %v890_v12  ;;  %v13590_v12 = vld [vmem:[#allocation39_spill] sm:$0xff] }
 0x23c   : > { %1686 = vst.msk [vmem:[#allocation2 + $0x118] sm:$0xff] %vm455_vm0, %v1653_v31  ;;  %v1072_v41 = vmul.f32 %v8617_v57, %v1034_v4  ;;  %6970 = vrsqrt.f32 %v973_v48  ;;  %v3509_v54 = vadd.f32 %v3477_v27, %v3307_v0  ;;  %v4874_v10 = vmul.f32 %v13588_v58, %v8886_v7  ;;  %v893_v3 = vpop.xlane.xlu0 %892  ;;  %v8934_v51 = vld [vmem:[#allocation3 + $0x110] sm:$0xff] }
 0x23d   : > { %v6961_v62 = vpop.eup %6960  ;;  %1142 = vst.msk [vmem:[#allocation3 + $0x120] sm:$0xff] %vm455_vm0, %v1109_v56  ;;  %v1622_v49 = vmul.f32 %v8617_v57, %v1590_v39  ;;  %v974_v37 = vadd.f32 1e-05, %v942_v60  ;;  %v1530_v48 = vadd.f32 1e-05, %v1498_v35  ;;  %v4905_v33 = vadd.f32 %v4873_v63, %v4703_v42  ;;  %v13592_v63 = vld [vmem:[#allocation77_spill] sm:$0xff] }
 0x23e   : > { %v6963_v50 = vpop.eup %6962  ;;  %v1110_v31 = vadd.f32 %v8631_v40, %v1072_v41  ;;  %v1591_v4 = vmul.f32 %v6961_v62, %v13590_v12  ;;  %v1447_v43 = vpop.xlane.xlu1 %1446  ;;  %v943_v27 = vmul.f32 0.03125, %v893_v3  ;;  %v3510_v41 = vadd.f32 %v3478_v8, %v3308_v5  ;;  %v13594_v8 = vld [vmem:[#allocation88_spill] sm:$0xff] }
 0x23f   : > { %v1654_v56 = vadd.f32 %v8631_v40, %v1622_v49  ;;  %v1035_v39 = vmul.f32 %v6963_v50, %v13591_v9  ;;  %6972 = vrsqrt.f32 %v974_v37  ;;  %v1499_v60 = vmul.f32 0.03125, %v1447_v43  ;;  %v8942_v42 = vld [vmem:[#allocation3 + $0x118] sm:$0xff] }
 0x240   : > { %1143 = vst.msk [vmem:[#allocation3 + $0x128] sm:$0xff] %vm455_vm0, %v1110_v31  ;;  %v1623_v0 = vmul.f32 %v8617_v57, %v1591_v4  ;;  %6974 = vrsqrt.f32 %v1530_v48  ;;  %v3679_v9 = vmul.f32 %v13592_v63, %v8934_v51  ;;  %v4906_v49 = vadd.f32 %v4874_v10, %v4704_v44  ;;  %v13593_v31 = vld [vmem:[#allocation41_spill] sm:$0xff]  ;;  %v1450_v5 = vpop.xlane.xlu0 %1449 }
 0x241   : > { %v6965_v62 = vpop.eup %6964  ;;  %1687 = vst.msk [vmem:[#allocation2 + $0x120] sm:$0xff] %vm455_vm0, %v1654_v56  ;;  %v1073_v35 = vmul.f32 %v8617_v57, %v1035_v39  ;;  %v1531_v12 = vadd.f32 1e-05, %v1499_v60  ;;  %v975_v48 = vadd.f32 1e-05, %v943_v27  ;;  %v5075_v3 = vmul.f32 %v13594_v8, %v8906_v46  ;;  %v13595_v39 = vld [vmem:[#allocation42_spill] sm:$0xff] }
 0x242   : > { %v6967_v37 = vpop.eup %6966  ;;  %v1655_v50 = vadd.f32 %v8631_v40, %v1623_v0  ;;  %v1036_v4 = vmul.f32 %v6965_v62, %v13593_v31  ;;  %v896_v43 = vpop.xlane.xlu1 %895  ;;  %v1500_v10 = vmul.f32 0.03125, %v1450_v5  ;;  %v3680_v0 = vmul.f32 %v13592_v63, %v8942_v42 }
 0x243   : > { %v1111_v56 = vadd.f32 %v8631_v40, %v1073_v35  ;;  %v1592_v60 = vmul.f32 %v6967_v37, %v13595_v39  ;;  %6976 = vrsqrt.f32 %v1531_v12  ;;  %v944_v15 = vmul.f32 0.03125, %v896_v43  ;;  %v13596_v43 = vld [vmem:[#allocation43_spill] sm:$0xff] }
 0x244   : > { %1688 = vst.msk [vmem:[#allocation2 + $0x128] sm:$0xff] %vm455_vm0, %v1655_v50  ;;  %v1074_v44 = vmul.f32 %v8617_v57, %v1036_v4  ;;  %6978 = vrsqrt.f32 %v975_v48  ;;  %v3711_v35 = vadd.f32 %v3679_v9, %v3509_v54  ;;  %v5076_v12 = vmul.f32 %v13594_v8, %v8914_v45  ;;  %v899_v39 = vpop.xlane.xlu0 %898  ;;  %v8962_v16 = vld [vmem:[#allocation3 + $0x120] sm:$0xff] }
 0x245   : > { %v6969_v27 = vpop.eup %6968  ;;  %1144 = vst.msk [vmem:[#allocation3 + $0x130] sm:$0xff] %vm455_vm0, %v1111_v56  ;;  %v1624_v62 = vmul.f32 %v8617_v57, %v1592_v60  ;;  %v976_v31 = vadd.f32 1e-05, %v944_v15  ;;  %v1532_v48 = vadd.f32 1e-05, %v1500_v10  ;;  %v5107_v20 = vadd.f32 %v5075_v3, %v4905_v33 }
 0x246   : > { %v6971_v37 = vpop.eup %6970  ;;  %v1112_v50 = vadd.f32 %v8631_v40, %v1074_v44  ;;  %v1593_v4 = vmul.f32 %v6969_v27, %v13596_v43  ;;  %v1453_v5 = vpop.xlane.xlu1 %1452  ;;  %v945_v9 = vmul.f32 0.03125, %v899_v39  ;;  %v3712_v44 = vadd.f32 %v3680_v0, %v3510_v41  ;;  %v13599_v0 = vld [vmem:[#allocation89_spill] sm:$0xff] }
 0x247   : > { %v1656_v56 = vadd.f32 %v8631_v40, %v1624_v62  ;;  %v1037_v60 = vmul.f32 %v6971_v37, %v13597_v19  ;;  %6980 = vrsqrt.f32 %v976_v31  ;;  %v1501_v15 = vmul.f32 0.03125, %v1453_v5  ;;  %v8970_v33 = vld [vmem:[#allocation3 + $0x128] sm:$0xff]  ;;  %v13598_v37 = vld [vmem:[#allocation45_spill] sm:$0xff] }
 0x248   : > { %1145 = vst.msk [vmem:[#allocation3 + $0x138] sm:$0xff] %vm455_vm0, %v1112_v50  ;;  %v1625_v54 = vmul.f32 %v8617_v57, %v1593_v4  ;;  %6982 = vrsqrt.f32 %v1532_v48  ;;  %v3879_v19 = vmul.f32 %v8565_v32, %v8962_v16  ;;  %v5108_v3 = vadd.f32 %v5076_v12, %v4906_v49  ;;  %v1456_v41 = vpop.xlane.xlu0 %1455 }
 0x249   : > { %v6973_v27 = vpop.eup %6972  ;;  %1689 = vst.msk [vmem:[#allocation2 + $0x130] sm:$0xff] %vm455_vm0, %v1656_v56  ;;  %v1075_v10 = vmul.f32 %v8617_v57, %v1037_v60  ;;  %v1533_v43 = vadd.f32 1e-05, %v1501_v15  ;;  %v977_v4 = vadd.f32 1e-05, %v945_v9  ;;  %v5277_v5 = vmul.f32 %v13599_v0, %v8934_v51  ;;  %v13600_v56 = vld [vmem:[#allocation46_spill] sm:$0xff] }
 0x24a   : > { %v6975_v62 = vpop.eup %6974  ;;  %v1657_v31 = vadd.f32 %v8631_v40, %v1625_v54  ;;  %v1038_v50 = vmul.f32 %v6973_v27, %v13598_v37  ;;  %v902_v48 = vpop.xlane.xlu1 %901  ;;  %v1502_v12 = vmul.f32 0.03125, %v1456_v41  ;;  %v3880_v54 = vmul.f32 %v8565_v32, %v8970_v33  ;;  %v8985_v27 = vld [vmem:[#allocation6] ss:$0 sm:$0xff] }
 0x24b   : > { %v1113_v39 = vadd.f32 %v8631_v40, %v1075_v10  ;;  %v1594_v60 = vmul.f32 %v6975_v62, %v13600_v56  ;;  %6984 = vrsqrt.f32 %v1533_v43  ;;  %v946_v15 = vmul.f32 0.03125, %v902_v48 }
 0x24c   : > { %1690 = vst.msk [vmem:[#allocation2 + $0x138] sm:$0xff] %vm455_vm0, %v1657_v31  ;;  %v1076_v49 = vmul.f32 %v8617_v57, %v1038_v50  ;;  %6986 = vrsqrt.f32 %v977_v4  ;;  %v3911_v62 = vadd.f32 %v3879_v19, %v3711_v35  ;;  %v5278_v43 = vmul.f32 %v13599_v0, %v8942_v42  ;;  %v13601_v50 = vld [vmem:[#allocation47_spill] sm:$0xff]  ;;  %v905_v56 = vpop.xlane.xlu0 %904 }
 0x24d   : > { %v6977_v9 = vpop.eup %6976  ;;  %1146 = vst.msk [vmem:[#allocation3 + $0x140] sm:$0xff] %vm455_vm0, %v1113_v39  ;;  %v1626_v10 = vmul.f32 %v8985_v27, %v1594_v60  ;;  %v978_v37 = vadd.f32 1e-05, %v946_v15  ;;  %v1534_v48 = vadd.f32 1e-05, %v1502_v12  ;;  %v8992_v2 = vld [vmem:[#allocation3 + $0x130] sm:$0xff]  ;;  %v5309_v39 = vadd.f32 %v5277_v5, %v5107_v20 }
 0x24e   : > { %v6979_v31 = vpop.eup %6978  ;;  %v1114_v57 = vadd.f32 %v8631_v40, %v1076_v49  ;;  %v1595_v4 = vmul.f32 %v6977_v9, %v13601_v50  ;;  %v1459_v41 = vpop.xlane.xlu1 %1458  ;;  %v13602_v15 = vld [vmem:[#allocation48_spill] sm:$0xff]  ;;  %v947_v49 = vmul.f32 0.03125, %v905_v56  ;;  %v3912_v12 = vadd.f32 %v3880_v54, %v3712_v44  ;;  %v13621_v0 = vld [vmem:[#allocation83_spill] sm:$0xff] }
 0x24f   : > { %v1658_v60 = vadd.f32 %v8994_v61, %v1626_v10  ;;  %v1039_v35 = vmul.f32 %v6979_v31, %v13602_v15  ;;  %6988 = vrsqrt.f32 %v978_v37  ;;  %v1503_v19 = vmul.f32 0.03125, %v1459_v41  ;;  %v9002_v50 = vld [vmem:[#allocation3 + $0x138] sm:$0xff]  ;;  %v13604_v15 = vld [vmem:[#allocation50_spill] sm:$0xff] }
 0x250   : > { %1147 = vst.msk [vmem:[#allocation3 + $0x148] sm:$0xff] %vm455_vm0, %v1114_v57  ;;  %v1627_v40 = vmul.f32 %v8985_v27, %v1595_v4  ;;  %6990 = vrsqrt.f32 %v1534_v48  ;;  %v4081_v10 = vmul.f32 %v13564_v47, %v8992_v2  ;;  %v5310_v37 = vadd.f32 %v5278_v43, %v5108_v3  ;;  %v13603_v41 = vld [vmem:[#allocation49_spill] sm:$0xff]  ;;  %v1462_v44 = vpop.xlane.xlu0 %1461 }
 0x251   : > { %v6981_v9 = vpop.eup %6980  ;;  %1691 = vst.msk [vmem:[#allocation2 + $0x140] sm:$0xff] %vm455_vm0, %v1658_v60  ;;  %v1077_v20 = vmul.f32 %v8985_v27, %v1039_v35  ;;  %v1535_v5 = vadd.f32 1e-05, %v1503_v19  ;;  %v979_v48 = vadd.f32 1e-05, %v947_v49  ;;  %v5479_v54 = vmul.f32 %v8629_v14, %v8962_v16 }
 0x252   : > { %v6983_v31 = vpop.eup %6982  ;;  %v1659_v57 = vadd.f32 %v8994_v61, %v1627_v40  ;;  %v1040_v4 = vmul.f32 %v6981_v9, %v13603_v41  ;;  %v908_v56 = vpop.xlane.xlu1 %907  ;;  %v1504_v43 = vmul.f32 0.03125, %v1462_v44  ;;  %v4082_v40 = vmul.f32 %v13564_v47, %v9002_v50 }
 0x253   : > { %v1115_v60 = vadd.f32 %v8994_v61, %v1077_v20  ;;  %v1596_v35 = vmul.f32 %v6983_v31, %v13604_v15  ;;  %6992 = vrsqrt.f32 %v1535_v5  ;;  %v948_v19 = vmul.f32 0.03125, %v908_v56  ;;  %v13605_v56 = vld [vmem:[#allocation51_spill] sm:$0xff] }
 0x254   : > { %1692 = vst.msk [vmem:[#allocation2 + $0x148] sm:$0xff] %vm455_vm0, %v1659_v57  ;;  %v1078_v3 = vmul.f32 %v8985_v27, %v1040_v4  ;;  %6994 = vrsqrt.f32 %v979_v48  ;;  %v4113_v20 = vadd.f32 %v4081_v10, %v3911_v62  ;;  %v5480_v5 = vmul.f32 %v8629_v14, %v8970_v33  ;;  %v911_v15 = vpop.xlane.xlu0 %910  ;;  %v9022_v53 = vld [vmem:[#allocation3 + $0x140] sm:$0xff] }
 0x255   : > { %v6985_v49 = vpop.eup %6984  ;;  %1148 = vst.msk [vmem:[#allocation3 + $0x150] sm:$0xff] %vm455_vm0, %v1115_v60  ;;  %v1628_v9 = vmul.f32 %v8985_v27, %v1596_v35  ;;  %v980_v41 = vadd.f32 1e-05, %v948_v19  ;;  %v1536_v48 = vadd.f32 1e-05, %v1504_v43  ;;  %v5511_v24 = vadd.f32 %v5479_v54, %v5309_v39 }
 0x256   : > { %v6987_v31 = vpop.eup %6986  ;;  %v1116_v57 = vadd.f32 %v8994_v61, %v1078_v3  ;;  %v1597_v4 = vmul.f32 %v6985_v49, %v13605_v56  ;;  %v1465_v44 = vpop.xlane.xlu1 %1464  ;;  %v949_v19 = vmul.f32 0.03125, %v911_v15  ;;  %v4114_v3 = vadd.f32 %v4082_v40, %v3912_v12  ;;  %v13608_v15 = vld [vmem:[#allocation14_spill] sm:$0xff] }
 0x257   : > { %v1660_v60 = vadd.f32 %v8994_v61, %v1628_v9  ;;  %v1041_v35 = vmul.f32 %v6987_v31, %v13606_v30  ;;  %6996 = vrsqrt.f32 %v980_v41  ;;  %v1505_v62 = vmul.f32 0.03125, %v1465_v44  ;;  %v9030_v39 = vld [vmem:[#allocation3 + $0x148] sm:$0xff]  ;;  %v13607_v31 = vld [vmem:[#allocation53_spill] sm:$0xff] }
 0x258   : > { %1149 = vst.msk [vmem:[#allocation3 + $0x158] sm:$0xff] %vm455_vm0, %v1116_v57  ;;  %v1629_v10 = vmul.f32 %v8985_v27, %v1597_v4  ;;  %6998 = vrsqrt.f32 %v1536_v48  ;;  %v4283_v30 = vmul.f32 %v13570_v29, %v9022_v53  ;;  %v5512_v54 = vadd.f32 %v5480_v5, %v5310_v37  ;;  %v1468_v12 = vpop.xlane.xlu0 %1467 }
 0x259   : > { %v6989_v49 = vpop.eup %6988  ;;  %1693 = vst.msk [vmem:[#allocation2 + $0x150] sm:$0xff] %vm455_vm0, %v1660_v60  ;;  %v1079_v43 = vmul.f32 %v8985_v27, %v1041_v35  ;;  %v1537_v56 = vadd.f32 1e-05, %v1505_v62  ;;  %v981_v4 = vadd.f32 1e-05, %v949_v19  ;;  %v5681_v40 = vmul.f32 %v8634_v26, %v8992_v2 }
 0x25a   : > { %v6991_v9 = vpop.eup %6990  ;;  %v1661_v41 = vadd.f32 %v8994_v61, %v1629_v10  ;;  %v1042_v57 = vmul.f32 %v6989_v49, %v13607_v31  ;;  %v914_v48 = vpop.xlane.xlu1 %913  ;;  %v1506_v5 = vmul.f32 0.03125, %v1468_v12  ;;  %v4284_v62 = vmul.f32 %v13570_v29, %v9030_v39  ;;  %v13609_v31 = vld [vmem:[#allocation15_spill] sm:$0xff] }
 0x25b   : > { %v1117_v44 = vadd.f32 %v8994_v61, %v1079_v43  ;;  %v1598_v60 = vmul.f32 %v6991_v9, %v13608_v15  ;;  %7000 = vrsqrt.f32 %v1537_v56  ;;  %v950_v35 = vmul.f32 0.03125, %v914_v48 }
 0x25c   : > { %1694 = vst.msk [vmem:[#allocation2 + $0x158] sm:$0xff] %vm455_vm0, %v1661_v41  ;;  %v1080_v37 = vmul.f32 %v8985_v27, %v1042_v57  ;;  %7002 = vrsqrt.f32 %v981_v4  ;;  %v4315_v43 = vadd.f32 %v4283_v30, %v4113_v20  ;;  %v5682_v56 = vmul.f32 %v8634_v26, %v9002_v50  ;;  %v917_v12 = vpop.xlane.xlu0 %916  ;;  %v9050_v15 = vld [vmem:[#allocation3 + $0x150] sm:$0xff] }
 0x25d   : > { %v6993_v10 = vpop.eup %6992  ;;  %1150 = vst.msk [vmem:[#allocation3 + $0x160] sm:$0xff] %vm455_vm0, %v1117_v44  ;;  %v1630_v19 = vmul.f32 %v8985_v27, %v1598_v60  ;;  %v982_v49 = vadd.f32 1e-05, %v950_v35  ;;  %v1538_v4 = vadd.f32 1e-05, %v1506_v5  ;;  %v9052_v14 = vadd.f32 %v5681_v40, %v5511_v24  ;;  %v13610_v60 = vld [vmem:[#allocation16_spill] sm:$0xff] }
 0x25e   : > { %v6995_v9 = vpop.eup %6994  ;;  %v1118_v41 = vadd.f32 %v8994_v61, %v1080_v37  ;;  %v1599_v57 = vmul.f32 %v6993_v10, %v13609_v31  ;;  %v1471_v48 = vpop.xlane.xlu1 %1470  ;;  %v951_v37 = vmul.f32 0.03125, %v917_v12  ;;  %v4316_v10 = vadd.f32 %v4284_v62, %v4114_v3 }
 0x25f   : > { %v1662_v44 = vadd.f32 %v8994_v61, %v1630_v19  ;;  %v1043_v35 = vmul.f32 %v6995_v9, %v13610_v60  ;;  %7004 = vrsqrt.f32 %v982_v49  ;;  %v1507_v20 = vmul.f32 0.03125, %v1471_v48  ;;  %v9060_v40 = vld [vmem:[#allocation3 + $0x158] sm:$0xff]  ;;  %v13613_v60 = vld [vmem:[#allocation18_spill] sm:$0xff] }
 0x260   : > { %1151 = vst.msk [vmem:[#allocation3 + $0x168] sm:$0xff] %vm455_vm0, %v1118_v41  ;;  %v1631_v30 = vmul.f32 %v8985_v27, %v1599_v57  ;;  %7006 = vrsqrt.f32 %v1538_v4  ;;  %13611 = vst [vmem:[#allocation22_spill] sm:$0xff] %v9060_v40  ;;  %v4485_v19 = vmul.f32 %v13576_v17, %v9050_v15  ;;  %v9064_v49 = vadd.f32 %v5682_v56, %v5512_v54  ;;  %v13612_v57 = vld [vmem:[#allocation17_spill] sm:$0xff]  ;;  %v1474_v62 = vpop.xlane.xlu0 %1473 }
 0x261   : > { %v6997_v5 = vpop.eup %6996  ;;  %1695 = vst.msk [vmem:[#allocation2 + $0x160] sm:$0xff] %vm455_vm0, %v1662_v44  ;;  %v1081_v31 = vmul.f32 %v8985_v27, %v1043_v35  ;;  %v1539_v24 = vadd.f32 1e-05, %v1507_v20  ;;  %v983_v48 = vadd.f32 1e-05, %v951_v37  ;;  %v9070_v12 = vmul.f32 %v8638_v38, %v9022_v53 }
 0x262   : > { %v6999_v9 = vpop.eup %6998  ;;  %v1663_v41 = vadd.f32 %v8994_v61, %v1631_v30  ;;  %v1044_v4 = vmul.f32 %v6997_v5, %v13612_v57  ;;  %v920_v3 = vpop.xlane.xlu1 %919  ;;  %v1508_v56 = vmul.f32 0.03125, %v1474_v62  ;;  %v4486_v30 = vmul.f32 %v13576_v17, %v9060_v40  ;;  %v13616_v17 = vld [vmem:[#allocation57_spill] sm:$0xff] }
 0x263   : > { %v1119_v44 = vadd.f32 %v8994_v61, %v1081_v31  ;;  %v1600_v35 = vmul.f32 %v6999_v9, %v13613_v60  ;;  %7008 = vrsqrt.f32 %v1539_v24  ;;  %v952_v20 = vmul.f32 0.03125, %v920_v3  ;;  %v7026_v60 = vld [vmem:[#allocation3 + $0xa0] sm:$0xff] }
 0x264   : > { %1696 = vst.msk [vmem:[#allocation2 + $0x168] sm:$0xff] %vm455_vm0, %v1663_v41  ;;  %v1082_v54 = vmul.f32 %v8985_v27, %v1044_v4  ;;  %7010 = vrsqrt.f32 %v983_v48  ;;  %v4517_v31 = vadd.f32 %v4485_v19, %v4315_v43  ;;  %v9080_v26 = vld [vmem:[#allocation3 + $0x160] sm:$0xff]  ;;  %v5884_v24 = vmul.f32 %v8638_v38, %v9030_v39  ;;  %v13615_v4 = vld [vmem:[#allocation19_spill] sm:$0xff] }
 0x265   : > { %v7001_v37 = vpop.eup %7000  ;;  %1152 = vst.msk [vmem:[#allocation3 + $0x170] sm:$0xff] %vm455_vm0, %v1119_v44  ;;  %v1632_v5 = vmul.f32 %v8985_v27, %v1600_v35  ;;  %v984_v57 = vadd.f32 1e-05, %v952_v20  ;;  %13614 = vst [vmem:[#allocation23_spill] sm:$0xff] %v9080_v26  ;;  %v1540_v3 = vadd.f32 1e-05, %v1508_v56  ;;  %v2065_v40 = vmul.f32 %v7026_v60, %v13616_v17 }
 0x266   : > { %v7003_v9 = vpop.eup %7002  ;;  %v1120_v41 = vadd.f32 %v8994_v61, %v1082_v54  ;;  %v1601_v48 = vmul.f32 %v7001_v37, %v13615_v4  ;;  %v1477_v62 = vpop.xlane.xlu1 %1476  ;;  %v13617_v35 = vld [vmem:[#allocation20_spill] sm:$0xff]  ;;  %v4518_v54 = vadd.f32 %v4486_v30, %v4316_v10  ;;  %v4687_v56 = vmul.f32 %v13582_v55, %v9080_v26 }
 0x267   : > { %v1664_v44 = vadd.f32 %v8994_v61, %v1632_v5  ;;  %v1045_v20 = vmul.f32 %v7003_v9, %v13617_v35  ;;  %7012 = vrsqrt.f32 %v984_v57  ;;  %v1509_v43 = vmul.f32 0.03125, %v1477_v62  ;;  %v9089_v19 = vld [vmem:[#allocation3 + $0x168] sm:$0xff]  ;;  %v13619_v30 = vld [vmem:[#allocation80_spill] sm:$0xff] }
 0x268   : > { %1153 = vst.msk [vmem:[#allocation3 + $0x178] sm:$0xff] %vm455_vm0, %v1120_v41  ;;  %v1633_v38 = vmul.f32 %v8985_v27, %v1601_v48  ;;  %7014 = vrsqrt.f32 %v1540_v3  ;;  %v4688_v57 = vmul.f32 %v13582_v55, %v9089_v19  ;;  %v7027_v9 = vld [vmem:[#allocation3 + $0xa8] sm:$0xff]  ;;  %v13618_v3 = vld [vmem:[#allocation21_spill] sm:$0xff]  ;;  %v2097_v60 = vadd.f32 %v2065_v40, %v13619_v30  ;;  %v7028_v35 = vld [vmem:[#allocation3 + $0xb0] sm:$0xff] }
 0x269   : > { %v7005_v37 = vpop.eup %7004  ;;  %1697 = vst.msk [vmem:[#allocation2 + $0x170] sm:$0xff] %vm455_vm0, %v1664_v44  ;;  %v1083_v5 = vmul.f32 %v8985_v27, %v1045_v20  ;;  %v1541_v4 = vadd.f32 1e-05, %v1509_v43  ;;  %v2066_v62 = vmul.f32 %v7027_v9, %v13616_v17  ;;  %v2267_v26 = vmul.f32 %v7028_v35, %v8473_v6  ;;  %v13620_v20 = vld [vmem:[#allocation58_spill] sm:$0xff]  ;;  %v7029_v17 = vld [vmem:[#allocation3 + $0xb8] sm:$0xff] }
 0x26a   : > { %v7007_v41 = vpop.eup %7006  ;;  %v1665_v48 = vadd.f32 %v8994_v61, %v1633_v38  ;;  %v1046_v10 = vmul.f32 %v7005_v37, %v13618_v3  ;;  %v2268_v38 = vmul.f32 %v7029_v17, %v8473_v6  ;;  %v2469_v40 = vmul.f32 %v8792_v59, %v8484_v22  ;;  %v13622_v17 = vld [vmem:[#allocation59_spill] sm:$0xff]  ;;  %v9377_v6 = vld [vmem:[#allocation2 + $0x38] sm:$0xff] }
 0x26b   : > { %v1121_v44 = vadd.f32 %v8994_v61, %v1083_v5  ;;  %v1602_v43 = vmul.f32 %v7007_v41, %v13620_v20  ;;  %7016 = vrsqrt.f32 %v1541_v4  ;;  %v2098_v55 = vadd.f32 %v2066_v62, %v13621_v0  ;;  %13687 = vst [vmem:[#allocation46_spill] sm:$0xff] %v9377_v6 }
 0x26c   : > { %1698 = vst.msk [vmem:[#allocation2 + $0x178] sm:$0xff] %vm455_vm0, %v1665_v48  ;;  %v1084_v9 = vmul.f32 %v8985_v27, %v1046_v10  ;;  %v2299_v37 = vadd.f32 %v2267_v26, %v2097_v60  ;;  %v9115_v4 = vadd.f32 %v5884_v24, %v9064_v49  ;;  %v2470_v0 = vmul.f32 %v8801_v23, %v8484_v22  ;;  %v13623_v60 = vld [vmem:[#allocation62_spill] sm:$0xff]  ;;  %v9125_v49 = vld [vmem:[#allocation3 + $0x170] sm:$0xff] }
 0x26d   : > { %v7009_v3 = vpop.eup %7008  ;;  %1154 = vst.msk [vmem:[#allocation3 + $0x180] sm:$0xff] %vm455_vm0, %v1121_v44  ;;  %v1634_v5 = vmul.f32 %v8985_v27, %v1602_v43  ;;  %v2671_v62 = vmul.f32 %v8822_v11, %v8505_v34  ;;  %v2300_v59 = vadd.f32 %v2268_v38, %v2098_v55  ;;  %v4719_v44 = vadd.f32 %v4687_v56, %v4517_v31 }
 0x26e   : > { %v7011_v41 = vpop.eup %7010  ;;  %v1122_v26 = vadd.f32 %v8994_v61, %v1084_v9  ;;  %v1603_v48 = vmul.f32 %v7009_v3, %v13622_v17  ;;  %v2501_v10 = vadd.f32 %v2469_v40, %v2299_v37  ;;  %v2672_v23 = vmul.f32 %v8830_v28, %v8505_v34 }
 0x26f   : > { %v1666_v30 = vadd.f32 %v8994_v61, %v1634_v5  ;;  %v1047_v35 = vmul.f32 %v7011_v41, %v13623_v60  ;;  %v4720_v24 = vadd.f32 %v4688_v57, %v4518_v54  ;;  %v2502_v20 = vadd.f32 %v2470_v0, %v2300_v59  ;;  %v13624_v54 = vld [vmem:[#allocation63_spill] sm:$0xff]  ;;  %v4854_v40 = vld [vmem:[#allocation3 + $0x178] sm:$0xff] }
 0x270   : > { %1155 = vst.msk [vmem:[#allocation3 + $0x188] sm:$0xff] %vm455_vm0, %v1122_v26  ;;  %v1635_v11 = vmul.f32 %v8985_v27, %v1603_v48  ;;  %v2703_v43 = vadd.f32 %v2671_v62, %v2501_v10  ;;  %v2873_v31 = vmul.f32 %v8850_v21, %v13568_v18  ;;  %v2874_v56 = vmul.f32 %v8858_v36, %v13568_v18  ;;  %v13625_v62 = vld [vmem:[#allocation67_spill] sm:$0xff] }
 0x271   : > { %v7013_v9 = vpop.eup %7012  ;;  %1699 = vst.msk [vmem:[#allocation2 + $0x180] sm:$0xff] %vm455_vm0, %v1666_v30  ;;  %v1085_v55 = vmul.f32 %v8985_v27, %v1047_v35  ;;  %v3075_v28 = vmul.f32 %v8878_v52, %v13574_v1  ;;  %v4889_v3 = vmul.f32 %v13588_v58, %v9125_v49  ;;  %v2704_v5 = vadd.f32 %v2672_v23, %v2502_v20 }
 0x272   : > { %v7015_v38 = vpop.eup %7014  ;;  %v1667_v37 = vadd.f32 %v8994_v61, %v1635_v11  ;;  %v1048_v57 = vmul.f32 %v7013_v9, %v13624_v54  ;;  %v2905_v41 = vadd.f32 %v2873_v31, %v2703_v43  ;;  %v3076_v36 = vmul.f32 %v8886_v7, %v13574_v1  ;;  %v13626_v11 = vld [vmem:[#allocation68_spill] sm:$0xff]  ;;  %v13675_v1 = vld [vmem:[#allocation70_spill] sm:$0xff] }
 0x273   : > { %v1123_v0 = vadd.f32 %v8994_v61, %v1085_v55  ;;  %v1604_v21 = vmul.f32 %v7015_v38, %v13625_v62  ;;  %v2906_v17 = vadd.f32 %v2874_v56, %v2704_v5  ;;  %v3277_v48 = vmul.f32 %v8906_v46, %v13580_v25 }
 0x274   : > { %1700 = vst.msk [vmem:[#allocation2 + $0x188] sm:$0xff] %vm455_vm0, %v1667_v37  ;;  %v1086_v52 = vmul.f32 %v8985_v27, %v1048_v57  ;;  %v5055_v26 = vld [vmem:[#allocation3 + $0x180] sm:$0xff]  ;;  %v3278_v59 = vmul.f32 %v8914_v45, %v13580_v25  ;;  %v4890_v60 = vmul.f32 %v13588_v58, %v4854_v40  ;;  %v3107_v7 = vadd.f32 %v3075_v28, %v2905_v41  ;;  %v9336_v25 = vld [vmem:[#allocation2 + $0x158] sm:$0xff] }
 0x275   : > { %v7017_v10 = vpop.eup %7016  ;;  %1156 = vst.msk [vmem:[#allocation3 + $0x190] sm:$0xff] %vm455_vm0, %v1123_v0  ;;  %v1636_v30 = vmul.f32 %v8985_v27, %v1604_v21  ;;  %v3479_v35 = vmul.f32 %v8934_v51, %v13586_v13  ;;  %v3108_v43 = vadd.f32 %v3076_v36, %v2906_v17  ;;  %v3480_v46 = vmul.f32 %v8942_v42, %v13586_v13 }
 0x276   : > { %v1124_v23 = vadd.f32 %v8994_v61, %v1086_v52  ;;  %v1605_v20 = vmul.f32 %v7017_v10, %v13626_v11  ;;  %v5091_v55 = vmul.f32 %v13594_v8, %v5055_v26  ;;  %v3309_v31 = vadd.f32 %v3277_v48, %v3107_v7  ;;  %v13628_v52 = vld [vmem:[#allocation22_spill] sm:$0xff]  ;;  %13674 = vst [vmem:[#allocation37_spill] sm:$0xff] %v9336_v25 }
 0x277   : > { %v1668_v45 = vadd.f32 %v8994_v61, %v1636_v30  ;;  %v5056_v9 = vld [vmem:[#allocation3 + $0x188] sm:$0xff]  ;;  %v3681_v56 = vmul.f32 %v8962_v16, %v13592_v63  ;;  %v3310_v38 = vadd.f32 %v3278_v59, %v3108_v43  ;;  %v3682_v37 = vmul.f32 %v8970_v33, %v13592_v63  ;;  %v9202_v43 = vld [vmem:[#allocation2 + $0xa0] sm:$0xff] }
 0x278   : > { %1157 = vst.msk [vmem:[#allocation3 + $0x198] sm:$0xff] %vm455_vm0, %v1124_v23  ;;  %v1637_v51 = vmul.f32 %v8985_v27, %v1605_v20  ;;  %v5092_v28 = vmul.f32 %v13594_v8, %v5056_v9  ;;  %v4921_v42 = vadd.f32 %v4889_v3, %v4719_v44  ;;  %v9174_v54 = vadd.f32 %v9070_v12, %v9052_v14  ;;  %v13629_v48 = vld [vmem:[#allocation82_spill] sm:$0xff]  ;;  %v13630_v59 = vld [vmem:[#allocation23_spill] sm:$0xff] }
 0x279   : > { %1701 = vst.msk [vmem:[#allocation2 + $0x190] sm:$0xff] %vm455_vm0, %v1668_v45  ;;  %v3511_v57 = vadd.f32 %v3479_v35, %v3309_v31  ;;  %v3881_v16 = vmul.f32 %v8992_v2, %v8565_v32  ;;  %v4922_v27 = vadd.f32 %v4890_v60, %v4720_v24  ;;  %v3512_v0 = vadd.f32 %v3480_v46, %v3310_v38  ;;  %v13631_v60 = vld [vmem:[#allocation86_spill] sm:$0xff]  ;;  %v7032_v38 = vld [vmem:[#allocation3 + $0x1b0] sm:$0xff] }
 0x27a   : > { %v1669_v5 = vadd.f32 %v8994_v61, %v1637_v51  ;;  %v3882_v62 = vmul.f32 %v9002_v50, %v8565_v32  ;;  %v5123_v21 = vadd.f32 %v5091_v55, %v4921_v42  ;;  %v4083_v14 = vmul.f32 %v9022_v53, %v13564_v47  ;;  %v13627_v50 = vld [vmem:[#allocation89_spill] sm:$0xff]  ;;  %v9330_v63 = vld [vmem:[#allocation2 + $0x148] sm:$0xff] }
 0x27b   : > { %v3713_v44 = vadd.f32 %v3681_v56, %v3511_v57  ;;  %v5124_v12 = vadd.f32 %v5092_v28, %v4922_v27  ;;  %v3714_v2 = vadd.f32 %v3682_v37, %v3512_v0  ;;  %v4084_v61 = vmul.f32 %v9030_v39, %v13564_v47  ;;  %v13632_v56 = vld [vmem:[#allocation109_spill] sm:$0xff]  ;;  %v13633_v37 = vld [vmem:[#allocation90_spill] sm:$0xff]  ;;  %13672 = vst [vmem:[#allocation35_spill] sm:$0xff] %v9330_v63 }
 0x27c   : > { %1702 = vst.msk [vmem:[#allocation2 + $0x198] sm:$0xff] %vm455_vm0, %v1669_v5  ;;  %v5257_v3 = vld [vmem:[#allocation3 + $0x190] sm:$0xff]  ;;  %v4285_v24 = vmul.f32 %v9050_v15, %v13570_v29  ;;  %v4286_v17 = vmul.f32 %v13628_v52, %v13570_v29  ;;  %v4487_v53 = vmul.f32 %v13630_v59, %v13629_v48  ;;  %v4488_v30 = vmul.f32 %v9089_v19, %v13629_v48  ;;  %v7030_v19 = vld [vmem:[#allocation3 + $0x1a0] sm:$0xff]  ;;  %v9216_v57 = vld [vmem:[#allocation2 + $0xb8] sm:$0xff] }
 0x27d   : > { %v5293_v41 = vmul.f32 %v13627_v50, %v5257_v3  ;;  %v3913_v36 = vadd.f32 %v3881_v16, %v3713_v44  ;;  %v3914_v10 = vadd.f32 %v3882_v62, %v3714_v2  ;;  %v4689_v7 = vmul.f32 %v9125_v49, %v13631_v60  ;;  %v9207_v49 = vld [vmem:[#allocation2 + $0xa8] sm:$0xff]  ;;  %v13634_v0 = vld [vmem:[#allocation93_spill] sm:$0xff] }
 0x27e   : > { %v4690_v39 = vmul.f32 %v4854_v40, %v13631_v60  ;;  %v4891_v11 = vmul.f32 %v5055_v26, %v13588_v58  ;;  %v4892_v20 = vmul.f32 %v5056_v9, %v13588_v58  ;;  %v5093_v55 = vmul.f32 %v5257_v3, %v13594_v8  ;;  %v9209_v40 = vld [vmem:[#allocation2 + $0xb0] sm:$0xff]  ;;  %v7031_v26 = vld [vmem:[#allocation3 + $0x1a8] sm:$0xff] }
 0x27f   : > { %v5258_v35 = vld [vmem:[#allocation3 + $0x198] sm:$0xff]  ;;  %v5325_v15 = vadd.f32 %v5293_v41, %v5123_v21  ;;  %v4115_v23 = vadd.f32 %v4083_v14, %v3913_v36  ;;  %v4116_v45 = vadd.f32 %v4084_v61, %v3914_v10  ;;  %v5295_v31 = vmul.f32 %v7030_v19, %v13627_v50  ;;  %v9221_v21 = vld [vmem:[#allocation2 + $0xc0] sm:$0xff]  ;;  %v13635_v44 = vld [vmem:[#allocation111_spill] sm:$0xff] }
 0x280   : > { %v5294_v46 = vmul.f32 %v13627_v50, %v5258_v35  ;;  %v5296_v9 = vmul.f32 %v7031_v26, %v13627_v50  ;;  %v9214_v42 = vmul.f32 %v7032_v38, %v13633_v37  ;;  %v5094_v27 = vmul.f32 %v5258_v35, %v13594_v8  ;;  %v13636_v61 = vld [vmem:[#allocation96_spill] sm:$0xff]  ;;  %v9228_v41 = vld [vmem:[#allocation2 + $0xc8] sm:$0xff] }
 0x281   : > { %v5527_v51 = vadd.f32 %v13632_v56, %v5325_v15  ;;  %v4317_v28 = vadd.f32 %v4285_v24, %v4115_v23  ;;  %v4318_v5 = vadd.f32 %v4286_v17, %v4116_v45  ;;  %v2164_v62 = vmul.f32 %v13634_v0, %v9202_v43  ;;  %v13638_v17 = vld [vmem:[#allocation94_spill] sm:$0xff]  ;;  %v9234_v35 = vld [vmem:[#allocation2 + $0xd0] sm:$0xff]  ;;  %v9236_v15 = vld [vmem:[#allocation2 + $0xd8] sm:$0xff] }
 0x282   : > { %v5326_v16 = vadd.f32 %v5294_v46, %v5124_v12  ;;  %v2165_v2 = vmul.f32 %v13634_v0, %v9207_v49  ;;  %v2366_v24 = vmul.f32 %v13636_v61, %v9209_v40  ;;  %v13637_v12 = vld [vmem:[#allocation110_spill] sm:$0xff]  ;;  %v2367_v10 = vmul.f32 %v13636_v61, %v9216_v57  ;;  %v13640_v45 = vld [vmem:[#allocation95_spill] sm:$0xff]  ;;  %v13641_v56 = vld [vmem:[#allocation97_spill] sm:$0xff] }
 0x283   : > { %v5729_v14 = vadd.f32 %v13635_v44, %v5527_v51  ;;  %v4519_v3 = vadd.f32 %v4487_v53, %v4317_v28  ;;  %v4520_v52 = vadd.f32 %v4488_v30, %v4318_v5  ;;  %v2196_v59 = vadd.f32 %v2164_v62, %v13638_v17  ;;  %v13639_v53 = vld [vmem:[#allocation113_spill] sm:$0xff]  ;;  %v13642_v30 = vld [vmem:[#allocation112_spill] sm:$0xff]  ;;  %v9247_v62 = vld [vmem:[#allocation2 + $0xe8] sm:$0xff] }
 0x284   : > { %v5528_v36 = vadd.f32 %v13637_v12, %v5326_v16  ;;  %v2197_v19 = vadd.f32 %v2165_v2, %v13640_v45  ;;  %v2568_v51 = vmul.f32 %v13641_v56, %v9221_v21  ;;  %v9242_v28 = vld [vmem:[#allocation2 + $0xe0] sm:$0xff]  ;;  %v2569_v5 = vmul.f32 %v13641_v56, %v9228_v41  ;;  %v9253_v2 = vld [vmem:[#allocation2 + $0xf0] sm:$0xff]  ;;  %v9273_v50 = vld [vmem:[#allocation2 + $0x108] sm:$0xff] }
 0x285   : > { %v5931_v23 = vadd.f32 %v13639_v53, %v5729_v14  ;;  %v4721_v46 = vadd.f32 %v4689_v7, %v4519_v3  ;;  %v4722_v38 = vadd.f32 %v4690_v39, %v4520_v52  ;;  %v2398_v16 = vadd.f32 %v2366_v24, %v2196_v59  ;;  %v13643_v7 = vld [vmem:[#allocation98_spill] sm:$0xff]  ;;  %v13645_v24 = vld [vmem:[#allocation99_spill] sm:$0xff]  ;;  %v9258_v59 = vld [vmem:[#allocation2 + $0xf8] sm:$0xff]  ;;  %13650 = vst [vmem:[#allocation25_spill] sm:$0xff] %v9273_v50 }
 0x286   : > { %v5730_v26 = vadd.f32 %v13642_v30, %v5528_v36  ;;  %v2399_v12 = vadd.f32 %v2367_v10, %v2197_v19  ;;  %v2770_v14 = vmul.f32 %v13643_v7, %v9234_v35  ;;  %v2771_v3 = vmul.f32 %v13643_v7, %v9236_v15  ;;  %v13644_v17 = vld [vmem:[#allocation114_spill] sm:$0xff] }
 0x287   : > { %v4923_v44 = vadd.f32 %v4891_v11, %v4721_v46  ;;  %v4924_v36 = vadd.f32 %v4892_v20, %v4722_v38  ;;  %v2600_v39 = vadd.f32 %v2568_v51, %v2398_v16  ;;  %v2972_v52 = vmul.f32 %v13645_v24, %v9242_v28  ;;  %v7033_v46 = vld [vmem:[#allocation3 + $0x1b8] sm:$0xff]  ;;  %v9269_v51 = vld [vmem:[#allocation2 + $0x100] sm:$0xff]  ;;  %v5865_v38 = vld [vmem:[#allocation3 + $0x1d0] sm:$0xff] }
 0x288   : > { %v5932_v53 = vadd.f32 %v13644_v17, %v5730_v26  ;;  %v5498_v45 = vmul.f32 %v7033_v46, %v13633_v37  ;;  %v2601_v19 = vadd.f32 %v2569_v5, %v2399_v12  ;;  %v2973_v20 = vmul.f32 %v13645_v24, %v9247_v62  ;;  %13648 = vst [vmem:[#allocation24_spill] sm:$0xff] %v9269_v51  ;;  %v13649_v17 = vld [vmem:[#allocation102_spill] sm:$0xff]  ;;  %v5866_v46 = vld [vmem:[#allocation3 + $0x1d8] sm:$0xff]  ;;  %v9278_v37 = vld [vmem:[#allocation2 + $0x110] sm:$0xff] }
 0x289   : > { %v5125_v10 = vadd.f32 %v5093_v55, %v4923_v44  ;;  %v5126_v26 = vadd.f32 %v5094_v27, %v4924_v36  ;;  %v2802_v16 = vadd.f32 %v2770_v14, %v2600_v39  ;;  %v3174_v33 = vmul.f32 %v13649_v17, %v9253_v2  ;;  %v7034_v55 = vld [vmem:[#allocation3 + $0x1c0] sm:$0xff]  ;;  %v13651_v44 = vld [vmem:[#allocation91_spill] sm:$0xff]  ;;  %13652 = vst [vmem:[#allocation26_spill] sm:$0xff] %v9278_v37  ;;  %v9285_v39 = vld [vmem:[#allocation2 + $0x118] sm:$0xff] }
 0x28a   : > { %v6766_v30 = vpack.c.bf16 %v5932_v53, %v5931_v23  ;;  %v5699_v58 = vmul.f32 %v7034_v55, %v13651_v44  ;;  %v2803_v5 = vadd.f32 %v2771_v3, %v2601_v19  ;;  %v3175_v12 = vmul.f32 %v13649_v17, %v9258_v59  ;;  %v7035_v23 = vld [vmem:[#allocation3 + $0x1c8] sm:$0xff]  ;;  %13654 = vst [vmem:[#allocation27_spill] sm:$0xff] %v9285_v39  ;;  %v13656_v19 = vld [vmem:[#allocation92_spill] sm:$0xff] }
 0x28b   : > { %v5327_v8 = vadd.f32 %v5295_v31, %v5125_v10  ;;  %v5328_v27 = vadd.f32 %v5296_v9, %v5126_v26  ;;  %v5700_v14 = vmul.f32 %v7035_v23, %v13651_v44  ;;  %v3004_v53 = vadd.f32 %v2972_v52, %v2802_v16  ;;  %v13653_v31 = vld [vmem:[#allocation104_spill] sm:$0xff]  ;;  %v9296_v52 = vld [vmem:[#allocation2 + $0x120] sm:$0xff] }
 0x28c   : > { %6768 = vmatprep.subr.msk.bf16.mxu1 %vm9262_vm1, %v6766_v30  ;;  %v3376_v36 = vmul.f32 %v13653_v31, %v9269_v51  ;;  %v13655_v3 = vpack.c.bf16 %v9115_v4, %v9174_v54  ;;  %v5901_v30 = vmul.f32 %v13656_v19, %v5865_v38  ;;  %v3005_v9 = vadd.f32 %v2973_v20, %v2803_v5  ;;  %v13658_v44 = vld [vmem:[#allocation106_spill] sm:$0xff]  ;;  %v13661_v20 = vld [vmem:[#allocation103_spill] sm:$0xff]  ;;  %v13662_v38 = vld [vmem:[#allocation105_spill] sm:$0xff] }
 0x28d   : > { %v5529_v10 = vadd.f32 %v9214_v42, %v5327_v8  ;;  %v3377_v26 = vmul.f32 %v13653_v31, %v9273_v50  ;;  %13657 = vst [vmem:[#allocation28_spill] sm:$0xff] %v9296_v52  ;;  %v5530_v16 = vadd.f32 %v5498_v45, %v5328_v27  ;;  %v5902_v55 = vmul.f32 %v13656_v19, %v5866_v46  ;;  %v9301_v54 = vld [vmem:[#allocation2 + $0x128] sm:$0xff]  ;;  %v9305_v42 = vld [vmem:[#allocation2 + $0x130] sm:$0xff]  ;;  %v9311_v27 = vld [vmem:[#allocation2 + $0x138] sm:$0xff] }
 0x28e   : > { %6771 = vmatpush3.bf16.xpose.msk.msra.mxu1 %vm9262_vm1, %v13655_v3  ;;  %v3206_v23 = vadd.f32 %v3174_v33, %v3004_v53  ;;  %v3578_v4 = vmul.f32 %v13658_v44, %v9278_v37  ;;  %13659 = vst [vmem:[#allocation29_spill] sm:$0xff] %v9301_v54  ;;  %v3207_v60 = vadd.f32 %v3175_v12, %v3005_v9  ;;  %13660 = vst [vmem:[#allocation30_spill] sm:$0xff] %v9305_v42  ;;  %v13663_v46 = vld [vmem:[#allocation108_spill] sm:$0xff]  ;;  %v13665_v12 = vld [vmem:[#allocation61_spill] sm:$0xff] }
 0x28f   : > { %v5731_v3 = vadd.f32 %v5699_v58, %v5529_v10  ;;  %v3579_v8 = vmul.f32 %v13658_v44, %v9285_v39  ;;  %v1979_v5 = vadd.f32 %v13662_v38, %v13661_v20  ;;  %v5732_v48 = vadd.f32 %v5700_v14, %v5530_v16  ;;  %13664 = vst [vmem:[#allocation31_spill] sm:$0xff] %v9311_v27  ;;  %v7036_v58 = vld [vmem:[%s12639_s4 + $0x8] sm:$0xff]  ;;  %v9321_v19 = vld [vmem:[#allocation2 + $0x140] sm:$0xff]  ;;  %v13670_v16 = vld [vmem:[#allocation100_spill] sm:$0xff] }
 0x290   : > { %v3408_v45 = vadd.f32 %v3376_v36, %v3206_v23  ;;  %v3779_v33 = vmul.f32 %v13663_v46, %v9296_v52  ;;  %v9317_v53 = vrot.slane %v7036_v58, %v13665_v12  ;;  %v3409_v10 = vadd.f32 %v3377_v26, %v3207_v60  ;;  %13667 = vst [vmem:[#allocation33_spill] sm:$0xff] %v9321_v19  ;;  %v13668_v14 = vld [vmem:[#allocation66_spill] sm:$0xff]  ;;  %v13671_v23 = vld [vmem:[#allocation101_spill] sm:$0xff]  ;;  %v9332_v60 = vld [vmem:[#allocation2 + $0x150] sm:$0xff] }
 0x291   : > { %v3780_v9 = vmul.f32 %v13663_v46, %v9301_v54  ;;  %v9324_v36 = vrot.slane %v7036_v58, %v13668_v14  ;;  %v2180_v20 = vadd.f32 %v13671_v23, %v13670_v16  ;;  %v5933_v38 = vadd.f32 %v5901_v30, %v5731_v3  ;;  %13673 = vst [vmem:[#allocation36_spill] sm:$0xff] %v9332_v60  ;;  %v9341_v16 = vld [vmem:[#allocation2 + $0x160] sm:$0xff]  ;;  %v13679_v30 = vld [vmem:[#allocation107_spill] sm:$0xff] }
 0x292   : > { %13666 = vst [vmem:[#allocation32_spill] sm:$0xff] %v9317_v53  ;;  %v5934_v29 = vadd.f32 %v5902_v55, %v5732_v48  ;;  %v3610_v47 = vadd.f32 %v3578_v4, %v3408_v45  ;;  %v3980_v32 = vmul.f32 %v9317_v53, %v9305_v42  ;;  %v3611_v26 = vadd.f32 %v3579_v8, %v3409_v10  ;;  %v9343_v48 = vld [vmem:[#allocation2 + $0x168] sm:$0xff]  ;;  %v9349_v3 = vld [vmem:[%s12639_s4 + $0x10] sm:$0x1f]  ;;  %v9419_v39 = vld [vmem:[#allocation2 + $0x60] sm:$0xff] }
 0x293   : > { %13669 = vst [vmem:[#allocation34_spill] sm:$0xff] %v9324_v36  ;;  %v3981_v13 = vmul.f32 %v9317_v53, %v9311_v27  ;;  %v9339_v18 = vrot.slane %v7036_v58, %v13675_v1  ;;  %13677 = vst [vmem:[#allocation39_spill] sm:$0xff] %v9341_v16  ;;  %v2181_v55 = vadd.f32 %v13679_v30, %v1979_v5  ;;  %v13680_v10 = vld [vmem:[#allocation72_spill] sm:$0xff]  ;;  %v9431_v37 = vld [vmem:[#allocation2 + $0x1a0] sm:$0xff] }
 0x294   : > { %13678 = vst [vmem:[#allocation40_spill] sm:$0xff] %v9343_v48  ;;  %v6772_v4 = vpack.c.bf16 %v5934_v29, %v5933_v38  ;;  %v3811_v8 = vadd.f32 %v3779_v33, %v3610_v47  ;;  %v4182_v45 = vmul.f32 %v9324_v36, %v9321_v19  ;;  %v9354_v23 = vrot.slane %v7036_v58, %v13680_v10  ;;  %v9356_v1 = vld [vmem:[#allocation2 + $0x170] sm:$0xff]  ;;  %v9362_v5 = vld [vmem:[#allocation2 + $0x178] sm:$0xff]  ;;  %v13684_v38 = vld [vmem:[#allocation74_spill] sm:$0xff] }
 0x295   : > { %13676 = vst [vmem:[#allocation38_spill] sm:$0xff] %v9339_v18  ;;  %13682 = vst [vmem:[#allocation42_spill] sm:$0xff] %v9356_v1  ;;  %v3812_v34 = vadd.f32 %v3780_v9, %v3611_v26  ;;  %v4183_v22 = vmul.f32 %v9324_v36, %v9330_v63  ;;  %v4384_v29 = vmul.f32 %v9339_v18, %v9332_v60  ;;  %v9367_v47 = vld [vmem:[#allocation2 + $0x30] sm:$0xff]  ;;  %v9379_v60 = vld [vmem:[#allocation2 + $0x40] sm:$0xff] }
 0x296   : > { %13681 = vst [vmem:[#allocation41_spill] sm:$0xff] %v9354_v23  ;;  %13683 = vst [vmem:[#allocation43_spill] sm:$0xff] %v9362_v5  ;;  %v9365_v30 = vrot.slane %v7036_v58, %v13684_v38  ;;  %6774 = vmatprep.subr.msk.bf16.mxu1 %vm9262_vm1, %v6772_v4  ;;  %v4012_v33 = vadd.f32 %v3980_v32, %v3811_v8  ;;  %v4385_v9 = vmul.f32 %v9339_v18, %v9336_v25  ;;  %v9381_v58 = vld [vmem:[#allocation2 + $0x48] sm:$0xff]  ;;  %v9385_v32 = vld [vmem:[#allocation2 + $0x180] sm:$0xff] }
 0x297   : > { %13686 = vst [vmem:[#allocation45_spill] sm:$0xff] %v9367_v47  ;;  %v4586_v26 = vmul.f32 %v9354_v23, %v9341_v16  ;;  %v4587_v10 = vmul.f32 %v9354_v23, %v9343_v48  ;;  %13688 = vst [vmem:[#allocation47_spill] sm:$0xff] %v9379_v60  ;;  %v4013_v38 = vadd.f32 %v3981_v13, %v3812_v34  ;;  %v9387_v8 = vld [vmem:[#allocation2 + $0x188] sm:$0xff]  ;;  %v9393_v63 = vld [vmem:[#allocation2 + $0x190] sm:$0xff] }
 0x298   : > { %13685 = vst [vmem:[#allocation44_spill] sm:$0xff] %v9365_v30  ;;  %13689 = vst [vmem:[#allocation48_spill] sm:$0xff] %v9381_v58  ;;  %v4788_v4 = vmul.f32 %v9365_v30, %v9356_v1  ;;  %v13692_v25 = vld [vmem:[#allocation54_spill] sm:$0xff]  ;;  %v13695_v48 = vld [vmem:[#allocation55_spill] sm:$0xff]  ;;  %v4214_v27 = vadd.f32 %v4182_v45, %v4012_v33  ;;  %v4789_v34 = vmul.f32 %v9365_v30, %v9362_v5 }
 0x299   : > { %13690 = vst [vmem:[#allocation49_spill] sm:$0xff] %v9385_v32  ;;  %13691 = vst [vmem:[#allocation50_spill] sm:$0xff] %v9387_v8  ;;  %v9391_v16 = vrot.slane %v9349_v3, %v13692_v25  ;;  %v9397_v19 = vrot.slane %v9349_v3, %v13695_v48  ;;  %v9401_v13 = vld [vmem:[#allocation2 + $0x198] sm:$0xff]  ;;  %v2350_v25 = vmul.f32 %v13636_v61, %v9367_v47  ;;  %v9415_v33 = vld [vmem:[#allocation2 + $0x50] sm:$0xff] }
 0x29a   : > { %13694 = vst [vmem:[#allocation52_spill] sm:$0xff] %v9393_v63  ;;  %13697 = vst [vmem:[#allocation14_spill] sm:$0xff] %v9401_v13  ;;  %v13698_v1 = vld [vmem:[#allocation60_spill] sm:$0xff]  ;;  %v4215_v54 = vadd.f32 %v4183_v22, %v4013_v38  ;;  %v2351_v52 = vmul.f32 %v13636_v61, %v9377_v6  ;;  %v2552_v48 = vmul.f32 %v13641_v56, %v9379_v60  ;;  %v9427_v60 = vld [vmem:[#allocation2 + $0x68] sm:$0xff] }
 0x29b   : > { %13693 = vst [vmem:[#allocation51_spill] sm:$0xff] %v9391_v16  ;;  %13696 = vst [vmem:[#allocation53_spill] sm:$0xff] %v9397_v19  ;;  %v9405_v42 = vrot.slane %v9349_v3, %v13698_v1  ;;  %v2553_v45 = vmul.f32 %v13641_v56, %v9381_v58  ;;  %v9417_v5 = vld [vmem:[#allocation2 + $0x58] sm:$0xff]  ;;  %v4416_v1 = vadd.f32 %v4384_v29, %v4214_v27  ;;  %v9433_v50 = vld [vmem:[#allocation2 + $0x1a8] sm:$0xff] }
 0x29c   : > { %13700 = vst [vmem:[#allocation16_spill] sm:$0xff] %v9417_v5  ;;  %13701 = vst [vmem:[#allocation17_spill] sm:$0xff] %v9419_v39  ;;  %v4990_v47 = vmul.f32 %v9391_v16, %v9385_v32  ;;  %v4991_v22 = vmul.f32 %v9391_v16, %v9387_v8  ;;  %v5192_v38 = vmul.f32 %v9397_v19, %v9393_v63  ;;  %v9435_v51 = vld [vmem:[#allocation2 + $0x70] sm:$0xff] }
 0x29d   : > { %13699 = vst [vmem:[#allocation15_spill] sm:$0xff] %v9405_v42  ;;  %13702 = vst [vmem:[#allocation18_spill] sm:$0xff] %v9427_v60  ;;  %v4417_v6 = vadd.f32 %v4385_v9, %v4215_v54  ;;  %v5193_v58 = vmul.f32 %v9397_v19, %v9401_v13  ;;  %v2382_v27 = vadd.f32 %v2350_v25, %v2180_v20  ;;  %v9443_v9 = vld [vmem:[#allocation2 + $0x78] sm:$0xff] }
 0x29e   : > { %v2383_v29 = vadd.f32 %v2351_v52, %v2181_v55  ;;  %13703 = vst [vmem:[#allocation19_spill] sm:$0xff] %v9435_v51  ;;  %v4618_v32 = vadd.f32 %v4586_v26, %v4416_v1  ;;  %v2754_v8 = vmul.f32 %v13643_v7, %v9415_v33  ;;  %v2755_v63 = vmul.f32 %v13643_v7, %v9417_v5  ;;  %v9455_v5 = vld [vmem:[#allocation2 + $0x1b8] sm:$0xff] }
 0x29f   : > { %v2956_v54 = vmul.f32 %v13645_v24, %v9419_v39  ;;  %13704 = vst [vmem:[#allocation20_spill] sm:$0xff] %v9443_v9  ;;  %v4619_v13 = vadd.f32 %v4587_v10, %v4417_v6  ;;  %v2584_v19 = vadd.f32 %v2552_v48, %v2382_v27  ;;  %v2957_v52 = vmul.f32 %v13645_v24, %v9427_v60  ;;  %v9453_v39 = vld [vmem:[#allocation2 + $0x1b0] sm:$0xff]  ;;  %v7037_v27 = vld [vmem:[#allocation2 + $0x80] sm:$0xff] }
 0x2a0   : > { %v2585_v16 = vadd.f32 %v2553_v45, %v2383_v29  ;;  %v4820_v20 = vadd.f32 %v4788_v4, %v4618_v32  ;;  %v5394_v55 = vmul.f32 %v9405_v42, %v9431_v37  ;;  %v5395_v26 = vmul.f32 %v9405_v42, %v9433_v50  ;;  %v9468_v29 = vld [vmem:[#allocation2 + $0x1c0] sm:$0xff] }
 0x2a1   : > { %v3158_v25 = vmul.f32 %v13649_v17, %v9435_v51  ;;  %v4821_v1 = vadd.f32 %v4789_v34, %v4619_v13  ;;  %v2786_v6 = vadd.f32 %v2754_v8, %v2584_v19  ;;  %v3159_v48 = vmul.f32 %v13649_v17, %v9443_v9  ;;  %v9470_v19 = vld [vmem:[#allocation2 + $0x1c8] sm:$0xff]  ;;  %v7040_v51 = vld [vmem:[#allocation2 + $0x98] sm:$0xff] }
 0x2a2   : > { %v2787_v10 = vadd.f32 %v2755_v63, %v2585_v16  ;;  %v5022_v4 = vadd.f32 %v4990_v47, %v4820_v20  ;;  %v9461_v32 = vrot.slane %v9349_v3, %v13665_v12  ;;  %v9465_v45 = vrot.slane %v9349_v3, %v13668_v14  ;;  %v7038_v8 = vld [vmem:[#allocation2 + $0x88] sm:$0xff]  ;;  %v7039_v3 = vld [vmem:[#allocation2 + $0x90] sm:$0xff] }
 0x2a3   : > { %v3360_v34 = vmul.f32 %v7037_v27, %v13653_v31  ;;  %v5023_v13 = vadd.f32 %v4991_v22, %v4821_v1  ;;  %v2988_v63 = vadd.f32 %v2956_v54, %v2786_v6  ;;  %v3361_v47 = vmul.f32 %v7038_v8, %v13653_v31 }
 0x2a4   : > { %13705 = vst [vmem:[#allocation21_spill] sm:$0xff] %v9461_v32  ;;  %13706 = vst [vmem:[#allocation80_spill] sm:$0xff] %v9465_v45  ;;  %v2989_v16 = vadd.f32 %v2957_v52, %v2787_v10  ;;  %v5224_v20 = vadd.f32 %v5192_v38, %v5022_v4  ;;  %v5596_v12 = vmul.f32 %v9461_v32, %v9453_v39 }
 0x2a5   : > { %v5597_v14 = vmul.f32 %v9461_v32, %v9455_v5  ;;  %v3562_v27 = vmul.f32 %v7039_v3, %v13658_v44  ;;  %v5225_v22 = vadd.f32 %v5193_v58, %v5023_v13  ;;  %v3190_v1 = vadd.f32 %v3158_v25, %v2988_v63 }
 0x2a6   : > { %v3191_v9 = vadd.f32 %v3159_v48, %v2989_v16  ;;  %v3563_v54 = vmul.f32 %v7040_v51, %v13658_v44  ;;  %v5426_v52 = vadd.f32 %v5394_v55, %v5224_v20  ;;  %v5798_v6 = vmul.f32 %v9465_v45, %v9468_v29 }
 0x2a7   : > { %v5799_v38 = vmul.f32 %v9465_v45, %v9470_v19  ;;  %v3763_v10 = vmul.f32 %v13663_v46, %v9202_v43  ;;  %v5427_v4 = vadd.f32 %v5395_v26, %v5225_v22  ;;  %v3392_v8 = vadd.f32 %v3360_v34, %v3190_v1 }
 0x2a8   : > { %v3393_v60 = vadd.f32 %v3361_v47, %v3191_v9  ;;  %v3764_v58 = vmul.f32 %v13663_v46, %v9207_v49  ;;  %v5628_v25 = vadd.f32 %v5596_v12, %v5426_v52  ;;  %v3964_v48 = vmul.f32 %v9317_v53, %v9209_v40  ;;  %v13707_v52 = vld [vmem:[#allocation84_spill] sm:$0xff] }
 0x2a9   : > { %v5629_v55 = vadd.f32 %v5597_v14, %v5427_v4  ;;  %v3594_v13 = vadd.f32 %v3562_v27, %v3392_v8  ;;  %v3965_v16 = vmul.f32 %v9317_v53, %v9216_v57  ;;  %v4166_v20 = vmul.f32 %v9324_v36, %v9221_v21 }
 0x2aa   : > { %v3595_v63 = vadd.f32 %v3563_v54, %v3393_v60  ;;  %v4167_v26 = vmul.f32 %v9324_v36, %v9228_v41  ;;  %v5830_v9 = vadd.f32 %v5798_v6, %v5628_v25  ;;  %v4368_v12 = vmul.f32 %v9339_v18, %v9234_v35  ;;  %v13708_v6 = vld [vmem:[#allocation85_spill] sm:$0xff] }
 0x2ab   : > { %v5831_v34 = vadd.f32 %v5799_v38, %v5629_v55  ;;  %v3795_v47 = vadd.f32 %v3763_v10, %v3594_v13  ;;  %v4369_v14 = vmul.f32 %v9339_v18, %v9236_v15  ;;  %v4570_v60 = vmul.f32 %v9354_v23, %v9242_v28 }
 0x2ac   : > { %v3796_v22 = vadd.f32 %v3764_v58, %v3595_v63  ;;  %v1763_v4 = vmul.f32 %v7039_v3, %v13707_v52  ;;  %v1764_v8 = vmul.f32 %v7040_v51, %v13707_v52  ;;  %v1964_v38 = vmul.f32 %v9202_v43, %v13708_v6 }
 0x2ad   : > { %v6718_v27 = vpack.c.bf16 %v5831_v34, %v5830_v9  ;;  %v3996_v1 = vadd.f32 %v3964_v48, %v3795_v47  ;;  %v1965_v10 = vmul.f32 %v9207_v49, %v13708_v6  ;;  %v2166_v58 = vmul.f32 %v9209_v40, %v13634_v0 }
 0x2ae   : > { %v3997_v54 = vadd.f32 %v3965_v16, %v3796_v22  ;;  %v4571_v48 = vmul.f32 %v9354_v23, %v9247_v62  ;;  %v2167_v51 = vmul.f32 %v9216_v57, %v13634_v0  ;;  %v1996_v3 = vadd.f32 %v1964_v38, %v1763_v4  ;;  %v13709_v22 = vld [vmem:[#allocation24_spill] sm:$0xff] }
 0x2af   : > { %6720 = vmatprep.subr.msk.bf16.mxu0 %vm9262_vm1, %v6718_v27  ;;  %v4198_v25 = vadd.f32 %v4166_v20, %v3996_v1  ;;  %v1997_v13 = vadd.f32 %v1965_v10, %v1764_v8  ;;  %v2368_v43 = vmul.f32 %v9221_v21, %v13636_v61  ;;  %v2369_v49 = vmul.f32 %v9228_v41, %v13636_v61  ;;  %v13710_v41 = vld [vmem:[#allocation51_spill] sm:$0xff]  ;;  %v13712_v10 = vld [vmem:[#allocation26_spill] sm:$0xff] }
 0x2b0   : > { %v4199_v55 = vadd.f32 %v4167_v26, %v3997_v54  ;;  %v4772_v16 = vmul.f32 %v9365_v30, %v9253_v2  ;;  %v4773_v20 = vmul.f32 %v9365_v30, %v9258_v59  ;;  %v2198_v26 = vadd.f32 %v2166_v58, %v1996_v3  ;;  %v13714_v58 = vld [vmem:[#allocation27_spill] sm:$0xff] }
 0x2b1   : > { %v4400_v40 = vadd.f32 %v4368_v12, %v4198_v25  ;;  %v2199_v9 = vadd.f32 %v2167_v51, %v1997_v13  ;;  %v2570_v57 = vmul.f32 %v9234_v35, %v13641_v56  ;;  %v2571_v34 = vmul.f32 %v9236_v15, %v13641_v56  ;;  %v13713_v15 = vld [vmem:[#allocation53_spill] sm:$0xff] }
 0x2b2   : > { %v4401_v63 = vadd.f32 %v4369_v14, %v4199_v55  ;;  %v4974_v12 = vmul.f32 %v13710_v41, %v13709_v22  ;;  %v13711_v14 = vld [vmem:[#allocation25_spill] sm:$0xff]  ;;  %v2400_v1 = vadd.f32 %v2368_v43, %v2198_v26  ;;  %v2772_v4 = vmul.f32 %v9242_v28, %v13643_v7  ;;  %v13715_v43 = vld [vmem:[#allocation28_spill] sm:$0xff] }
 0x2b3   : > { %v4602_v21 = vadd.f32 %v4570_v60, %v4400_v40  ;;  %v4975_v27 = vmul.f32 %v13710_v41, %v13711_v14  ;;  %v2401_v54 = vadd.f32 %v2369_v49, %v2199_v9  ;;  %v2773_v8 = vmul.f32 %v9247_v62, %v13643_v7  ;;  %v13716_v49 = vld [vmem:[#allocation29_spill] sm:$0xff] }
 0x2b4   : > { %v4603_v47 = vadd.f32 %v4571_v48, %v4401_v63  ;;  %v5176_v60 = vmul.f32 %v13713_v15, %v13712_v10  ;;  %v5177_v25 = vmul.f32 %v13713_v15, %v13714_v58  ;;  %v2602_v55 = vadd.f32 %v2570_v57, %v2400_v1  ;;  %v13717_v57 = vld [vmem:[#allocation30_spill] sm:$0xff] }
 0x2b5   : > { %v4804_v35 = vadd.f32 %v4772_v16, %v4602_v21  ;;  %v2603_v48 = vadd.f32 %v2571_v34, %v2401_v54  ;;  %v2974_v51 = vmul.f32 %v9253_v2, %v13645_v24  ;;  %v2975_v3 = vmul.f32 %v9258_v59, %v13645_v24  ;;  %v13718_v34 = vld [vmem:[#allocation31_spill] sm:$0xff] }
 0x2b6   : > { %v4805_v38 = vadd.f32 %v4773_v20, %v4603_v47  ;;  %v5378_v62 = vmul.f32 %v9405_v42, %v13715_v43  ;;  %v5379_v40 = vmul.f32 %v9405_v42, %v13716_v49  ;;  %v2804_v63 = vadd.f32 %v2772_v4, %v2602_v55  ;;  %v13719_v4 = vld [vmem:[#allocation33_spill] sm:$0xff] }
 0x2b7   : > { %v5006_v28 = vadd.f32 %v4974_v12, %v4804_v35  ;;  %v2805_v16 = vadd.f32 %v2773_v8, %v2603_v48  ;;  %v3176_v20 = vmul.f32 %v13709_v22, %v13649_v17  ;;  %v3177_v26 = vmul.f32 %v13711_v14, %v13649_v17  ;;  %v13720_v8 = vld [vmem:[#allocation35_spill] sm:$0xff] }
 0x2b8   : > { %v5007_v13 = vadd.f32 %v4975_v27, %v4805_v38  ;;  %v5580_v59 = vmul.f32 %v9461_v32, %v13717_v57  ;;  %v5581_v21 = vmul.f32 %v9461_v32, %v13718_v34  ;;  %v3006_v47 = vadd.f32 %v2974_v51, %v2804_v63 }
 0x2b9   : > { %v5208_v2 = vadd.f32 %v5176_v60, %v5006_v28  ;;  %v3007_v12 = vadd.f32 %v2975_v3, %v2805_v16  ;;  %v3378_v27 = vmul.f32 %v13712_v10, %v13653_v31  ;;  %v3379_v1 = vmul.f32 %v13714_v58, %v13653_v31  ;;  %v13721_v16 = vld [vmem:[#allocation36_spill] sm:$0xff] }
 0x2ba   : > { %v5209_v9 = vadd.f32 %v5177_v25, %v5007_v13  ;;  %v5782_v14 = vmul.f32 %v9465_v45, %v13719_v4  ;;  %v5783_v35 = vmul.f32 %v9465_v45, %v13720_v8  ;;  %v3208_v38 = vadd.f32 %v3176_v20, %v3006_v47  ;;  %v13726_v47 = vld [vmem:[#allocation39_spill] sm:$0xff] }
 0x2bb   : > { %v5410_v22 = vadd.f32 %v5378_v62, %v5208_v2  ;;  %v3209_v60 = vadd.f32 %v3177_v26, %v3007_v12  ;;  %v3580_v25 = vmul.f32 %v13715_v43, %v13658_v44  ;;  %v3581_v55 = vmul.f32 %v13716_v49, %v13658_v44  ;;  %v1811_v43 = vld [vmem:[#allocation3 + $0x10] sm:$0xff]  ;;  %v13722_v26 = vld [vmem:[#allocation37_spill] sm:$0xff] }
 0x2bc   : > { %v5411_v54 = vadd.f32 %v5379_v40, %v5209_v9  ;;  %v3781_v58 = vmul.f32 %v13717_v57, %v13663_v46  ;;  %v3782_v51 = vmul.f32 %v13718_v34, %v13663_v46  ;;  %v3410_v3 = vadd.f32 %v3378_v27, %v3208_v38  ;;  %v1812_v40 = vld [vmem:[#allocation3 + $0x18] sm:$0xff]  ;;  %v9579_v9 = vld [vmem:[#allocation3 + $0x20] sm:$0xff]  ;;  %v9581_v57 = vld [vmem:[#allocation3 + $0x28] sm:$0xff] }
 0x2bd   : > { %v5612_v10 = vadd.f32 %v5580_v59, %v5410_v22  ;;  %v3411_v28 = vadd.f32 %v3379_v1, %v3209_v60  ;;  %v3982_v13 = vmul.f32 %v13719_v4, %v9317_v53  ;;  %v3983_v62 = vmul.f32 %v13720_v8, %v9317_v53  ;;  %13723 = vst [vmem:[#allocation58_spill] sm:$0xff] %v9579_v9  ;;  %v9583_v59 = vld [vmem:[#allocation3 + $0x30] sm:$0xff]  ;;  %v9589_v22 = vld [vmem:[#allocation3 + $0x38] sm:$0xff]  ;;  %v9593_v4 = vld [vmem:[#allocation3 + $0x48] sm:$0xff] }
 0x2be   : > { %v5613_v48 = vadd.f32 %v5581_v21, %v5411_v54  ;;  %v4184_v20 = vmul.f32 %v13721_v16, %v9324_v36  ;;  %v4185_v2 = vmul.f32 %v13722_v26, %v9324_v36  ;;  %13724 = vst [vmem:[#allocation83_spill] sm:$0xff] %v9581_v57  ;;  %13725 = vst [vmem:[#allocation59_spill] sm:$0xff] %v9583_v59  ;;  %v13727_v27 = vld [vmem:[#allocation40_spill] sm:$0xff]  ;;  %v9591_v54 = vld [vmem:[#allocation3 + $0x40] sm:$0xff] }
 0x2bf   : > { %v5814_v63 = vadd.f32 %v5782_v14, %v5612_v10  ;;  %v3612_v34 = vadd.f32 %v3580_v25, %v3410_v3  ;;  %v3613_v21 = vadd.f32 %v3581_v55, %v3411_v28  ;;  %v4386_v12 = vmul.f32 %v13726_v47, %v9339_v18  ;;  %13728 = vst [vmem:[#allocation62_spill] sm:$0xff] %v9589_v22  ;;  %v13731_v8 = vld [vmem:[#allocation42_spill] sm:$0xff]  ;;  %v13732_v38 = vld [vmem:[#allocation56_spill] sm:$0xff] }
 0x2c0   : > { %v5815_v49 = vadd.f32 %v5783_v35, %v5613_v48  ;;  %v4387_v1 = vmul.f32 %v13727_v27, %v9339_v18  ;;  %13729 = vst [vmem:[#allocation63_spill] sm:$0xff] %v9591_v54  ;;  %13730 = vst [vmem:[#allocation67_spill] sm:$0xff] %v9593_v4  ;;  %v4588_v35 = vmul.f32 %v13731_v8, %v9354_v23  ;;  %v13733_v48 = vld [vmem:[#allocation57_spill] sm:$0xff]  ;;  %v9603_v16 = vld [vmem:[#allocation3 + $0x50] sm:$0xff] }
 0x2c1   : > { %v1847_v60 = vmul.f32 %v13732_v38, %v1811_v43  ;;  %v1848_v25 = vmul.f32 %v13732_v38, %v1812_v40  ;;  %v3813_v55 = vadd.f32 %v3781_v58, %v3612_v34  ;;  %v3814_v10 = vadd.f32 %v3782_v51, %v3613_v21  ;;  %13734 = vst [vmem:[#allocation68_spill] sm:$0xff] %v9603_v16  ;;  %v9605_v26 = vld [vmem:[#allocation3 + $0x58] sm:$0xff]  ;;  %v9617_v8 = vld [vmem:[#allocation3 + $0x60] sm:$0xff] }
 0x2c2   : > { %v6721_v14 = vpack.c.bf16 %v5815_v49, %v5814_v63  ;;  %v2049_v3 = vmul.f32 %v13733_v48, %v9579_v9  ;;  %v2050_v28 = vmul.f32 %v13733_v48, %v9581_v57  ;;  %13735 = vst [vmem:[#allocation22_spill] sm:$0xff] %v9605_v26  ;;  %v13736_v63 = vld [vmem:[#allocation64_spill] sm:$0xff]  ;;  %v13737_v51 = vld [vmem:[#allocation65_spill] sm:$0xff]  ;;  %13738 = vst [vmem:[#allocation23_spill] sm:$0xff] %v9617_v8 }
 0x2c3   : > { %v2251_v43 = vmul.f32 %v13736_v63, %v9583_v59  ;;  %v2252_v58 = vmul.f32 %v13736_v63, %v9589_v22  ;;  %v2453_v40 = vmul.f32 %v13737_v51, %v9591_v54  ;;  %v2454_v49 = vmul.f32 %v13737_v51, %v9593_v4  ;;  %v9619_v57 = vld [vmem:[#allocation3 + $0x68] sm:$0xff]  ;;  %v13741_v9 = vld [vmem:[#allocation49_spill] sm:$0xff] }
 0x2c4   : > { %6723 = vmatpush3.bf16.xpose.msk.msra.mxu0 %vm9262_vm1, %v6721_v14  ;;  %v4014_v34 = vadd.f32 %v3982_v13, %v3813_v55  ;;  %v4015_v21 = vadd.f32 %v3983_v62, %v3814_v10  ;;  %v2081_v47 = vadd.f32 %v2049_v3, %v1847_v60  ;;  %v2082_v27 = vadd.f32 %v2050_v28, %v1848_v25  ;;  %v13740_v14 = vld [vmem:[#allocation43_spill] sm:$0xff]  ;;  %v13742_v18 = vld [vmem:[#allocation69_spill] sm:$0xff]  ;;  %v13745_v3 = vld [vmem:[#allocation50_spill] sm:$0xff] }
 0x2c5   : > { %13739 = vst [vmem:[#allocation109_spill] sm:$0xff] %v9619_v57  ;;  %v4589_v59 = vmul.f32 %v13740_v14, %v9354_v23  ;;  %v4790_v22 = vmul.f32 %v13741_v9, %v9365_v30  ;;  %v2655_v54 = vmul.f32 %v13742_v18, %v9603_v16  ;;  %v2656_v4 = vmul.f32 %v13742_v18, %v9605_v26  ;;  %v9629_v55 = vld [vmem:[#allocation3 + $0x70] sm:$0xff]  ;;  %v9631_v10 = vld [vmem:[#allocation3 + $0x78] sm:$0xff] }
 0x2c6   : > { %v4216_v13 = vadd.f32 %v4184_v20, %v4014_v34  ;;  %v4217_v62 = vadd.f32 %v4185_v2, %v4015_v21  ;;  %v2283_v60 = vadd.f32 %v2251_v43, %v2081_v47  ;;  %v2284_v25 = vadd.f32 %v2252_v58, %v2082_v27  ;;  %13743 = vst [vmem:[#allocation93_spill] sm:$0xff] %v9629_v55  ;;  %v13746_v14 = vld [vmem:[#allocation52_spill] sm:$0xff]  ;;  %v13747_v23 = vld [vmem:[#allocation71_spill] sm:$0xff]  ;;  %v9641_v34 = vld [vmem:[#allocation3 + $0x80] sm:$0xff] }
 0x2c7   : > { %13744 = vst [vmem:[#allocation111_spill] sm:$0xff] %v9631_v10  ;;  %v4791_v28 = vmul.f32 %v13745_v3, %v9365_v30  ;;  %v4992_v9 = vmul.f32 %v13746_v14, %v13710_v41  ;;  %v2857_v16 = vmul.f32 %v13747_v23, %v9617_v8  ;;  %v2858_v26 = vmul.f32 %v13747_v23, %v9619_v57  ;;  %v9643_v21 = vld [vmem:[#allocation3 + $0x88] sm:$0xff]  ;;  %v13751_v14 = vld [vmem:[#allocation73_spill] sm:$0xff] }
 0x2c8   : > { %v4418_v20 = vadd.f32 %v4386_v12, %v4216_v13  ;;  %v4419_v2 = vadd.f32 %v4387_v1, %v4217_v62  ;;  %v2485_v43 = vadd.f32 %v2453_v40, %v2283_v60  ;;  %v2486_v58 = vadd.f32 %v2454_v49, %v2284_v25  ;;  %13748 = vst [vmem:[#allocation96_spill] sm:$0xff] %v9641_v34  ;;  %v13750_v47 = vld [vmem:[#allocation14_spill] sm:$0xff]  ;;  %v9653_v13 = vld [vmem:[#allocation3 + $0x90] sm:$0xff]  ;;  %v9655_v62 = vld [vmem:[#allocation3 + $0x98] sm:$0xff] }
 0x2c9   : > { %13749 = vst [vmem:[#allocation110_spill] sm:$0xff] %v9643_v21  ;;  %v4993_v27 = vmul.f32 %v13750_v47, %v13710_v41  ;;  %v5194_v3 = vmul.f32 %v9431_v37, %v13713_v15  ;;  %v3059_v8 = vmul.f32 %v13751_v14, %v9629_v55  ;;  %v3060_v57 = vmul.f32 %v13751_v14, %v9631_v10  ;;  %v13754_v25 = vld [vmem:[#allocation75_spill] sm:$0xff]  ;;  %v13773_v30 = vld [vmem:[#allocation82_spill] sm:$0xff] }
 0x2ca   : > { %v4620_v12 = vadd.f32 %v4588_v35, %v4418_v20  ;;  %v4621_v1 = vadd.f32 %v4589_v59, %v4419_v2  ;;  %v2687_v40 = vadd.f32 %v2655_v54, %v2485_v43  ;;  %v2688_v49 = vadd.f32 %v2656_v4, %v2486_v58  ;;  %13752 = vst [vmem:[#allocation94_spill] sm:$0xff] %v9653_v13  ;;  %v9665_v54 = vld [vmem:[#allocation2 + $0x1d0] sm:$0xff]  ;;  %v9667_v2 = vld [vmem:[#allocation3 + $0xa0] sm:$0xff]  ;;  %v9669_v43 = vld [vmem:[#allocation3 + $0xa8] sm:$0xff] }
 0x2cb   : > { %13753 = vst [vmem:[#allocation113_spill] sm:$0xff] %v9655_v62  ;;  %v5195_v60 = vmul.f32 %v9433_v50, %v13713_v15  ;;  %v5396_v37 = vmul.f32 %v9453_v39, %v9405_v42  ;;  %v3261_v47 = vmul.f32 %v13754_v25, %v9641_v34  ;;  %v3262_v10 = vmul.f32 %v13754_v25, %v9643_v21  ;;  %v9675_v58 = vld [vmem:[#allocation2 + $0x1d8] sm:$0xff] }
 0x2cc   : > { %v4822_v35 = vadd.f32 %v4790_v22, %v4620_v12  ;;  %v4823_v59 = vadd.f32 %v4791_v28, %v4621_v1  ;;  %13755 = vst [vmem:[#allocation95_spill] sm:$0xff] %v9665_v54  ;;  %v2889_v4 = vadd.f32 %v2857_v16, %v2687_v40  ;;  %v2890_v20 = vadd.f32 %v2858_v26, %v2688_v49  ;;  %v13759_v21 = vld [vmem:[#allocation76_spill] sm:$0xff] }
 0x2cd   : > { %13756 = vst [vmem:[#allocation97_spill] sm:$0xff] %v9667_v2  ;;  %13757 = vst [vmem:[#allocation112_spill] sm:$0xff] %v9669_v43  ;;  %v5397_v50 = vmul.f32 %v9455_v5, %v9405_v42  ;;  %v5598_v39 = vmul.f32 %v9468_v29, %v9461_v32  ;;  %v3463_v22 = vmul.f32 %v13759_v21, %v9653_v13  ;;  %v9681_v40 = vld [vmem:[#allocation3 + $0xb0] sm:$0xff]  ;;  %v9683_v49 = vld [vmem:[#allocation3 + $0xb8] sm:$0xff] }
 0x2ce   : > { %13758 = vst [vmem:[#allocation98_spill] sm:$0xff] %v9675_v58  ;;  %v3464_v28 = vmul.f32 %v13759_v21, %v9655_v62  ;;  %v5024_v16 = vadd.f32 %v4992_v9, %v4822_v35  ;;  %v5025_v26 = vadd.f32 %v4993_v27, %v4823_v59  ;;  %v3091_v12 = vadd.f32 %v3059_v8, %v2889_v4  ;;  %v9685_v5 = vld [vmem:[#allocation3 + $0xc0] sm:$0xff]  ;;  %v9695_v8 = vld [vmem:[#allocation3 + $0xc8] sm:$0xff]  ;;  %v9697_v4 = vld [vmem:[#allocation3 + $0xd0] sm:$0xff] }
 0x2cf   : > { %v3092_v1 = vadd.f32 %v3060_v57, %v2890_v20  ;;  %13760 = vst [vmem:[#allocation114_spill] sm:$0xff] %v9681_v40  ;;  %13761 = vst [vmem:[#allocation103_spill] sm:$0xff] %v9683_v49  ;;  %v5599_v29 = vmul.f32 %v9470_v19, %v9461_v32  ;;  %v5800_v34 = vmul.f32 %v9465_v45, %v9665_v54  ;;  %v13763_v13 = vld [vmem:[#allocation77_spill] sm:$0xff]  ;;  %v13768_v62 = vld [vmem:[#allocation78_spill] sm:$0xff] }
 0x2d0   : > { %13762 = vst [vmem:[#allocation105_spill] sm:$0xff] %v9685_v5  ;;  %v3665_v55 = vmul.f32 %v13763_v13, %v9667_v2  ;;  %v3666_v9 = vmul.f32 %v13763_v13, %v9669_v43  ;;  %13764 = vst [vmem:[#allocation61_spill] sm:$0xff] %v9695_v8  ;;  %v5226_v57 = vadd.f32 %v5194_v3, %v5024_v16  ;;  %v9699_v20 = vld [vmem:[#allocation3 + $0xd8] sm:$0xff]  ;;  %v9701_v19 = vld [vmem:[#allocation3 + $0xe0] sm:$0xff] }
 0x2d1   : > { %v5227_v27 = vadd.f32 %v5195_v60, %v5025_v26  ;;  %v3293_v35 = vadd.f32 %v3261_v47, %v3091_v12  ;;  %v3294_v59 = vadd.f32 %v3262_v10, %v3092_v1  ;;  %13765 = vst [vmem:[#allocation66_spill] sm:$0xff] %v9697_v4  ;;  %13766 = vst [vmem:[#allocation100_spill] sm:$0xff] %v9699_v20  ;;  %v13769_v3 = vld [vmem:[#allocation79_spill] sm:$0xff] }
 0x2d2   : > { %13767 = vst [vmem:[#allocation101_spill] sm:$0xff] %v9701_v19  ;;  %v5801_v54 = vmul.f32 %v9465_v45, %v9675_v58  ;;  %v3865_v32 = vmul.f32 %v13768_v62, %v9681_v40  ;;  %v3866_v42 = vmul.f32 %v13768_v62, %v9683_v49  ;;  %v4067_v60 = vmul.f32 %v13769_v3, %v9685_v5  ;;  %v9711_v12 = vld [vmem:[#allocation3 + $0xe8] sm:$0xff]  ;;  %v9713_v1 = vld [vmem:[#allocation3 + $0xf0] sm:$0xff]  ;;  %v13772_v45 = vld [vmem:[#allocation81_spill] sm:$0xff] }
 0x2d3   : > { %v5428_v47 = vadd.f32 %v5396_v37, %v5226_v57  ;;  %v5429_v10 = vadd.f32 %v5397_v50, %v5227_v27  ;;  %v3495_v16 = vadd.f32 %v3463_v22, %v3293_v35  ;;  %v3496_v26 = vadd.f32 %v3464_v28, %v3294_v59  ;;  %13770 = vst [vmem:[#allocation70_spill] sm:$0xff] %v9711_v12  ;;  %v9725_v27 = vld [vmem:[#allocation3 + $0xf8] sm:$0xff]  ;;  %v13775_v35 = vld [vmem:[#allocation86_spill] sm:$0xff] }
 0x2d4   : > { %13771 = vst [vmem:[#allocation107_spill] sm:$0xff] %v9713_v1  ;;  %v4068_v58 = vmul.f32 %v13769_v3, %v9695_v8  ;;  %v4269_v15 = vmul.f32 %v13772_v45, %v9697_v4  ;;  %v4270_v41 = vmul.f32 %v13772_v45, %v9699_v20  ;;  %v4471_v36 = vmul.f32 %v13773_v30, %v9701_v19 }
 0x2d5   : > { %v5630_v37 = vadd.f32 %v5598_v39, %v5428_v47  ;;  %v5631_v50 = vadd.f32 %v5599_v29, %v5429_v10  ;;  %v3697_v22 = vadd.f32 %v3665_v55, %v3495_v16  ;;  %v3698_v28 = vadd.f32 %v3666_v9, %v3496_v26  ;;  %13774 = vst [vmem:[#allocation72_spill] sm:$0xff] %v9725_v27  ;;  %v9733_v55 = vld [vmem:[#allocation3 + $0x100] sm:$0xff]  ;;  %v9735_v9 = vld [vmem:[#allocation3 + $0x108] sm:$0xff] }
 0x2d6   : > { %v4472_v57 = vmul.f32 %v13773_v30, %v9711_v12  ;;  %v4673_v59 = vmul.f32 %v13775_v35, %v9713_v1  ;;  %v1865_v53 = vmul.f32 %v9667_v2, %v13732_v38  ;;  %v1866_v46 = vmul.f32 %v9669_v43, %v13732_v38  ;;  %13776 = vst [vmem:[#allocation74_spill] sm:$0xff] %v9733_v55  ;;  %v9799_v43 = vld [vmem:[#allocation3 + $0x158] sm:$0xff] }
 0x2d7   : > { %v5832_v44 = vadd.f32 %v5800_v34, %v5630_v37  ;;  %v5833_v31 = vadd.f32 %v5801_v54, %v5631_v50  ;;  %v3897_v39 = vadd.f32 %v3865_v32, %v3697_v22  ;;  %v3898_v29 = vadd.f32 %v3866_v42, %v3698_v28  ;;  %13777 = vst [vmem:[#allocation54_spill] sm:$0xff] %v9735_v9  ;;  %v9747_v37 = vld [vmem:[#allocation3 + $0x110] sm:$0xff]  ;;  %v9749_v50 = vld [vmem:[#allocation3 + $0x118] sm:$0xff] }
 0x2d8   : > { %v2067_v47 = vmul.f32 %v9681_v40, %v13733_v48  ;;  %v2068_v10 = vmul.f32 %v9683_v49, %v13733_v48  ;;  %v2269_v16 = vmul.f32 %v9685_v5, %v13736_v63  ;;  %v2270_v26 = vmul.f32 %v9695_v8, %v13736_v63  ;;  %13778 = vst [vmem:[#allocation55_spill] sm:$0xff] %v9747_v37  ;;  %v9775_v8 = vld [vmem:[#allocation3 + $0x138] sm:$0xff]  ;;  %v9787_v40 = vld [vmem:[#allocation3 + $0x148] sm:$0xff] }
 0x2d9   : > { %v6724_v34 = vpack.c.bf16 %v5833_v31, %v5832_v44  ;;  %v4099_v54 = vadd.f32 %v4067_v60, %v3897_v39  ;;  %v4100_v32 = vadd.f32 %v4068_v58, %v3898_v29  ;;  %v4674_v42 = vmul.f32 %v13775_v35, %v9725_v27  ;;  %13779 = vst [vmem:[#allocation60_spill] sm:$0xff] %v9749_v50  ;;  %v13780_v58 = vld [vmem:[#allocation87_spill] sm:$0xff]  ;;  %v9761_v29 = vld [vmem:[#allocation3 + $0x120] sm:$0xff] }
 0x2da   : > { %v2099_v22 = vadd.f32 %v2067_v47, %v1865_v53  ;;  %v2100_v28 = vadd.f32 %v2068_v10, %v1866_v46  ;;  %v2471_v49 = vmul.f32 %v9697_v4, %v13737_v51  ;;  %v2472_v5 = vmul.f32 %v9699_v20, %v13737_v51  ;;  %13781 = vst [vmem:[#allocation84_spill] sm:$0xff] %v9761_v29  ;;  %v9763_v46 = vld [vmem:[#allocation3 + $0x128] sm:$0xff]  ;;  %v9773_v4 = vld [vmem:[#allocation3 + $0x130] sm:$0xff] }
 0x2db   : > { %6726 = vmatprep.subr.msk.bf16.mxu0 %vm9262_vm1, %v6724_v34  ;;  %v4301_v44 = vadd.f32 %v4269_v15, %v4099_v54  ;;  %v4302_v31 = vadd.f32 %v4270_v41, %v4100_v32  ;;  %v4875_v60 = vmul.f32 %v13780_v58, %v9733_v55  ;;  %v4876_v39 = vmul.f32 %v13780_v58, %v9735_v9  ;;  %v13783_v54 = vld [vmem:[#allocation88_spill] sm:$0xff] }
 0x2dc   : > { %13782 = vst [vmem:[#allocation85_spill] sm:$0xff] %v9763_v46  ;;  %v2301_v53 = vadd.f32 %v2269_v16, %v2099_v22  ;;  %v2302_v47 = vadd.f32 %v2270_v26, %v2100_v28  ;;  %v2673_v10 = vmul.f32 %v9701_v19, %v13742_v18  ;;  %v2674_v34 = vmul.f32 %v9711_v12, %v13742_v18  ;;  %v9785_v19 = vld [vmem:[#allocation3 + $0x140] sm:$0xff] }
 0x2dd   : > { %v4503_v15 = vadd.f32 %v4471_v36, %v4301_v44  ;;  %v4504_v41 = vadd.f32 %v4472_v57, %v4302_v31  ;;  %v5077_v32 = vmul.f32 %v13783_v54, %v9747_v37  ;;  %v5078_v20 = vmul.f32 %v13783_v54, %v9749_v50  ;;  %13784 = vst [vmem:[#allocation24_spill] sm:$0xff] %v9773_v4  ;;  %v13786_v44 = vld [vmem:[#allocation89_spill] sm:$0xff] }
 0x2de   : > { %13785 = vst [vmem:[#allocation25_spill] sm:$0xff] %v9775_v8  ;;  %v2503_v16 = vadd.f32 %v2471_v49, %v2301_v53  ;;  %v2504_v26 = vadd.f32 %v2472_v5, %v2302_v47  ;;  %v2875_v22 = vmul.f32 %v9713_v1, %v13747_v23  ;;  %v2876_v28 = vmul.f32 %v9725_v27, %v13747_v23  ;;  %v9797_v1 = vld [vmem:[#allocation3 + $0x150] sm:$0xff] }
 0x2df   : > { %v4705_v36 = vadd.f32 %v4673_v59, %v4503_v15  ;;  %v4706_v57 = vadd.f32 %v4674_v42, %v4504_v41  ;;  %v5279_v31 = vmul.f32 %v13786_v44, %v9761_v29  ;;  %v5280_v12 = vmul.f32 %v13786_v44, %v9763_v46  ;;  %13787 = vst [vmem:[#allocation26_spill] sm:$0xff] %v9785_v19  ;;  %v13789_v15 = vld [vmem:[#allocation90_spill] sm:$0xff] }
 0x2e0   : > { %13788 = vst [vmem:[#allocation27_spill] sm:$0xff] %v9787_v40  ;;  %v2705_v49 = vadd.f32 %v2673_v10, %v2503_v16  ;;  %v2706_v5 = vadd.f32 %v2674_v34, %v2504_v26  ;;  %v3077_v53 = vmul.f32 %v9733_v55, %v13751_v14  ;;  %v3078_v47 = vmul.f32 %v9735_v9, %v13751_v14 }
 0x2e1   : > { %v4907_v59 = vadd.f32 %v4875_v60, %v4705_v36  ;;  %v4908_v42 = vadd.f32 %v4876_v39, %v4706_v57  ;;  %v5481_v41 = vmul.f32 %v13789_v15, %v9773_v4  ;;  %v5482_v27 = vmul.f32 %v13789_v15, %v9775_v8  ;;  %13790 = vst [vmem:[#allocation28_spill] sm:$0xff] %v9797_v1  ;;  %v13792_v36 = vld [vmem:[#allocation91_spill] sm:$0xff] }
 0x2e2   : > { %13791 = vst [vmem:[#allocation29_spill] sm:$0xff] %v9799_v43  ;;  %v2907_v10 = vadd.f32 %v2875_v22, %v2705_v49  ;;  %v2908_v34 = vadd.f32 %v2876_v28, %v2706_v5  ;;  %v3279_v16 = vmul.f32 %v9747_v37, %v13754_v25  ;;  %v3280_v26 = vmul.f32 %v9749_v50, %v13754_v25  ;;  %v13793_v50 = vld [vmem:[#allocation92_spill] sm:$0xff]  ;;  %v13840_v37 = vld [vmem:[#allocation38_spill] sm:$0xff] }
 0x2e3   : > { %v5109_v60 = vadd.f32 %v5077_v32, %v4907_v59  ;;  %v5110_v39 = vadd.f32 %v5078_v20, %v4908_v42  ;;  %v5683_v57 = vmul.f32 %v13792_v36, %v9785_v19  ;;  %v5684_v9 = vmul.f32 %v13792_v36, %v9787_v40 }
 0x2e4   : > { %v3109_v55 = vadd.f32 %v3077_v53, %v2907_v10  ;;  %v3110_v2 = vadd.f32 %v3078_v47, %v2908_v34  ;;  %v3481_v22 = vmul.f32 %v9761_v29, %v13759_v21  ;;  %v3482_v28 = vmul.f32 %v9763_v46, %v13759_v21  ;;  %v9821_v10 = vld [vmem:[#allocation3 + $0x160] sm:$0xff]  ;;  %v9823_v34 = vld [vmem:[#allocation3 + $0x168] sm:$0xff] }
 0x2e5   : > { %v5311_v49 = vadd.f32 %v5279_v31, %v5109_v60  ;;  %v5312_v5 = vadd.f32 %v5280_v12, %v5110_v39  ;;  %v5885_v32 = vmul.f32 %v13793_v50, %v9797_v1  ;;  %v5886_v20 = vmul.f32 %v13793_v50, %v9799_v43  ;;  %13794 = vst [vmem:[#allocation30_spill] sm:$0xff] %v9821_v10 }
 0x2e6   : > { %v3311_v59 = vadd.f32 %v3279_v16, %v3109_v55  ;;  %v3312_v42 = vadd.f32 %v3280_v26, %v3110_v2  ;;  %v3683_v53 = vmul.f32 %v9773_v4, %v13763_v13  ;;  %v3684_v47 = vmul.f32 %v9775_v8, %v13763_v13  ;;  %13795 = vst [vmem:[#allocation31_spill] sm:$0xff] %v9823_v34  ;;  %v9829_v55 = vld [vmem:[#allocation3 + $0x170] sm:$0xff]  ;;  %v9831_v2 = vld [vmem:[#allocation3 + $0x178] sm:$0xff] }
 0x2e7   : > { %v5513_v31 = vadd.f32 %v5481_v41, %v5311_v49  ;;  %v5514_v12 = vadd.f32 %v5482_v27, %v5312_v5  ;;  %v3883_v60 = vmul.f32 %v9785_v19, %v13768_v62  ;;  %v3884_v39 = vmul.f32 %v9787_v40, %v13768_v62  ;;  %13796 = vst [vmem:[#allocation33_spill] sm:$0xff] %v9829_v55  ;;  %v9837_v41 = vld [vmem:[#allocation3 + $0x180] sm:$0xff] }
 0x2e8   : > { %13797 = vst [vmem:[#allocation35_spill] sm:$0xff] %v9831_v2  ;;  %v3513_v16 = vadd.f32 %v3481_v22, %v3311_v59  ;;  %v3514_v26 = vadd.f32 %v3482_v28, %v3312_v42  ;;  %v4085_v8 = vmul.f32 %v9797_v1, %v13769_v3  ;;  %v4086_v4 = vmul.f32 %v9799_v43, %v13769_v3  ;;  %v9850_v43 = vld [vmem:[#allocation3 + $0x188] sm:$0xff] }
 0x2e9   : > { %13798 = vst [vmem:[#allocation36_spill] sm:$0xff] %v9837_v41  ;;  %v5715_v27 = vadd.f32 %v5683_v57, %v5513_v31  ;;  %v5716_v49 = vadd.f32 %v5684_v9, %v5514_v12  ;;  %v4287_v5 = vmul.f32 %v13772_v45, %v9821_v10  ;;  %v4288_v40 = vmul.f32 %v13772_v45, %v9823_v34  ;;  %v7041_v9 = vld [vmem:[#allocation2 + $0x10] sm:$0xff]  ;;  %v9937_v1 = vld [vmem:[#allocation2 + $0xa8] sm:$0xff] }
 0x2ea   : > { %v3715_v19 = vadd.f32 %v3683_v53, %v3513_v16  ;;  %v3716_v46 = vadd.f32 %v3684_v47, %v3514_v26  ;;  %v4489_v22 = vmul.f32 %v13773_v30, %v9829_v55  ;;  %v4490_v28 = vmul.f32 %v13773_v30, %v9831_v2  ;;  %13799 = vst [vmem:[#allocation37_spill] sm:$0xff] %v9850_v43  ;;  %v9852_v53 = vld [vmem:[#allocation3 + $0x190] sm:$0xff]  ;;  %v7042_v47 = vld [vmem:[#allocation2 + $0x18] sm:$0xff]  ;;  %v7043_v26 = vld [vmem:[#allocation2 + $0x20] sm:$0xff] }
 0x2eb   : > { %v5917_v59 = vadd.f32 %v5885_v32, %v5715_v27  ;;  %v5918_v42 = vadd.f32 %v5886_v20, %v5716_v49  ;;  %v4691_v57 = vmul.f32 %v13775_v35, %v9837_v41  ;;  %v1747_v31 = vmul.f32 %v7041_v9, %v13707_v52  ;;  %13800 = vst [vmem:[#allocation39_spill] sm:$0xff] %v9852_v53  ;;  %v7044_v20 = vld [vmem:[#allocation2 + $0x28] sm:$0xff]  ;;  %v13801_v49 = vld [vmem:[#allocation45_spill] sm:$0xff] }
 0x2ec   : > { %v3915_v12 = vadd.f32 %v3883_v60, %v3715_v19  ;;  %v3916_v10 = vadd.f32 %v3884_v39, %v3716_v46  ;;  %v1748_v16 = vmul.f32 %v7042_v47, %v13707_v52  ;;  %v1948_v2 = vmul.f32 %v7043_v26, %v13708_v6  ;;  %v13802_v19 = vld [vmem:[#allocation46_spill] sm:$0xff]  ;;  %v9861_v9 = vld [vmem:[#allocation3 + $0x198] sm:$0xff]  ;;  %v13805_v34 = vld [vmem:[#allocation47_spill] sm:$0xff] }
 0x2ed   : > { %v6775_v32 = vpack.c.bf16 %v5918_v42, %v5917_v59  ;;  %v1949_v27 = vmul.f32 %v7044_v20, %v13708_v6  ;;  %v2150_v41 = vmul.f32 %v13801_v49, %v13634_v0  ;;  %v2151_v46 = vmul.f32 %v13802_v19, %v13634_v0  ;;  %13803 = vst [vmem:[#allocation40_spill] sm:$0xff] %v9861_v9  ;;  %v9863_v55 = vld [vmem:[#allocation3 + $0x1a0] sm:$0xff]  ;;  %v9875_v49 = vld [vmem:[#allocation3 + $0x1a8] sm:$0xff] }
 0x2ee   : > { %v4117_v60 = vadd.f32 %v4085_v8, %v3915_v12  ;;  %v4118_v39 = vadd.f32 %v4086_v4, %v3916_v10  ;;  %13804 = vst [vmem:[#allocation42_spill] sm:$0xff] %v9863_v55  ;;  %v1980_v47 = vadd.f32 %v1948_v2, %v1747_v31  ;;  %v2352_v26 = vmul.f32 %v13805_v34, %v13636_v61  ;;  %v13806_v8 = vld [vmem:[#allocation48_spill] sm:$0xff] }
 0x2ef   : > { %6777 = vmatpush3.bf16.xpose.msk.msra.mxu1 %vm9262_vm1, %v6775_v32  ;;  %v4692_v59 = vmul.f32 %v13775_v35, %v9850_v43  ;;  %v4893_v42 = vmul.f32 %v13780_v58, %v9852_v53  ;;  %v1981_v20 = vadd.f32 %v1949_v27, %v1748_v16  ;;  %v2353_v4 = vmul.f32 %v13806_v8, %v13636_v61  ;;  %v9877_v2 = vld [vmem:[#allocation3 + $0x1b0] sm:$0xff] }
 0x2f0   : > { %v4319_v10 = vadd.f32 %v4287_v5, %v4117_v60  ;;  %v4320_v12 = vadd.f32 %v4288_v40, %v4118_v39  ;;  %13807 = vst [vmem:[#allocation43_spill] sm:$0xff] %v9875_v49  ;;  %13808 = vst [vmem:[#allocation49_spill] sm:$0xff] %v9877_v2  ;;  %v2182_v34 = vadd.f32 %v2150_v41, %v1980_v47  ;;  %v13809_v27 = vld [vmem:[#allocation16_spill] sm:$0xff]  ;;  %v9889_v39 = vld [vmem:[#allocation3 + $0x1c0] sm:$0xff] }
 0x2f1   : > { %v2554_v31 = vmul.f32 %v9415_v33, %v13641_v56  ;;  %v4894_v32 = vmul.f32 %v13780_v58, %v9861_v9  ;;  %v5095_v19 = vmul.f32 %v13783_v54, %v9863_v55  ;;  %v2183_v16 = vadd.f32 %v2151_v46, %v1981_v20  ;;  %v9887_v60 = vld [vmem:[#allocation3 + $0x1b8] sm:$0xff]  ;;  %13811 = vst [vmem:[#allocation52_spill] sm:$0xff] %v9889_v39  ;;  %v13813_v20 = vld [vmem:[#allocation18_spill] sm:$0xff] }
 0x2f2   : > { %v2555_v8 = vmul.f32 %v13809_v27, %v13641_v56  ;;  %v4521_v5 = vadd.f32 %v4489_v22, %v4319_v10  ;;  %v4522_v40 = vadd.f32 %v4490_v28, %v4320_v12  ;;  %13810 = vst [vmem:[#allocation50_spill] sm:$0xff] %v9887_v60  ;;  %v2384_v41 = vadd.f32 %v2352_v26, %v2182_v34  ;;  %v13812_v47 = vld [vmem:[#allocation17_spill] sm:$0xff]  ;;  %v9901_v12 = vld [vmem:[#allocation3 + $0x1c8] sm:$0xff]  ;;  %v9903_v26 = vld [vmem:[#allocation3 + $0x1d0] sm:$0xff] }
 0x2f3   : > { %v2756_v33 = vmul.f32 %v13812_v47, %v13643_v7  ;;  %v5096_v9 = vmul.f32 %v13783_v54, %v9875_v49  ;;  %v5297_v55 = vmul.f32 %v13786_v44, %v9877_v2  ;;  %v2385_v46 = vadd.f32 %v2353_v4, %v2183_v16  ;;  %v9899_v22 = vld [vmem:[#allocation2 + $0x80] sm:$0xff]  ;;  %13815 = vst [vmem:[#allocation76_spill] sm:$0xff] %v9901_v12  ;;  %v13817_v47 = vld [vmem:[#allocation19_spill] sm:$0xff] }
 0x2f4   : > { %v2757_v27 = vmul.f32 %v13813_v20, %v13643_v7  ;;  %13814 = vst [vmem:[#allocation14_spill] sm:$0xff] %v9899_v22  ;;  %v4723_v28 = vadd.f32 %v4691_v57, %v4521_v5  ;;  %v4724_v10 = vadd.f32 %v4692_v59, %v4522_v40  ;;  %13816 = vst [vmem:[#allocation77_spill] sm:$0xff] %v9903_v26  ;;  %v9907_v49 = vld [vmem:[#allocation2 + $0x88] sm:$0xff]  ;;  %v13819_v57 = vld [vmem:[#allocation20_spill] sm:$0xff] }
 0x2f5   : > { %v2586_v34 = vadd.f32 %v2554_v31, %v2384_v41  ;;  %v2958_v53 = vmul.f32 %v13817_v47, %v13645_v24  ;;  %13818 = vst [vmem:[#allocation45_spill] sm:$0xff] %v9907_v49  ;;  %v5298_v4 = vmul.f32 %v13786_v44, %v9887_v60  ;;  %v5499_v16 = vmul.f32 %v13789_v15, %v9889_v39  ;;  %v9915_v5 = vld [vmem:[#allocation2 + $0x90] sm:$0xff]  ;;  %v9917_v31 = vld [vmem:[#allocation3 + $0x1d8] sm:$0xff]  ;;  %v9919_v41 = vld [vmem:[#allocation3 + $0x1e0] sm:$0xff] }
 0x2f6   : > { %v2587_v20 = vadd.f32 %v2555_v8, %v2385_v46  ;;  %v2959_v59 = vmul.f32 %v13819_v57, %v13645_v24  ;;  %13820 = vst [vmem:[#allocation46_spill] sm:$0xff] %v9915_v5  ;;  %v4925_v40 = vadd.f32 %v4893_v42, %v4723_v28  ;;  %v4926_v2 = vadd.f32 %v4894_v32, %v4724_v10  ;;  %v9923_v60 = vld [vmem:[#allocation2 + $0x98] sm:$0xff]  ;;  %v9931_v32 = vld [vmem:[#allocation2 + $0xa0] sm:$0xff]  ;;  %v9969_v44 = vld [vmem:[#allocation2 + $0xe8] sm:$0xff] }
 0x2f7   : > { %13821 = vst [vmem:[#allocation47_spill] sm:$0xff] %v9917_v31  ;;  %13822 = vst [vmem:[#allocation48_spill] sm:$0xff] %v9919_v41  ;;  %v2788_v47 = vadd.f32 %v2756_v33, %v2586_v34  ;;  %v3160_v43 = vmul.f32 %v13649_v17, %v9899_v22  ;;  %v5500_v8 = vmul.f32 %v13789_v15, %v9901_v12  ;;  %v9933_v33 = vld [vmem:[#allocation3 + $0x1e8] sm:$0xff]  ;;  %v13825_v22 = vld [vmem:[#allocation104_spill] sm:$0xff] }
 0x2f8   : > { %13823 = vst [vmem:[#allocation16_spill] sm:$0xff] %v9923_v60  ;;  %v5701_v46 = vmul.f32 %v13792_v36, %v9903_v26  ;;  %v2789_v57 = vadd.f32 %v2757_v27, %v2587_v20  ;;  %v3161_v42 = vmul.f32 %v13649_v17, %v9907_v49  ;;  %v5127_v28 = vadd.f32 %v5095_v19, %v4925_v40  ;;  %v9939_v12 = vld [vmem:[#allocation2 + $0xb0] sm:$0xff]  ;;  %v9951_v26 = vld [vmem:[#allocation2 + $0xc0] sm:$0xff]  ;;  %v9953_v15 = vld [vmem:[#allocation2 + $0xc8] sm:$0xff] }
 0x2f9   : > { %v5128_v10 = vadd.f32 %v5096_v9, %v4926_v2  ;;  %13824 = vst [vmem:[#allocation17_spill] sm:$0xff] %v9933_v33  ;;  %v2990_v34 = vadd.f32 %v2958_v53, %v2788_v47  ;;  %v3362_v39 = vmul.f32 %v13825_v22, %v9915_v5  ;;  %13826 = vst [vmem:[#allocation18_spill] sm:$0xff] %v9937_v1  ;;  %v9947_v2 = vld [vmem:[#allocation2 + $0xb8] sm:$0xff]  ;;  %v13829_v47 = vld [vmem:[#allocation106_spill] sm:$0xff] }
 0x2fa   : > { %13827 = vst [vmem:[#allocation19_spill] sm:$0xff] %v9939_v12  ;;  %v5702_v27 = vmul.f32 %v13792_v36, %v9917_v31  ;;  %v5903_v20 = vmul.f32 %v13793_v50, %v9919_v41  ;;  %v2991_v49 = vadd.f32 %v2959_v59, %v2789_v57  ;;  %v3363_v9 = vmul.f32 %v13825_v22, %v9923_v60  ;;  %v9955_v31 = vld [vmem:[#allocation2 + $0xd0] sm:$0xff]  ;;  %v9967_v36 = vld [vmem:[#allocation2 + $0xe0] sm:$0xff] }
 0x2fb   : > { %13828 = vst [vmem:[#allocation20_spill] sm:$0xff] %v9947_v2  ;;  %v5329_v53 = vadd.f32 %v5297_v55, %v5127_v28  ;;  %v5330_v19 = vadd.f32 %v5298_v4, %v5128_v10  ;;  %v3192_v40 = vadd.f32 %v3160_v43, %v2990_v34  ;;  %v3564_v5 = vmul.f32 %v13829_v47, %v9931_v32  ;;  %v13833_v55 = vld [vmem:[#allocation108_spill] sm:$0xff] }
 0x2fc   : > { %13830 = vst [vmem:[#allocation115_spill] sm:$0xff] %v9951_v26  ;;  %13831 = vst [vmem:[#allocation116_spill] sm:$0xff] %v9953_v15  ;;  %v5904_v59 = vmul.f32 %v13793_v50, %v9933_v33  ;;  %v3193_v57 = vadd.f32 %v3161_v42, %v2991_v49  ;;  %v3565_v60 = vmul.f32 %v13829_v47, %v9937_v1  ;;  %v9963_v43 = vld [vmem:[#allocation2 + $0xd8] sm:$0xff]  ;;  %v9971_v33 = vld [vmem:[#allocation2 + $0xf0] sm:$0xff] }
 0x2fd   : > { %13832 = vst [vmem:[#allocation117_spill] sm:$0xff] %v9955_v31  ;;  %v3765_v4 = vmul.f32 %v13833_v55, %v9939_v12  ;;  %13834 = vst [vmem:[#allocation118_spill] sm:$0xff] %v9963_v43  ;;  %v5531_v28 = vadd.f32 %v5499_v16, %v5329_v53  ;;  %v5532_v10 = vadd.f32 %v5500_v8, %v5330_v19  ;;  %v13838_v42 = vld [vmem:[#allocation32_spill] sm:$0xff]  ;;  %v13839_v16 = vld [vmem:[#allocation34_spill] sm:$0xff] }
 0x2fe   : > { %v3394_v34 = vadd.f32 %v3362_v39, %v3192_v40  ;;  %v3766_v41 = vmul.f32 %v13833_v55, %v9947_v2  ;;  %13835 = vst [vmem:[#allocation119_spill] sm:$0xff] %v9967_v36  ;;  %13836 = vst [vmem:[#allocation120_spill] sm:$0xff] %v9969_v44  ;;  %v3395_v49 = vadd.f32 %v3363_v9, %v3193_v57  ;;  %v13841_v57 = vld [vmem:[#allocation41_spill] sm:$0xff] }
 0x2ff   : > { %13837 = vst [vmem:[#allocation121_spill] sm:$0xff] %v9971_v33  ;;  %v3966_v50 = vmul.f32 %v13838_v42, %v9951_v26  ;;  %v3967_v29 = vmul.f32 %v13838_v42, %v9953_v15  ;;  %v4168_v8 = vmul.f32 %v13839_v16, %v9955_v31  ;;  %v5733_v39 = vadd.f32 %v5701_v46, %v5531_v28 }
 0x300   : > { %v5734_v53 = vadd.f32 %v5702_v27, %v5532_v10  ;;  %v3596_v19 = vadd.f32 %v3564_v5, %v3394_v34  ;;  %v4169_v40 = vmul.f32 %v13839_v16, %v9963_v43  ;;  %v3597_v54 = vadd.f32 %v3565_v60, %v3395_v49  ;;  %v9989_v27 = vld [vmem:[#allocation2 + $0xf8] sm:$0xff] }
 0x301   : > { %v4370_v58 = vmul.f32 %v13840_v37, %v9967_v36  ;;  %v4371_v9 = vmul.f32 %v13840_v37, %v9969_v44  ;;  %v4572_v35 = vmul.f32 %v13841_v57, %v9971_v33  ;;  %v5935_v30 = vadd.f32 %v5903_v20, %v5733_v39  ;;  %13842 = vst [vmem:[#allocation122_spill] sm:$0xff] %v9989_v27 }
 0x302   : > { %v5936_v45 = vadd.f32 %v5904_v59, %v5734_v53  ;;  %v3797_v3 = vadd.f32 %v3765_v4, %v3596_v19  ;;  %v1765_v46 = vmul.f32 %v9931_v32, %v13707_v52  ;;  %v3798_v5 = vadd.f32 %v3766_v41, %v3597_v54  ;;  %v10001_v41 = vld [vmem:[#allocation2 + $0x100] sm:$0xff]  ;;  %v10003_v4 = vld [vmem:[#allocation2 + $0x108] sm:$0xff] }
 0x303   : > { %v1766_v60 = vmul.f32 %v9937_v1, %v13707_v52  ;;  %v1966_v28 = vmul.f32 %v9939_v12, %v13708_v6  ;;  %v1967_v10 = vmul.f32 %v9947_v2, %v13708_v6  ;;  %v2168_v20 = vmul.f32 %v9951_v26, %v13634_v0  ;;  %13843 = vst [vmem:[#allocation123_spill] sm:$0xff] %v10001_v41  ;;  %v10053_v26 = vld [vmem:[#allocation2 + $0x148] sm:$0xff]  ;;  %v10065_v2 = vld [vmem:[#allocation2 + $0x158] sm:$0xff] }
 0x304   : > { %v6778_v34 = vpack.c.bf16 %v5936_v45, %v5935_v30  ;;  %v3998_v49 = vadd.f32 %v3966_v50, %v3797_v3  ;;  %v2169_v59 = vmul.f32 %v9953_v15, %v13634_v0  ;;  %v3999_v54 = vadd.f32 %v3967_v29, %v3798_v5  ;;  %13844 = vst [vmem:[#allocation124_spill] sm:$0xff] %v10003_v4  ;;  %v10015_v5 = vld [vmem:[#allocation2 + $0x110] sm:$0xff]  ;;  %v10041_v15 = vld [vmem:[#allocation2 + $0x138] sm:$0xff]  ;;  %v10085_v1 = vld [vmem:[#allocation2 + $0x168] sm:$0xff] }
 0x305   : > { %v1998_v39 = vadd.f32 %v1966_v28, %v1765_v46  ;;  %v1999_v53 = vadd.f32 %v1967_v10, %v1766_v60  ;;  %v2370_v19 = vmul.f32 %v9955_v31, %v13636_v61  ;;  %v4573_v45 = vmul.f32 %v13841_v57, %v9989_v27  ;;  %13845 = vst [vmem:[#allocation125_spill] sm:$0xff] %v10015_v5  ;;  %v10017_v46 = vld [vmem:[#allocation2 + $0x118] sm:$0xff]  ;;  %v10029_v31 = vld [vmem:[#allocation2 + $0x128] sm:$0xff] }
 0x306   : > { %6780 = vmatprep.subr.msk.bf16.mxu1 %vm9262_vm1, %v6778_v34  ;;  %v4200_v30 = vadd.f32 %v4168_v8, %v3998_v49  ;;  %v2371_v3 = vmul.f32 %v9963_v43, %v13636_v61  ;;  %v2572_v50 = vmul.f32 %v9967_v36, %v13641_v56  ;;  %v4201_v29 = vadd.f32 %v4169_v40, %v3999_v54  ;;  %v13847_v34 = vld [vmem:[#allocation44_spill] sm:$0xff]  ;;  %v10027_v54 = vld [vmem:[#allocation2 + $0x120] sm:$0xff] }
 0x307   : > { %13846 = vst [vmem:[#allocation126_spill] sm:$0xff] %v10017_v46  ;;  %v2200_v60 = vadd.f32 %v2168_v20, %v1998_v39  ;;  %v2201_v28 = vadd.f32 %v2169_v59, %v1999_v53  ;;  %v2573_v10 = vmul.f32 %v9969_v44, %v13641_v56  ;;  %v4774_v49 = vmul.f32 %v13847_v34, %v10001_v41  ;;  %v13850_v53 = vld [vmem:[#allocation51_spill] sm:$0xff] }
 0x308   : > { %v4402_v8 = vadd.f32 %v4370_v58, %v4200_v30  ;;  %v4775_v43 = vmul.f32 %v13847_v34, %v10003_v4  ;;  %v2774_v36 = vmul.f32 %v9971_v33, %v13643_v7  ;;  %v4403_v40 = vadd.f32 %v4371_v9, %v4201_v29  ;;  %13848 = vst [vmem:[#allocation127_spill] sm:$0xff] %v10027_v54  ;;  %v10039_v29 = vld [vmem:[#allocation2 + $0x130] sm:$0xff] }
 0x309   : > { %13849 = vst [vmem:[#allocation128_spill] sm:$0xff] %v10029_v31  ;;  %v2402_v20 = vadd.f32 %v2370_v19, %v2200_v60  ;;  %v2403_v59 = vadd.f32 %v2371_v3, %v2201_v28  ;;  %v2775_v39 = vmul.f32 %v9989_v27, %v13643_v7  ;;  %v4976_v30 = vmul.f32 %v13850_v53, %v10015_v5  ;;  %v13853_v28 = vld [vmem:[#allocation53_spill] sm:$0xff] }
 0x30a   : > { %v4604_v58 = vadd.f32 %v4572_v35, %v4402_v8  ;;  %v4977_v44 = vmul.f32 %v13850_v53, %v10017_v46  ;;  %v2976_v33 = vmul.f32 %v10001_v41, %v13645_v24  ;;  %v4605_v9 = vadd.f32 %v4573_v45, %v4403_v40  ;;  %13851 = vst [vmem:[#allocation129_spill] sm:$0xff] %v10039_v29  ;;  %v10051_v40 = vld [vmem:[#allocation2 + $0x140] sm:$0xff] }
 0x30b   : > { %13852 = vst [vmem:[#allocation130_spill] sm:$0xff] %v10041_v15  ;;  %v2604_v19 = vadd.f32 %v2572_v50, %v2402_v20  ;;  %v2605_v3 = vadd.f32 %v2573_v10, %v2403_v59  ;;  %v2977_v60 = vmul.f32 %v10003_v4, %v13645_v24  ;;  %v5178_v8 = vmul.f32 %v13853_v28, %v10027_v54  ;;  %v13856_v59 = vld [vmem:[#allocation15_spill] sm:$0xff] }
 0x30c   : > { %v4806_v35 = vadd.f32 %v4774_v49, %v4604_v58  ;;  %v5179_v27 = vmul.f32 %v13853_v28, %v10029_v31  ;;  %v3178_v41 = vmul.f32 %v10015_v5, %v13649_v17  ;;  %v4807_v45 = vadd.f32 %v4775_v43, %v4605_v9  ;;  %13854 = vst [vmem:[#allocation131_spill] sm:$0xff] %v10051_v40  ;;  %v10063_v9 = vld [vmem:[#allocation2 + $0x150] sm:$0xff] }
 0x30d   : > { %13855 = vst [vmem:[#allocation132_spill] sm:$0xff] %v10053_v26  ;;  %v2806_v50 = vadd.f32 %v2774_v36, %v2604_v19  ;;  %v2807_v10 = vadd.f32 %v2775_v39, %v2605_v3  ;;  %v3179_v20 = vmul.f32 %v10017_v46, %v13649_v17  ;;  %v5380_v58 = vmul.f32 %v13856_v59, %v10039_v29  ;;  %v13859_v3 = vld [vmem:[#allocation21_spill] sm:$0xff] }
 0x30e   : > { %v5008_v49 = vadd.f32 %v4976_v30, %v4806_v35  ;;  %v5381_v4 = vmul.f32 %v13856_v59, %v10041_v15  ;;  %v3380_v5 = vmul.f32 %v10027_v54, %v13825_v22  ;;  %v5009_v43 = vadd.f32 %v4977_v44, %v4807_v45  ;;  %13857 = vst [vmem:[#allocation133_spill] sm:$0xff] %v10063_v9 }
 0x30f   : > { %13858 = vst [vmem:[#allocation134_spill] sm:$0xff] %v10065_v2  ;;  %v3008_v36 = vadd.f32 %v2976_v33, %v2806_v50  ;;  %v3009_v39 = vadd.f32 %v2977_v60, %v2807_v10  ;;  %v3381_v19 = vmul.f32 %v10029_v31, %v13825_v22  ;;  %v5582_v35 = vmul.f32 %v13859_v3, %v10051_v40  ;;  %v10077_v60 = vld [vmem:[#allocation2 + $0x160] sm:$0xff] }
 0x310   : > { %v5210_v30 = vadd.f32 %v5178_v8, %v5008_v49  ;;  %v5583_v46 = vmul.f32 %v13859_v3, %v10053_v26  ;;  %v3582_v54 = vmul.f32 %v10039_v29, %v13829_v47  ;;  %v5211_v44 = vadd.f32 %v5179_v27, %v5009_v43  ;;  %13860 = vst [vmem:[#allocation135_spill] sm:$0xff] %v10077_v60  ;;  %v13861_v8 = vld [vmem:[#allocation80_spill] sm:$0xff] }
 0x311   : > { %v3210_v45 = vadd.f32 %v3178_v41, %v3008_v36  ;;  %v3211_v12 = vadd.f32 %v3179_v20, %v3009_v39  ;;  %v3583_v33 = vmul.f32 %v10041_v15, %v13829_v47  ;;  %v5784_v10 = vmul.f32 %v13861_v8, %v10063_v9  ;;  %13862 = vst [vmem:[#allocation136_spill] sm:$0xff] %v10085_v1  ;;  %v10089_v36 = vld [vmem:[#allocation2 + $0x170] sm:$0xff]  ;;  %v10093_v39 = vld [vmem:[#allocation2 + $0x180] sm:$0xff] }
 0x312   : > { %v5412_v50 = vadd.f32 %v5380_v58, %v5210_v30  ;;  %v5785_v49 = vmul.f32 %v13861_v8, %v10065_v2  ;;  %v3783_v31 = vmul.f32 %v10051_v40, %v13833_v55  ;;  %v5413_v27 = vadd.f32 %v5381_v4, %v5211_v44  ;;  %13863 = vst [vmem:[#allocation137_spill] sm:$0xff] %v10089_v36  ;;  %v10091_v58 = vld [vmem:[#allocation2 + $0x178] sm:$0xff] }
 0x313   : > { %v3412_v41 = vadd.f32 %v3380_v5, %v3210_v45  ;;  %v3413_v20 = vadd.f32 %v3381_v19, %v3211_v12  ;;  %v3784_v43 = vmul.f32 %v10053_v26, %v13833_v55  ;;  %13864 = vst [vmem:[#allocation138_spill] sm:$0xff] %v10091_v58  ;;  %13865 = vst [vmem:[#allocation139_spill] sm:$0xff] %v10093_v39 }
 0x314   : > { %v5614_v30 = vadd.f32 %v5582_v35, %v5412_v50  ;;  %v3984_v15 = vmul.f32 %v10063_v9, %v13838_v42  ;;  %v3985_v40 = vmul.f32 %v10065_v2, %v13838_v42  ;;  %v4186_v4 = vmul.f32 %v13839_v16, %v10077_v60 }
 0x315   : > { %v5615_v12 = vadd.f32 %v5583_v46, %v5413_v27  ;;  %v3614_v5 = vadd.f32 %v3582_v54, %v3412_v41  ;;  %v3615_v19 = vadd.f32 %v3583_v33, %v3413_v20  ;;  %v4187_v44 = vmul.f32 %v13839_v16, %v10085_v1  ;;  %v13866_v46 = vld [vmem:[#allocation58_spill] sm:$0xff]  ;;  %v10113_v27 = vld [vmem:[#allocation2 + $0x190] sm:$0xff] }
 0x316   : > { %v5816_v45 = vadd.f32 %v5784_v10, %v5614_v30  ;;  %v4388_v26 = vmul.f32 %v13840_v37, %v10089_v36  ;;  %v4389_v35 = vmul.f32 %v13840_v37, %v10091_v58  ;;  %v4590_v50 = vmul.f32 %v13841_v57, %v10093_v39  ;;  %v10111_v33 = vld [vmem:[#allocation2 + $0x188] sm:$0xff]  ;;  %13868 = vst [vmem:[#allocation140_spill] sm:$0xff] %v10113_v27  ;;  %v10125_v39 = vld [vmem:[#allocation2 + $0x198] sm:$0xff]  ;;  %v10127_v1 = vld [vmem:[#allocation2 + $0x1a0] sm:$0xff] }
 0x317   : > { %v5817_v2 = vadd.f32 %v5785_v49, %v5615_v12  ;;  %v3815_v9 = vadd.f32 %v3783_v31, %v3614_v5  ;;  %v3816_v29 = vadd.f32 %v3784_v43, %v3615_v19  ;;  %v1849_v54 = vmul.f32 %v13866_v46, %v13732_v38  ;;  %13867 = vst [vmem:[#allocation58_spill] sm:$0xff] %v10111_v33  ;;  %v13869_v10 = vld [vmem:[#allocation83_spill] sm:$0xff]  ;;  %v13871_v58 = vld [vmem:[#allocation62_spill] sm:$0xff] }
 0x318   : > { %v1850_v41 = vmul.f32 %v13869_v10, %v13732_v38  ;;  %v13870_v20 = vld [vmem:[#allocation59_spill] sm:$0xff]  ;;  %v2052_v36 = vmul.f32 %v13871_v58, %v13733_v48  ;;  %13874 = vst [vmem:[#allocation83_spill] sm:$0xff] %v10125_v39  ;;  %v13877_v58 = vld [vmem:[#allocation22_spill] sm:$0xff] }
 0x319   : > { %v2051_v30 = vmul.f32 %v13870_v20, %v13733_v48  ;;  %v13872_v49 = vld [vmem:[#allocation63_spill] sm:$0xff]  ;;  %v6727_v43 = vpack.c.bf16 %v5817_v2, %v5816_v45  ;;  %v4016_v12 = vadd.f32 %v3984_v15, %v3815_v9  ;;  %v4017_v5 = vadd.f32 %v3985_v40, %v3816_v29  ;;  %13875 = vst [vmem:[#allocation59_spill] sm:$0xff] %v10127_v1  ;;  %v13876_v20 = vld [vmem:[#allocation68_spill] sm:$0xff] }
 0x31a   : > { %v2253_v31 = vmul.f32 %v13872_v49, %v13736_v63  ;;  %v13873_v19 = vld [vmem:[#allocation67_spill] sm:$0xff]  ;;  %v2084_v60 = vadd.f32 %v2052_v36, %v1850_v41  ;;  %v2455_v37 = vmul.f32 %v13876_v20, %v13737_v51  ;;  %v2456_v16 = vmul.f32 %v13877_v58, %v13737_v51  ;;  %v13881_v49 = vld [vmem:[#allocation109_spill] sm:$0xff] }
 0x31b   : > { %v2254_v46 = vmul.f32 %v13873_v19, %v13736_v63  ;;  %v2083_v10 = vadd.f32 %v2051_v30, %v1849_v54  ;;  %6729 = vmatpush3.bf16.xpose.msk.msra.mxu0 %vm9262_vm1, %v6727_v43  ;;  %v4218_v15 = vadd.f32 %v4186_v4, %v4016_v12  ;;  %v4219_v2 = vadd.f32 %v4187_v44, %v4017_v5  ;;  %v10139_v9 = vld [vmem:[#allocation2 + $0x1a8] sm:$0xff]  ;;  %v10141_v36 = vld [vmem:[#allocation2 + $0x1b0] sm:$0xff]  ;;  %v10151_v19 = vld [vmem:[#allocation2 + $0x1b8] sm:$0xff] }
 0x31c   : > { %v4591_v29 = vmul.f32 %v13841_v57, %v10111_v33  ;;  %v4792_v40 = vmul.f32 %v13847_v34, %v10113_v27  ;;  %13878 = vst [vmem:[#allocation62_spill] sm:$0xff] %v10139_v9  ;;  %13879 = vst [vmem:[#allocation63_spill] sm:$0xff] %v10141_v36  ;;  %v13880_v41 = vld [vmem:[#allocation23_spill] sm:$0xff]  ;;  %v2658_v43 = vmul.f32 %v13881_v49, %v13742_v18  ;;  %v10153_v20 = vld [vmem:[#allocation2 + $0x1c0] sm:$0xff] }
 0x31d   : > { %v2285_v45 = vadd.f32 %v2253_v31, %v2083_v10  ;;  %v2286_v54 = vadd.f32 %v2254_v46, %v2084_v60  ;;  %v2657_v30 = vmul.f32 %v13880_v41, %v13742_v18  ;;  %v4420_v4 = vadd.f32 %v4388_v26, %v4218_v15  ;;  %13882 = vst [vmem:[#allocation67_spill] sm:$0xff] %v10151_v19  ;;  %v13884_v46 = vld [vmem:[#allocation93_spill] sm:$0xff]  ;;  %v13885_v58 = vld [vmem:[#allocation111_spill] sm:$0xff]  ;;  %v13915_v33 = vld [vmem:[#allocation86_spill] sm:$0xff] }
 0x31e   : > { %v4421_v44 = vadd.f32 %v4389_v35, %v4219_v2  ;;  %v4793_v12 = vmul.f32 %v13847_v34, %v10125_v39  ;;  %v4994_v5 = vmul.f32 %v13850_v53, %v10127_v1  ;;  %13883 = vst [vmem:[#allocation68_spill] sm:$0xff] %v10153_v20  ;;  %v2859_v10 = vmul.f32 %v13884_v46, %v13747_v23  ;;  %v10163_v49 = vld [vmem:[#allocation2 + $0x1c8] sm:$0xff] }
 0x31f   : > { %v2487_v31 = vadd.f32 %v2455_v37, %v2285_v45  ;;  %v2488_v60 = vadd.f32 %v2456_v16, %v2286_v54  ;;  %v2860_v41 = vmul.f32 %v13885_v58, %v13747_v23  ;;  %v4622_v26 = vadd.f32 %v4590_v50, %v4420_v4  ;;  %13886 = vst [vmem:[#allocation22_spill] sm:$0xff] %v10163_v49  ;;  %v13887_v37 = vld [vmem:[#allocation96_spill] sm:$0xff]  ;;  %v13888_v45 = vld [vmem:[#allocation110_spill] sm:$0xff] }
 0x320   : > { %v4623_v35 = vadd.f32 %v4591_v29, %v4421_v44  ;;  %v4995_v15 = vmul.f32 %v13850_v53, %v10139_v9  ;;  %v5196_v2 = vmul.f32 %v13853_v28, %v10141_v36  ;;  %v3061_v16 = vmul.f32 %v13887_v37, %v13751_v14  ;;  %v10173_v4 = vld [vmem:[#allocation2 + $0x1e0] sm:$0xff]  ;;  %v10211_v9 = vld [vmem:[#allocation3 + $0xb8] sm:$0xff] }
 0x321   : > { %v2689_v1 = vadd.f32 %v2657_v30, %v2487_v31  ;;  %v2690_v39 = vadd.f32 %v2658_v43, %v2488_v60  ;;  %v3062_v54 = vmul.f32 %v13888_v45, %v13751_v14  ;;  %v4824_v46 = vadd.f32 %v4792_v40, %v4622_v26  ;;  %13889 = vst [vmem:[#allocation23_spill] sm:$0xff] %v10173_v4  ;;  %v13890_v30 = vld [vmem:[#allocation94_spill] sm:$0xff]  ;;  %v13891_v31 = vld [vmem:[#allocation113_spill] sm:$0xff] }
 0x322   : > { %v4825_v58 = vadd.f32 %v4793_v12, %v4623_v35  ;;  %v5197_v50 = vmul.f32 %v13853_v28, %v10151_v19  ;;  %v5398_v29 = vmul.f32 %v13856_v59, %v10153_v20  ;;  %v3263_v43 = vmul.f32 %v13890_v30, %v13754_v25  ;;  %v13892_v12 = vld [vmem:[#allocation95_spill] sm:$0xff]  ;;  %13907 = vst [vmem:[#allocation111_spill] sm:$0xff] %v10211_v9 }
 0x323   : > { %v2891_v44 = vadd.f32 %v2859_v10, %v2689_v1  ;;  %v2892_v36 = vadd.f32 %v2860_v41, %v2690_v39  ;;  %v3264_v60 = vmul.f32 %v13891_v31, %v13754_v25  ;;  %v5026_v37 = vadd.f32 %v4994_v5, %v4824_v46  ;;  %v10183_v35 = vld [vmem:[#allocation2 + $0x1e8] sm:$0xff]  ;;  %v13894_v1 = vld [vmem:[#allocation97_spill] sm:$0xff]  ;;  %v13895_v10 = vld [vmem:[#allocation112_spill] sm:$0xff] }
 0x324   : > { %v5027_v45 = vadd.f32 %v4995_v15, %v4825_v58  ;;  %v5399_v40 = vmul.f32 %v13856_v59, %v10163_v49  ;;  %v5600_v26 = vmul.f32 %v13892_v12, %v13859_v3  ;;  %13893 = vst [vmem:[#allocation109_spill] sm:$0xff] %v10183_v35  ;;  %v3465_v39 = vmul.f32 %v13894_v1, %v13759_v21  ;;  %v13896_v5 = vld [vmem:[#allocation98_spill] sm:$0xff] }
 0x325   : > { %v3093_v20 = vadd.f32 %v3061_v16, %v2891_v44  ;;  %v3094_v19 = vadd.f32 %v3062_v54, %v2892_v36  ;;  %v3466_v41 = vmul.f32 %v13895_v10, %v13759_v21  ;;  %v5228_v30 = vadd.f32 %v5196_v2, %v5026_v37  ;;  %v13897_v49 = vld [vmem:[#allocation114_spill] sm:$0xff]  ;;  %v13898_v36 = vld [vmem:[#allocation103_spill] sm:$0xff] }
 0x326   : > { %v5229_v31 = vadd.f32 %v5197_v50, %v5027_v45  ;;  %v5601_v15 = vmul.f32 %v13896_v5, %v13859_v3  ;;  %v5802_v46 = vmul.f32 %v13861_v8, %v10173_v4  ;;  %v3667_v16 = vmul.f32 %v13897_v49, %v13763_v13  ;;  %v13899_v50 = vld [vmem:[#allocation105_spill] sm:$0xff] }
 0x327   : > { %v3295_v58 = vadd.f32 %v3263_v43, %v3093_v20  ;;  %v3296_v12 = vadd.f32 %v3264_v60, %v3094_v19  ;;  %v3668_v54 = vmul.f32 %v13898_v36, %v13763_v13  ;;  %v5430_v44 = vadd.f32 %v5398_v29, %v5228_v30  ;;  %v13900_v5 = vld [vmem:[#allocation61_spill] sm:$0xff]  ;;  %v13901_v19 = vld [vmem:[#allocation79_spill] sm:$0xff]  ;;  %v13902_v43 = vld [vmem:[#allocation66_spill] sm:$0xff] }
 0x328   : > { %v5431_v1 = vadd.f32 %v5399_v40, %v5229_v31  ;;  %v5803_v2 = vmul.f32 %v13861_v8, %v10183_v35  ;;  %v3867_v37 = vmul.f32 %v13899_v50, %v13768_v62  ;;  %v3868_v20 = vmul.f32 %v13900_v5, %v13768_v62  ;;  %v13903_v36 = vld [vmem:[#allocation100_spill] sm:$0xff]  ;;  %v13904_v40 = vld [vmem:[#allocation81_spill] sm:$0xff]  ;;  %v13909_v50 = vld [vmem:[#allocation82_spill] sm:$0xff] }
 0x329   : > { %v3497_v45 = vadd.f32 %v3465_v39, %v3295_v58  ;;  %v3498_v10 = vadd.f32 %v3466_v41, %v3296_v12  ;;  %v4069_v60 = vmul.f32 %v13902_v43, %v13901_v19  ;;  %v5632_v49 = vadd.f32 %v5600_v26, %v5430_v44  ;;  %v13905_v30 = vld [vmem:[#allocation101_spill] sm:$0xff]  ;;  %v10209_v35 = vld [vmem:[#allocation3 + $0xb0] sm:$0xff]  ;;  %v13908_v58 = vld [vmem:[#allocation70_spill] sm:$0xff] }
 0x32a   : > { %v5633_v4 = vadd.f32 %v5601_v15, %v5431_v1  ;;  %v4070_v29 = vmul.f32 %v13903_v36, %v13901_v19  ;;  %v4271_v31 = vmul.f32 %v13905_v30, %v13904_v40  ;;  %13906 = vst [vmem:[#allocation93_spill] sm:$0xff] %v10209_v35  ;;  %v4272_v12 = vmul.f32 %v13908_v58, %v13904_v40  ;;  %v13910_v5 = vld [vmem:[#allocation107_spill] sm:$0xff]  ;;  %v10217_v26 = vld [vmem:[#allocation3 + $0xc0] sm:$0xff]  ;;  %v13914_v30 = vld [vmem:[#allocation72_spill] sm:$0xff] }
 0x32b   : > { %v3699_v39 = vadd.f32 %v3667_v16, %v3497_v45  ;;  %v3700_v41 = vadd.f32 %v3668_v54, %v3498_v10  ;;  %v4473_v43 = vmul.f32 %v13910_v5, %v13909_v50  ;;  %13911 = vst [vmem:[#allocation96_spill] sm:$0xff] %v10217_v26  ;;  %v10219_v15 = vld [vmem:[#allocation3 + $0xc8] sm:$0xff]  ;;  %v10221_v44 = vld [vmem:[#allocation3 + $0xd0] sm:$0xff]  ;;  %v5834_v1 = vadd.f32 %v5802_v46, %v5632_v49  ;;  %v10227_v45 = vld [vmem:[#allocation3 + $0xd8] sm:$0xff] }
 0x32c   : > { %13912 = vst [vmem:[#allocation110_spill] sm:$0xff] %v10219_v15  ;;  %13913 = vst [vmem:[#allocation94_spill] sm:$0xff] %v10221_v44  ;;  %v5835_v36 = vadd.f32 %v5803_v2, %v5633_v4  ;;  %v4474_v27 = vmul.f32 %v13914_v30, %v13909_v50  ;;  %v13916_v16 = vld [vmem:[#allocation74_spill] sm:$0xff]  ;;  %v1867_v5 = vmul.f32 %v13732_v38, %v10209_v35 }
 0x32d   : > { %v4675_v54 = vmul.f32 %v13916_v16, %v13915_v33  ;;  %13917 = vst [vmem:[#allocation113_spill] sm:$0xff] %v10227_v45  ;;  %v3899_v10 = vadd.f32 %v3867_v37, %v3699_v39  ;;  %v3900_v58 = vadd.f32 %v3868_v20, %v3700_v41  ;;  %v1868_v8 = vmul.f32 %v13732_v38, %v10211_v9  ;;  %v10233_v3 = vld [vmem:[#allocation3 + $0xe0] sm:$0xff]  ;;  %v10235_v46 = vld [vmem:[#allocation3 + $0xe8] sm:$0xff]  ;;  %v10247_v9 = vld [vmem:[#allocation3 + $0xf0] sm:$0xff] }
 0x32e   : > { %13918 = vst [vmem:[#allocation95_spill] sm:$0xff] %v10233_v3  ;;  %13919 = vst [vmem:[#allocation97_spill] sm:$0xff] %v10235_v46  ;;  %v6730_v4 = vpack.c.bf16 %v5835_v36, %v5834_v1  ;;  %v2069_v2 = vmul.f32 %v13733_v48, %v10217_v26  ;;  %v2070_v49 = vmul.f32 %v13733_v48, %v10219_v15  ;;  %v13920_v41 = vld [vmem:[#allocation54_spill] sm:$0xff]  ;;  %v10249_v1 = vld [vmem:[#allocation3 + $0xf8] sm:$0xff] }
 0x32f   : > { %v2271_v37 = vmul.f32 %v13736_v63, %v10221_v44  ;;  %v4101_v20 = vadd.f32 %v4069_v60, %v3899_v10  ;;  %v4102_v39 = vadd.f32 %v4070_v29, %v3900_v58  ;;  %v4676_v30 = vmul.f32 %v13920_v41, %v13915_v33  ;;  %13921 = vst [vmem:[#allocation112_spill] sm:$0xff] %v10247_v9  ;;  %v13923_v58 = vld [vmem:[#allocation87_spill] sm:$0xff]  ;;  %v13925_v26 = vld [vmem:[#allocation60_spill] sm:$0xff] }
 0x330   : > { %v2272_v16 = vmul.f32 %v13736_v63, %v10227_v45  ;;  %13922 = vst [vmem:[#allocation98_spill] sm:$0xff] %v10249_v1  ;;  %6732 = vmatprep.subr.msk.bf16.mxu0 %vm9262_vm1, %v6730_v4  ;;  %v2101_v36 = vadd.f32 %v2069_v2, %v1867_v5  ;;  %v2102_v15 = vadd.f32 %v2070_v49, %v1868_v8  ;;  %v13924_v41 = vld [vmem:[#allocation55_spill] sm:$0xff]  ;;  %v10261_v63 = vld [vmem:[#allocation3 + $0x100] sm:$0xff]  ;;  %v13928_v49 = vld [vmem:[#allocation88_spill] sm:$0xff] }
 0x331   : > { %v2473_v44 = vmul.f32 %v13737_v51, %v10233_v3  ;;  %v2474_v60 = vmul.f32 %v13737_v51, %v10235_v46  ;;  %v4303_v29 = vadd.f32 %v4271_v31, %v4101_v20  ;;  %v4304_v10 = vadd.f32 %v4272_v12, %v4102_v39  ;;  %13926 = vst [vmem:[#allocation114_spill] sm:$0xff] %v10261_v63  ;;  %v10263_v48 = vld [vmem:[#allocation3 + $0x108] sm:$0xff]  ;;  %v13929_v20 = vld [vmem:[#allocation84_spill] sm:$0xff] }
 0x332   : > { %v4877_v45 = vmul.f32 %v13924_v41, %v13923_v58  ;;  %v4878_v35 = vmul.f32 %v13925_v26, %v13923_v58  ;;  %13927 = vst [vmem:[#allocation103_spill] sm:$0xff] %v10263_v48  ;;  %v2303_v5 = vadd.f32 %v2271_v37, %v2101_v36  ;;  %v2304_v8 = vadd.f32 %v2272_v16, %v2102_v15  ;;  %v13930_v41 = vld [vmem:[#allocation85_spill] sm:$0xff]  ;;  %v10273_v46 = vld [vmem:[#allocation3 + $0x110] sm:$0xff] }
 0x333   : > { %v2675_v4 = vmul.f32 %v13742_v18, %v10247_v9  ;;  %v2676_v2 = vmul.f32 %v13742_v18, %v10249_v1  ;;  %v4505_v31 = vadd.f32 %v4473_v43, %v4303_v29  ;;  %v4506_v12 = vadd.f32 %v4474_v27, %v4304_v10  ;;  %13931 = vst [vmem:[#allocation105_spill] sm:$0xff] %v10273_v46  ;;  %v10275_v3 = vld [vmem:[#allocation3 + $0x118] sm:$0xff]  ;;  %v10285_v9 = vld [vmem:[#allocation3 + $0x120] sm:$0xff]  ;;  %v10287_v18 = vld [vmem:[#allocation3 + $0x128] sm:$0xff] }
 0x334   : > { %v5079_v39 = vmul.f32 %v13929_v20, %v13928_v49  ;;  %v5080_v26 = vmul.f32 %v13930_v41, %v13928_v49  ;;  %13932 = vst [vmem:[#allocation61_spill] sm:$0xff] %v10275_v3  ;;  %v2505_v37 = vadd.f32 %v2473_v44, %v2303_v5  ;;  %v2506_v15 = vadd.f32 %v2474_v60, %v2304_v8  ;;  %v13933_v29 = vld [vmem:[#allocation89_spill] sm:$0xff]  ;;  %v13934_v10 = vld [vmem:[#allocation24_spill] sm:$0xff] }
 0x335   : > { %v2877_v16 = vmul.f32 %v13747_v23, %v10261_v63  ;;  %v2878_v36 = vmul.f32 %v13747_v23, %v10263_v48  ;;  %v4707_v43 = vadd.f32 %v4675_v54, %v4505_v31  ;;  %v4708_v27 = vadd.f32 %v4676_v30, %v4506_v12  ;;  %v13935_v1 = vld [vmem:[#allocation25_spill] sm:$0xff]  ;;  %13936 = vst [vmem:[#allocation66_spill] sm:$0xff] %v10285_v9  ;;  %v13938_v31 = vld [vmem:[#allocation90_spill] sm:$0xff]  ;;  %v13940_v48 = vld [vmem:[#allocation27_spill] sm:$0xff] }
 0x336   : > { %v5281_v20 = vmul.f32 %v13934_v10, %v13933_v29  ;;  %v5282_v41 = vmul.f32 %v13935_v1, %v13933_v29  ;;  %13937 = vst [vmem:[#allocation100_spill] sm:$0xff] %v10287_v18  ;;  %v2707_v44 = vadd.f32 %v2675_v4, %v2505_v37  ;;  %v2708_v60 = vadd.f32 %v2676_v2, %v2506_v15  ;;  %v13939_v12 = vld [vmem:[#allocation26_spill] sm:$0xff]  ;;  %v10297_v63 = vld [vmem:[#allocation3 + $0x130] sm:$0xff]  ;;  %v10299_v23 = vld [vmem:[#allocation3 + $0x138] sm:$0xff] }
 0x337   : > { %v3079_v5 = vmul.f32 %v13751_v14, %v10273_v46  ;;  %v3080_v8 = vmul.f32 %v13751_v14, %v10275_v3  ;;  %v4909_v54 = vadd.f32 %v4877_v45, %v4707_v43  ;;  %v4910_v30 = vadd.f32 %v4878_v35, %v4708_v27  ;;  %13941 = vst [vmem:[#allocation101_spill] sm:$0xff] %v10297_v63  ;;  %v13943_v43 = vld [vmem:[#allocation91_spill] sm:$0xff]  ;;  %v13944_v27 = vld [vmem:[#allocation28_spill] sm:$0xff]  ;;  %v13945_v3 = vld [vmem:[#allocation29_spill] sm:$0xff] }
 0x338   : > { %v5483_v10 = vmul.f32 %v13939_v12, %v13938_v31  ;;  %v5484_v1 = vmul.f32 %v13940_v48, %v13938_v31  ;;  %13942 = vst [vmem:[#allocation70_spill] sm:$0xff] %v10299_v23  ;;  %v2909_v4 = vadd.f32 %v2877_v16, %v2707_v44  ;;  %v2910_v2 = vadd.f32 %v2878_v36, %v2708_v60  ;;  %v10309_v46 = vld [vmem:[#allocation3 + $0x140] sm:$0xff]  ;;  %v10311_v14 = vld [vmem:[#allocation3 + $0x148] sm:$0xff] }
 0x339   : > { %v3281_v37 = vmul.f32 %v13754_v25, %v10285_v9  ;;  %v3282_v15 = vmul.f32 %v13754_v25, %v10287_v18  ;;  %v5111_v45 = vadd.f32 %v5079_v39, %v4909_v54  ;;  %v5112_v35 = vadd.f32 %v5080_v26, %v4910_v30  ;;  %13946 = vst [vmem:[#allocation107_spill] sm:$0xff] %v10309_v46  ;;  %v10317_v39 = vld [vmem:[#allocation3 + $0x150] sm:$0xff]  ;;  %v10319_v26 = vld [vmem:[#allocation3 + $0x158] sm:$0xff] }
 0x33a   : > { %v5685_v12 = vmul.f32 %v13944_v27, %v13943_v43  ;;  %v5686_v48 = vmul.f32 %v13945_v3, %v13943_v43  ;;  %13947 = vst [vmem:[#allocation72_spill] sm:$0xff] %v10311_v14  ;;  %v3111_v16 = vadd.f32 %v3079_v5, %v2909_v4  ;;  %v3112_v36 = vadd.f32 %v3080_v8, %v2910_v2  ;;  %v13950_v27 = vld [vmem:[#allocation30_spill] sm:$0xff]  ;;  %v13951_v3 = vld [vmem:[#allocation92_spill] sm:$0xff]  ;;  %v13952_v9 = vld [vmem:[#allocation31_spill] sm:$0xff] }
 0x33b   : > { %v3483_v44 = vmul.f32 %v13759_v21, %v10297_v63  ;;  %v3484_v60 = vmul.f32 %v13759_v21, %v10299_v23  ;;  %13948 = vst [vmem:[#allocation74_spill] sm:$0xff] %v10317_v39  ;;  %13949 = vst [vmem:[#allocation54_spill] sm:$0xff] %v10319_v26  ;;  %v5313_v54 = vadd.f32 %v5281_v20, %v5111_v45 }
 0x33c   : > { %v5314_v30 = vadd.f32 %v5282_v41, %v5112_v35  ;;  %v5887_v18 = vmul.f32 %v13951_v3, %v13950_v27  ;;  %v5888_v25 = vmul.f32 %v13951_v3, %v13952_v9  ;;  %v3313_v5 = vadd.f32 %v3281_v37, %v3111_v16  ;;  %v1713_v16 = vld [vmem:[#allocation2 + $0x20] sm:$0xff] }
 0x33d   : > { %v3314_v8 = vadd.f32 %v3282_v15, %v3112_v36  ;;  %v3685_v4 = vmul.f32 %v13763_v13, %v10309_v46  ;;  %v3686_v2 = vmul.f32 %v13763_v13, %v10311_v14  ;;  %v5515_v23 = vadd.f32 %v5483_v10, %v5313_v54  ;;  %v13953_v10 = vld [vmem:[#allocation33_spill] sm:$0xff]  ;;  %v13954_v54 = vld [vmem:[#allocation35_spill] sm:$0xff] }
 0x33e   : > { %v5516_v63 = vadd.f32 %v5484_v1, %v5314_v30  ;;  %v3885_v20 = vmul.f32 %v13768_v62, %v10317_v39  ;;  %v3886_v41 = vmul.f32 %v13768_v62, %v10319_v26  ;;  %v3515_v45 = vadd.f32 %v3483_v44, %v3313_v5  ;;  %v1714_v39 = vld [vmem:[#allocation2 + $0x28] sm:$0xff]  ;;  %v10341_v14 = vld [vmem:[#allocation2 + $0x30] sm:$0xff]  ;;  %v10347_v26 = vld [vmem:[#allocation2 + $0x38] sm:$0xff] }
 0x33f   : > { %v3516_v35 = vadd.f32 %v3484_v60, %v3314_v8  ;;  %v4087_v37 = vmul.f32 %v13950_v27, %v13901_v19  ;;  %v4088_v15 = vmul.f32 %v13952_v9, %v13901_v19  ;;  %v5717_v36 = vadd.f32 %v5685_v12, %v5515_v23  ;;  %13955 = vst [vmem:[#allocation55_spill] sm:$0xff] %v10341_v14  ;;  %v13956_v5 = vld [vmem:[#allocation36_spill] sm:$0xff]  ;;  %v13957_v8 = vld [vmem:[#allocation37_spill] sm:$0xff] }
 0x340   : > { %v5718_v46 = vadd.f32 %v5686_v48, %v5516_v63  ;;  %v4289_v1 = vmul.f32 %v13953_v10, %v13904_v40  ;;  %v4290_v30 = vmul.f32 %v13954_v54, %v13904_v40  ;;  %v3717_v44 = vadd.f32 %v3685_v4, %v3515_v45  ;;  %13958 = vst [vmem:[#allocation60_spill] sm:$0xff] %v10347_v26  ;;  %v10349_v23 = vld [vmem:[#allocation2 + $0x40] sm:$0xff]  ;;  %v10351_v63 = vld [vmem:[#allocation2 + $0x48] sm:$0xff] }
 0x341   : > { %v3718_v60 = vadd.f32 %v3686_v2, %v3516_v35  ;;  %v4491_v27 = vmul.f32 %v13956_v5, %v13909_v50  ;;  %v4492_v9 = vmul.f32 %v13957_v8, %v13909_v50  ;;  %13959 = vst [vmem:[#allocation84_spill] sm:$0xff] %v10349_v23  ;;  %13960 = vst [vmem:[#allocation85_spill] sm:$0xff] %v10351_v63  ;;  %v13961_v10 = vld [vmem:[#allocation39_spill] sm:$0xff]  ;;  %v10361_v50 = vld [vmem:[#allocation2 + $0x58] sm:$0xff] }
 0x342   : > { %v5919_v12 = vadd.f32 %v5887_v18, %v5717_v36  ;;  %v5920_v48 = vadd.f32 %v5888_v25, %v5718_v46  ;;  %v4693_v54 = vmul.f32 %v13961_v10, %v13915_v33  ;;  %v1749_v4 = vmul.f32 %v13707_v52, %v1713_v16  ;;  %v10356_v2 = vld [vmem:[#allocation2 + $0x50] sm:$0xff]  ;;  %13963 = vst [vmem:[#allocation25_spill] sm:$0xff] %v10361_v50  ;;  %v10369_v16 = vld [vmem:[#allocation2 + $0x60] sm:$0xff] }
 0x343   : > { %13962 = vst [vmem:[#allocation24_spill] sm:$0xff] %v10356_v2  ;;  %v3917_v45 = vadd.f32 %v3885_v20, %v3717_v44  ;;  %v3918_v35 = vadd.f32 %v3886_v41, %v3718_v60  ;;  %v1750_v5 = vmul.f32 %v13707_v52, %v1714_v39  ;;  %v1950_v8 = vmul.f32 %v13708_v6, %v10341_v14  ;;  %v10373_v44 = vld [vmem:[#allocation2 + $0x68] sm:$0xff]  ;;  %v13966_v60 = vld [vmem:[#allocation40_spill] sm:$0xff] }
 0x344   : > { %v6781_v40 = vpack.c.bf16 %v5920_v48, %v5919_v12  ;;  %v1951_v18 = vmul.f32 %v13708_v6, %v10347_v26  ;;  %v2152_v25 = vmul.f32 %v13634_v0, %v10349_v23  ;;  %v2153_v46 = vmul.f32 %v13634_v0, %v10351_v63  ;;  %13964 = vst [vmem:[#allocation26_spill] sm:$0xff] %v10369_v16  ;;  %v13967_v48 = vld [vmem:[#allocation42_spill] sm:$0xff]  ;;  %v13971_v23 = vld [vmem:[#allocation49_spill] sm:$0xff] }
 0x345   : > { %v4119_v20 = vadd.f32 %v4087_v37, %v3917_v45  ;;  %v4120_v41 = vadd.f32 %v4088_v15, %v3918_v35  ;;  %v1982_v39 = vadd.f32 %v1950_v8, %v1749_v4  ;;  %v2354_v36 = vmul.f32 %v13636_v61, %v10356_v2  ;;  %13965 = vst [vmem:[#allocation27_spill] sm:$0xff] %v10373_v44  ;;  %v10383_v15 = vld [vmem:[#allocation2 + $0x70] sm:$0xff]  ;;  %v10387_v2 = vld [vmem:[#allocation2 + $0x78] sm:$0xff]  ;;  %v10477_v14 = vld [vmem:[#allocation2 + $0xe8] sm:$0xff] }
 0x346   : > { %6783 = vmatpush3.bf16.xpose.msk.msra.mxu1 %vm9262_vm1, %v6781_v40  ;;  %v4694_v12 = vmul.f32 %v13966_v60, %v13915_v33  ;;  %v4895_v10 = vmul.f32 %v13967_v48, %v13923_v58  ;;  %v1983_v63 = vadd.f32 %v1951_v18, %v1750_v5  ;;  %v2355_v37 = vmul.f32 %v13636_v61, %v10361_v50  ;;  %v13970_v40 = vld [vmem:[#allocation43_spill] sm:$0xff] }
 0x347   : > { %13968 = vst [vmem:[#allocation28_spill] sm:$0xff] %v10383_v15  ;;  %v4321_v4 = vadd.f32 %v4289_v1, %v4119_v20  ;;  %v4322_v45 = vadd.f32 %v4290_v30, %v4120_v41  ;;  %v2184_v35 = vadd.f32 %v2152_v25, %v1982_v39  ;;  %v2556_v8 = vmul.f32 %v13641_v56, %v10369_v16  ;;  %v13972_v25 = vld [vmem:[#allocation50_spill] sm:$0xff]  ;;  %v13973_v41 = vld [vmem:[#allocation52_spill] sm:$0xff] }
 0x348   : > { %13969 = vst [vmem:[#allocation29_spill] sm:$0xff] %v10387_v2  ;;  %v4896_v60 = vmul.f32 %v13970_v40, %v13923_v58  ;;  %v5097_v48 = vmul.f32 %v13971_v23, %v13928_v49  ;;  %v2185_v5 = vadd.f32 %v2153_v46, %v1983_v63  ;;  %v2557_v18 = vmul.f32 %v13641_v56, %v10373_v44  ;;  %v10411_v44 = vld [vmem:[#allocation3 + $0x1f0] sm:$0xff] }
 0x349   : > { %v4523_v50 = vadd.f32 %v4491_v27, %v4321_v4  ;;  %v4524_v26 = vadd.f32 %v4492_v9, %v4322_v45  ;;  %v2386_v1 = vadd.f32 %v2354_v36, %v2184_v35  ;;  %v2758_v30 = vmul.f32 %v13643_v7, %v10383_v15  ;;  %v13974_v27 = vld [vmem:[#allocation14_spill] sm:$0xff]  ;;  %v13975_v36 = vld [vmem:[#allocation76_spill] sm:$0xff]  ;;  %v13976_v45 = vld [vmem:[#allocation77_spill] sm:$0xff]  ;;  %13978 = vst [vmem:[#allocation30_spill] sm:$0xff] %v10411_v44 }
 0x34a   : > { %v5098_v20 = vmul.f32 %v13972_v25, %v13928_v49  ;;  %v5299_v39 = vmul.f32 %v13973_v41, %v13933_v29  ;;  %v2387_v40 = vadd.f32 %v2355_v37, %v2185_v5  ;;  %v2759_v23 = vmul.f32 %v13643_v7, %v10387_v2  ;;  %v13977_v15 = vld [vmem:[#allocation45_spill] sm:$0xff]  ;;  %14006 = vst [vmem:[#allocation43_spill] sm:$0xff] %v10477_v14 }
 0x34b   : > { %v4725_v63 = vadd.f32 %v4693_v54, %v4523_v50  ;;  %v4726_v46 = vadd.f32 %v4694_v12, %v4524_v26  ;;  %v2588_v16 = vadd.f32 %v2556_v8, %v2386_v1  ;;  %v2960_v9 = vmul.f32 %v13974_v27, %v13645_v24  ;;  %v13979_v26 = vld [vmem:[#allocation46_spill] sm:$0xff]  ;;  %v13980_v12 = vld [vmem:[#allocation47_spill] sm:$0xff]  ;;  %v13981_v1 = vld [vmem:[#allocation48_spill] sm:$0xff] }
 0x34c   : > { %v5300_v4 = vmul.f32 %v13975_v36, %v13933_v29  ;;  %v5501_v35 = vmul.f32 %v13976_v45, %v13938_v31  ;;  %v2589_v25 = vadd.f32 %v2557_v18, %v2387_v40  ;;  %v2961_v41 = vmul.f32 %v13977_v15, %v13645_v24  ;;  %v13982_v18 = vld [vmem:[#allocation16_spill] sm:$0xff] }
 0x34d   : > { %v4927_v37 = vadd.f32 %v4895_v10, %v4725_v63  ;;  %v4928_v5 = vadd.f32 %v4896_v60, %v4726_v46  ;;  %v2790_v50 = vadd.f32 %v2758_v30, %v2588_v16  ;;  %v3162_v54 = vmul.f32 %v13979_v26, %v13649_v17  ;;  %v10421_v10 = vld [vmem:[#allocation3 + $0x1f8] sm:$0xff] }
 0x34e   : > { %v5502_v8 = vmul.f32 %v13980_v12, %v13938_v31  ;;  %v5703_v27 = vmul.f32 %v13981_v1, %v13943_v43  ;;  %v2791_v36 = vadd.f32 %v2759_v23, %v2589_v25  ;;  %v3163_v40 = vmul.f32 %v13982_v18, %v13649_v17  ;;  %13983 = vst [vmem:[#allocation31_spill] sm:$0xff] %v10421_v10  ;;  %v13984_v30 = vld [vmem:[#allocation17_spill] sm:$0xff]  ;;  %v13985_v23 = vld [vmem:[#allocation18_spill] sm:$0xff]  ;;  %v13988_v18 = vld [vmem:[#allocation115_spill] sm:$0xff] }
 0x34f   : > { %v5129_v45 = vadd.f32 %v5097_v48, %v4927_v37  ;;  %v5130_v15 = vadd.f32 %v5098_v20, %v4928_v5  ;;  %v2992_v60 = vadd.f32 %v2960_v9, %v2790_v50  ;;  %v3364_v16 = vmul.f32 %v9931_v32, %v13825_v22  ;;  %v13986_v20 = vld [vmem:[#allocation19_spill] sm:$0xff]  ;;  %v13987_v5 = vld [vmem:[#allocation20_spill] sm:$0xff] }
 0x350   : > { %v5704_v63 = vmul.f32 %v13984_v30, %v13943_v43  ;;  %v5905_v46 = vmul.f32 %v13951_v3, %v10411_v44  ;;  %v2993_v26 = vadd.f32 %v2961_v41, %v2791_v36  ;;  %v3365_v25 = vmul.f32 %v13985_v23, %v13825_v22 }
 0x351   : > { %v5331_v12 = vadd.f32 %v5299_v39, %v5129_v45  ;;  %v5332_v1 = vadd.f32 %v5300_v4, %v5130_v15  ;;  %v3194_v48 = vadd.f32 %v3162_v54, %v2992_v60  ;;  %v3566_v37 = vmul.f32 %v13986_v20, %v13829_v47  ;;  %v13989_v39 = vld [vmem:[#allocation116_spill] sm:$0xff]  ;;  %v13990_v45 = vld [vmem:[#allocation117_spill] sm:$0xff]  ;;  %v13991_v60 = vld [vmem:[#allocation118_spill] sm:$0xff] }
 0x352   : > { %v5906_v9 = vmul.f32 %v13951_v3, %v10421_v10  ;;  %v3195_v32 = vadd.f32 %v3163_v40, %v2993_v26  ;;  %v3567_v50 = vmul.f32 %v13987_v5, %v13829_v47  ;;  %v3767_v30 = vmul.f32 %v13988_v18, %v13833_v55  ;;  %v13992_v40 = vld [vmem:[#allocation34_spill] sm:$0xff]  ;;  %v13993_v26 = vld [vmem:[#allocation119_spill] sm:$0xff] }
 0x353   : > { %v5533_v41 = vadd.f32 %v5501_v35, %v5331_v12  ;;  %v5534_v36 = vadd.f32 %v5502_v8, %v5332_v1  ;;  %v3396_v44 = vadd.f32 %v3364_v16, %v3194_v48  ;;  %v3768_v4 = vmul.f32 %v13989_v39, %v13833_v55  ;;  %v10447_v5 = vld [vmem:[#allocation2 + $0xb0] sm:$0xff]  ;;  %v10451_v12 = vld [vmem:[#allocation2 + $0xb8] sm:$0xff]  ;;  %v10455_v1 = vld [vmem:[#allocation2 + $0xc8] sm:$0xff] }
 0x354   : > { %v3397_v54 = vadd.f32 %v3365_v25, %v3195_v32  ;;  %v3968_v15 = vmul.f32 %v13990_v45, %v13838_v42  ;;  %v3969_v23 = vmul.f32 %v13991_v60, %v13838_v42  ;;  %v4170_v20 = vmul.f32 %v13993_v26, %v13992_v40  ;;  %13994 = vst [vmem:[#allocation33_spill] sm:$0xff] %v10447_v5  ;;  %v13995_v8 = vld [vmem:[#allocation120_spill] sm:$0xff]  ;;  %v10453_v25 = vld [vmem:[#allocation2 + $0xc0] sm:$0xff] }
 0x355   : > { %v5735_v10 = vadd.f32 %v5703_v27, %v5533_v41  ;;  %v5736_v18 = vadd.f32 %v5704_v63, %v5534_v36  ;;  %v3598_v35 = vadd.f32 %v3566_v37, %v3396_v44  ;;  %v4171_v16 = vmul.f32 %v13995_v8, %v13992_v40  ;;  %13996 = vst [vmem:[#allocation35_spill] sm:$0xff] %v10451_v12  ;;  %v13999_v32 = vld [vmem:[#allocation38_spill] sm:$0xff]  ;;  %v14000_v39 = vld [vmem:[#allocation121_spill] sm:$0xff]  ;;  %v14002_v27 = vld [vmem:[#allocation123_spill] sm:$0xff] }
 0x356   : > { %13997 = vst [vmem:[#allocation36_spill] sm:$0xff] %v10453_v25  ;;  %13998 = vst [vmem:[#allocation37_spill] sm:$0xff] %v10455_v1  ;;  %v3599_v48 = vadd.f32 %v3567_v50, %v3397_v54  ;;  %v4372_v45 = vmul.f32 %v14000_v39, %v13999_v32  ;;  %v14001_v60 = vld [vmem:[#allocation122_spill] sm:$0xff]  ;;  %v4574_v63 = vmul.f32 %v14002_v27, %v13841_v57  ;;  %v10463_v44 = vld [vmem:[#allocation2 + $0xd0] sm:$0xff] }
 0x357   : > { %v4373_v26 = vmul.f32 %v14001_v60, %v13999_v32  ;;  %14003 = vst [vmem:[#allocation39_spill] sm:$0xff] %v10463_v44  ;;  %v10465_v37 = vld [vmem:[#allocation2 + $0xd8] sm:$0xff]  ;;  %v5937_v41 = vadd.f32 %v5905_v46, %v5735_v10  ;;  %v5938_v36 = vadd.f32 %v5906_v9, %v5736_v18  ;;  %v3799_v8 = vadd.f32 %v3767_v30, %v3598_v35  ;;  %v10469_v50 = vld [vmem:[#allocation2 + $0xe0] sm:$0xff]  ;;  %v10479_v10 = vld [vmem:[#allocation2 + $0xf0] sm:$0xff] }
 0x358   : > { %14004 = vst [vmem:[#allocation40_spill] sm:$0xff] %v10465_v37  ;;  %v1767_v2 = vmul.f32 %v13707_v52, %v10447_v5  ;;  %14005 = vst [vmem:[#allocation42_spill] sm:$0xff] %v10469_v50  ;;  %v3800_v54 = vadd.f32 %v3768_v4, %v3599_v48  ;;  %v1768_v39 = vmul.f32 %v13707_v52, %v10451_v12  ;;  %v10485_v18 = vld [vmem:[#allocation2 + $0xf8] sm:$0xff]  ;;  %v10489_v12 = vld [vmem:[#allocation2 + $0x100] sm:$0xff] }
 0x359   : > { %v1968_v60 = vmul.f32 %v13708_v6, %v10453_v25  ;;  %v1969_v27 = vmul.f32 %v13708_v6, %v10455_v1  ;;  %14007 = vst [vmem:[#allocation49_spill] sm:$0xff] %v10479_v10  ;;  %v6784_v46 = vpack.c.bf16 %v5938_v36, %v5937_v41  ;;  %v4000_v9 = vadd.f32 %v3968_v15, %v3799_v8  ;;  %v14010_v41 = vld [vmem:[#allocation124_spill] sm:$0xff] }
 0x35a   : > { %v2170_v30 = vmul.f32 %v13634_v0, %v10463_v44  ;;  %v2171_v4 = vmul.f32 %v13634_v0, %v10465_v37  ;;  %14008 = vst [vmem:[#allocation50_spill] sm:$0xff] %v10485_v18  ;;  %v4001_v35 = vadd.f32 %v3969_v23, %v3800_v54  ;;  %v2372_v1 = vmul.f32 %v13636_v61, %v10469_v50  ;;  %v10503_v50 = vld [vmem:[#allocation2 + $0x110] sm:$0xff]  ;;  %v10511_v37 = vld [vmem:[#allocation2 + $0x118] sm:$0xff] }
 0x35b   : > { %v2000_v48 = vadd.f32 %v1968_v60, %v1767_v2  ;;  %v2001_v25 = vadd.f32 %v1969_v27, %v1768_v39  ;;  %14009 = vst [vmem:[#allocation52_spill] sm:$0xff] %v10489_v12  ;;  %6786 = vmatprep.subr.msk.bf16.mxu1 %vm9262_vm1, %v6784_v46  ;;  %v4202_v15 = vadd.f32 %v4170_v20, %v4000_v9  ;;  %v10499_v2 = vld [vmem:[#allocation2 + $0x108] sm:$0xff]  ;;  %14012 = vst [vmem:[#allocation76_spill] sm:$0xff] %v10503_v50  ;;  %v14013_v46 = vld [vmem:[#allocation125_spill] sm:$0xff] }
 0x35c   : > { %v4575_v36 = vmul.f32 %v14010_v41, %v13841_v57  ;;  %v2373_v8 = vmul.f32 %v13636_v61, %v10477_v14  ;;  %v2574_v23 = vmul.f32 %v13641_v56, %v10479_v10  ;;  %14011 = vst [vmem:[#allocation14_spill] sm:$0xff] %v10499_v2  ;;  %v4203_v54 = vadd.f32 %v4171_v16, %v4001_v35  ;;  %v14014_v41 = vld [vmem:[#allocation126_spill] sm:$0xff]  ;;  %v10559_v44 = vld [vmem:[#allocation2 + $0x158] sm:$0xff] }
 0x35d   : > { %v2202_v39 = vadd.f32 %v2170_v30, %v2000_v48  ;;  %v2203_v60 = vadd.f32 %v2171_v4, %v2001_v25  ;;  %v2575_v27 = vmul.f32 %v13641_v56, %v10485_v18  ;;  %v4404_v20 = vadd.f32 %v4372_v45, %v4202_v15  ;;  %14015 = vst [vmem:[#allocation77_spill] sm:$0xff] %v10511_v37  ;;  %v10515_v35 = vld [vmem:[#allocation2 + $0x120] sm:$0xff]  ;;  %v14017_v48 = vld [vmem:[#allocation127_spill] sm:$0xff] }
 0x35e   : > { %v4776_v9 = vmul.f32 %v14013_v46, %v13847_v34  ;;  %v4777_v14 = vmul.f32 %v14014_v41, %v13847_v34  ;;  %v2776_v10 = vmul.f32 %v13643_v7, %v10489_v12  ;;  %v4405_v16 = vadd.f32 %v4373_v26, %v4203_v54  ;;  %14016 = vst [vmem:[#allocation45_spill] sm:$0xff] %v10515_v35  ;;  %v14018_v46 = vld [vmem:[#allocation128_spill] sm:$0xff]  ;;  %v10523_v18 = vld [vmem:[#allocation2 + $0x128] sm:$0xff] }
 0x35f   : > { %v2404_v30 = vadd.f32 %v2372_v1, %v2202_v39  ;;  %v2405_v25 = vadd.f32 %v2373_v8, %v2203_v60  ;;  %v2777_v4 = vmul.f32 %v13643_v7, %v10499_v2  ;;  %v4606_v45 = vadd.f32 %v4574_v63, %v4404_v20  ;;  %14019 = vst [vmem:[#allocation46_spill] sm:$0xff] %v10523_v18  ;;  %v10527_v39 = vld [vmem:[#allocation2 + $0x130] sm:$0xff]  ;;  %v14021_v60 = vld [vmem:[#allocation129_spill] sm:$0xff] }
 0x360   : > { %v4978_v15 = vmul.f32 %v14017_v48, %v13850_v53  ;;  %v4979_v41 = vmul.f32 %v14018_v46, %v13850_v53  ;;  %v2978_v12 = vmul.f32 %v13645_v24, %v10503_v50  ;;  %v4607_v26 = vadd.f32 %v4575_v36, %v4405_v16  ;;  %14020 = vst [vmem:[#allocation47_spill] sm:$0xff] %v10527_v39  ;;  %v14022_v48 = vld [vmem:[#allocation130_spill] sm:$0xff]  ;;  %v10535_v2 = vld [vmem:[#allocation2 + $0x138] sm:$0xff] }
 0x361   : > { %v2606_v1 = vadd.f32 %v2574_v23, %v2404_v30  ;;  %v2607_v8 = vadd.f32 %v2575_v27, %v2405_v25  ;;  %v2979_v54 = vmul.f32 %v13645_v24, %v10511_v37  ;;  %v4808_v63 = vadd.f32 %v4776_v9, %v4606_v45  ;;  %14023 = vst [vmem:[#allocation48_spill] sm:$0xff] %v10535_v2  ;;  %v10539_v30 = vld [vmem:[#allocation2 + $0x140] sm:$0xff]  ;;  %v14025_v25 = vld [vmem:[#allocation131_spill] sm:$0xff] }
 0x362   : > { %v5180_v20 = vmul.f32 %v14021_v60, %v13853_v28  ;;  %v5181_v46 = vmul.f32 %v14022_v48, %v13853_v28  ;;  %v3180_v50 = vmul.f32 %v13649_v17, %v10515_v35  ;;  %v4809_v36 = vadd.f32 %v4777_v14, %v4607_v26  ;;  %14024 = vst [vmem:[#allocation16_spill] sm:$0xff] %v10539_v30  ;;  %v14026_v60 = vld [vmem:[#allocation132_spill] sm:$0xff]  ;;  %v10547_v37 = vld [vmem:[#allocation2 + $0x148] sm:$0xff] }
 0x363   : > { %v2808_v23 = vadd.f32 %v2776_v10, %v2606_v1  ;;  %v2809_v27 = vadd.f32 %v2777_v4, %v2607_v8  ;;  %v3181_v16 = vmul.f32 %v13649_v17, %v10523_v18  ;;  %v5010_v9 = vadd.f32 %v4978_v15, %v4808_v63  ;;  %14027 = vst [vmem:[#allocation17_spill] sm:$0xff] %v10547_v37  ;;  %v10551_v1 = vld [vmem:[#allocation2 + $0x150] sm:$0xff]  ;;  %v14029_v8 = vld [vmem:[#allocation21_spill] sm:$0xff]  ;;  %v14031_v18 = vld [vmem:[#allocation134_spill] sm:$0xff] }
 0x364   : > { %v5382_v45 = vmul.f32 %v14025_v25, %v13856_v59  ;;  %v5383_v48 = vmul.f32 %v14026_v60, %v13856_v59  ;;  %v3382_v35 = vmul.f32 %v13825_v22, %v10527_v39  ;;  %v5011_v14 = vadd.f32 %v4979_v41, %v4809_v36  ;;  %14028 = vst [vmem:[#allocation18_spill] sm:$0xff] %v10551_v1  ;;  %v14030_v63 = vld [vmem:[#allocation133_spill] sm:$0xff] }
 0x365   : > { %v3010_v10 = vadd.f32 %v2978_v12, %v2808_v23  ;;  %v3011_v4 = vadd.f32 %v2979_v54, %v2809_v27  ;;  %v3383_v26 = vmul.f32 %v13825_v22, %v10535_v2  ;;  %v5212_v15 = vadd.f32 %v5180_v20, %v5010_v9  ;;  %14032 = vst [vmem:[#allocation19_spill] sm:$0xff] %v10559_v44  ;;  %v14033_v27 = vld [vmem:[#allocation135_spill] sm:$0xff]  ;;  %v14034_v20 = vld [vmem:[#allocation80_spill] sm:$0xff] }
 0x366   : > { %v5584_v25 = vmul.f32 %v14030_v63, %v14029_v8  ;;  %v5585_v60 = vmul.f32 %v14031_v18, %v14029_v8  ;;  %v3584_v39 = vmul.f32 %v13829_v47, %v10539_v30  ;;  %v5213_v41 = vadd.f32 %v5181_v46, %v5011_v14  ;;  %v14035_v2 = vld [vmem:[#allocation136_spill] sm:$0xff]  ;;  %v14036_v14 = vld [vmem:[#allocation137_spill] sm:$0xff] }
 0x367   : > { %v3212_v12 = vadd.f32 %v3180_v50, %v3010_v10  ;;  %v3213_v54 = vadd.f32 %v3181_v16, %v3011_v4  ;;  %v3585_v36 = vmul.f32 %v13829_v47, %v10547_v37  ;;  %v5414_v23 = vadd.f32 %v5382_v45, %v5212_v15  ;;  %v1815_v4 = vld [vmem:[#allocation3 + $0x30] sm:$0xff]  ;;  %v1816_v15 = vld [vmem:[#allocation3 + $0x38] sm:$0xff] }
 0x368   : > { %v5786_v9 = vmul.f32 %v14034_v20, %v14033_v27  ;;  %v5787_v63 = vmul.f32 %v14034_v20, %v14035_v2  ;;  %v3785_v18 = vmul.f32 %v13833_v55, %v10551_v1  ;;  %v5415_v22 = vadd.f32 %v5383_v48, %v5213_v41  ;;  %v10579_v41 = vld [vmem:[#allocation3 + $0x40] sm:$0xff] }
 0x369   : > { %v3414_v30 = vadd.f32 %v3382_v35, %v3212_v12  ;;  %v3415_v5 = vadd.f32 %v3383_v26, %v3213_v54  ;;  %v3786_v50 = vmul.f32 %v13833_v55, %v10559_v44  ;;  %v5616_v46 = vadd.f32 %v5584_v25, %v5414_v23  ;;  %v14037_v35 = vld [vmem:[#allocation138_spill] sm:$0xff]  ;;  %14038 = vst [vmem:[#allocation20_spill] sm:$0xff] %v10579_v41  ;;  %v10583_v12 = vld [vmem:[#allocation3 + $0x50] sm:$0xff] }
 0x36a   : > { %v3986_v16 = vmul.f32 %v14033_v27, %v13838_v42  ;;  %v3987_v45 = vmul.f32 %v14035_v2, %v13838_v42  ;;  %v4188_v10 = vmul.f32 %v14036_v14, %v13992_v40  ;;  %v5617_v37 = vadd.f32 %v5585_v60, %v5415_v22  ;;  %v10581_v25 = vld [vmem:[#allocation3 + $0x48] sm:$0xff]  ;;  %14040 = vst [vmem:[#allocation116_spill] sm:$0xff] %v10583_v12  ;;  %v14043_v22 = vld [vmem:[#allocation140_spill] sm:$0xff]  ;;  %v10594_v44 = vld [vmem:[#allocation3 + $0x60] sm:$0xff] }
 0x36b   : > { %v3616_v1 = vadd.f32 %v3584_v39, %v3414_v30  ;;  %v3617_v48 = vadd.f32 %v3585_v36, %v3415_v5  ;;  %v4189_v26 = vmul.f32 %v14037_v35, %v13992_v40  ;;  %14039 = vst [vmem:[#allocation115_spill] sm:$0xff] %v10581_v25  ;;  %v5818_v54 = vadd.f32 %v5786_v9, %v5616_v46  ;;  %v14041_v2 = vld [vmem:[#allocation139_spill] sm:$0xff]  ;;  %v14042_v27 = vld [vmem:[#allocation58_spill] sm:$0xff]  ;;  %v10591_v5 = vld [vmem:[#allocation3 + $0x58] sm:$0xff] }
 0x36c   : > { %v4390_v23 = vmul.f32 %v14041_v2, %v13999_v32  ;;  %v4391_v14 = vmul.f32 %v14042_v27, %v13999_v32  ;;  %v4592_v39 = vmul.f32 %v14043_v22, %v13841_v57  ;;  %14044 = vst [vmem:[#allocation117_spill] sm:$0xff] %v10591_v5  ;;  %v5819_v30 = vadd.f32 %v5787_v63, %v5617_v37  ;;  %v10596_v40 = vld [vmem:[#allocation3 + $0x68] sm:$0xff]  ;;  %v14047_v46 = vld [vmem:[#allocation57_spill] sm:$0xff]  ;;  %v14048_v22 = vld [vmem:[#allocation64_spill] sm:$0xff] }
 0x36d   : > { %v3817_v60 = vadd.f32 %v3785_v18, %v3616_v1  ;;  %v3818_v36 = vadd.f32 %v3786_v50, %v3617_v48  ;;  %v1851_v35 = vmul.f32 %v13732_v38, %v1815_v4  ;;  %14045 = vst [vmem:[#allocation118_spill] sm:$0xff] %v10594_v44  ;;  %14046 = vst [vmem:[#allocation119_spill] sm:$0xff] %v10596_v40  ;;  %v10607_v50 = vld [vmem:[#allocation3 + $0x70] sm:$0xff]  ;;  %v10609_v4 = vld [vmem:[#allocation3 + $0x78] sm:$0xff] }
 0x36e   : > { %v1852_v9 = vmul.f32 %v13732_v38, %v1816_v15  ;;  %v2053_v2 = vmul.f32 %v14047_v46, %v10579_v41  ;;  %v2054_v27 = vmul.f32 %v14047_v46, %v10581_v25  ;;  %v2255_v32 = vmul.f32 %v14048_v22, %v10583_v12  ;;  %14049 = vst [vmem:[#allocation120_spill] sm:$0xff] %v10607_v50  ;;  %v10635_v12 = vld [vmem:[#allocation3 + $0x98] sm:$0xff]  ;;  %v14087_v55 = vld [vmem:[#allocation103_spill] sm:$0xff] }
 0x36f   : > { %v6733_v37 = vpack.c.bf16 %v5819_v30, %v5818_v54  ;;  %v4018_v1 = vadd.f32 %v3986_v16, %v3817_v60  ;;  %v4019_v63 = vadd.f32 %v3987_v45, %v3818_v36  ;;  %v2256_v18 = vmul.f32 %v14048_v22, %v10591_v5  ;;  %14050 = vst [vmem:[#allocation121_spill] sm:$0xff] %v10609_v4  ;;  %v14051_v54 = vld [vmem:[#allocation83_spill] sm:$0xff]  ;;  %v10621_v5 = vld [vmem:[#allocation3 + $0x80] sm:$0xff] }
 0x370   : > { %v2085_v15 = vadd.f32 %v2053_v2, %v1851_v35  ;;  %v2086_v48 = vadd.f32 %v2054_v27, %v1852_v9  ;;  %v2457_v41 = vmul.f32 %v13737_v51, %v10594_v44  ;;  %v2458_v25 = vmul.f32 %v13737_v51, %v10596_v40  ;;  %v14052_v60 = vld [vmem:[#allocation59_spill] sm:$0xff]  ;;  %14053 = vst [vmem:[#allocation122_spill] sm:$0xff] %v10621_v5  ;;  %v14055_v27 = vld [vmem:[#allocation69_spill] sm:$0xff] }
 0x371   : > { %6735 = vmatpush3.bf16.xpose.msk.msra.mxu0 %vm9262_vm1, %v6733_v37  ;;  %v4220_v16 = vadd.f32 %v4188_v10, %v4018_v1  ;;  %v4221_v45 = vadd.f32 %v4189_v26, %v4019_v63  ;;  %v4593_v30 = vmul.f32 %v14051_v54, %v13841_v57  ;;  %v4794_v36 = vmul.f32 %v14052_v60, %v13847_v34  ;;  %v10623_v35 = vld [vmem:[#allocation3 + $0x88] sm:$0xff]  ;;  %v10633_v44 = vld [vmem:[#allocation3 + $0x90] sm:$0xff] }
 0x372   : > { %14054 = vst [vmem:[#allocation123_spill] sm:$0xff] %v10623_v35  ;;  %v2287_v9 = vadd.f32 %v2255_v32, %v2085_v15  ;;  %v2288_v2 = vadd.f32 %v2256_v18, %v2086_v48  ;;  %v2659_v40 = vmul.f32 %v14055_v27, %v10607_v50  ;;  %v2660_v37 = vmul.f32 %v14055_v27, %v10609_v4  ;;  %v14056_v1 = vld [vmem:[#allocation62_spill] sm:$0xff]  ;;  %v14057_v54 = vld [vmem:[#allocation63_spill] sm:$0xff] }
 0x373   : > { %v4422_v10 = vadd.f32 %v4390_v23, %v4220_v16  ;;  %v4423_v26 = vadd.f32 %v4391_v14, %v4221_v45  ;;  %v4795_v63 = vmul.f32 %v14056_v1, %v13847_v34  ;;  %v4996_v60 = vmul.f32 %v14057_v54, %v13850_v53  ;;  %14058 = vst [vmem:[#allocation124_spill] sm:$0xff] %v10633_v44  ;;  %v10637_v32 = vld [vmem:[#allocation2 + $0x1d0] sm:$0xff]  ;;  %v10647_v34 = vld [vmem:[#allocation3 + $0xa0] sm:$0xff]  ;;  %v10649_v57 = vld [vmem:[#allocation3 + $0xa8] sm:$0xff] }
 0x374   : > { %14059 = vst [vmem:[#allocation125_spill] sm:$0xff] %v10635_v12  ;;  %14060 = vst [vmem:[#allocation126_spill] sm:$0xff] %v10637_v32  ;;  %v2489_v18 = vadd.f32 %v2457_v41, %v2287_v9  ;;  %v2490_v15 = vadd.f32 %v2458_v25, %v2288_v2  ;;  %v14061_v48 = vld [vmem:[#allocation71_spill] sm:$0xff]  ;;  %v14063_v54 = vld [vmem:[#allocation68_spill] sm:$0xff] }
 0x375   : > { %v2861_v50 = vmul.f32 %v14061_v48, %v10621_v5  ;;  %v2862_v23 = vmul.f32 %v14061_v48, %v10623_v35  ;;  %v4624_v14 = vadd.f32 %v4592_v39, %v4422_v10  ;;  %v4625_v16 = vadd.f32 %v4593_v30, %v4423_v26  ;;  %v14062_v45 = vld [vmem:[#allocation67_spill] sm:$0xff]  ;;  %14064 = vst [vmem:[#allocation127_spill] sm:$0xff] %v10647_v34  ;;  %v10651_v41 = vld [vmem:[#allocation2 + $0x1d8] sm:$0xff]  ;;  %v14068_v26 = vld [vmem:[#allocation22_spill] sm:$0xff] }
 0x376   : > { %v4997_v1 = vmul.f32 %v14062_v45, %v13850_v53  ;;  %v5198_v4 = vmul.f32 %v14063_v54, %v13853_v28  ;;  %14065 = vst [vmem:[#allocation128_spill] sm:$0xff] %v10649_v57  ;;  %14066 = vst [vmem:[#allocation129_spill] sm:$0xff] %v10651_v41  ;;  %v2691_v25 = vadd.f32 %v2659_v40, %v2489_v18  ;;  %v14067_v2 = vld [vmem:[#allocation73_spill] sm:$0xff]  ;;  %v10661_v35 = vld [vmem:[#allocation2 + $0x1f0] sm:$0xff] }
 0x377   : > { %v2692_v9 = vadd.f32 %v2660_v37, %v2490_v15  ;;  %v3063_v5 = vmul.f32 %v14067_v2, %v10633_v44  ;;  %v3064_v39 = vmul.f32 %v14067_v2, %v10635_v12  ;;  %v4826_v30 = vadd.f32 %v4794_v36, %v4624_v14  ;;  %14069 = vst [vmem:[#allocation130_spill] sm:$0xff] %v10661_v35  ;;  %v14070_v40 = vld [vmem:[#allocation75_spill] sm:$0xff]  ;;  %v14081_v44 = vld [vmem:[#allocation97_spill] sm:$0xff] }
 0x378   : > { %v4827_v10 = vadd.f32 %v4795_v63, %v4625_v16  ;;  %v5199_v45 = vmul.f32 %v14068_v26, %v13853_v28  ;;  %v5400_v54 = vmul.f32 %v13856_v59, %v10637_v32  ;;  %v2893_v53 = vadd.f32 %v2861_v50, %v2691_v25  ;;  %v14071_v63 = vld [vmem:[#allocation23_spill] sm:$0xff]  ;;  %v10671_v16 = vld [vmem:[#allocation2 + $0x1f8] sm:$0xff] }
 0x379   : > { %v2894_v42 = vadd.f32 %v2862_v23, %v2692_v9  ;;  %v3265_v37 = vmul.f32 %v14070_v40, %v10647_v34  ;;  %v3266_v18 = vmul.f32 %v14070_v40, %v10649_v57  ;;  %v5028_v15 = vadd.f32 %v4996_v60, %v4826_v30  ;;  %14072 = vst [vmem:[#allocation131_spill] sm:$0xff] %v10671_v16  ;;  %v14073_v50 = vld [vmem:[#allocation93_spill] sm:$0xff]  ;;  %v14074_v25 = vld [vmem:[#allocation111_spill] sm:$0xff] }
 0x37a   : > { %v5029_v12 = vadd.f32 %v4997_v1, %v4827_v10  ;;  %v5401_v36 = vmul.f32 %v13856_v59, %v10651_v41  ;;  %v5602_v14 = vmul.f32 %v14071_v63, %v14029_v8  ;;  %v3095_v26 = vadd.f32 %v3063_v5, %v2893_v53  ;;  %v14075_v60 = vld [vmem:[#allocation109_spill] sm:$0xff]  ;;  %v14076_v41 = vld [vmem:[#allocation96_spill] sm:$0xff] }
 0x37b   : > { %v3096_v32 = vadd.f32 %v3064_v39, %v2894_v42  ;;  %v3467_v23 = vmul.f32 %v13759_v21, %v14073_v50  ;;  %v3468_v9 = vmul.f32 %v13759_v21, %v14074_v25  ;;  %v5230_v34 = vadd.f32 %v5198_v4, %v5028_v15  ;;  %v14077_v42 = vld [vmem:[#allocation110_spill] sm:$0xff] }
 0x37c   : > { %v5231_v57 = vadd.f32 %v5199_v45, %v5029_v12  ;;  %v5603_v1 = vmul.f32 %v14075_v60, %v14029_v8  ;;  %v5804_v30 = vmul.f32 %v14034_v20, %v10661_v35  ;;  %v3297_v10 = vadd.f32 %v3265_v37, %v3095_v26  ;;  %v14078_v12 = vld [vmem:[#allocation94_spill] sm:$0xff]  ;;  %v14079_v60 = vld [vmem:[#allocation113_spill] sm:$0xff] }
 0x37d   : > { %v3298_v63 = vadd.f32 %v3266_v18, %v3096_v32  ;;  %v3669_v53 = vmul.f32 %v13763_v13, %v14076_v41  ;;  %v3670_v5 = vmul.f32 %v13763_v13, %v14077_v42  ;;  %v5432_v39 = vadd.f32 %v5400_v54, %v5230_v34  ;;  %v14080_v32 = vld [vmem:[#allocation95_spill] sm:$0xff]  ;;  %v14083_v54 = vld [vmem:[#allocation81_spill] sm:$0xff]  ;;  %v14084_v8 = vld [vmem:[#allocation98_spill] sm:$0xff] }
 0x37e   : > { %v5433_v50 = vadd.f32 %v5401_v36, %v5231_v57  ;;  %v5805_v4 = vmul.f32 %v14034_v20, %v10671_v16  ;;  %v3869_v45 = vmul.f32 %v13768_v62, %v14078_v12  ;;  %v3499_v15 = vadd.f32 %v3467_v23, %v3297_v10  ;;  %v14082_v57 = vld [vmem:[#allocation112_spill] sm:$0xff]  ;;  %v14086_v10 = vld [vmem:[#allocation82_spill] sm:$0xff] }
 0x37f   : > { %v3500_v25 = vadd.f32 %v3468_v9, %v3298_v63  ;;  %v3870_v37 = vmul.f32 %v13768_v62, %v14079_v60  ;;  %v4071_v18 = vmul.f32 %v13901_v19, %v14080_v32  ;;  %v5634_v26 = vadd.f32 %v5602_v14, %v5432_v39  ;;  %v14085_v9 = vld [vmem:[#allocation114_spill] sm:$0xff] }
 0x380   : > { %v5635_v35 = vadd.f32 %v5603_v1, %v5433_v50  ;;  %v4072_v34 = vmul.f32 %v13901_v19, %v14081_v44  ;;  %v4273_v36 = vmul.f32 %v14083_v54, %v14082_v57  ;;  %v3701_v16 = vadd.f32 %v3669_v53, %v3499_v15  ;;  %v14088_v1 = vld [vmem:[#allocation105_spill] sm:$0xff] }
 0x381   : > { %v3702_v20 = vadd.f32 %v3670_v5, %v3500_v25  ;;  %v4274_v23 = vmul.f32 %v14083_v54, %v14084_v8  ;;  %v4475_v63 = vmul.f32 %v14086_v10, %v14085_v9  ;;  %v5836_v59 = vadd.f32 %v5804_v30, %v5634_v26 }
 0x382   : > { %v5837_v28 = vadd.f32 %v5805_v4, %v5635_v35  ;;  %v4476_v14 = vmul.f32 %v14086_v10, %v14087_v55  ;;  %v4677_v39 = vmul.f32 %v13915_v33, %v14088_v1  ;;  %v3901_v50 = vadd.f32 %v3869_v45, %v3701_v16  ;;  %v14089_v16 = vld [vmem:[#allocation61_spill] sm:$0xff] }
 0x383   : > { %v3902_v47 = vadd.f32 %v3870_v37, %v3702_v20  ;;  %v1869_v53 = vmul.f32 %v14076_v41, %v13732_v38  ;;  %v1870_v5 = vmul.f32 %v14077_v42, %v13732_v38  ;;  %v2071_v25 = vmul.f32 %v14078_v12, %v14047_v46 }
 0x384   : > { %v6736_v15 = vpack.c.bf16 %v5837_v28, %v5836_v59  ;;  %v2072_v35 = vmul.f32 %v14079_v60, %v14047_v46  ;;  %v2273_v30 = vmul.f32 %v14080_v32, %v14048_v22  ;;  %v4103_v4 = vadd.f32 %v4071_v18, %v3901_v50  ;;  %v14091_v32 = vld [vmem:[#allocation100_spill] sm:$0xff] }
 0x385   : > { %v4104_v26 = vadd.f32 %v4072_v34, %v3902_v47  ;;  %v4678_v20 = vmul.f32 %v13915_v33, %v14089_v16  ;;  %v2274_v41 = vmul.f32 %v14081_v44, %v14048_v22  ;;  %v2103_v28 = vadd.f32 %v2071_v25, %v1869_v53  ;;  %v14090_v47 = vld [vmem:[#allocation66_spill] sm:$0xff] }
 0x386   : > { %6738 = vmatprep.subr.msk.bf16.mxu0 %vm9262_vm1, %v6736_v15  ;;  %v2104_v59 = vadd.f32 %v2072_v35, %v1870_v5  ;;  %v2475_v42 = vmul.f32 %v14082_v57, %v13737_v51  ;;  %v2476_v12 = vmul.f32 %v14084_v8, %v13737_v51  ;;  %v4305_v45 = vadd.f32 %v4273_v36, %v4103_v4  ;;  %v14092_v15 = vld [vmem:[#allocation101_spill] sm:$0xff]  ;;  %v14093_v36 = vld [vmem:[#allocation70_spill] sm:$0xff] }
 0x387   : > { %v4306_v60 = vadd.f32 %v4274_v23, %v4104_v26  ;;  %v4879_v37 = vmul.f32 %v13923_v58, %v14090_v47  ;;  %v4880_v18 = vmul.f32 %v13923_v58, %v14091_v32  ;;  %v2305_v44 = vadd.f32 %v2273_v30, %v2103_v28  ;;  %v10745_v28 = vld [vmem:[#allocation3 + $0x160] sm:$0xff] }
 0x388   : > { %v2306_v34 = vadd.f32 %v2274_v41, %v2104_v59  ;;  %v2677_v50 = vmul.f32 %v14085_v9, %v14055_v27  ;;  %v2678_v53 = vmul.f32 %v14087_v55, %v14055_v27  ;;  %v4507_v57 = vadd.f32 %v4475_v63, %v4305_v45  ;;  %v14094_v41 = vld [vmem:[#allocation107_spill] sm:$0xff]  ;;  %v14095_v63 = vld [vmem:[#allocation72_spill] sm:$0xff]  ;;  %14096 = vst [vmem:[#allocation132_spill] sm:$0xff] %v10745_v28  ;;  %v14098_v45 = vld [vmem:[#allocation74_spill] sm:$0xff] }
 0x389   : > { %v4508_v5 = vadd.f32 %v4476_v14, %v4306_v60  ;;  %v5081_v8 = vmul.f32 %v13928_v49, %v14092_v15  ;;  %v5082_v23 = vmul.f32 %v13928_v49, %v14093_v36  ;;  %v2507_v25 = vadd.f32 %v2475_v42, %v2305_v44  ;;  %v10747_v59 = vld [vmem:[#allocation3 + $0x168] sm:$0xff] }
 0x38a   : > { %v2508_v35 = vadd.f32 %v2476_v12, %v2306_v34  ;;  %v2879_v30 = vmul.f32 %v14088_v1, %v14061_v48  ;;  %v2880_v4 = vmul.f32 %v14089_v16, %v14061_v48  ;;  %v4709_v9 = vadd.f32 %v4677_v39, %v4507_v57  ;;  %14097 = vst [vmem:[#allocation133_spill] sm:$0xff] %v10747_v59  ;;  %v14099_v44 = vld [vmem:[#allocation54_spill] sm:$0xff]  ;;  %v10757_v57 = vld [vmem:[#allocation3 + $0x170] sm:$0xff] }
 0x38b   : > { %v4710_v26 = vadd.f32 %v4678_v20, %v4508_v5  ;;  %v5283_v55 = vmul.f32 %v13933_v29, %v14094_v41  ;;  %v5284_v14 = vmul.f32 %v13933_v29, %v14095_v63  ;;  %v2709_v42 = vadd.f32 %v2677_v50, %v2507_v25  ;;  %14100 = vst [vmem:[#allocation134_spill] sm:$0xff] %v10757_v57  ;;  %v10759_v5 = vld [vmem:[#allocation3 + $0x178] sm:$0xff] }
 0x38c   : > { %v2710_v12 = vadd.f32 %v2678_v53, %v2508_v35  ;;  %v3081_v1 = vmul.f32 %v14090_v47, %v14067_v2  ;;  %v3082_v16 = vmul.f32 %v14091_v32, %v14067_v2  ;;  %v4911_v39 = vadd.f32 %v4879_v37, %v4709_v9  ;;  %14101 = vst [vmem:[#allocation135_spill] sm:$0xff] %v10759_v5 }
 0x38d   : > { %v4912_v20 = vadd.f32 %v4880_v18, %v4710_v26  ;;  %v5485_v60 = vmul.f32 %v13938_v31, %v14098_v45  ;;  %v5486_v34 = vmul.f32 %v13938_v31, %v14099_v44  ;;  %v2911_v50 = vadd.f32 %v2879_v30, %v2709_v42 }
 0x38e   : > { %v2912_v53 = vadd.f32 %v2880_v4, %v2710_v12  ;;  %v3283_v47 = vmul.f32 %v14092_v15, %v14070_v40  ;;  %v3284_v32 = vmul.f32 %v14093_v36, %v14070_v40  ;;  %v5113_v37 = vadd.f32 %v5081_v8, %v4911_v39  ;;  %v10783_v39 = vld [vmem:[#allocation3 + $0x188] sm:$0xff] }
 0x38f   : > { %v5114_v18 = vadd.f32 %v5082_v23, %v4912_v20  ;;  %v5687_v25 = vmul.f32 %v13943_v43, %v10745_v28  ;;  %v5688_v35 = vmul.f32 %v13943_v43, %v10747_v59  ;;  %v3113_v9 = vadd.f32 %v3081_v1, %v2911_v50  ;;  %14103 = vst [vmem:[#allocation137_spill] sm:$0xff] %v10783_v39  ;;  %v10789_v50 = vld [vmem:[#allocation3 + $0x190] sm:$0xff] }
 0x390   : > { %v3114_v26 = vadd.f32 %v3082_v16, %v2912_v53  ;;  %v3485_v30 = vmul.f32 %v14094_v41, %v13759_v21  ;;  %v3486_v4 = vmul.f32 %v14095_v63, %v13759_v21  ;;  %v5315_v15 = vadd.f32 %v5283_v55, %v5113_v37  ;;  %v10781_v41 = vld [vmem:[#allocation3 + $0x180] sm:$0xff]  ;;  %14104 = vst [vmem:[#allocation138_spill] sm:$0xff] %v10789_v50  ;;  %v10791_v53 = vld [vmem:[#allocation3 + $0x198] sm:$0xff] }
 0x391   : > { %v5316_v42 = vadd.f32 %v5284_v14, %v5114_v18  ;;  %v5889_v8 = vmul.f32 %v13951_v3, %v10757_v57  ;;  %v5890_v36 = vmul.f32 %v13951_v3, %v10759_v5  ;;  %v3315_v23 = vadd.f32 %v3283_v47, %v3113_v9  ;;  %14102 = vst [vmem:[#allocation136_spill] sm:$0xff] %v10781_v41 }
 0x392   : > { %v3316_v12 = vadd.f32 %v3284_v32, %v3114_v26  ;;  %v3687_v1 = vmul.f32 %v14098_v45, %v13763_v13  ;;  %v3688_v16 = vmul.f32 %v14099_v44, %v13763_v13  ;;  %v5517_v55 = vadd.f32 %v5485_v60, %v5315_v15  ;;  %14105 = vst [vmem:[#allocation139_spill] sm:$0xff] %v10791_v53  ;;  %v10797_v60 = vld [vmem:[#allocation3 + $0x1a0] sm:$0xff] }
 0x393   : > { %v5518_v63 = vadd.f32 %v5486_v34, %v5316_v42  ;;  %v3887_v14 = vmul.f32 %v10745_v28, %v13768_v62  ;;  %v3888_v20 = vmul.f32 %v10747_v59, %v13768_v62  ;;  %v3517_v45 = vadd.f32 %v3485_v30, %v3315_v23  ;;  %14106 = vst [vmem:[#allocation58_spill] sm:$0xff] %v10797_v60 }
 0x394   : > { %v3518_v47 = vadd.f32 %v3486_v4, %v3316_v12  ;;  %v4089_v44 = vmul.f32 %v10757_v57, %v13901_v19  ;;  %v4090_v32 = vmul.f32 %v10759_v5, %v13901_v19  ;;  %v5719_v34 = vadd.f32 %v5687_v25, %v5517_v55  ;;  %v14142_v57 = vld [vmem:[#allocation39_spill] sm:$0xff] }
 0x395   : > { %v5720_v37 = vadd.f32 %v5688_v35, %v5518_v63  ;;  %v4291_v18 = vmul.f32 %v14083_v54, %v10781_v41  ;;  %v4292_v9 = vmul.f32 %v14083_v54, %v10783_v39  ;;  %v3719_v26 = vadd.f32 %v3687_v1, %v3517_v45  ;;  %v14107_v35 = vld [vmem:[#allocation55_spill] sm:$0xff]  ;;  %v14117_v39 = vld [vmem:[#allocation26_spill] sm:$0xff] }
 0x396   : > { %v3720_v15 = vadd.f32 %v3688_v16, %v3518_v47  ;;  %v4493_v30 = vmul.f32 %v14086_v10, %v10789_v50  ;;  %v4494_v4 = vmul.f32 %v14086_v10, %v10791_v53  ;;  %v5921_v42 = vadd.f32 %v5889_v8, %v5719_v34  ;;  %v10811_v41 = vld [vmem:[#allocation3 + $0x1a8] sm:$0xff]  ;;  %v10813_v1 = vld [vmem:[#allocation3 + $0x1b0] sm:$0xff]  ;;  %v10827_v50 = vld [vmem:[#allocation3 + $0x1c0] sm:$0xff] }
 0x397   : > { %v5922_v23 = vadd.f32 %v5890_v36, %v5720_v37  ;;  %v4695_v25 = vmul.f32 %v13915_v33, %v10797_v60  ;;  %v1751_v12 = vmul.f32 %v14107_v35, %v13707_v52  ;;  %v3919_v55 = vadd.f32 %v3887_v14, %v3719_v26  ;;  %14108 = vst [vmem:[#allocation140_spill] sm:$0xff] %v10811_v41  ;;  %v14110_v16 = vld [vmem:[#allocation60_spill] sm:$0xff]  ;;  %v14112_v36 = vld [vmem:[#allocation85_spill] sm:$0xff] }
 0x398   : > { %v3920_v63 = vadd.f32 %v3888_v20, %v3720_v15  ;;  %14109 = vst [vmem:[#allocation83_spill] sm:$0xff] %v10813_v1  ;;  %v1752_v45 = vmul.f32 %v14110_v16, %v13707_v52  ;;  %v14111_v47 = vld [vmem:[#allocation84_spill] sm:$0xff]  ;;  %v1953_v34 = vmul.f32 %v14112_v36, %v13708_v6  ;;  %v14114_v14 = vld [vmem:[#allocation25_spill] sm:$0xff]  ;;  %14116 = vst [vmem:[#allocation62_spill] sm:$0xff] %v10827_v50 }
 0x399   : > { %v1952_v53 = vmul.f32 %v14111_v47, %v13708_v6  ;;  %v6787_v8 = vpack.c.bf16 %v5922_v23, %v5921_v42  ;;  %v14113_v37 = vld [vmem:[#allocation24_spill] sm:$0xff]  ;;  %v2155_v20 = vmul.f32 %v14114_v14, %v13634_v0  ;;  %v4121_v26 = vadd.f32 %v4089_v44, %v3919_v55  ;;  %v14118_v44 = vld [vmem:[#allocation27_spill] sm:$0xff]  ;;  %v10839_v55 = vld [vmem:[#allocation2 + $0x80] sm:$0xff] }
 0x39a   : > { %v2154_v60 = vmul.f32 %v14113_v37, %v13634_v0  ;;  %v4122_v15 = vadd.f32 %v4090_v32, %v3920_v63  ;;  %v10825_v35 = vld [vmem:[#allocation3 + $0x1b8] sm:$0xff]  ;;  %v2356_v47 = vmul.f32 %v14117_v39, %v13636_v61  ;;  %v4696_v42 = vmul.f32 %v13915_v33, %v10811_v41  ;;  %14119 = vst [vmem:[#allocation63_spill] sm:$0xff] %v10839_v55  ;;  %v10843_v39 = vld [vmem:[#allocation3 + $0x1d0] sm:$0xff]  ;;  %v10847_v41 = vld [vmem:[#allocation2 + $0x88] sm:$0xff] }
 0x39b   : > { %14115 = vst [vmem:[#allocation59_spill] sm:$0xff] %v10825_v35  ;;  %v1984_v16 = vadd.f32 %v1952_v53, %v1751_v12  ;;  %6789 = vmatpush3.bf16.xpose.msk.msra.mxu1 %vm9262_vm1, %v6787_v8  ;;  %v4897_v23 = vmul.f32 %v13923_v58, %v10813_v1  ;;  %v1985_v36 = vadd.f32 %v1953_v34, %v1752_v45  ;;  %v10841_v12 = vld [vmem:[#allocation3 + $0x1c8] sm:$0xff]  ;;  %14121 = vst [vmem:[#allocation68_spill] sm:$0xff] %v10843_v39  ;;  %v14122_v8 = vld [vmem:[#allocation28_spill] sm:$0xff] }
 0x39c   : > { %v2357_v32 = vmul.f32 %v14118_v44, %v13636_v61  ;;  %v4323_v63 = vadd.f32 %v4291_v18, %v4121_v26  ;;  %v4324_v53 = vadd.f32 %v4292_v9, %v4122_v15  ;;  %14120 = vst [vmem:[#allocation67_spill] sm:$0xff] %v10841_v12  ;;  %v2558_v14 = vmul.f32 %v14122_v8, %v13641_v56  ;;  %v14124_v18 = vld [vmem:[#allocation29_spill] sm:$0xff]  ;;  %v10855_v26 = vld [vmem:[#allocation2 + $0x90] sm:$0xff] }
 0x39d   : > { %v2186_v37 = vadd.f32 %v2154_v60, %v1984_v16  ;;  %14123 = vst [vmem:[#allocation22_spill] sm:$0xff] %v10847_v41  ;;  %v4898_v45 = vmul.f32 %v13923_v58, %v10825_v35  ;;  %v5099_v34 = vmul.f32 %v13928_v49, %v10827_v50  ;;  %v2187_v44 = vadd.f32 %v2155_v20, %v1985_v36  ;;  %v10857_v60 = vld [vmem:[#allocation3 + $0x1d8] sm:$0xff]  ;;  %v10859_v16 = vld [vmem:[#allocation3 + $0x1e0] sm:$0xff]  ;;  %v10877_v50 = vld [vmem:[#allocation2 + $0xa8] sm:$0xff] }
 0x39e   : > { %v2559_v9 = vmul.f32 %v14124_v18, %v13641_v56  ;;  %14125 = vst [vmem:[#allocation75_spill] sm:$0xff] %v10855_v26  ;;  %v4525_v15 = vadd.f32 %v4493_v30, %v4323_v63  ;;  %v4526_v1 = vadd.f32 %v4494_v4, %v4324_v53  ;;  %14126 = vst [vmem:[#allocation23_spill] sm:$0xff] %v10857_v60  ;;  %v10863_v35 = vld [vmem:[#allocation2 + $0x98] sm:$0xff]  ;;  %v10871_v4 = vld [vmem:[#allocation2 + $0xa0] sm:$0xff] }
 0x39f   : > { %14127 = vst [vmem:[#allocation93_spill] sm:$0xff] %v10859_v16  ;;  %v2388_v8 = vadd.f32 %v2356_v47, %v2186_v37  ;;  %v2760_v5 = vmul.f32 %v13643_v7, %v10839_v55  ;;  %14128 = vst [vmem:[#allocation111_spill] sm:$0xff] %v10863_v35  ;;  %v5100_v20 = vmul.f32 %v13928_v49, %v10841_v12  ;;  %v10873_v47 = vld [vmem:[#allocation3 + $0x1e8] sm:$0xff]  ;;  %v14155_v58 = vld [vmem:[#allocation41_spill] sm:$0xff] }
 0x3a0   : > { %v5301_v36 = vmul.f32 %v13933_v29, %v10843_v39  ;;  %v2389_v18 = vadd.f32 %v2357_v32, %v2187_v44  ;;  %v2761_v30 = vmul.f32 %v13643_v7, %v10847_v41  ;;  %14129 = vst [vmem:[#allocation109_spill] sm:$0xff] %v10871_v4  ;;  %v4727_v63 = vadd.f32 %v4695_v25, %v4525_v15  ;;  %v14150_v49 = vld [vmem:[#allocation50_spill] sm:$0xff] }
 0x3a1   : > { %v4728_v53 = vadd.f32 %v4696_v42, %v4526_v1  ;;  %14130 = vst [vmem:[#allocation96_spill] sm:$0xff] %v10873_v47  ;;  %v2590_v37 = vadd.f32 %v2558_v14, %v2388_v8  ;;  %v2962_v55 = vmul.f32 %v13645_v24, %v10855_v26  ;;  %14131 = vst [vmem:[#allocation110_spill] sm:$0xff] %v10877_v50  ;;  %v10885_v42 = vld [vmem:[#allocation3 + $0x200] sm:$0xff] }
 0x3a2   : > { %v5302_v12 = vmul.f32 %v13933_v29, %v10857_v60  ;;  %v5503_v32 = vmul.f32 %v13938_v31, %v10859_v16  ;;  %v2591_v44 = vadd.f32 %v2559_v9, %v2389_v18  ;;  %v2963_v41 = vmul.f32 %v13645_v24, %v10863_v35  ;;  %14132 = vst [vmem:[#allocation94_spill] sm:$0xff] %v10885_v42  ;;  %v14133_v60 = vld [vmem:[#allocation30_spill] sm:$0xff] }
 0x3a3   : > { %v4929_v25 = vadd.f32 %v4897_v23, %v4727_v63  ;;  %v4930_v1 = vadd.f32 %v4898_v45, %v4728_v53  ;;  %v2792_v14 = vadd.f32 %v2760_v5, %v2590_v37  ;;  %v3164_v15 = vmul.f32 %v13649_v17, %v10871_v4  ;;  %v10895_v23 = vld [vmem:[#allocation3 + $0x208] sm:$0xff]  ;;  %v14135_v63 = vld [vmem:[#allocation33_spill] sm:$0xff]  ;;  %v14136_v5 = vld [vmem:[#allocation104_spill] sm:$0xff] }
 0x3a4   : > { %v5504_v8 = vmul.f32 %v13938_v31, %v10873_v47  ;;  %v5705_v26 = vmul.f32 %v14133_v60, %v13943_v43  ;;  %v2793_v39 = vadd.f32 %v2761_v30, %v2591_v44  ;;  %v3165_v9 = vmul.f32 %v13649_v17, %v10877_v50  ;;  %14134 = vst [vmem:[#allocation113_spill] sm:$0xff] %v10895_v23  ;;  %v14137_v37 = vld [vmem:[#allocation31_spill] sm:$0xff] }
 0x3a5   : > { %v5131_v18 = vadd.f32 %v5099_v34, %v4929_v25  ;;  %v5132_v35 = vadd.f32 %v5100_v20, %v4930_v1  ;;  %v2994_v45 = vadd.f32 %v2962_v55, %v2792_v14  ;;  %v3366_v53 = vmul.f32 %v14136_v5, %v14135_v63  ;;  %v14138_v60 = vld [vmem:[#allocation35_spill] sm:$0xff]  ;;  %v14139_v20 = vld [vmem:[#allocation36_spill] sm:$0xff]  ;;  %v14140_v25 = vld [vmem:[#allocation106_spill] sm:$0xff] }
 0x3a6   : > { %v5706_v4 = vmul.f32 %v14137_v37, %v13943_v43  ;;  %v5907_v47 = vmul.f32 %v13951_v3, %v10885_v42  ;;  %v2995_v16 = vadd.f32 %v2963_v41, %v2793_v39  ;;  %v3367_v30 = vmul.f32 %v14136_v5, %v14138_v60  ;;  %v14141_v63 = vld [vmem:[#allocation37_spill] sm:$0xff]  ;;  %v14143_v43 = vld [vmem:[#allocation108_spill] sm:$0xff] }
 0x3a7   : > { %v5333_v44 = vadd.f32 %v5301_v36, %v5131_v18  ;;  %v5334_v50 = vadd.f32 %v5302_v12, %v5132_v35  ;;  %v3196_v34 = vadd.f32 %v3164_v15, %v2994_v45  ;;  %v3568_v1 = vmul.f32 %v14140_v25, %v14139_v20  ;;  %v14144_v60 = vld [vmem:[#allocation40_spill] sm:$0xff]  ;;  %v14145_v36 = vld [vmem:[#allocation42_spill] sm:$0xff]  ;;  %v14147_v45 = vld [vmem:[#allocation43_spill] sm:$0xff] }
 0x3a8   : > { %v5908_v55 = vmul.f32 %v13951_v3, %v10895_v23  ;;  %v3197_v14 = vadd.f32 %v3165_v9, %v2995_v16  ;;  %v3569_v37 = vmul.f32 %v14140_v25, %v14141_v63  ;;  %v3769_v42 = vmul.f32 %v14143_v43, %v14142_v57  ;;  %v14146_v15 = vld [vmem:[#allocation32_spill] sm:$0xff]  ;;  %v14148_v16 = vld [vmem:[#allocation49_spill] sm:$0xff]  ;;  %v14149_v9 = vld [vmem:[#allocation34_spill] sm:$0xff] }
 0x3a9   : > { %v5535_v41 = vadd.f32 %v5503_v32, %v5333_v44  ;;  %v5536_v39 = vadd.f32 %v5504_v8, %v5334_v50  ;;  %v3398_v59 = vadd.f32 %v3366_v53, %v3196_v34  ;;  %v3770_v35 = vmul.f32 %v14143_v43, %v14144_v60  ;;  %v14151_v8 = vld [vmem:[#allocation52_spill] sm:$0xff]  ;;  %v14152_v53 = vld [vmem:[#allocation38_spill] sm:$0xff] }
 0x3aa   : > { %v3399_v12 = vadd.f32 %v3367_v30, %v3197_v14  ;;  %v3970_v18 = vmul.f32 %v14146_v15, %v14145_v36  ;;  %v3971_v23 = vmul.f32 %v14146_v15, %v14147_v45  ;;  %v4172_v3 = vmul.f32 %v14149_v9, %v14148_v16  ;;  %v14153_v30 = vld [vmem:[#allocation14_spill] sm:$0xff]  ;;  %v14154_v14 = vld [vmem:[#allocation76_spill] sm:$0xff] }
 0x3ab   : > { %v5737_v28 = vadd.f32 %v5705_v26, %v5535_v41  ;;  %v5738_v31 = vadd.f32 %v5706_v4, %v5536_v39  ;;  %v3600_v29 = vadd.f32 %v3568_v1, %v3398_v59  ;;  %v4173_v50 = vmul.f32 %v14149_v9, %v14150_v49 }
 0x3ac   : > { %v3601_v32 = vadd.f32 %v3569_v37, %v3399_v12  ;;  %v4374_v44 = vmul.f32 %v14152_v53, %v14151_v8  ;;  %v4375_v34 = vmul.f32 %v14152_v53, %v14153_v30  ;;  %v4576_v33 = vmul.f32 %v14155_v58, %v14154_v14 }
 0x3ad   : > { %v5939_v10 = vadd.f32 %v5907_v47, %v5737_v28  ;;  %v5940_v54 = vadd.f32 %v5908_v55, %v5738_v31  ;;  %v3801_v19 = vadd.f32 %v3769_v42, %v3600_v29  ;;  %v1769_v26 = vmul.f32 %v14139_v20, %v13707_v52  ;;  %v14156_v55 = vld [vmem:[#allocation77_spill] sm:$0xff] }
 0x3ae   : > { %v3802_v59 = vadd.f32 %v3770_v35, %v3601_v32  ;;  %v1770_v4 = vmul.f32 %v14141_v63, %v13707_v52  ;;  %v1970_v1 = vmul.f32 %v14142_v57, %v13708_v6  ;;  %v1971_v37 = vmul.f32 %v14144_v60, %v13708_v6 }
 0x3af   : > { %v6790_v41 = vpack.c.bf16 %v5940_v54, %v5939_v10  ;;  %v4002_v39 = vadd.f32 %v3970_v18, %v3801_v19  ;;  %v2172_v28 = vmul.f32 %v14145_v36, %v13634_v0  ;;  %v2173_v29 = vmul.f32 %v14147_v45, %v13634_v0  ;;  %v14157_v36 = vld [vmem:[#allocation45_spill] sm:$0xff]  ;;  %v14158_v18 = vld [vmem:[#allocation44_spill] sm:$0xff] }
 0x3b0   : > { %v4003_v31 = vadd.f32 %v3971_v23, %v3802_v59  ;;  %v2002_v47 = vadd.f32 %v1970_v1, %v1769_v26  ;;  %v2003_v42 = vadd.f32 %v1971_v37, %v1770_v4  ;;  %v2374_v20 = vmul.f32 %v14148_v16, %v13636_v61  ;;  %v14160_v4 = vld [vmem:[#allocation47_spill] sm:$0xff] }
 0x3b1   : > { %6792 = vmatprep.subr.msk.bf16.mxu1 %vm9262_vm1, %v6790_v41  ;;  %v4204_v57 = vadd.f32 %v4172_v3, %v4002_v39  ;;  %v4577_v54 = vmul.f32 %v14155_v58, %v14156_v55  ;;  %v2375_v19 = vmul.f32 %v14150_v49, %v13636_v61  ;;  %v2576_v10 = vmul.f32 %v14151_v8, %v13641_v56  ;;  %v14159_v3 = vld [vmem:[#allocation46_spill] sm:$0xff]  ;;  %v14161_v1 = vld [vmem:[#allocation51_spill] sm:$0xff] }
 0x3b2   : > { %v4205_v63 = vadd.f32 %v4173_v50, %v4003_v31  ;;  %v2204_v23 = vadd.f32 %v2172_v28, %v2002_v47  ;;  %v2205_v60 = vadd.f32 %v2173_v29, %v2003_v42  ;;  %v2577_v35 = vmul.f32 %v14153_v30, %v13641_v56  ;;  %v14163_v31 = vld [vmem:[#allocation16_spill] sm:$0xff]  ;;  %v14164_v47 = vld [vmem:[#allocation53_spill] sm:$0xff] }
 0x3b3   : > { %v4406_v12 = vadd.f32 %v4374_v44, %v4204_v57  ;;  %v4778_v45 = vmul.f32 %v14158_v18, %v14157_v36  ;;  %v4779_v16 = vmul.f32 %v14158_v18, %v14159_v3  ;;  %v2778_v32 = vmul.f32 %v14154_v14, %v13643_v7  ;;  %v14162_v44 = vld [vmem:[#allocation48_spill] sm:$0xff] }
 0x3b4   : > { %v4407_v49 = vadd.f32 %v4375_v34, %v4205_v63  ;;  %v2406_v26 = vadd.f32 %v2374_v20, %v2204_v23  ;;  %v2407_v59 = vadd.f32 %v2375_v19, %v2205_v60  ;;  %v2779_v50 = vmul.f32 %v14156_v55, %v13643_v7  ;;  %v10975_v19 = vld [vmem:[#allocation2 + $0x160] sm:$0xff]  ;;  %v10977_v63 = vld [vmem:[#allocation2 + $0x168] sm:$0xff] }
 0x3b5   : > { %v4608_v8 = vadd.f32 %v4576_v33, %v4406_v12  ;;  %v4980_v30 = vmul.f32 %v14161_v1, %v14160_v4  ;;  %v4981_v37 = vmul.f32 %v14161_v1, %v14162_v44  ;;  %v2980_v41 = vmul.f32 %v14157_v36, %v13645_v24  ;;  %v14165_v33 = vld [vmem:[#allocation17_spill] sm:$0xff]  ;;  %14166 = vst [vmem:[#allocation95_spill] sm:$0xff] %v10975_v19  ;;  %v14169_v12 = vld [vmem:[#allocation15_spill] sm:$0xff] }
 0x3b6   : > { %v4609_v39 = vadd.f32 %v4577_v54, %v4407_v49  ;;  %v2608_v28 = vadd.f32 %v2576_v10, %v2406_v26  ;;  %v2609_v29 = vadd.f32 %v2577_v35, %v2407_v59  ;;  %v2981_v34 = vmul.f32 %v14159_v3, %v13645_v24  ;;  %14167 = vst [vmem:[#allocation97_spill] sm:$0xff] %v10977_v63  ;;  %v14168_v35 = vld [vmem:[#allocation18_spill] sm:$0xff]  ;;  %v10987_v26 = vld [vmem:[#allocation2 + $0x170] sm:$0xff]  ;;  %v10989_v59 = vld [vmem:[#allocation2 + $0x178] sm:$0xff] }
 0x3b7   : > { %v4810_v14 = vadd.f32 %v4778_v45, %v4608_v8  ;;  %v5182_v42 = vmul.f32 %v14164_v47, %v14163_v31  ;;  %v5183_v20 = vmul.f32 %v14164_v47, %v14165_v33  ;;  %v3182_v57 = vmul.f32 %v14160_v4, %v13649_v17  ;;  %v14170_v45 = vld [vmem:[#allocation19_spill] sm:$0xff]  ;;  %14171 = vst [vmem:[#allocation112_spill] sm:$0xff] %v10987_v26 }
 0x3b8   : > { %v4811_v55 = vadd.f32 %v4779_v16, %v4609_v39  ;;  %v2810_v54 = vadd.f32 %v2778_v32, %v2608_v28  ;;  %v2811_v10 = vadd.f32 %v2779_v50, %v2609_v29  ;;  %v3183_v23 = vmul.f32 %v14162_v44, %v13649_v17  ;;  %14172 = vst [vmem:[#allocation98_spill] sm:$0xff] %v10989_v59 }
 0x3b9   : > { %v5012_v60 = vadd.f32 %v4980_v30, %v4810_v14  ;;  %v5384_v36 = vmul.f32 %v14169_v12, %v14168_v35  ;;  %v5385_v3 = vmul.f32 %v14169_v12, %v14170_v45  ;;  %v3384_v49 = vmul.f32 %v14163_v31, %v14136_v5  ;;  %v14173_v30 = vld [vmem:[#allocation21_spill] sm:$0xff] }
 0x3ba   : > { %v5013_v16 = vadd.f32 %v4981_v37, %v4811_v55  ;;  %v3012_v32 = vadd.f32 %v2980_v41, %v2810_v54  ;;  %v3013_v50 = vadd.f32 %v2981_v34, %v2811_v10  ;;  %v3385_v8 = vmul.f32 %v14165_v33, %v14136_v5  ;;  %v11001_v34 = vld [vmem:[#allocation2 + $0x180] sm:$0xff]  ;;  %v11009_v10 = vld [vmem:[#allocation2 + $0x188] sm:$0xff] }
 0x3bb   : > { %v5214_v4 = vadd.f32 %v5182_v42, %v5012_v60  ;;  %v5586_v44 = vmul.f32 %v14173_v30, %v10975_v19  ;;  %v5587_v39 = vmul.f32 %v14173_v30, %v10977_v63  ;;  %v3586_v28 = vmul.f32 %v14168_v35, %v14140_v25  ;;  %14174 = vst [vmem:[#allocation114_spill] sm:$0xff] %v11001_v34  ;;  %v14175_v42 = vld [vmem:[#allocation80_spill] sm:$0xff] }
 0x3bc   : > { %v5215_v37 = vadd.f32 %v5183_v20, %v5013_v16  ;;  %v3214_v29 = vadd.f32 %v3182_v57, %v3012_v32  ;;  %v3215_v14 = vadd.f32 %v3183_v23, %v3013_v50  ;;  %v3587_v41 = vmul.f32 %v14170_v45, %v14140_v25  ;;  %14176 = vst [vmem:[#allocation103_spill] sm:$0xff] %v11009_v10  ;;  %v11013_v35 = vld [vmem:[#allocation2 + $0x190] sm:$0xff]  ;;  %v11017_v45 = vld [vmem:[#allocation2 + $0x1a0] sm:$0xff] }
 0x3bd   : > { %v5416_v31 = vadd.f32 %v5384_v36, %v5214_v4  ;;  %v5788_v33 = vmul.f32 %v14175_v42, %v10987_v26  ;;  %v5789_v55 = vmul.f32 %v14175_v42, %v10989_v59  ;;  %v3787_v54 = vmul.f32 %v10975_v19, %v14143_v43  ;;  %14177 = vst [vmem:[#allocation105_spill] sm:$0xff] %v11013_v35  ;;  %v11015_v36 = vld [vmem:[#allocation2 + $0x198] sm:$0xff] }
 0x3be   : > { %v5417_v20 = vadd.f32 %v5385_v3, %v5215_v37  ;;  %v3416_v57 = vadd.f32 %v3384_v49, %v3214_v29  ;;  %v3417_v23 = vadd.f32 %v3385_v8, %v3215_v14  ;;  %v3788_v60 = vmul.f32 %v10977_v63, %v14143_v43  ;;  %14178 = vst [vmem:[#allocation61_spill] sm:$0xff] %v11015_v36 }
 0x3bf   : > { %14179 = vst [vmem:[#allocation66_spill] sm:$0xff] %v11017_v45  ;;  %v5618_v16 = vadd.f32 %v5586_v44, %v5416_v31  ;;  %v3988_v32 = vmul.f32 %v10987_v26, %v14146_v15  ;;  %v3989_v50 = vmul.f32 %v10989_v59, %v14146_v15  ;;  %v4190_v3 = vmul.f32 %v14149_v9, %v11001_v34 }
 0x3c0   : > { %v5619_v49 = vadd.f32 %v5587_v39, %v5417_v20  ;;  %v3618_v8 = vadd.f32 %v3586_v28, %v3416_v57  ;;  %v3619_v4 = vadd.f32 %v3587_v41, %v3417_v23  ;;  %v4191_v37 = vmul.f32 %v14149_v9, %v11009_v10  ;;  %v14180_v39 = vld [vmem:[#allocation20_spill] sm:$0xff]  ;;  %v11035_v41 = vld [vmem:[#allocation2 + $0x1a8] sm:$0xff]  ;;  %v11051_v10 = vld [vmem:[#allocation2 + $0x1c0] sm:$0xff] }
 0x3c1   : > { %v5820_v29 = vadd.f32 %v5788_v33, %v5618_v16  ;;  %v4392_v14 = vmul.f32 %v14152_v53, %v11013_v35  ;;  %v4393_v44 = vmul.f32 %v14152_v53, %v11015_v36  ;;  %v4594_v31 = vmul.f32 %v14155_v58, %v11017_v45  ;;  %14181 = vst [vmem:[#allocation100_spill] sm:$0xff] %v11035_v41  ;;  %v11037_v20 = vld [vmem:[#allocation2 + $0x1b0] sm:$0xff]  ;;  %v14185_v36 = vld [vmem:[#allocation117_spill] sm:$0xff] }
 0x3c2   : > { %v5821_v59 = vadd.f32 %v5789_v55, %v5619_v49  ;;  %v3819_v26 = vadd.f32 %v3787_v54, %v3618_v8  ;;  %v3820_v63 = vadd.f32 %v3788_v60, %v3619_v4  ;;  %v1853_v28 = vmul.f32 %v14180_v39, %v13732_v38  ;;  %14182 = vst [vmem:[#allocation101_spill] sm:$0xff] %v11037_v20  ;;  %v14183_v33 = vld [vmem:[#allocation115_spill] sm:$0xff]  ;;  %v14184_v23 = vld [vmem:[#allocation116_spill] sm:$0xff]  ;;  %v14186_v55 = vld [vmem:[#allocation118_spill] sm:$0xff] }
 0x3c3   : > { %v1854_v57 = vmul.f32 %v14183_v33, %v13732_v38  ;;  %v2055_v16 = vmul.f32 %v14184_v23, %v14047_v46  ;;  %v2056_v35 = vmul.f32 %v14185_v36, %v14047_v46  ;;  %v2257_v54 = vmul.f32 %v14186_v55, %v14048_v22  ;;  %v14187_v4 = vld [vmem:[#allocation119_spill] sm:$0xff]  ;;  %v11049_v45 = vld [vmem:[#allocation2 + $0x1b8] sm:$0xff]  ;;  %14189 = vst [vmem:[#allocation107_spill] sm:$0xff] %v11051_v10 }
 0x3c4   : > { %v6739_v60 = vpack.c.bf16 %v5821_v59, %v5820_v29  ;;  %v4020_v49 = vadd.f32 %v3988_v32, %v3819_v26  ;;  %v4021_v8 = vadd.f32 %v3989_v50, %v3820_v63  ;;  %v2258_v39 = vmul.f32 %v14187_v4, %v14048_v22  ;;  %14188 = vst [vmem:[#allocation70_spill] sm:$0xff] %v11049_v45  ;;  %v14190_v23 = vld [vmem:[#allocation120_spill] sm:$0xff]  ;;  %v14191_v36 = vld [vmem:[#allocation121_spill] sm:$0xff]  ;;  %v11063_v50 = vld [vmem:[#allocation2 + $0x1c8] sm:$0xff] }
 0x3c5   : > { %v2087_v33 = vadd.f32 %v2055_v16, %v1853_v28  ;;  %v2088_v34 = vadd.f32 %v2056_v35, %v1854_v57  ;;  %v2459_v19 = vmul.f32 %v14190_v23, %v13737_v51  ;;  %v2460_v53 = vmul.f32 %v14191_v36, %v13737_v51  ;;  %14192 = vst [vmem:[#allocation72_spill] sm:$0xff] %v11063_v50  ;;  %v14193_v28 = vld [vmem:[#allocation122_spill] sm:$0xff]  ;;  %v14194_v16 = vld [vmem:[#allocation123_spill] sm:$0xff] }
 0x3c6   : > { %6741 = vmatpush3.bf16.xpose.msk.msra.mxu0 %vm9262_vm1, %v6739_v60  ;;  %v4222_v26 = vadd.f32 %v4190_v3, %v4020_v49  ;;  %v4223_v63 = vadd.f32 %v4191_v37, %v4021_v8  ;;  %v4595_v59 = vmul.f32 %v14155_v58, %v11035_v41  ;;  %v4796_v32 = vmul.f32 %v14158_v18, %v11037_v20  ;;  %v11073_v49 = vld [vmem:[#allocation2 + $0x1e0] sm:$0xff]  ;;  %v14220_v20 = vld [vmem:[#allocation79_spill] sm:$0xff] }
 0x3c7   : > { %v2289_v35 = vadd.f32 %v2257_v54, %v2087_v33  ;;  %v2290_v29 = vadd.f32 %v2258_v39, %v2088_v34  ;;  %v2661_v57 = vmul.f32 %v14193_v28, %v14055_v27  ;;  %v2662_v55 = vmul.f32 %v14194_v16, %v14055_v27  ;;  %14195 = vst [vmem:[#allocation74_spill] sm:$0xff] %v11073_v49  ;;  %v14196_v34 = vld [vmem:[#allocation124_spill] sm:$0xff]  ;;  %v14197_v39 = vld [vmem:[#allocation125_spill] sm:$0xff] }
 0x3c8   : > { %v4424_v4 = vadd.f32 %v4392_v14, %v4222_v26  ;;  %v4425_v60 = vadd.f32 %v4393_v44, %v4223_v63  ;;  %v4797_v3 = vmul.f32 %v14158_v18, %v11049_v45  ;;  %v4998_v37 = vmul.f32 %v14161_v1, %v11051_v10  ;;  %v14198_v44 = vld [vmem:[#allocation126_spill] sm:$0xff]  ;;  %v11083_v63 = vld [vmem:[#allocation3 + $0xb0] sm:$0xff]  ;;  %v11085_v16 = vld [vmem:[#allocation3 + $0xb8] sm:$0xff] }
 0x3c9   : > { %v2491_v8 = vadd.f32 %v2459_v19, %v2289_v35  ;;  %v2492_v23 = vadd.f32 %v2460_v53, %v2290_v29  ;;  %v2863_v54 = vmul.f32 %v14196_v34, %v14061_v48  ;;  %v2864_v33 = vmul.f32 %v14197_v39, %v14061_v48  ;;  %14199 = vst [vmem:[#allocation54_spill] sm:$0xff] %v11083_v63  ;;  %v11087_v19 = vld [vmem:[#allocation2 + $0x1e8] sm:$0xff]  ;;  %v14204_v39 = vld [vmem:[#allocation129_spill] sm:$0xff] }
 0x3ca   : > { %v4626_v36 = vadd.f32 %v4594_v31, %v4424_v4  ;;  %v4627_v28 = vadd.f32 %v4595_v59, %v4425_v60  ;;  %v4999_v14 = vmul.f32 %v14161_v1, %v11063_v50  ;;  %v5200_v26 = vmul.f32 %v14198_v44, %v14164_v47  ;;  %14200 = vst [vmem:[#allocation55_spill] sm:$0xff] %v11085_v16  ;;  %v14202_v29 = vld [vmem:[#allocation127_spill] sm:$0xff]  ;;  %v14203_v31 = vld [vmem:[#allocation128_spill] sm:$0xff]  ;;  %v11097_v10 = vld [vmem:[#allocation3 + $0xc0] sm:$0xff] }
 0x3cb   : > { %14201 = vst [vmem:[#allocation60_spill] sm:$0xff] %v11087_v19  ;;  %v2693_v53 = vadd.f32 %v2661_v57, %v2491_v8  ;;  %v2694_v35 = vadd.f32 %v2662_v55, %v2492_v23  ;;  %v3065_v34 = vmul.f32 %v14202_v29, %v14067_v2  ;;  %v3066_v59 = vmul.f32 %v14203_v31, %v14067_v2  ;;  %v11099_v45 = vld [vmem:[#allocation3 + $0xc8] sm:$0xff]  ;;  %v11101_v57 = vld [vmem:[#allocation2 + $0x200] sm:$0xff] }
 0x3cc   : > { %v4828_v4 = vadd.f32 %v4796_v32, %v4626_v36  ;;  %v4829_v60 = vadd.f32 %v4797_v3, %v4627_v28  ;;  %v5201_v50 = vmul.f32 %v14204_v39, %v14164_v47  ;;  %v5402_v44 = vmul.f32 %v14169_v12, %v11073_v49  ;;  %14205 = vst [vmem:[#allocation84_spill] sm:$0xff] %v11097_v10  ;;  %v14208_v29 = vld [vmem:[#allocation130_spill] sm:$0xff]  ;;  %v11111_v39 = vld [vmem:[#allocation3 + $0xd0] sm:$0xff]  ;;  %v11113_v49 = vld [vmem:[#allocation3 + $0xd8] sm:$0xff] }
 0x3cd   : > { %14206 = vst [vmem:[#allocation85_spill] sm:$0xff] %v11099_v45  ;;  %14207 = vst [vmem:[#allocation24_spill] sm:$0xff] %v11101_v57  ;;  %v2895_v55 = vadd.f32 %v2863_v54, %v2693_v53  ;;  %v2896_v8 = vadd.f32 %v2864_v33, %v2694_v35  ;;  %v3267_v23 = vmul.f32 %v14070_v40, %v11083_v63  ;;  %v11115_v54 = vld [vmem:[#allocation2 + $0x208] sm:$0xff] }
 0x3ce   : > { %v3268_v32 = vmul.f32 %v14070_v40, %v11085_v16  ;;  %v5030_v3 = vadd.f32 %v4998_v37, %v4828_v4  ;;  %v5031_v36 = vadd.f32 %v4999_v14, %v4829_v60  ;;  %v5403_v28 = vmul.f32 %v14169_v12, %v11087_v19  ;;  %14209 = vst [vmem:[#allocation25_spill] sm:$0xff] %v11111_v39  ;;  %v11121_v14 = vld [vmem:[#allocation3 + $0xe0] sm:$0xff]  ;;  %v11127_v63 = vld [vmem:[#allocation3 + $0xe8] sm:$0xff] }
 0x3cf   : > { %v5604_v31 = vmul.f32 %v14208_v29, %v14173_v30  ;;  %14210 = vst [vmem:[#allocation26_spill] sm:$0xff] %v11113_v49  ;;  %14211 = vst [vmem:[#allocation27_spill] sm:$0xff] %v11115_v54  ;;  %v3097_v33 = vadd.f32 %v3065_v34, %v2895_v55  ;;  %v3098_v53 = vadd.f32 %v3066_v59, %v2896_v8  ;;  %v14213_v29 = vld [vmem:[#allocation131_spill] sm:$0xff] }
 0x3d0   : > { %v3469_v35 = vmul.f32 %v13759_v21, %v11097_v10  ;;  %v3470_v37 = vmul.f32 %v13759_v21, %v11099_v45  ;;  %14212 = vst [vmem:[#allocation28_spill] sm:$0xff] %v11121_v14  ;;  %v5232_v4 = vadd.f32 %v5200_v26, %v5030_v3  ;;  %v5233_v60 = vadd.f32 %v5201_v50, %v5031_v36  ;;  %v11129_v34 = vld [vmem:[#allocation3 + $0xf0] sm:$0xff]  ;;  %v11135_v26 = vld [vmem:[#allocation3 + $0xf8] sm:$0xff]  ;;  %v11137_v50 = vld [vmem:[#allocation3 + $0x100] sm:$0xff] }
 0x3d1   : > { %v5605_v19 = vmul.f32 %v14213_v29, %v14173_v30  ;;  %v5806_v16 = vmul.f32 %v14175_v42, %v11101_v57  ;;  %14214 = vst [vmem:[#allocation29_spill] sm:$0xff] %v11127_v63  ;;  %14215 = vst [vmem:[#allocation30_spill] sm:$0xff] %v11129_v34  ;;  %v3299_v59 = vadd.f32 %v3267_v23, %v3097_v33  ;;  %v11143_v23 = vld [vmem:[#allocation3 + $0x108] sm:$0xff] }
 0x3d2   : > { %v3300_v55 = vadd.f32 %v3268_v32, %v3098_v53  ;;  %v3671_v8 = vmul.f32 %v13763_v13, %v11111_v39  ;;  %v3672_v45 = vmul.f32 %v13763_v13, %v11113_v49  ;;  %14216 = vst [vmem:[#allocation33_spill] sm:$0xff] %v11135_v26  ;;  %14217 = vst [vmem:[#allocation31_spill] sm:$0xff] %v11137_v50  ;;  %v11145_v32 = vld [vmem:[#allocation3 + $0x110] sm:$0xff] }
 0x3d3   : > { %v5434_v3 = vadd.f32 %v5402_v44, %v5232_v4  ;;  %v5435_v36 = vadd.f32 %v5403_v28, %v5233_v60  ;;  %v5807_v29 = vmul.f32 %v14175_v42, %v11115_v54  ;;  %v3871_v57 = vmul.f32 %v13768_v62, %v11121_v14  ;;  %14218 = vst [vmem:[#allocation35_spill] sm:$0xff] %v11143_v23  ;;  %v11151_v44 = vld [vmem:[#allocation3 + $0x118] sm:$0xff]  ;;  %v11153_v28 = vld [vmem:[#allocation3 + $0x120] sm:$0xff] }
 0x3d4   : > { %14219 = vst [vmem:[#allocation36_spill] sm:$0xff] %v11145_v32  ;;  %v3501_v33 = vadd.f32 %v3469_v35, %v3299_v59  ;;  %v3502_v53 = vadd.f32 %v3470_v37, %v3300_v55  ;;  %v3872_v10 = vmul.f32 %v13768_v62, %v11127_v63  ;;  %v4073_v41 = vmul.f32 %v14220_v20, %v11129_v34  ;;  %v14223_v42 = vld [vmem:[#allocation81_spill] sm:$0xff]  ;;  %v14224_v55 = vld [vmem:[#allocation82_spill] sm:$0xff] }
 0x3d5   : > { %14221 = vst [vmem:[#allocation37_spill] sm:$0xff] %v11151_v44  ;;  %14222 = vst [vmem:[#allocation39_spill] sm:$0xff] %v11153_v28  ;;  %v5636_v4 = vadd.f32 %v5604_v31, %v5434_v3  ;;  %v5637_v60 = vadd.f32 %v5605_v19, %v5435_v36  ;;  %v4074_v54 = vmul.f32 %v14220_v20, %v11135_v26  ;;  %v11165_v19 = vld [vmem:[#allocation3 + $0x128] sm:$0xff] }
 0x3d6   : > { %v4275_v30 = vmul.f32 %v14223_v42, %v11137_v50  ;;  %v3703_v35 = vadd.f32 %v3671_v8, %v3501_v33  ;;  %v3704_v37 = vadd.f32 %v3672_v45, %v3502_v53  ;;  %v4276_v59 = vmul.f32 %v14223_v42, %v11143_v23  ;;  %14225 = vst [vmem:[#allocation40_spill] sm:$0xff] %v11165_v19  ;;  %v14226_v3 = vld [vmem:[#allocation86_spill] sm:$0xff]  ;;  %v11173_v53 = vld [vmem:[#allocation3 + $0x130] sm:$0xff] }
 0x3d7   : > { %v4477_v12 = vmul.f32 %v14224_v55, %v11145_v32  ;;  %v5838_v47 = vadd.f32 %v5806_v16, %v5636_v4  ;;  %v5839_v1 = vadd.f32 %v5807_v29, %v5637_v60  ;;  %v4478_v31 = vmul.f32 %v14224_v55, %v11151_v44  ;;  %14227 = vst [vmem:[#allocation42_spill] sm:$0xff] %v11173_v53  ;;  %v11175_v16 = vld [vmem:[#allocation3 + $0x138] sm:$0xff] }
 0x3d8   : > { %v4679_v36 = vmul.f32 %v14226_v3, %v11153_v28  ;;  %v3903_v18 = vadd.f32 %v3871_v57, %v3703_v35  ;;  %v3904_v58 = vadd.f32 %v3872_v10, %v3704_v37  ;;  %v1871_v45 = vmul.f32 %v11111_v39, %v13732_v38  ;;  %14228 = vst [vmem:[#allocation43_spill] sm:$0xff] %v11175_v16  ;;  %v11191_v37 = vld [vmem:[#allocation3 + $0x148] sm:$0xff]  ;;  %v11203_v39 = vld [vmem:[#allocation3 + $0x158] sm:$0xff] }
 0x3d9   : > { %v1872_v8 = vmul.f32 %v11113_v49, %v13732_v38  ;;  %v6742_v33 = vpack.c.bf16 %v5839_v1, %v5838_v47  ;;  %v2073_v29 = vmul.f32 %v11121_v14, %v14047_v46  ;;  %v2074_v4 = vmul.f32 %v11127_v63, %v14047_v46  ;;  %v11189_v47 = vld [vmem:[#allocation3 + $0x140] sm:$0xff]  ;;  %14230 = vst [vmem:[#allocation50_spill] sm:$0xff] %v11191_v37  ;;  %v11201_v49 = vld [vmem:[#allocation3 + $0x150] sm:$0xff] }
 0x3da   : > { %v2275_v10 = vmul.f32 %v11129_v34, %v14048_v22  ;;  %v4105_v57 = vadd.f32 %v4073_v41, %v3903_v18  ;;  %v4106_v60 = vadd.f32 %v4074_v54, %v3904_v58  ;;  %v4680_v35 = vmul.f32 %v14226_v3, %v11165_v19  ;;  %14229 = vst [vmem:[#allocation49_spill] sm:$0xff] %v11189_v47  ;;  %v14231_v54 = vld [vmem:[#allocation87_spill] sm:$0xff] }
 0x3db   : > { %v2276_v1 = vmul.f32 %v11135_v26, %v14048_v22  ;;  %6744 = vmatprep.subr.msk.bf16.mxu0 %vm9262_vm1, %v6742_v33  ;;  %v2105_v14 = vadd.f32 %v2073_v29, %v1871_v45  ;;  %v2106_v63 = vadd.f32 %v2074_v4, %v1872_v8  ;;  %v2477_v34 = vmul.f32 %v11137_v50, %v13737_v51 }
 0x3dc   : > { %v2478_v58 = vmul.f32 %v11143_v23, %v13737_v51  ;;  %v4307_v18 = vadd.f32 %v4275_v30, %v4105_v57  ;;  %v4308_v41 = vadd.f32 %v4276_v59, %v4106_v60  ;;  %v4881_v26 = vmul.f32 %v14231_v54, %v11173_v53  ;;  %14232 = vst [vmem:[#allocation52_spill] sm:$0xff] %v11201_v49  ;;  %v14234_v57 = vld [vmem:[#allocation88_spill] sm:$0xff] }
 0x3dd   : > { %v4882_v33 = vmul.f32 %v14231_v54, %v11175_v16  ;;  %14233 = vst [vmem:[#allocation14_spill] sm:$0xff] %v11203_v39  ;;  %v2307_v45 = vadd.f32 %v2275_v10, %v2105_v14  ;;  %v2308_v8 = vadd.f32 %v2276_v1, %v2106_v63  ;;  %v2679_v29 = vmul.f32 %v11145_v32, %v14055_v27 }
 0x3de   : > { %v2680_v4 = vmul.f32 %v11151_v44, %v14055_v27  ;;  %v4509_v30 = vadd.f32 %v4477_v12, %v4307_v18  ;;  %v4510_v59 = vadd.f32 %v4478_v31, %v4308_v41  ;;  %v5083_v60 = vmul.f32 %v14234_v57, %v11189_v47  ;;  %v14235_v44 = vld [vmem:[#allocation89_spill] sm:$0xff] }
 0x3df   : > { %v5084_v23 = vmul.f32 %v14234_v57, %v11191_v37  ;;  %v2509_v50 = vadd.f32 %v2477_v34, %v2307_v45  ;;  %v2510_v51 = vadd.f32 %v2478_v58, %v2308_v8  ;;  %v2881_v14 = vmul.f32 %v11153_v28, %v14061_v48  ;;  %v14236_v28 = vld [vmem:[#allocation90_spill] sm:$0xff] }
 0x3e0   : > { %v2882_v63 = vmul.f32 %v11165_v19, %v14061_v48  ;;  %v4711_v10 = vadd.f32 %v4679_v36, %v4509_v30  ;;  %v4712_v1 = vadd.f32 %v4680_v35, %v4510_v59  ;;  %v5285_v12 = vmul.f32 %v14235_v44, %v11201_v49  ;;  %v14237_v19 = vld [vmem:[#allocation132_spill] sm:$0xff]  ;;  %v14238_v35 = vld [vmem:[#allocation133_spill] sm:$0xff] }
 0x3e1   : > { %v5286_v31 = vmul.f32 %v14235_v44, %v11203_v39  ;;  %v2711_v18 = vadd.f32 %v2679_v29, %v2509_v50  ;;  %v2712_v41 = vadd.f32 %v2680_v4, %v2510_v51  ;;  %v3083_v34 = vmul.f32 %v11173_v53, %v14067_v2  ;;  %v14239_v53 = vld [vmem:[#allocation91_spill] sm:$0xff] }
 0x3e2   : > { %v3084_v58 = vmul.f32 %v11175_v16, %v14067_v2  ;;  %v4913_v45 = vadd.f32 %v4881_v26, %v4711_v10  ;;  %v4914_v8 = vadd.f32 %v4882_v33, %v4712_v1  ;;  %v5487_v36 = vmul.f32 %v14237_v19, %v14236_v28  ;;  %v14240_v16 = vld [vmem:[#allocation134_spill] sm:$0xff]  ;;  %v14241_v33 = vld [vmem:[#allocation135_spill] sm:$0xff] }
 0x3e3   : > { %v5488_v30 = vmul.f32 %v14238_v35, %v14236_v28  ;;  %v2913_v59 = vadd.f32 %v2881_v14, %v2711_v18  ;;  %v2914_v32 = vadd.f32 %v2882_v63, %v2712_v41  ;;  %v3285_v50 = vmul.f32 %v11189_v47, %v14070_v40  ;;  %v11237_v19 = vld [vmem:[#allocation3 + $0x160] sm:$0xff]  ;;  %v11239_v1 = vld [vmem:[#allocation3 + $0x168] sm:$0xff]  ;;  %v14247_v35 = vld [vmem:[#allocation92_spill] sm:$0xff] }
 0x3e4   : > { %v3286_v51 = vmul.f32 %v11191_v37, %v14070_v40  ;;  %v5115_v29 = vadd.f32 %v5083_v60, %v4913_v45  ;;  %v5116_v4 = vadd.f32 %v5084_v23, %v4914_v8  ;;  %v5689_v26 = vmul.f32 %v14240_v16, %v14239_v53  ;;  %14242 = vst [vmem:[#allocation76_spill] sm:$0xff] %v11237_v19  ;;  %v11245_v60 = vld [vmem:[#allocation3 + $0x170] sm:$0xff]  ;;  %v11247_v23 = vld [vmem:[#allocation3 + $0x178] sm:$0xff] }
 0x3e5   : > { %v5690_v10 = vmul.f32 %v14241_v33, %v14239_v53  ;;  %14243 = vst [vmem:[#allocation77_spill] sm:$0xff] %v11239_v1  ;;  %v3115_v14 = vadd.f32 %v3083_v34, %v2913_v59  ;;  %v3116_v63 = vadd.f32 %v3084_v58, %v2914_v32  ;;  %v3487_v18 = vmul.f32 %v11201_v49, %v13759_v21  ;;  %v14246_v8 = vld [vmem:[#allocation136_spill] sm:$0xff]  ;;  %v14248_v37 = vld [vmem:[#allocation137_spill] sm:$0xff] }
 0x3e6   : > { %v3488_v41 = vmul.f32 %v11203_v39, %v13759_v21  ;;  %14244 = vst [vmem:[#allocation45_spill] sm:$0xff] %v11245_v60  ;;  %14245 = vst [vmem:[#allocation46_spill] sm:$0xff] %v11247_v23  ;;  %v5317_v16 = vadd.f32 %v5285_v12, %v5115_v29  ;;  %v5318_v45 = vadd.f32 %v5286_v31, %v5116_v4 }
 0x3e7   : > { %v5891_v33 = vmul.f32 %v14247_v35, %v14246_v8  ;;  %v5892_v47 = vmul.f32 %v14247_v35, %v14248_v37  ;;  %v3317_v34 = vadd.f32 %v3285_v50, %v3115_v14  ;;  %v3318_v32 = vadd.f32 %v3286_v51, %v3116_v63  ;;  %v1717_v14 = vld [vmem:[#allocation2 + $0x40] sm:$0xff] }
 0x3e8   : > { %v3689_v58 = vmul.f32 %v13763_v13, %v11237_v19  ;;  %v3690_v59 = vmul.f32 %v13763_v13, %v11239_v1  ;;  %v5519_v39 = vadd.f32 %v5487_v36, %v5317_v16  ;;  %v5520_v49 = vadd.f32 %v5488_v30, %v5318_v45  ;;  %v14249_v36 = vld [vmem:[#allocation138_spill] sm:$0xff]  ;;  %v14250_v16 = vld [vmem:[#allocation139_spill] sm:$0xff] }
 0x3e9   : > { %v3889_v12 = vmul.f32 %v13768_v62, %v11245_v60  ;;  %v3890_v31 = vmul.f32 %v13768_v62, %v11247_v23  ;;  %v3519_v29 = vadd.f32 %v3487_v18, %v3317_v34  ;;  %v3520_v4 = vadd.f32 %v3488_v41, %v3318_v32  ;;  %v1718_v60 = vld [vmem:[#allocation2 + $0x48] sm:$0xff]  ;;  %v11269_v1 = vld [vmem:[#allocation2 + $0x50] sm:$0xff]  ;;  %v11275_v23 = vld [vmem:[#allocation2 + $0x58] sm:$0xff] }
 0x3ea   : > { %v4091_v50 = vmul.f32 %v14246_v8, %v14220_v20  ;;  %v4092_v51 = vmul.f32 %v14248_v37, %v14220_v20  ;;  %v5721_v63 = vadd.f32 %v5689_v26, %v5519_v39  ;;  %v5722_v19 = vadd.f32 %v5690_v10, %v5520_v49  ;;  %14251 = vst [vmem:[#allocation47_spill] sm:$0xff] %v11269_v1  ;;  %v14252_v34 = vld [vmem:[#allocation58_spill] sm:$0xff]  ;;  %v14253_v32 = vld [vmem:[#allocation140_spill] sm:$0xff] }
 0x3eb   : > { %v4293_v30 = vmul.f32 %v14249_v36, %v14223_v42  ;;  %v4294_v45 = vmul.f32 %v14250_v16, %v14223_v42  ;;  %v3721_v18 = vadd.f32 %v3689_v58, %v3519_v29  ;;  %v3722_v41 = vadd.f32 %v3690_v59, %v3520_v4  ;;  %14254 = vst [vmem:[#allocation48_spill] sm:$0xff] %v11275_v23  ;;  %v11277_v49 = vld [vmem:[#allocation2 + $0x60] sm:$0xff]  ;;  %v11279_v39 = vld [vmem:[#allocation2 + $0x68] sm:$0xff]  ;;  %v11284_v59 = vld [vmem:[#allocation2 + $0x70] sm:$0xff] }
 0x3ec   : > { %v4495_v8 = vmul.f32 %v14252_v34, %v14224_v55  ;;  %v4496_v37 = vmul.f32 %v14253_v32, %v14224_v55  ;;  %14255 = vst [vmem:[#allocation16_spill] sm:$0xff] %v11277_v49  ;;  %14256 = vst [vmem:[#allocation17_spill] sm:$0xff] %v11279_v39  ;;  %v5923_v26 = vadd.f32 %v5891_v33, %v5721_v63  ;;  %v14257_v36 = vld [vmem:[#allocation83_spill] sm:$0xff]  ;;  %v11289_v55 = vld [vmem:[#allocation2 + $0x78] sm:$0xff] }
 0x3ed   : > { %v5924_v10 = vadd.f32 %v5892_v47, %v5722_v19  ;;  %v4697_v16 = vmul.f32 %v14257_v36, %v14226_v3  ;;  %v1753_v58 = vmul.f32 %v13707_v52, %v1717_v14  ;;  %14258 = vst [vmem:[#allocation18_spill] sm:$0xff] %v11284_v59  ;;  %v3921_v29 = vadd.f32 %v3889_v12, %v3721_v18  ;;  %v14260_v63 = vld [vmem:[#allocation59_spill] sm:$0xff] }
 0x3ee   : > { %v3922_v4 = vadd.f32 %v3890_v31, %v3722_v41  ;;  %v1754_v34 = vmul.f32 %v13707_v52, %v1718_v60  ;;  %v1954_v32 = vmul.f32 %v13708_v6, %v11269_v1  ;;  %14259 = vst [vmem:[#allocation19_spill] sm:$0xff] %v11289_v55  ;;  %v1955_v47 = vmul.f32 %v13708_v6, %v11275_v23  ;;  %v14261_v41 = vld [vmem:[#allocation62_spill] sm:$0xff]  ;;  %v11315_v23 = vld [vmem:[#allocation3 + $0x1f0] sm:$0xff]  ;;  %v11391_v1 = vld [vmem:[#allocation2 + $0x118] sm:$0xff] }
 0x3ef   : > { %v6793_v42 = vpack.c.bf16 %v5924_v10, %v5923_v26  ;;  %v2156_v19 = vmul.f32 %v13634_v0, %v11277_v49  ;;  %v2157_v33 = vmul.f32 %v13634_v0, %v11279_v39  ;;  %v4123_v14 = vadd.f32 %v4091_v50, %v3921_v29  ;;  %v14265_v49 = vld [vmem:[#allocation22_spill] sm:$0xff]  ;;  %14266 = vst [vmem:[#allocation20_spill] sm:$0xff] %v11315_v23 }
 0x3f0   : > { %v4124_v12 = vadd.f32 %v4092_v51, %v3922_v4  ;;  %v1986_v31 = vadd.f32 %v1954_v32, %v1753_v58  ;;  %v2358_v60 = vmul.f32 %v13636_v61, %v11284_v59  ;;  %v4698_v18 = vmul.f32 %v14260_v63, %v14226_v3  ;;  %v14262_v58 = vld [vmem:[#allocation63_spill] sm:$0xff]  ;;  %14291 = vst [vmem:[#allocation130_spill] sm:$0xff] %v11391_v1 }
 0x3f1   : > { %6795 = vmatpush3.bf16.xpose.msk.msra.mxu1 %vm9262_vm1, %v6793_v42  ;;  %v4899_v26 = vmul.f32 %v14261_v41, %v14231_v54  ;;  %v1987_v10 = vadd.f32 %v1955_v47, %v1754_v34  ;;  %v2359_v36 = vmul.f32 %v13636_v61, %v11289_v55  ;;  %v4325_v39 = vadd.f32 %v4293_v30, %v4123_v14  ;;  %v14263_v4 = vld [vmem:[#allocation67_spill] sm:$0xff]  ;;  %v14264_v42 = vld [vmem:[#allocation68_spill] sm:$0xff] }
 0x3f2   : > { %v4326_v50 = vadd.f32 %v4294_v45, %v4124_v12  ;;  %v2188_v51 = vadd.f32 %v2156_v19, %v1986_v31  ;;  %v2560_v29 = vmul.f32 %v14262_v58, %v13641_v56  ;;  %v4900_v32 = vmul.f32 %v14263_v4, %v14231_v54  ;;  %v14267_v45 = vld [vmem:[#allocation75_spill] sm:$0xff]  ;;  %v14269_v31 = vld [vmem:[#allocation93_spill] sm:$0xff] }
 0x3f3   : > { %v5101_v59 = vmul.f32 %v14264_v42, %v14234_v57  ;;  %v2189_v63 = vadd.f32 %v2157_v33, %v1987_v10  ;;  %v2561_v41 = vmul.f32 %v14265_v49, %v13641_v56  ;;  %v4527_v34 = vadd.f32 %v4495_v8, %v4325_v39  ;;  %v14268_v14 = vld [vmem:[#allocation23_spill] sm:$0xff]  ;;  %v11327_v49 = vld [vmem:[#allocation3 + $0x1f8] sm:$0xff] }
 0x3f4   : > { %v4528_v47 = vadd.f32 %v4496_v37, %v4326_v50  ;;  %v2390_v30 = vadd.f32 %v2358_v60, %v2188_v51  ;;  %v2762_v19 = vmul.f32 %v14267_v45, %v13643_v7  ;;  %v5102_v12 = vmul.f32 %v14268_v14, %v14234_v57  ;;  %v14270_v33 = vld [vmem:[#allocation111_spill] sm:$0xff]  ;;  %14272 = vst [vmem:[#allocation116_spill] sm:$0xff] %v11327_v49  ;;  %v14273_v60 = vld [vmem:[#allocation109_spill] sm:$0xff]  ;;  %v14275_v45 = vld [vmem:[#allocation96_spill] sm:$0xff] }
 0x3f5   : > { %v5303_v58 = vmul.f32 %v14269_v31, %v14235_v44  ;;  %v2391_v4 = vadd.f32 %v2359_v36, %v2189_v63  ;;  %v2763_v10 = vmul.f32 %v14270_v33, %v13643_v7  ;;  %v11325_v42 = vld [vmem:[#allocation2 + $0xb0] sm:$0xff]  ;;  %v4729_v8 = vadd.f32 %v4697_v16, %v4527_v34  ;;  %v11331_v51 = vld [vmem:[#allocation2 + $0xb8] sm:$0xff]  ;;  %v14276_v31 = vld [vmem:[#allocation110_spill] sm:$0xff] }
 0x3f6   : > { %14271 = vst [vmem:[#allocation115_spill] sm:$0xff] %v11325_v42  ;;  %v4730_v37 = vadd.f32 %v4698_v18, %v4528_v47  ;;  %v2592_v39 = vadd.f32 %v2560_v29, %v2390_v30  ;;  %v2964_v50 = vmul.f32 %v14273_v60, %v13645_v24  ;;  %14274 = vst [vmem:[#allocation117_spill] sm:$0xff] %v11331_v51  ;;  %v11339_v16 = vld [vmem:[#allocation2 + $0xc0] sm:$0xff]  ;;  %v11341_v29 = vld [vmem:[#allocation3 + $0x210] sm:$0xff] }
 0x3f7   : > { %v5304_v14 = vmul.f32 %v14275_v45, %v14235_v44  ;;  %v5505_v36 = vmul.f32 %v14236_v28, %v11315_v23  ;;  %v2593_v63 = vadd.f32 %v2561_v41, %v2391_v4  ;;  %v2965_v33 = vmul.f32 %v14276_v31, %v13645_v24  ;;  %14277 = vst [vmem:[#allocation118_spill] sm:$0xff] %v11339_v16  ;;  %v11345_v60 = vld [vmem:[#allocation2 + $0xc8] sm:$0xff]  ;;  %v11375_v55 = vld [vmem:[#allocation2 + $0xf8] sm:$0xff] }
 0x3f8   : > { %v4931_v18 = vadd.f32 %v4899_v26, %v4729_v8  ;;  %v4932_v34 = vadd.f32 %v4900_v32, %v4730_v37  ;;  %14278 = vst [vmem:[#allocation119_spill] sm:$0xff] %v11341_v29  ;;  %v2794_v47 = vadd.f32 %v2762_v19, %v2592_v39  ;;  %v3166_v30 = vmul.f32 %v13649_v17, %v11325_v42  ;;  %v14280_v41 = vld [vmem:[#allocation94_spill] sm:$0xff]  ;;  %v11353_v26 = vld [vmem:[#allocation2 + $0xd0] sm:$0xff]  ;;  %v11355_v19 = vld [vmem:[#allocation3 + $0x218] sm:$0xff] }
 0x3f9   : > { %14279 = vst [vmem:[#allocation120_spill] sm:$0xff] %v11345_v60  ;;  %v5506_v45 = vmul.f32 %v14236_v28, %v11327_v49  ;;  %v5707_v4 = vmul.f32 %v14280_v41, %v14239_v53  ;;  %v2795_v23 = vadd.f32 %v2763_v10, %v2593_v63  ;;  %v3167_v31 = vmul.f32 %v13649_v17, %v11331_v51  ;;  %v11359_v42 = vld [vmem:[#allocation2 + $0xd8] sm:$0xff]  ;;  %v11361_v49 = vld [vmem:[#allocation2 + $0xe0] sm:$0xff] }
 0x3fa   : > { %v5133_v32 = vadd.f32 %v5101_v59, %v4931_v18  ;;  %v5134_v8 = vadd.f32 %v5102_v12, %v4932_v34  ;;  %14281 = vst [vmem:[#allocation121_spill] sm:$0xff] %v11355_v19  ;;  %v2996_v37 = vadd.f32 %v2964_v50, %v2794_v47  ;;  %v3368_v39 = vmul.f32 %v14136_v5, %v11339_v16  ;;  %v14284_v41 = vld [vmem:[#allocation113_spill] sm:$0xff]  ;;  %v11369_v12 = vld [vmem:[#allocation2 + $0xe8] sm:$0xff]  ;;  %v11373_v16 = vld [vmem:[#allocation2 + $0xf0] sm:$0xff] }
 0x3fb   : > { %14282 = vst [vmem:[#allocation122_spill] sm:$0xff] %v11359_v42  ;;  %14283 = vst [vmem:[#allocation123_spill] sm:$0xff] %v11361_v49  ;;  %v5708_v10 = vmul.f32 %v14284_v41, %v14239_v53  ;;  %v5909_v63 = vmul.f32 %v14247_v35, %v11341_v29  ;;  %v2997_v51 = vadd.f32 %v2965_v33, %v2795_v23  ;;  %v11377_v41 = vld [vmem:[#allocation2 + $0x100] sm:$0xff]  ;;  %v11389_v29 = vld [vmem:[#allocation2 + $0x110] sm:$0xff] }
 0x3fc   : > { %v3369_v59 = vmul.f32 %v14136_v5, %v11345_v60  ;;  %14285 = vst [vmem:[#allocation124_spill] sm:$0xff] %v11369_v12  ;;  %v5335_v50 = vadd.f32 %v5303_v58, %v5133_v32  ;;  %v5336_v18 = vadd.f32 %v5304_v14, %v5134_v8  ;;  %v3198_v34 = vadd.f32 %v3166_v30, %v2996_v37  ;;  %v11385_v14 = vld [vmem:[#allocation2 + $0x108] sm:$0xff] }
 0x3fd   : > { %v3570_v47 = vmul.f32 %v14140_v25, %v11353_v26  ;;  %14286 = vst [vmem:[#allocation125_spill] sm:$0xff] %v11373_v16  ;;  %14287 = vst [vmem:[#allocation126_spill] sm:$0xff] %v11375_v55  ;;  %v5910_v23 = vmul.f32 %v14247_v35, %v11355_v19  ;;  %v3199_v33 = vadd.f32 %v3167_v31, %v2997_v51  ;;  %v11393_v19 = vld [vmem:[#allocation2 + $0x120] sm:$0xff] }
 0x3fe   : > { %14288 = vst [vmem:[#allocation127_spill] sm:$0xff] %v11377_v41  ;;  %v3571_v60 = vmul.f32 %v14140_v25, %v11359_v42  ;;  %v3771_v58 = vmul.f32 %v14143_v43, %v11361_v49  ;;  %14289 = vst [vmem:[#allocation128_spill] sm:$0xff] %v11385_v14  ;;  %v5537_v30 = vadd.f32 %v5505_v36, %v5335_v50  ;;  %v14293_v53 = vld [vmem:[#allocation38_spill] sm:$0xff] }
 0x3ff   : > { %v5538_v32 = vadd.f32 %v5506_v45, %v5336_v18  ;;  %v3400_v8 = vadd.f32 %v3368_v39, %v3198_v34  ;;  %v3772_v37 = vmul.f32 %v14143_v43, %v11369_v12  ;;  %14290 = vst [vmem:[#allocation129_spill] sm:$0xff] %v11389_v29  ;;  %14292 = vst [vmem:[#allocation131_spill] sm:$0xff] %v11393_v19 }
 0x400   : > { %v3401_v51 = vadd.f32 %v3369_v59, %v3199_v33  ;;  %v3972_v31 = vmul.f32 %v14146_v15, %v11373_v16  ;;  %v3973_v35 = vmul.f32 %v14146_v15, %v11375_v55  ;;  %v4174_v36 = vmul.f32 %v14149_v9, %v11377_v41  ;;  %v14294_v33 = vld [vmem:[#allocation41_spill] sm:$0xff] }
 0x401   : > { %v5739_v45 = vadd.f32 %v5707_v4, %v5537_v30  ;;  %v5740_v39 = vadd.f32 %v5708_v10, %v5538_v32  ;;  %v3602_v50 = vadd.f32 %v3570_v47, %v3400_v8  ;;  %v4175_v18 = vmul.f32 %v14149_v9, %v11385_v14  ;;  %v11411_v47 = vld [vmem:[#allocation2 + $0x128] sm:$0xff] }
 0x402   : > { %v3603_v34 = vadd.f32 %v3571_v60, %v3401_v51  ;;  %v4376_v28 = vmul.f32 %v14293_v53, %v11389_v29  ;;  %v4377_v59 = vmul.f32 %v14293_v53, %v11391_v1  ;;  %v4578_v44 = vmul.f32 %v14294_v33, %v11393_v19  ;;  %14295 = vst [vmem:[#allocation132_spill] sm:$0xff] %v11411_v47 }
 0x403   : > { %v5941_v57 = vadd.f32 %v5909_v63, %v5739_v45  ;;  %v5942_v54 = vadd.f32 %v5910_v23, %v5740_v39  ;;  %v3803_v3 = vadd.f32 %v3771_v58, %v3602_v50  ;;  %v1771_v4 = vmul.f32 %v11353_v26, %v13707_v52  ;;  %v11425_v45 = vld [vmem:[#allocation2 + $0x138] sm:$0xff] }
 0x404   : > { %v3804_v10 = vadd.f32 %v3772_v37, %v3603_v34  ;;  %v1772_v60 = vmul.f32 %v11359_v42, %v13707_v52  ;;  %v1972_v30 = vmul.f32 %v11361_v49, %v13708_v6  ;;  %v1973_v32 = vmul.f32 %v11369_v12, %v13708_v6  ;;  %v11423_v37 = vld [vmem:[#allocation2 + $0x130] sm:$0xff]  ;;  %14297 = vst [vmem:[#allocation134_spill] sm:$0xff] %v11425_v45 }
 0x405   : > { %v6796_v8 = vpack.c.bf16 %v5942_v54, %v5941_v57  ;;  %v4004_v51 = vadd.f32 %v3972_v31, %v3803_v3  ;;  %v2174_v63 = vmul.f32 %v11373_v16, %v13634_v0  ;;  %v2175_v23 = vmul.f32 %v11375_v55, %v13634_v0  ;;  %14296 = vst [vmem:[#allocation133_spill] sm:$0xff] %v11423_v37 }
 0x406   : > { %v4005_v58 = vadd.f32 %v3973_v35, %v3804_v10  ;;  %v2004_v39 = vadd.f32 %v1972_v30, %v1771_v4  ;;  %v2005_v50 = vadd.f32 %v1973_v32, %v1772_v60  ;;  %v2376_v34 = vmul.f32 %v11377_v41, %v13636_v61  ;;  %v11437_v10 = vld [vmem:[#allocation2 + $0x140] sm:$0xff]  ;;  %v11439_v4 = vld [vmem:[#allocation2 + $0x148] sm:$0xff]  ;;  %v11451_v41 = vld [vmem:[#allocation2 + $0x158] sm:$0xff] }
 0x407   : > { %6798 = vmatprep.subr.msk.bf16.mxu1 %vm9262_vm1, %v6796_v8  ;;  %v4206_v3 = vadd.f32 %v4174_v36, %v4004_v51  ;;  %v4579_v54 = vmul.f32 %v14294_v33, %v11411_v47  ;;  %v2377_v57 = vmul.f32 %v11385_v14, %v13636_v61  ;;  %v2578_v35 = vmul.f32 %v11389_v29, %v13641_v56  ;;  %v14300_v8 = vld [vmem:[#allocation44_spill] sm:$0xff] }
 0x408   : > { %v4207_v31 = vadd.f32 %v4175_v18, %v4005_v58  ;;  %14298 = vst [vmem:[#allocation135_spill] sm:$0xff] %v11437_v10  ;;  %14299 = vst [vmem:[#allocation136_spill] sm:$0xff] %v11439_v4  ;;  %v2206_v60 = vadd.f32 %v2174_v63, %v2004_v39  ;;  %v2207_v30 = vadd.f32 %v2175_v23, %v2005_v50  ;;  %v11449_v58 = vld [vmem:[#allocation2 + $0x150] sm:$0xff] }
 0x409   : > { %v2579_v32 = vmul.f32 %v11391_v1, %v13641_v56  ;;  %v4408_v36 = vadd.f32 %v4376_v28, %v4206_v3  ;;  %v4780_v51 = vmul.f32 %v14300_v8, %v11423_v37  ;;  %v4781_v14 = vmul.f32 %v14300_v8, %v11425_v45  ;;  %14301 = vst [vmem:[#allocation137_spill] sm:$0xff] %v11449_v58  ;;  %v14303_v50 = vld [vmem:[#allocation51_spill] sm:$0xff] }
 0x40a   : > { %v2780_v29 = vmul.f32 %v11393_v19, %v13643_v7  ;;  %v4409_v18 = vadd.f32 %v4377_v59, %v4207_v31  ;;  %14302 = vst [vmem:[#allocation138_spill] sm:$0xff] %v11451_v41  ;;  %v2408_v63 = vadd.f32 %v2376_v34, %v2206_v60  ;;  %v2409_v23 = vadd.f32 %v2377_v57, %v2207_v30  ;;  %v14304_v60 = vld [vmem:[#allocation53_spill] sm:$0xff] }
 0x40b   : > { %v2781_v39 = vmul.f32 %v11411_v47, %v13643_v7  ;;  %v4610_v28 = vadd.f32 %v4578_v44, %v4408_v36  ;;  %v4982_v3 = vmul.f32 %v14303_v50, %v11437_v10  ;;  %v4983_v1 = vmul.f32 %v14303_v50, %v11439_v4 }
 0x40c   : > { %v2982_v19 = vmul.f32 %v11423_v37, %v13645_v24  ;;  %v4611_v59 = vadd.f32 %v4579_v54, %v4409_v18  ;;  %v2610_v31 = vadd.f32 %v2578_v35, %v2408_v63  ;;  %v2611_v55 = vadd.f32 %v2579_v32, %v2409_v23  ;;  %v11471_v35 = vld [vmem:[#allocation2 + $0x160] sm:$0xff]  ;;  %v14306_v18 = vld [vmem:[#allocation15_spill] sm:$0xff] }
 0x40d   : > { %v2983_v34 = vmul.f32 %v11425_v45, %v13645_v24  ;;  %v4812_v57 = vadd.f32 %v4780_v51, %v4610_v28  ;;  %v5184_v30 = vmul.f32 %v14304_v60, %v11449_v58  ;;  %v5185_v44 = vmul.f32 %v14304_v60, %v11451_v41  ;;  %14305 = vst [vmem:[#allocation139_spill] sm:$0xff] %v11471_v35  ;;  %v14307_v51 = vld [vmem:[#allocation95_spill] sm:$0xff]  ;;  %v14308_v23 = vld [vmem:[#allocation97_spill] sm:$0xff] }
 0x40e   : > { %v3184_v36 = vmul.f32 %v11437_v10, %v13649_v17  ;;  %v4813_v47 = vadd.f32 %v4781_v14, %v4611_v59  ;;  %v2812_v16 = vadd.f32 %v2780_v29, %v2610_v31  ;;  %v2813_v12 = vadd.f32 %v2781_v39, %v2611_v55  ;;  %v11479_v37 = vld [vmem:[#allocation2 + $0x168] sm:$0xff]  ;;  %v11483_v59 = vld [vmem:[#allocation2 + $0x170] sm:$0xff]  ;;  %v14311_v31 = vld [vmem:[#allocation21_spill] sm:$0xff] }
 0x40f   : > { %v3185_v54 = vmul.f32 %v11439_v4, %v13649_v17  ;;  %v5014_v32 = vadd.f32 %v4982_v3, %v4812_v57  ;;  %v5386_v63 = vmul.f32 %v14307_v51, %v14306_v18  ;;  %v5387_v28 = vmul.f32 %v14308_v23, %v14306_v18  ;;  %14309 = vst [vmem:[#allocation58_spill] sm:$0xff] %v11479_v37  ;;  %v14312_v57 = vld [vmem:[#allocation112_spill] sm:$0xff]  ;;  %v14313_v4 = vld [vmem:[#allocation98_spill] sm:$0xff] }
 0x410   : > { %v3386_v45 = vmul.f32 %v11449_v58, %v14136_v5  ;;  %v5015_v14 = vadd.f32 %v4983_v1, %v4813_v47  ;;  %v3014_v29 = vadd.f32 %v2982_v19, %v2812_v16  ;;  %v3015_v55 = vadd.f32 %v2983_v34, %v2813_v12  ;;  %14310 = vst [vmem:[#allocation140_spill] sm:$0xff] %v11483_v59  ;;  %v11491_v10 = vld [vmem:[#allocation2 + $0x178] sm:$0xff]  ;;  %v14315_v34 = vld [vmem:[#allocation114_spill] sm:$0xff] }
 0x411   : > { %v3387_v39 = vmul.f32 %v11451_v41, %v14136_v5  ;;  %v5216_v3 = vadd.f32 %v5184_v30, %v5014_v32  ;;  %v5588_v51 = vmul.f32 %v14312_v57, %v14311_v31  ;;  %v5589_v23 = vmul.f32 %v14313_v4, %v14311_v31  ;;  %14314 = vst [vmem:[#allocation83_spill] sm:$0xff] %v11491_v10  ;;  %v14316_v30 = vld [vmem:[#allocation80_spill] sm:$0xff]  ;;  %v14317_v41 = vld [vmem:[#allocation103_spill] sm:$0xff] }
 0x412   : > { %v3588_v58 = vmul.f32 %v14140_v25, %v11471_v35  ;;  %v5217_v1 = vadd.f32 %v5185_v44, %v5015_v14  ;;  %v3216_v16 = vadd.f32 %v3184_v36, %v3014_v29  ;;  %v3217_v19 = vadd.f32 %v3185_v54, %v3015_v55  ;;  %v14318_v14 = vld [vmem:[#allocation105_spill] sm:$0xff]  ;;  %v1819_v55 = vld [vmem:[#allocation3 + $0x50] sm:$0xff] }
 0x413   : > { %v3589_v12 = vmul.f32 %v14140_v25, %v11479_v37  ;;  %v5418_v47 = vadd.f32 %v5386_v63, %v5216_v3  ;;  %v5790_v32 = vmul.f32 %v14316_v30, %v14315_v34  ;;  %v5791_v57 = vmul.f32 %v14316_v30, %v14317_v41  ;;  %v1820_v3 = vld [vmem:[#allocation3 + $0x58] sm:$0xff] }
 0x414   : > { %v3789_v4 = vmul.f32 %v14143_v43, %v11483_v59  ;;  %v5419_v49 = vadd.f32 %v5387_v28, %v5217_v1  ;;  %v3418_v35 = vadd.f32 %v3386_v45, %v3216_v16  ;;  %v3419_v42 = vadd.f32 %v3387_v39, %v3217_v19  ;;  %v14319_v45 = vld [vmem:[#allocation61_spill] sm:$0xff]  ;;  %v11515_v16 = vld [vmem:[#allocation3 + $0x70] sm:$0xff] }
 0x415   : > { %v3790_v44 = vmul.f32 %v14143_v43, %v11491_v10  ;;  %v5620_v36 = vadd.f32 %v5588_v51, %v5418_v47  ;;  %v3990_v54 = vmul.f32 %v14315_v34, %v14146_v15  ;;  %v3991_v63 = vmul.f32 %v14317_v41, %v14146_v15  ;;  %v11511_v1 = vld [vmem:[#allocation3 + $0x60] sm:$0xff]  ;;  %v11513_v51 = vld [vmem:[#allocation3 + $0x68] sm:$0xff]  ;;  %14322 = vst [vmem:[#allocation63_spill] sm:$0xff] %v11515_v16  ;;  %v14324_v34 = vld [vmem:[#allocation100_spill] sm:$0xff] }
 0x416   : > { %v4192_v29 = vmul.f32 %v14318_v14, %v14149_v9  ;;  %v5621_v37 = vadd.f32 %v5589_v23, %v5419_v49  ;;  %v3620_v59 = vadd.f32 %v3588_v58, %v3418_v35  ;;  %v3621_v28 = vadd.f32 %v3589_v12, %v3419_v42  ;;  %14320 = vst [vmem:[#allocation59_spill] sm:$0xff] %v11511_v1  ;;  %v14323_v41 = vld [vmem:[#allocation66_spill] sm:$0xff]  ;;  %v14325_v49 = vld [vmem:[#allocation101_spill] sm:$0xff] }
 0x417   : > { %v4193_v39 = vmul.f32 %v14319_v45, %v14149_v9  ;;  %14321 = vst [vmem:[#allocation62_spill] sm:$0xff] %v11513_v51  ;;  %v5822_v19 = vadd.f32 %v5790_v32, %v5620_v36  ;;  %v4394_v47 = vmul.f32 %v14323_v41, %v14293_v53  ;;  %v4395_v14 = vmul.f32 %v14324_v34, %v14293_v53  ;;  %v11523_v42 = vld [vmem:[#allocation3 + $0x78] sm:$0xff]  ;;  %v11526_v10 = vld [vmem:[#allocation3 + $0x80] sm:$0xff]  ;;  %v11528_v9 = vld [vmem:[#allocation3 + $0x88] sm:$0xff] }
 0x418   : > { %v4596_v58 = vmul.f32 %v14325_v49, %v14294_v33  ;;  %14326 = vst [vmem:[#allocation67_spill] sm:$0xff] %v11523_v42  ;;  %v5823_v35 = vadd.f32 %v5791_v57, %v5621_v37  ;;  %v3821_v23 = vadd.f32 %v3789_v4, %v3620_v59  ;;  %v3822_v12 = vadd.f32 %v3790_v44, %v3621_v28  ;;  %v11539_v44 = vld [vmem:[#allocation3 + $0x90] sm:$0xff] }
 0x419   : > { %v1855_v45 = vmul.f32 %v13732_v38, %v1819_v55  ;;  %14327 = vst [vmem:[#allocation68_spill] sm:$0xff] %v11526_v10  ;;  %14328 = vst [vmem:[#allocation22_spill] sm:$0xff] %v11528_v9  ;;  %v1856_v32 = vmul.f32 %v13732_v38, %v1820_v3  ;;  %v2057_v36 = vmul.f32 %v14047_v46, %v11511_v1  ;;  %v11541_v55 = vld [vmem:[#allocation3 + $0x98] sm:$0xff]  ;;  %v11543_v3 = vld [vmem:[#allocation2 + $0x1d0] sm:$0xff] }
 0x41a   : > { %v2058_v41 = vmul.f32 %v14047_v46, %v11513_v51  ;;  %v2259_v34 = vmul.f32 %v14048_v22, %v11515_v16  ;;  %v6745_v37 = vpack.c.bf16 %v5823_v35, %v5822_v19  ;;  %v4022_v59 = vadd.f32 %v3990_v54, %v3821_v23  ;;  %14329 = vst [vmem:[#allocation75_spill] sm:$0xff] %v11539_v44  ;;  %v14332_v1 = vld [vmem:[#allocation65_spill] sm:$0xff]  ;;  %v14333_v19 = vld [vmem:[#allocation70_spill] sm:$0xff]  ;;  %v14334_v23 = vld [vmem:[#allocation107_spill] sm:$0xff] }
 0x41b   : > { %v4023_v57 = vadd.f32 %v3991_v63, %v3822_v12  ;;  %v2260_v4 = vmul.f32 %v14048_v22, %v11523_v42  ;;  %14330 = vst [vmem:[#allocation23_spill] sm:$0xff] %v11541_v55  ;;  %14331 = vst [vmem:[#allocation93_spill] sm:$0xff] %v11543_v3  ;;  %v2089_v28 = vadd.f32 %v2057_v36, %v1855_v45  ;;  %v11555_v42 = vld [vmem:[#allocation3 + $0xa0] sm:$0xff]  ;;  %v11557_v45 = vld [vmem:[#allocation3 + $0xa8] sm:$0xff] }
 0x41c   : > { %v2090_v49 = vadd.f32 %v2058_v41, %v1856_v32  ;;  %v2461_v51 = vmul.f32 %v14332_v1, %v11526_v10  ;;  %v2462_v16 = vmul.f32 %v14332_v1, %v11528_v9  ;;  %6747 = vmatpush3.bf16.xpose.msk.msra.mxu0 %vm9262_vm1, %v6745_v37  ;;  %v4224_v54 = vadd.f32 %v4192_v29, %v4022_v59  ;;  %v11559_v32 = vld [vmem:[#allocation2 + $0x1d8] sm:$0xff] }
 0x41d   : > { %v4225_v63 = vadd.f32 %v4193_v39, %v4023_v57  ;;  %v4597_v35 = vmul.f32 %v14333_v19, %v14294_v33  ;;  %v4798_v12 = vmul.f32 %v14334_v23, %v14300_v8  ;;  %14335 = vst [vmem:[#allocation111_spill] sm:$0xff] %v11555_v42  ;;  %14336 = vst [vmem:[#allocation109_spill] sm:$0xff] %v11557_v45  ;;  %v14338_v59 = vld [vmem:[#allocation72_spill] sm:$0xff] }
 0x41e   : > { %14337 = vst [vmem:[#allocation96_spill] sm:$0xff] %v11559_v32  ;;  %v2291_v36 = vadd.f32 %v2259_v34, %v2089_v28  ;;  %v2292_v41 = vadd.f32 %v2260_v4, %v2090_v49  ;;  %v2663_v9 = vmul.f32 %v14055_v27, %v11539_v44  ;;  %v2664_v29 = vmul.f32 %v14055_v27, %v11541_v55  ;;  %v11569_v23 = vld [vmem:[#allocation2 + $0x1f0] sm:$0xff]  ;;  %v14370_v44 = vld [vmem:[#allocation86_spill] sm:$0xff] }
 0x41f   : > { %v4426_v39 = vadd.f32 %v4394_v47, %v4224_v54  ;;  %v4427_v37 = vadd.f32 %v4395_v14, %v4225_v63  ;;  %v4799_v57 = vmul.f32 %v14338_v59, %v14300_v8  ;;  %v5000_v19 = vmul.f32 %v14303_v50, %v11543_v3  ;;  %14339 = vst [vmem:[#allocation110_spill] sm:$0xff] %v11569_v23  ;;  %v14340_v14 = vld [vmem:[#allocation74_spill] sm:$0xff]  ;;  %v11579_v63 = vld [vmem:[#allocation2 + $0x1f8] sm:$0xff] }
 0x420   : > { %v2493_v10 = vadd.f32 %v2461_v51, %v2291_v36  ;;  %v2494_v33 = vadd.f32 %v2462_v16, %v2292_v41  ;;  %v2865_v34 = vmul.f32 %v14061_v48, %v11555_v42  ;;  %v2866_v4 = vmul.f32 %v14061_v48, %v11557_v45  ;;  %14341 = vst [vmem:[#allocation94_spill] sm:$0xff] %v11579_v63  ;;  %v14342_v51 = vld [vmem:[#allocation54_spill] sm:$0xff]  ;;  %v14343_v36 = vld [vmem:[#allocation55_spill] sm:$0xff] }
 0x421   : > { %v4628_v28 = vadd.f32 %v4596_v58, %v4426_v39  ;;  %v4629_v49 = vadd.f32 %v4597_v35, %v4427_v37  ;;  %v5001_v47 = vmul.f32 %v14303_v50, %v11559_v32  ;;  %v5202_v54 = vmul.f32 %v14340_v14, %v14304_v60  ;;  %v14344_v58 = vld [vmem:[#allocation60_spill] sm:$0xff] }
 0x422   : > { %v2695_v59 = vadd.f32 %v2663_v9, %v2493_v10  ;;  %v2696_v3 = vadd.f32 %v2664_v29, %v2494_v33  ;;  %v3067_v16 = vmul.f32 %v14342_v51, %v14067_v2  ;;  %v3068_v41 = vmul.f32 %v14343_v36, %v14067_v2  ;;  %v11589_v37 = vld [vmem:[#allocation2 + $0x210] sm:$0xff]  ;;  %v14347_v10 = vld [vmem:[#allocation85_spill] sm:$0xff] }
 0x423   : > { %v4830_v42 = vadd.f32 %v4798_v12, %v4628_v28  ;;  %v4831_v45 = vadd.f32 %v4799_v57, %v4629_v49  ;;  %v5203_v35 = vmul.f32 %v14344_v58, %v14304_v60  ;;  %v5404_v39 = vmul.f32 %v14306_v18, %v11569_v23  ;;  %14345 = vst [vmem:[#allocation113_spill] sm:$0xff] %v11589_v37  ;;  %v14346_v9 = vld [vmem:[#allocation84_spill] sm:$0xff] }
 0x424   : > { %v2897_v14 = vadd.f32 %v2865_v34, %v2695_v59  ;;  %v2898_v32 = vadd.f32 %v2866_v4, %v2696_v3  ;;  %v3269_v33 = vmul.f32 %v14346_v9, %v14070_v40  ;;  %v3270_v29 = vmul.f32 %v14347_v10, %v14070_v40  ;;  %v14348_v57 = vld [vmem:[#allocation24_spill] sm:$0xff]  ;;  %v14350_v3 = vld [vmem:[#allocation25_spill] sm:$0xff]  ;;  %v14351_v4 = vld [vmem:[#allocation26_spill] sm:$0xff] }
 0x425   : > { %v5032_v51 = vadd.f32 %v5000_v19, %v4830_v42  ;;  %v5033_v36 = vadd.f32 %v5001_v47, %v4831_v45  ;;  %v5405_v12 = vmul.f32 %v14306_v18, %v11579_v63  ;;  %v5606_v28 = vmul.f32 %v14348_v57, %v14311_v31  ;;  %v11599_v49 = vld [vmem:[#allocation2 + $0x218] sm:$0xff]  ;;  %v14352_v42 = vld [vmem:[#allocation27_spill] sm:$0xff] }
 0x426   : > { %14349 = vst [vmem:[#allocation95_spill] sm:$0xff] %v11599_v49  ;;  %v3099_v58 = vadd.f32 %v3067_v16, %v2897_v14  ;;  %v3100_v23 = vadd.f32 %v3068_v41, %v2898_v32  ;;  %v3471_v34 = vmul.f32 %v14350_v3, %v13759_v21  ;;  %v3472_v59 = vmul.f32 %v14351_v4, %v13759_v21  ;;  %v14353_v63 = vld [vmem:[#allocation28_spill] sm:$0xff]  ;;  %v14354_v32 = vld [vmem:[#allocation29_spill] sm:$0xff] }
 0x427   : > { %v5234_v9 = vadd.f32 %v5202_v54, %v5032_v51  ;;  %v5235_v10 = vadd.f32 %v5203_v35, %v5033_v36  ;;  %v5607_v45 = vmul.f32 %v14352_v42, %v14311_v31  ;;  %v5808_v19 = vmul.f32 %v14316_v30, %v11589_v37  ;;  %v14355_v35 = vld [vmem:[#allocation30_spill] sm:$0xff]  ;;  %v14356_v42 = vld [vmem:[#allocation33_spill] sm:$0xff]  ;;  %v11649_v31 = vld [vmem:[#allocation3 + $0x110] sm:$0xff] }
 0x428   : > { %v3301_v47 = vadd.f32 %v3269_v33, %v3099_v58  ;;  %v3302_v57 = vadd.f32 %v3270_v29, %v3100_v23  ;;  %v3673_v16 = vmul.f32 %v14353_v63, %v13763_v13  ;;  %v3674_v41 = vmul.f32 %v14354_v32, %v13763_v13  ;;  %v14357_v23 = vld [vmem:[#allocation31_spill] sm:$0xff]  ;;  %14373 = vst [vmem:[#allocation61_spill] sm:$0xff] %v11649_v31  ;;  %v11719_v60 = vld [vmem:[#allocation3 + $0x198] sm:$0xff] }
 0x429   : > { %v5436_v14 = vadd.f32 %v5404_v39, %v5234_v9  ;;  %v5437_v3 = vadd.f32 %v5405_v12, %v5235_v10  ;;  %v5809_v54 = vmul.f32 %v14316_v30, %v11599_v49  ;;  %v3873_v51 = vmul.f32 %v14355_v35, %v13768_v62  ;;  %v14358_v32 = vld [vmem:[#allocation35_spill] sm:$0xff]  ;;  %v14359_v12 = vld [vmem:[#allocation81_spill] sm:$0xff]  ;;  %v14360_v9 = vld [vmem:[#allocation36_spill] sm:$0xff]  ;;  %14397 = vst [vmem:[#allocation84_spill] sm:$0xff] %v11719_v60 }
 0x42a   : > { %v3503_v36 = vadd.f32 %v3471_v34, %v3301_v47  ;;  %v3504_v4 = vadd.f32 %v3472_v59, %v3302_v57  ;;  %v3874_v33 = vmul.f32 %v14356_v42, %v13768_v62  ;;  %v4075_v29 = vmul.f32 %v14357_v23, %v14220_v20  ;;  %v11625_v49 = vld [vmem:[#allocation3 + $0xe0] sm:$0xff]  ;;  %v11627_v37 = vld [vmem:[#allocation3 + $0xe8] sm:$0xff]  ;;  %v11717_v18 = vld [vmem:[#allocation3 + $0x190] sm:$0xff] }
 0x42b   : > { %v5638_v63 = vadd.f32 %v5606_v28, %v5436_v14  ;;  %v5639_v58 = vadd.f32 %v5607_v45, %v5437_v3  ;;  %v4076_v39 = vmul.f32 %v14358_v32, %v14220_v20  ;;  %v4277_v10 = vmul.f32 %v14360_v9, %v14359_v12  ;;  %14361 = vst [vmem:[#allocation97_spill] sm:$0xff] %v11625_v49  ;;  %v14363_v47 = vld [vmem:[#allocation37_spill] sm:$0xff]  ;;  %v14364_v35 = vld [vmem:[#allocation82_spill] sm:$0xff]  ;;  %v14365_v42 = vld [vmem:[#allocation39_spill] sm:$0xff] }
 0x42c   : > { %14362 = vst [vmem:[#allocation112_spill] sm:$0xff] %v11627_v37  ;;  %v3705_v34 = vadd.f32 %v3673_v16, %v3503_v36  ;;  %v3706_v59 = vadd.f32 %v3674_v41, %v3504_v4  ;;  %v4278_v57 = vmul.f32 %v14363_v47, %v14359_v12  ;;  %v4479_v23 = vmul.f32 %v14365_v42, %v14364_v35  ;;  %v11633_v28 = vld [vmem:[#allocation3 + $0xf0] sm:$0xff]  ;;  %v11635_v45 = vld [vmem:[#allocation3 + $0xf8] sm:$0xff]  ;;  %v11637_v14 = vld [vmem:[#allocation3 + $0x100] sm:$0xff] }
 0x42d   : > { %14366 = vst [vmem:[#allocation98_spill] sm:$0xff] %v11633_v28  ;;  %14367 = vst [vmem:[#allocation114_spill] sm:$0xff] %v11635_v45  ;;  %v5840_v3 = vadd.f32 %v5808_v19, %v5638_v63  ;;  %v5841_v32 = vadd.f32 %v5809_v54, %v5639_v58  ;;  %v14369_v9 = vld [vmem:[#allocation40_spill] sm:$0xff]  ;;  %v14371_v16 = vld [vmem:[#allocation42_spill] sm:$0xff]  ;;  %v1873_v42 = vmul.f32 %v13732_v38, %v11625_v49 }
 0x42e   : > { %14368 = vst [vmem:[#allocation103_spill] sm:$0xff] %v11637_v14  ;;  %v4480_v55 = vmul.f32 %v14369_v9, %v14364_v35  ;;  %v4681_v41 = vmul.f32 %v14371_v16, %v14370_v44  ;;  %v11643_v36 = vld [vmem:[#allocation3 + $0x108] sm:$0xff]  ;;  %v3905_v4 = vadd.f32 %v3873_v51, %v3705_v34  ;;  %v3906_v47 = vadd.f32 %v3874_v33, %v3706_v59  ;;  %v11651_v19 = vld [vmem:[#allocation3 + $0x118] sm:$0xff] }
 0x42f   : > { %14372 = vst [vmem:[#allocation105_spill] sm:$0xff] %v11643_v36  ;;  %v1874_v30 = vmul.f32 %v13732_v38, %v11627_v37  ;;  %14374 = vst [vmem:[#allocation66_spill] sm:$0xff] %v11651_v19  ;;  %v6748_v54 = vpack.c.bf16 %v5841_v32, %v5840_v3  ;;  %v2075_v63 = vmul.f32 %v14047_v46, %v11633_v28  ;;  %v14375_v59 = vld [vmem:[#allocation43_spill] sm:$0xff]  ;;  %v11663_v37 = vld [vmem:[#allocation3 + $0x120] sm:$0xff] }
 0x430   : > { %v2076_v58 = vmul.f32 %v14047_v46, %v11635_v45  ;;  %v2277_v51 = vmul.f32 %v14048_v22, %v11637_v14  ;;  %v4107_v33 = vadd.f32 %v4075_v29, %v3905_v4  ;;  %v4108_v34 = vadd.f32 %v4076_v39, %v3906_v47  ;;  %14376 = vst [vmem:[#allocation100_spill] sm:$0xff] %v11663_v37  ;;  %v11665_v3 = vld [vmem:[#allocation3 + $0x128] sm:$0xff]  ;;  %v11679_v46 = vld [vmem:[#allocation3 + $0x138] sm:$0xff] }
 0x431   : > { %v4682_v9 = vmul.f32 %v14375_v59, %v14370_v44  ;;  %v2278_v16 = vmul.f32 %v14048_v22, %v11643_v36  ;;  %14377 = vst [vmem:[#allocation101_spill] sm:$0xff] %v11665_v3  ;;  %6750 = vmatprep.subr.msk.bf16.mxu0 %vm9262_vm1, %v6748_v54  ;;  %v2107_v32 = vadd.f32 %v2075_v63, %v1873_v42  ;;  %v14378_v47 = vld [vmem:[#allocation87_spill] sm:$0xff]  ;;  %v14379_v59 = vld [vmem:[#allocation49_spill] sm:$0xff]  ;;  %v14380_v28 = vld [vmem:[#allocation50_spill] sm:$0xff] }
 0x432   : > { %v2108_v45 = vadd.f32 %v2076_v58, %v1874_v30  ;;  %v2479_v14 = vmul.f32 %v14332_v1, %v11649_v31  ;;  %v2480_v29 = vmul.f32 %v14332_v1, %v11651_v19  ;;  %v4309_v39 = vadd.f32 %v4277_v10, %v4107_v33  ;;  %v11677_v22 = vld [vmem:[#allocation3 + $0x130] sm:$0xff]  ;;  %14382 = vst [vmem:[#allocation107_spill] sm:$0xff] %v11679_v46  ;;  %v11689_v19 = vld [vmem:[#allocation3 + $0x140] sm:$0xff]  ;;  %v11691_v31 = vld [vmem:[#allocation3 + $0x148] sm:$0xff] }
 0x433   : > { %v4310_v4 = vadd.f32 %v4278_v57, %v4108_v34  ;;  %v4883_v36 = vmul.f32 %v14379_v59, %v14378_v47  ;;  %v4884_v49 = vmul.f32 %v14380_v28, %v14378_v47  ;;  %14381 = vst [vmem:[#allocation70_spill] sm:$0xff] %v11677_v22  ;;  %v2309_v42 = vadd.f32 %v2277_v51, %v2107_v32  ;;  %v14383_v58 = vld [vmem:[#allocation88_spill] sm:$0xff]  ;;  %v14385_v59 = vld [vmem:[#allocation14_spill] sm:$0xff] }
 0x434   : > { %v2310_v30 = vadd.f32 %v2278_v16, %v2108_v45  ;;  %v2681_v54 = vmul.f32 %v14055_v27, %v11663_v37  ;;  %v2682_v63 = vmul.f32 %v14055_v27, %v11665_v3  ;;  %v4511_v10 = vadd.f32 %v4479_v23, %v4309_v39  ;;  %v14384_v33 = vld [vmem:[#allocation52_spill] sm:$0xff]  ;;  %14386 = vst [vmem:[#allocation72_spill] sm:$0xff] %v11689_v19  ;;  %v14390_v3 = vld [vmem:[#allocation77_spill] sm:$0xff]  ;;  %v14395_v1 = vld [vmem:[#allocation46_spill] sm:$0xff] }
 0x435   : > { %v4512_v57 = vadd.f32 %v4480_v55, %v4310_v4  ;;  %v5085_v34 = vmul.f32 %v14384_v33, %v14383_v58  ;;  %v5086_v28 = vmul.f32 %v14385_v59, %v14383_v58  ;;  %14387 = vst [vmem:[#allocation74_spill] sm:$0xff] %v11691_v31  ;;  %v2511_v51 = vadd.f32 %v2479_v14, %v2309_v42  ;;  %v14388_v39 = vld [vmem:[#allocation76_spill] sm:$0xff]  ;;  %v14389_v4 = vld [vmem:[#allocation89_spill] sm:$0xff] }
 0x436   : > { %v2512_v45 = vadd.f32 %v2480_v29, %v2310_v30  ;;  %v2883_v16 = vmul.f32 %v14061_v48, %v11677_v22  ;;  %v2884_v32 = vmul.f32 %v14061_v48, %v11679_v46  ;;  %v4713_v23 = vadd.f32 %v4681_v41, %v4511_v10  ;;  %v11701_v37 = vld [vmem:[#allocation3 + $0x150] sm:$0xff]  ;;  %v11703_v27 = vld [vmem:[#allocation3 + $0x158] sm:$0xff]  ;;  %v11705_v14 = vld [vmem:[#allocation3 + $0x180] sm:$0xff]  ;;  %14396 = vst [vmem:[#allocation60_spill] sm:$0xff] %v11717_v18 }
 0x437   : > { %v4714_v55 = vadd.f32 %v4682_v9, %v4512_v57  ;;  %v5287_v33 = vmul.f32 %v14389_v4, %v14388_v39  ;;  %v5288_v59 = vmul.f32 %v14389_v4, %v14390_v3  ;;  %14391 = vst [vmem:[#allocation54_spill] sm:$0xff] %v11703_v27  ;;  %v11707_v29 = vld [vmem:[#allocation3 + $0x188] sm:$0xff]  ;;  %v2713_v42 = vadd.f32 %v2681_v54, %v2511_v51  ;;  %v14393_v46 = vld [vmem:[#allocation45_spill] sm:$0xff] }
 0x438   : > { %14392 = vst [vmem:[#allocation55_spill] sm:$0xff] %v11707_v29  ;;  %v2714_v30 = vadd.f32 %v2682_v63, %v2512_v45  ;;  %v3085_v41 = vmul.f32 %v14067_v2, %v11689_v19  ;;  %v3086_v9 = vmul.f32 %v14067_v2, %v11691_v31  ;;  %v4915_v10 = vadd.f32 %v4883_v36, %v4713_v23  ;;  %v14394_v22 = vld [vmem:[#allocation90_spill] sm:$0xff]  ;;  %v14398_v23 = vld [vmem:[#allocation91_spill] sm:$0xff] }
 0x439   : > { %v4916_v57 = vadd.f32 %v4884_v49, %v4714_v55  ;;  %v5489_v48 = vmul.f32 %v14394_v22, %v14393_v46  ;;  %v5490_v38 = vmul.f32 %v14394_v22, %v14395_v1  ;;  %v2915_v54 = vadd.f32 %v2883_v16, %v2713_v42 }
 0x43a   : > { %v2916_v63 = vadd.f32 %v2884_v32, %v2714_v30  ;;  %v3287_v51 = vmul.f32 %v14070_v40, %v11701_v37  ;;  %v3288_v45 = vmul.f32 %v14070_v40, %v11703_v27  ;;  %v5117_v36 = vadd.f32 %v5085_v34, %v4915_v10  ;;  %v14399_v27 = vld [vmem:[#allocation92_spill] sm:$0xff] }
 0x43b   : > { %v5118_v49 = vadd.f32 %v5086_v28, %v4916_v57  ;;  %v5691_v55 = vmul.f32 %v14398_v23, %v11705_v14  ;;  %v5692_v31 = vmul.f32 %v14398_v23, %v11707_v29  ;;  %v3117_v19 = vadd.f32 %v3085_v41, %v2915_v54  ;;  %v11743_v54 = vld [vmem:[#allocation3 + $0x1a8] sm:$0xff] }
 0x43c   : > { %v3118_v2 = vadd.f32 %v3086_v9, %v2916_v63  ;;  %v3489_v16 = vmul.f32 %v14388_v39, %v13759_v21  ;;  %v3490_v32 = vmul.f32 %v14390_v3, %v13759_v21  ;;  %v5319_v42 = vadd.f32 %v5287_v33, %v5117_v36  ;;  %v11741_v39 = vld [vmem:[#allocation3 + $0x1a0] sm:$0xff]  ;;  %14401 = vst [vmem:[#allocation24_spill] sm:$0xff] %v11743_v54 }
 0x43d   : > { %v5320_v30 = vadd.f32 %v5288_v59, %v5118_v49  ;;  %v5893_v34 = vmul.f32 %v14399_v27, %v11717_v18  ;;  %v5894_v28 = vmul.f32 %v14399_v27, %v11719_v60  ;;  %v3319_v10 = vadd.f32 %v3287_v51, %v3117_v19  ;;  %14400 = vst [vmem:[#allocation85_spill] sm:$0xff] %v11741_v39  ;;  %v11749_v19 = vld [vmem:[#allocation3 + $0x1b0] sm:$0xff] }
 0x43e   : > { %v3320_v57 = vadd.f32 %v3288_v45, %v3118_v2  ;;  %v3691_v41 = vmul.f32 %v14393_v46, %v13763_v13  ;;  %v3692_v9 = vmul.f32 %v14395_v1, %v13763_v13  ;;  %v5521_v3 = vadd.f32 %v5489_v48, %v5319_v42  ;;  %14402 = vst [vmem:[#allocation25_spill] sm:$0xff] %v11749_v19  ;;  %v11751_v2 = vld [vmem:[#allocation3 + $0x1b8] sm:$0xff]  ;;  %v11757_v48 = vld [vmem:[#allocation3 + $0x1c0] sm:$0xff] }
 0x43f   : > { %v5522_v33 = vadd.f32 %v5490_v38, %v5320_v30  ;;  %v3891_v59 = vmul.f32 %v11705_v14, %v13768_v62  ;;  %v3892_v63 = vmul.f32 %v11707_v29, %v13768_v62  ;;  %14403 = vst [vmem:[#allocation26_spill] sm:$0xff] %v11751_v2  ;;  %v3521_v46 = vadd.f32 %v3489_v16, %v3319_v10 }
 0x440   : > { %v3522_v51 = vadd.f32 %v3490_v32, %v3320_v57  ;;  %v4093_v1 = vmul.f32 %v11717_v18, %v14220_v20  ;;  %v4094_v45 = vmul.f32 %v11719_v60, %v14220_v20  ;;  %14404 = vst [vmem:[#allocation27_spill] sm:$0xff] %v11757_v48  ;;  %v5723_v38 = vadd.f32 %v5691_v55, %v5521_v3  ;;  %v11793_v18 = vld [vmem:[#allocation3 + $0x1e0] sm:$0xff] }
 0x441   : > { %v5724_v36 = vadd.f32 %v5692_v31, %v5522_v33  ;;  %v4295_v49 = vmul.f32 %v14359_v12, %v11741_v39  ;;  %v4296_v42 = vmul.f32 %v14359_v12, %v11743_v54  ;;  %v3723_v30 = vadd.f32 %v3691_v41, %v3521_v46  ;;  %v14405_v31 = vld [vmem:[#allocation47_spill] sm:$0xff]  ;;  %v11771_v33 = vld [vmem:[#allocation2 + $0x80] sm:$0xff]  ;;  %v14409_v46 = vld [vmem:[#allocation48_spill] sm:$0xff]  ;;  %14417 = vst [vmem:[#allocation36_spill] sm:$0xff] %v11793_v18 }
 0x442   : > { %v3724_v29 = vadd.f32 %v3692_v9, %v3522_v51  ;;  %v4497_v16 = vmul.f32 %v14364_v35, %v11749_v19  ;;  %v4498_v32 = vmul.f32 %v14364_v35, %v11751_v2  ;;  %v5925_v10 = vadd.f32 %v5893_v34, %v5723_v38  ;;  %14406 = vst [vmem:[#allocation28_spill] sm:$0xff] %v11771_v33  ;;  %v11773_v41 = vld [vmem:[#allocation3 + $0x1c8] sm:$0xff]  ;;  %v11775_v9 = vld [vmem:[#allocation3 + $0x1d0] sm:$0xff] }
 0x443   : > { %v5926_v57 = vadd.f32 %v5894_v28, %v5724_v36  ;;  %v4699_v55 = vmul.f32 %v14370_v44, %v11757_v48  ;;  %v1755_v3 = vmul.f32 %v14405_v31, %v13707_v52  ;;  %v3923_v39 = vadd.f32 %v3891_v59, %v3723_v30  ;;  %14407 = vst [vmem:[#allocation29_spill] sm:$0xff] %v11773_v41  ;;  %v14410_v34 = vld [vmem:[#allocation16_spill] sm:$0xff]  ;;  %v11781_v38 = vld [vmem:[#allocation2 + $0x88] sm:$0xff]  ;;  %v14412_v48 = vld [vmem:[#allocation17_spill] sm:$0xff] }
 0x444   : > { %v3924_v54 = vadd.f32 %v3892_v63, %v3724_v29  ;;  %14408 = vst [vmem:[#allocation30_spill] sm:$0xff] %v11775_v9  ;;  %v1756_v51 = vmul.f32 %v14409_v46, %v13707_v52  ;;  %v1956_v28 = vmul.f32 %v14410_v34, %v13708_v6  ;;  %14411 = vst [vmem:[#allocation33_spill] sm:$0xff] %v11781_v38  ;;  %v14413_v2 = vld [vmem:[#allocation18_spill] sm:$0xff]  ;;  %v14414_v29 = vld [vmem:[#allocation19_spill] sm:$0xff] }
 0x445   : > { %v6799_v36 = vpack.c.bf16 %v5926_v57, %v5925_v10  ;;  %v1957_v31 = vmul.f32 %v14412_v48, %v13708_v6  ;;  %v2158_v59 = vmul.f32 %v14413_v2, %v13634_v0  ;;  %v2159_v63 = vmul.f32 %v14414_v29, %v13634_v0  ;;  %v11789_v30 = vld [vmem:[#allocation2 + $0x90] sm:$0xff]  ;;  %v11791_v46 = vld [vmem:[#allocation3 + $0x1d8] sm:$0xff] }
 0x446   : > { %14415 = vst [vmem:[#allocation31_spill] sm:$0xff] %v11789_v30  ;;  %v4125_v19 = vadd.f32 %v4093_v1, %v3923_v39  ;;  %v4126_v60 = vadd.f32 %v4094_v45, %v3924_v54  ;;  %14416 = vst [vmem:[#allocation35_spill] sm:$0xff] %v11791_v46  ;;  %v1988_v34 = vadd.f32 %v1956_v28, %v1755_v3  ;;  %v11797_v57 = vld [vmem:[#allocation2 + $0x98] sm:$0xff]  ;;  %v11807_v45 = vld [vmem:[#allocation2 + $0xa0] sm:$0xff] }
 0x447   : > { %v2360_v10 = vmul.f32 %v13636_v61, %v11771_v33  ;;  %14418 = vst [vmem:[#allocation37_spill] sm:$0xff] %v11797_v57  ;;  %6801 = vmatpush3.bf16.xpose.msk.msra.mxu1 %vm9262_vm1, %v6799_v36  ;;  %v4700_v2 = vmul.f32 %v14370_v44, %v11773_v41  ;;  %v4901_v39 = vmul.f32 %v14378_v47, %v11775_v9  ;;  %14419 = vst [vmem:[#allocation39_spill] sm:$0xff] %v11807_v45  ;;  %v11809_v28 = vld [vmem:[#allocation3 + $0x1e8] sm:$0xff] }
 0x448   : > { %v1989_v54 = vadd.f32 %v1957_v31, %v1756_v51  ;;  %v2361_v1 = vmul.f32 %v13636_v61, %v11781_v38  ;;  %v4327_v48 = vadd.f32 %v4295_v49, %v4125_v19  ;;  %v4328_v3 = vadd.f32 %v4296_v42, %v4126_v60  ;;  %14420 = vst [vmem:[#allocation40_spill] sm:$0xff] %v11809_v28  ;;  %v11813_v33 = vld [vmem:[#allocation2 + $0xa8] sm:$0xff]  ;;  %v11821_v49 = vld [vmem:[#allocation3 + $0x200] sm:$0xff] }
 0x449   : > { %v2190_v29 = vadd.f32 %v2158_v59, %v1988_v34  ;;  %v2562_v36 = vmul.f32 %v13641_v56, %v11789_v30  ;;  %14421 = vst [vmem:[#allocation42_spill] sm:$0xff] %v11813_v33  ;;  %v4902_v41 = vmul.f32 %v14378_v47, %v11791_v46  ;;  %v5103_v51 = vmul.f32 %v14383_v58, %v11793_v18  ;;  %v14423_v46 = vld [vmem:[#allocation20_spill] sm:$0xff] }
 0x44a   : > { %v2191_v31 = vadd.f32 %v2159_v63, %v1989_v54  ;;  %v2563_v38 = vmul.f32 %v13641_v56, %v11797_v57  ;;  %v4529_v19 = vadd.f32 %v4497_v16, %v4327_v48  ;;  %v4530_v60 = vadd.f32 %v4498_v32, %v4328_v3  ;;  %14422 = vst [vmem:[#allocation43_spill] sm:$0xff] %v11821_v49  ;;  %v11831_v16 = vld [vmem:[#allocation3 + $0x208] sm:$0xff]  ;;  %v14426_v3 = vld [vmem:[#allocation116_spill] sm:$0xff] }
 0x44b   : > { %v2392_v42 = vadd.f32 %v2360_v10, %v2190_v29  ;;  %v2764_v59 = vmul.f32 %v13643_v7, %v11807_v45  ;;  %v5104_v34 = vmul.f32 %v14383_v58, %v11809_v28  ;;  %v5305_v30 = vmul.f32 %v14423_v46, %v14389_v4  ;;  %14424 = vst [vmem:[#allocation49_spill] sm:$0xff] %v11831_v16  ;;  %v14425_v10 = vld [vmem:[#allocation115_spill] sm:$0xff]  ;;  %v14427_v46 = vld [vmem:[#allocation117_spill] sm:$0xff] }
 0x44c   : > { %v2393_v9 = vadd.f32 %v2361_v1, %v2191_v31  ;;  %v2765_v63 = vmul.f32 %v13643_v7, %v11813_v33  ;;  %v4731_v54 = vadd.f32 %v4699_v55, %v4529_v19  ;;  %v4732_v57 = vadd.f32 %v4700_v2, %v4530_v60  ;;  %v11841_v55 = vld [vmem:[#allocation3 + $0x220] sm:$0xff] }
 0x44d   : > { %v2594_v32 = vadd.f32 %v2562_v36, %v2392_v42  ;;  %v2966_v48 = vmul.f32 %v14425_v10, %v13645_v24  ;;  %v5306_v29 = vmul.f32 %v14426_v3, %v14389_v4  ;;  %v5507_v28 = vmul.f32 %v14394_v22, %v11821_v49  ;;  %14428 = vst [vmem:[#allocation50_spill] sm:$0xff] %v11841_v55  ;;  %v14429_v36 = vld [vmem:[#allocation118_spill] sm:$0xff]  ;;  %v14430_v42 = vld [vmem:[#allocation119_spill] sm:$0xff] }
 0x44e   : > { %v2595_v45 = vadd.f32 %v2563_v38, %v2393_v9  ;;  %v2967_v1 = vmul.f32 %v14427_v46, %v13645_v24  ;;  %v4933_v31 = vadd.f32 %v4901_v39, %v4731_v54  ;;  %v4934_v33 = vadd.f32 %v4902_v41, %v4732_v57  ;;  %v14431_v9 = vld [vmem:[#allocation120_spill] sm:$0xff]  ;;  %v11851_v39 = vld [vmem:[#allocation3 + $0x228] sm:$0xff] }
 0x44f   : > { %v2796_v2 = vadd.f32 %v2764_v59, %v2594_v32  ;;  %v3168_v19 = vmul.f32 %v14429_v36, %v13649_v17  ;;  %v5508_v60 = vmul.f32 %v14394_v22, %v11831_v16  ;;  %v5709_v10 = vmul.f32 %v14430_v42, %v14398_v23  ;;  %14432 = vst [vmem:[#allocation52_spill] sm:$0xff] %v11851_v39  ;;  %v14433_v59 = vld [vmem:[#allocation121_spill] sm:$0xff] }
 0x450   : > { %v2797_v3 = vadd.f32 %v2765_v63, %v2595_v45  ;;  %v3169_v38 = vmul.f32 %v14431_v9, %v13649_v17  ;;  %v5135_v49 = vadd.f32 %v5103_v51, %v4933_v31  ;;  %v5136_v46 = vadd.f32 %v5104_v34, %v4934_v33  ;;  %v14434_v45 = vld [vmem:[#allocation122_spill] sm:$0xff]  ;;  %v14435_v33 = vld [vmem:[#allocation123_spill] sm:$0xff]  ;;  %v14436_v31 = vld [vmem:[#allocation124_spill] sm:$0xff] }
 0x451   : > { %v2998_v41 = vadd.f32 %v2966_v48, %v2796_v2  ;;  %v3370_v57 = vmul.f32 %v11353_v26, %v14136_v5  ;;  %v5710_v54 = vmul.f32 %v14433_v59, %v14398_v23  ;;  %v5911_v32 = vmul.f32 %v14399_v27, %v11841_v55  ;;  %v14437_v59 = vld [vmem:[#allocation125_spill] sm:$0xff] }
 0x452   : > { %v2999_v36 = vadd.f32 %v2967_v1, %v2797_v3  ;;  %v3371_v63 = vmul.f32 %v14434_v45, %v14136_v5  ;;  %v5337_v42 = vadd.f32 %v5305_v30, %v5135_v49  ;;  %v5338_v9 = vadd.f32 %v5306_v29, %v5136_v46  ;;  %v14438_v30 = vld [vmem:[#allocation126_spill] sm:$0xff] }
 0x453   : > { %v3200_v51 = vadd.f32 %v3168_v19, %v2998_v41  ;;  %v3572_v34 = vmul.f32 %v14435_v33, %v14140_v25  ;;  %v5912_v48 = vmul.f32 %v14399_v27, %v11851_v39  ;;  %v3573_v2 = vmul.f32 %v14436_v31, %v14140_v25  ;;  %v14439_v19 = vld [vmem:[#allocation127_spill] sm:$0xff]  ;;  %v14440_v41 = vld [vmem:[#allocation128_spill] sm:$0xff]  ;;  %v11877_v31 = vld [vmem:[#allocation2 + $0xe0] sm:$0xff] }
 0x454   : > { %v3201_v26 = vadd.f32 %v3169_v38, %v2999_v36  ;;  %v3773_v55 = vmul.f32 %v14437_v59, %v14143_v43  ;;  %v5539_v1 = vadd.f32 %v5507_v28, %v5337_v42  ;;  %v5540_v3 = vadd.f32 %v5508_v60, %v5338_v9  ;;  %v14441_v38 = vld [vmem:[#allocation34_spill] sm:$0xff]  ;;  %v14442_v36 = vld [vmem:[#allocation129_spill] sm:$0xff]  ;;  %14443 = vst [vmem:[#allocation14_spill] sm:$0xff] %v11877_v31 }
 0x455   : > { %v3402_v16 = vadd.f32 %v3370_v57, %v3200_v51  ;;  %v3774_v49 = vmul.f32 %v14438_v30, %v14143_v43  ;;  %v3974_v46 = vmul.f32 %v14439_v19, %v14146_v15  ;;  %v3975_v45 = vmul.f32 %v14440_v41, %v14146_v15  ;;  %v14444_v60 = vld [vmem:[#allocation130_spill] sm:$0xff]  ;;  %v11885_v9 = vld [vmem:[#allocation2 + $0xf8] sm:$0xff] }
 0x456   : > { %v3403_v29 = vadd.f32 %v3371_v63, %v3201_v26  ;;  %v4176_v33 = vmul.f32 %v14442_v36, %v14441_v38  ;;  %v5741_v39 = vadd.f32 %v5709_v10, %v5539_v1  ;;  %v5742_v59 = vadd.f32 %v5710_v54, %v5540_v3  ;;  %v11881_v42 = vld [vmem:[#allocation2 + $0xe8] sm:$0xff]  ;;  %v11883_v63 = vld [vmem:[#allocation2 + $0xf0] sm:$0xff]  ;;  %14447 = vst [vmem:[#allocation45_spill] sm:$0xff] %v11885_v9  ;;  %v14450_v36 = vld [vmem:[#allocation41_spill] sm:$0xff] }
 0x457   : > { %v3604_v28 = vadd.f32 %v3572_v34, %v3402_v16  ;;  %v4177_v57 = vmul.f32 %v14444_v60, %v14441_v38  ;;  %14445 = vst [vmem:[#allocation76_spill] sm:$0xff] %v11881_v42  ;;  %14446 = vst [vmem:[#allocation77_spill] sm:$0xff] %v11883_v63  ;;  %v14448_v26 = vld [vmem:[#allocation131_spill] sm:$0xff]  ;;  %v14449_v19 = vld [vmem:[#allocation132_spill] sm:$0xff]  ;;  %v1773_v18 = vmul.f32 %v13707_v52, %v11877_v31 }
 0x458   : > { %v3605_v51 = vadd.f32 %v3573_v2, %v3403_v29  ;;  %v4378_v30 = vmul.f32 %v14448_v26, %v14293_v53  ;;  %v4379_v41 = vmul.f32 %v14449_v19, %v14293_v53  ;;  %v14451_v10 = vld [vmem:[#allocation133_spill] sm:$0xff]  ;;  %v11895_v34 = vld [vmem:[#allocation2 + $0x108] sm:$0xff]  ;;  %v5943_v1 = vadd.f32 %v5911_v32, %v5741_v39  ;;  %v11899_v2 = vld [vmem:[#allocation2 + $0x110] sm:$0xff] }
 0x459   : > { %v4580_v54 = vmul.f32 %v14451_v10, %v14450_v36  ;;  %v11893_v16 = vld [vmem:[#allocation2 + $0x100] sm:$0xff]  ;;  %14453 = vst [vmem:[#allocation47_spill] sm:$0xff] %v11895_v34  ;;  %v5944_v3 = vadd.f32 %v5912_v48, %v5742_v59  ;;  %v3805_v60 = vadd.f32 %v3773_v55, %v3604_v28  ;;  %14454 = vst [vmem:[#allocation48_spill] sm:$0xff] %v11899_v2  ;;  %v11907_v27 = vld [vmem:[#allocation2 + $0x118] sm:$0xff] }
 0x45a   : > { %14452 = vst [vmem:[#allocation46_spill] sm:$0xff] %v11893_v16  ;;  %v3806_v29 = vadd.f32 %v3774_v49, %v3605_v51  ;;  %v1774_v26 = vmul.f32 %v13707_v52, %v11881_v42  ;;  %v1974_v19 = vmul.f32 %v13708_v6, %v11883_v63  ;;  %v1975_v10 = vmul.f32 %v13708_v6, %v11885_v9  ;;  %v11909_v39 = vld [vmem:[#allocation2 + $0x120] sm:$0xff]  ;;  %v11915_v59 = vld [vmem:[#allocation2 + $0x128] sm:$0xff]  ;;  %v11919_v42 = vld [vmem:[#allocation2 + $0x130] sm:$0xff] }
 0x45b   : > { %14455 = vst [vmem:[#allocation16_spill] sm:$0xff] %v11907_v27  ;;  %14456 = vst [vmem:[#allocation17_spill] sm:$0xff] %v11909_v39  ;;  %v6802_v55 = vpack.c.bf16 %v5944_v3, %v5943_v1  ;;  %v4006_v32 = vadd.f32 %v3974_v46, %v3805_v60  ;;  %v2176_v48 = vmul.f32 %v13634_v0, %v11893_v16  ;;  %v14459_v1 = vld [vmem:[#allocation134_spill] sm:$0xff] }
 0x45c   : > { %v2177_v49 = vmul.f32 %v13634_v0, %v11895_v34  ;;  %14457 = vst [vmem:[#allocation18_spill] sm:$0xff] %v11915_v59  ;;  %v4007_v28 = vadd.f32 %v3975_v45, %v3806_v29  ;;  %v2006_v51 = vadd.f32 %v1974_v19, %v1773_v18  ;;  %v2007_v63 = vadd.f32 %v1975_v10, %v1774_v26  ;;  %v11929_v18 = vld [vmem:[#allocation2 + $0x138] sm:$0xff]  ;;  %v11941_v34 = vld [vmem:[#allocation2 + $0x148] sm:$0xff] }
 0x45d   : > { %v2378_v9 = vmul.f32 %v13636_v61, %v11899_v2  ;;  %14458 = vst [vmem:[#allocation19_spill] sm:$0xff] %v11919_v42  ;;  %6804 = vmatprep.subr.msk.bf16.mxu1 %vm9262_vm1, %v6802_v55  ;;  %v4208_v46 = vadd.f32 %v4176_v33, %v4006_v32  ;;  %v4581_v3 = vmul.f32 %v14459_v1, %v14450_v36  ;;  %14460 = vst [vmem:[#allocation20_spill] sm:$0xff] %v11929_v18  ;;  %v11933_v2 = vld [vmem:[#allocation2 + $0x140] sm:$0xff]  ;;  %v14462_v55 = vld [vmem:[#allocation135_spill] sm:$0xff] }
 0x45e   : > { %v2379_v60 = vmul.f32 %v13636_v61, %v11907_v27  ;;  %v2580_v45 = vmul.f32 %v13641_v56, %v11909_v39  ;;  %v4209_v29 = vadd.f32 %v4177_v57, %v4007_v28  ;;  %v2208_v26 = vadd.f32 %v2176_v48, %v2006_v51  ;;  %14461 = vst [vmem:[#allocation115_spill] sm:$0xff] %v11933_v2  ;;  %v14463_v1 = vld [vmem:[#allocation136_spill] sm:$0xff]  ;;  %v14466_v51 = vld [vmem:[#allocation137_spill] sm:$0xff]  ;;  %v11965_v31 = vld [vmem:[#allocation2 + $0x188] sm:$0xff] }
 0x45f   : > { %v2209_v19 = vadd.f32 %v2177_v49, %v2007_v63  ;;  %v2581_v10 = vmul.f32 %v13641_v56, %v11915_v59  ;;  %v4410_v33 = vadd.f32 %v4378_v30, %v4208_v46  ;;  %v4782_v32 = vmul.f32 %v14462_v55, %v14300_v8  ;;  %14464 = vst [vmem:[#allocation116_spill] sm:$0xff] %v11941_v34  ;;  %v11945_v28 = vld [vmem:[#allocation2 + $0x150] sm:$0xff]  ;;  %v14467_v55 = vld [vmem:[#allocation138_spill] sm:$0xff]  ;;  %v11953_v59 = vld [vmem:[#allocation2 + $0x158] sm:$0xff] }
 0x460   : > { %v4783_v27 = vmul.f32 %v14463_v1, %v14300_v8  ;;  %v2782_v39 = vmul.f32 %v13643_v7, %v11919_v42  ;;  %v4411_v57 = vadd.f32 %v4379_v41, %v4209_v29  ;;  %v2410_v48 = vadd.f32 %v2378_v9, %v2208_v26  ;;  %14465 = vst [vmem:[#allocation117_spill] sm:$0xff] %v11945_v28 }
 0x461   : > { %v2411_v63 = vadd.f32 %v2379_v60, %v2209_v19  ;;  %v2783_v49 = vmul.f32 %v13643_v7, %v11929_v18  ;;  %v4612_v30 = vadd.f32 %v4580_v54, %v4410_v33  ;;  %v4984_v46 = vmul.f32 %v14466_v51, %v14303_v50  ;;  %14468 = vst [vmem:[#allocation118_spill] sm:$0xff] %v11953_v59  ;;  %v14469_v19 = vld [vmem:[#allocation139_spill] sm:$0xff]  ;;  %v14470_v54 = vld [vmem:[#allocation53_spill] sm:$0xff]  ;;  %v14471_v18 = vld [vmem:[#allocation58_spill] sm:$0xff] }
 0x462   : > { %v4985_v1 = vmul.f32 %v14467_v55, %v14303_v50  ;;  %v2984_v42 = vmul.f32 %v13645_v24, %v11933_v2  ;;  %v4613_v41 = vadd.f32 %v4581_v3, %v4411_v57  ;;  %v2612_v9 = vadd.f32 %v2580_v45, %v2410_v48  ;;  %v11963_v2 = vld [vmem:[#allocation2 + $0x180] sm:$0xff]  ;;  %14473 = vst [vmem:[#allocation120_spill] sm:$0xff] %v11965_v31  ;;  %v14474_v57 = vld [vmem:[#allocation140_spill] sm:$0xff]  ;;  %v14475_v48 = vld [vmem:[#allocation15_spill] sm:$0xff] }
 0x463   : > { %v2613_v60 = vadd.f32 %v2581_v10, %v2411_v63  ;;  %v2985_v29 = vmul.f32 %v13645_v24, %v11941_v34  ;;  %v4814_v26 = vadd.f32 %v4782_v32, %v4612_v30  ;;  %v5186_v33 = vmul.f32 %v14470_v54, %v14469_v19  ;;  %14472 = vst [vmem:[#allocation119_spill] sm:$0xff] %v11963_v2  ;;  %v14476_v30 = vld [vmem:[#allocation83_spill] sm:$0xff]  ;;  %v11977_v24 = vld [vmem:[#allocation2 + $0x198] sm:$0xff] }
 0x464   : > { %v5187_v51 = vmul.f32 %v14470_v54, %v14471_v18  ;;  %v3186_v55 = vmul.f32 %v13649_v17, %v11945_v28  ;;  %v4815_v16 = vadd.f32 %v4783_v27, %v4613_v41  ;;  %v2814_v3 = vadd.f32 %v2782_v39, %v2612_v9  ;;  %v11975_v41 = vld [vmem:[#allocation2 + $0x190] sm:$0xff]  ;;  %14478 = vst [vmem:[#allocation122_spill] sm:$0xff] %v11977_v24 }
 0x465   : > { %v2815_v45 = vadd.f32 %v2783_v49, %v2613_v60  ;;  %v3187_v10 = vmul.f32 %v13649_v17, %v11953_v59  ;;  %v5016_v32 = vadd.f32 %v4984_v46, %v4814_v26  ;;  %v5388_v63 = vmul.f32 %v14475_v48, %v14474_v57  ;;  %14477 = vst [vmem:[#allocation121_spill] sm:$0xff] %v11975_v41  ;;  %v14479_v60 = vld [vmem:[#allocation21_spill] sm:$0xff] }
 0x466   : > { %v5389_v34 = vmul.f32 %v14475_v48, %v14476_v30  ;;  %v3388_v28 = vmul.f32 %v14469_v19, %v14136_v5  ;;  %v5017_v27 = vadd.f32 %v4985_v1, %v4815_v16  ;;  %v3016_v39 = vadd.f32 %v2984_v42, %v2814_v3 }
 0x467   : > { %v3017_v49 = vadd.f32 %v2985_v29, %v2815_v45  ;;  %v3389_v9 = vmul.f32 %v14471_v18, %v14136_v5  ;;  %v5218_v46 = vadd.f32 %v5186_v33, %v5016_v32  ;;  %v5590_v26 = vmul.f32 %v14479_v60, %v11963_v2  ;;  %v11989_v29 = vld [vmem:[#allocation2 + $0x1a0] sm:$0xff]  ;;  %v14481_v18 = vld [vmem:[#allocation80_spill] sm:$0xff]  ;;  %v11997_v5 = vld [vmem:[#allocation2 + $0x1a8] sm:$0xff] }
 0x468   : > { %v5591_v59 = vmul.f32 %v14479_v60, %v11965_v31  ;;  %v3590_v19 = vmul.f32 %v14474_v57, %v14140_v25  ;;  %v5219_v16 = vadd.f32 %v5187_v51, %v5017_v27  ;;  %v3218_v1 = vadd.f32 %v3186_v55, %v3016_v39  ;;  %14480 = vst [vmem:[#allocation123_spill] sm:$0xff] %v11989_v29  ;;  %v12005_v27 = vld [vmem:[#allocation2 + $0x1c0] sm:$0xff] }
 0x469   : > { %v3219_v17 = vadd.f32 %v3187_v10, %v3017_v49  ;;  %v3591_v42 = vmul.f32 %v14476_v30, %v14140_v25  ;;  %v5420_v3 = vadd.f32 %v5388_v63, %v5218_v46  ;;  %v5792_v33 = vmul.f32 %v14481_v18, %v11975_v41  ;;  %14482 = vst [vmem:[#allocation124_spill] sm:$0xff] %v11997_v5  ;;  %v12001_v30 = vld [vmem:[#allocation2 + $0x1b0] sm:$0xff]  ;;  %v12003_v63 = vld [vmem:[#allocation2 + $0x1b8] sm:$0xff] }
 0x46a   : > { %v5793_v45 = vmul.f32 %v14481_v18, %v11977_v24  ;;  %v3791_v32 = vmul.f32 %v11963_v2, %v14143_v43  ;;  %v5421_v51 = vadd.f32 %v5389_v34, %v5219_v16  ;;  %v3420_v55 = vadd.f32 %v3388_v28, %v3218_v1  ;;  %14483 = vst [vmem:[#allocation125_spill] sm:$0xff] %v12001_v30 }
 0x46b   : > { %v3421_v10 = vadd.f32 %v3389_v9, %v3219_v17  ;;  %v3792_v57 = vmul.f32 %v11965_v31, %v14143_v43  ;;  %14484 = vst [vmem:[#allocation126_spill] sm:$0xff] %v12003_v63  ;;  %14485 = vst [vmem:[#allocation127_spill] sm:$0xff] %v12005_v27  ;;  %v5622_v39 = vadd.f32 %v5590_v26, %v5420_v3 }
 0x46c   : > { %v3992_v49 = vmul.f32 %v11975_v41, %v14146_v15  ;;  %v3993_v46 = vmul.f32 %v11977_v24, %v14146_v15  ;;  %v4194_v34 = vmul.f32 %v14441_v38, %v11989_v29  ;;  %v5623_v17 = vadd.f32 %v5591_v59, %v5421_v51  ;;  %v14486_v29 = vld [vmem:[#allocation56_spill] sm:$0xff]  ;;  %v14487_v59 = vld [vmem:[#allocation59_spill] sm:$0xff]  ;;  %v14489_v51 = vld [vmem:[#allocation62_spill] sm:$0xff] }
 0x46d   : > { %v3622_v28 = vadd.f32 %v3590_v19, %v3420_v55  ;;  %v3623_v9 = vadd.f32 %v3591_v42, %v3421_v10  ;;  %v4195_v16 = vmul.f32 %v14441_v38, %v11997_v5  ;;  %v5824_v1 = vadd.f32 %v5792_v33, %v5622_v39  ;;  %v12023_v42 = vld [vmem:[#allocation2 + $0x1c8] sm:$0xff]  ;;  %v14490_v55 = vld [vmem:[#allocation57_spill] sm:$0xff]  ;;  %v14493_v5 = vld [vmem:[#allocation64_spill] sm:$0xff] }
 0x46e   : > { %v4396_v31 = vmul.f32 %v14293_v53, %v12001_v30  ;;  %v4397_v26 = vmul.f32 %v14293_v53, %v12003_v63  ;;  %v4598_v3 = vmul.f32 %v14450_v36, %v12005_v27  ;;  %v5825_v24 = vadd.f32 %v5793_v45, %v5623_v17  ;;  %14488 = vst [vmem:[#allocation128_spill] sm:$0xff] %v12023_v42  ;;  %v14491_v10 = vld [vmem:[#allocation63_spill] sm:$0xff]  ;;  %v14494_v53 = vld [vmem:[#allocation68_spill] sm:$0xff]  ;;  %v14495_v17 = vld [vmem:[#allocation22_spill] sm:$0xff] }
 0x46f   : > { %v3823_v41 = vadd.f32 %v3791_v32, %v3622_v28  ;;  %v3824_v2 = vadd.f32 %v3792_v57, %v3623_v9  ;;  %v1857_v19 = vmul.f32 %v14487_v59, %v14486_v29  ;;  %v1858_v33 = vmul.f32 %v14489_v51, %v14486_v29  ;;  %v14492_v30 = vld [vmem:[#allocation67_spill] sm:$0xff]  ;;  %v12035_v9 = vld [vmem:[#allocation2 + $0x1e0] sm:$0xff] }
 0x470   : > { %v2059_v39 = vmul.f32 %v14491_v10, %v14490_v55  ;;  %v2060_v63 = vmul.f32 %v14492_v30, %v14490_v55  ;;  %v2261_v27 = vmul.f32 %v14494_v53, %v14493_v5  ;;  %v6751_v45 = vpack.c.bf16 %v5825_v24, %v5824_v1  ;;  %14496 = vst [vmem:[#allocation129_spill] sm:$0xff] %v12035_v9  ;;  %v14497_v51 = vld [vmem:[#allocation65_spill] sm:$0xff]  ;;  %v14498_v15 = vld [vmem:[#allocation75_spill] sm:$0xff] }
 0x471   : > { %v4024_v32 = vadd.f32 %v3992_v49, %v3823_v41  ;;  %v4025_v57 = vadd.f32 %v3993_v46, %v3824_v2  ;;  %v2262_v28 = vmul.f32 %v14495_v17, %v14493_v5  ;;  %v2463_v43 = vmul.f32 %v14498_v15, %v14497_v51  ;;  %v14499_v10 = vld [vmem:[#allocation23_spill] sm:$0xff]  ;;  %v14500_v41 = vld [vmem:[#allocation93_spill] sm:$0xff] }
 0x472   : > { %v2091_v59 = vadd.f32 %v2059_v39, %v1857_v19  ;;  %v2092_v38 = vadd.f32 %v2060_v63, %v1858_v33  ;;  %v2464_v25 = vmul.f32 %v14499_v10, %v14497_v51  ;;  %6753 = vmatpush3.bf16.xpose.msk.msra.mxu0 %vm9262_vm1, %v6751_v45  ;;  %v4599_v2 = vmul.f32 %v14450_v36, %v12023_v42  ;;  %v12047_v49 = vld [vmem:[#allocation3 + $0xb0] sm:$0xff]  ;;  %v12049_v63 = vld [vmem:[#allocation3 + $0xb8] sm:$0xff]  ;;  %v12051_v46 = vld [vmem:[#allocation2 + $0x1e8] sm:$0xff] }
 0x473   : > { %v4226_v53 = vadd.f32 %v4194_v34, %v4024_v32  ;;  %v4227_v24 = vadd.f32 %v4195_v16, %v4025_v57  ;;  %v4800_v30 = vmul.f32 %v14500_v41, %v14300_v8  ;;  %14501 = vst [vmem:[#allocation130_spill] sm:$0xff] %v12047_v49  ;;  %14502 = vst [vmem:[#allocation131_spill] sm:$0xff] %v12049_v63  ;;  %v14504_v19 = vld [vmem:[#allocation69_spill] sm:$0xff]  ;;  %v14505_v33 = vld [vmem:[#allocation111_spill] sm:$0xff] }
 0x474   : > { %14503 = vst [vmem:[#allocation132_spill] sm:$0xff] %v12051_v46  ;;  %v2293_v15 = vadd.f32 %v2261_v27, %v2091_v59  ;;  %v2294_v1 = vadd.f32 %v2262_v28, %v2092_v38  ;;  %v2665_v39 = vmul.f32 %v14505_v33, %v14504_v19  ;;  %v14506_v34 = vld [vmem:[#allocation109_spill] sm:$0xff]  ;;  %v14507_v57 = vld [vmem:[#allocation96_spill] sm:$0xff]  ;;  %v5002_v10 = vmul.f32 %v14303_v50, %v12035_v9  ;;  %v12063_v42 = vld [vmem:[#allocation3 + $0xc8] sm:$0xff] }
 0x475   : > { %v2666_v16 = vmul.f32 %v14506_v34, %v14504_v19  ;;  %v4428_v45 = vadd.f32 %v4396_v31, %v4226_v53  ;;  %v4429_v32 = vadd.f32 %v4397_v26, %v4227_v24  ;;  %v4801_v17 = vmul.f32 %v14507_v57, %v14300_v8  ;;  %v12061_v41 = vld [vmem:[#allocation3 + $0xc0] sm:$0xff]  ;;  %14509 = vst [vmem:[#allocation134_spill] sm:$0xff] %v12063_v42  ;;  %v14511_v59 = vld [vmem:[#allocation71_spill] sm:$0xff]  ;;  %v12077_v8 = vld [vmem:[#allocation3 + $0xd8] sm:$0xff] }
 0x476   : > { %14508 = vst [vmem:[#allocation133_spill] sm:$0xff] %v12061_v41  ;;  %v12065_v27 = vld [vmem:[#allocation2 + $0x200] sm:$0xff]  ;;  %v2495_v38 = vadd.f32 %v2463_v43, %v2293_v15  ;;  %v2496_v28 = vadd.f32 %v2464_v25, %v2294_v1  ;;  %v2867_v33 = vmul.f32 %v14511_v59, %v12047_v49  ;;  %v2868_v31 = vmul.f32 %v14511_v59, %v12049_v63  ;;  %v12075_v9 = vld [vmem:[#allocation3 + $0xd0] sm:$0xff]  ;;  %v12079_v43 = vld [vmem:[#allocation2 + $0x208] sm:$0xff] }
 0x477   : > { %14510 = vst [vmem:[#allocation135_spill] sm:$0xff] %v12065_v27  ;;  %v4630_v26 = vadd.f32 %v4598_v3, %v4428_v45  ;;  %v4631_v53 = vadd.f32 %v4599_v2, %v4429_v32  ;;  %v5003_v24 = vmul.f32 %v14303_v50, %v12051_v46  ;;  %v14512_v34 = vld [vmem:[#allocation110_spill] sm:$0xff]  ;;  %14513 = vst [vmem:[#allocation136_spill] sm:$0xff] %v12075_v9  ;;  %v14516_v1 = vld [vmem:[#allocation73_spill] sm:$0xff] }
 0x478   : > { %v5204_v57 = vmul.f32 %v14512_v34, %v14470_v54  ;;  %14514 = vst [vmem:[#allocation137_spill] sm:$0xff] %v12077_v8  ;;  %14515 = vst [vmem:[#allocation138_spill] sm:$0xff] %v12079_v43  ;;  %v2697_v25 = vadd.f32 %v2665_v39, %v2495_v38  ;;  %v2698_v15 = vadd.f32 %v2666_v16, %v2496_v28  ;;  %v14517_v32 = vld [vmem:[#allocation94_spill] sm:$0xff] }
 0x479   : > { %v3069_v49 = vmul.f32 %v14516_v1, %v12061_v41  ;;  %v3070_v3 = vmul.f32 %v14516_v1, %v12063_v42  ;;  %v4832_v2 = vadd.f32 %v4800_v30, %v4630_v26  ;;  %v4833_v45 = vadd.f32 %v4801_v17, %v4631_v53  ;;  %v12089_v63 = vld [vmem:[#allocation2 + $0x220] sm:$0xff]  ;;  %v12099_v53 = vld [vmem:[#allocation2 + $0x228] sm:$0xff] }
 0x47a   : > { %v5205_v46 = vmul.f32 %v14517_v32, %v14470_v54  ;;  %v5406_v34 = vmul.f32 %v14475_v48, %v12065_v27  ;;  %14518 = vst [vmem:[#allocation139_spill] sm:$0xff] %v12089_v63  ;;  %v2899_v50 = vadd.f32 %v2867_v33, %v2697_v25  ;;  %v2900_v36 = vadd.f32 %v2868_v31, %v2698_v15  ;;  %v14519_v17 = vld [vmem:[#allocation113_spill] sm:$0xff]  ;;  %v14522_v25 = vld [vmem:[#allocation112_spill] sm:$0xff]  ;;  %v14529_v42 = vld [vmem:[#allocation66_spill] sm:$0xff] }
 0x47b   : > { %v3271_v39 = vmul.f32 %v14070_v40, %v12075_v9  ;;  %v3272_v16 = vmul.f32 %v14070_v40, %v12077_v8  ;;  %v5034_v38 = vadd.f32 %v5002_v10, %v4832_v2  ;;  %v5035_v28 = vadd.f32 %v5003_v24, %v4833_v45  ;;  %14520 = vst [vmem:[#allocation53_spill] sm:$0xff] %v12099_v53  ;;  %v14521_v33 = vld [vmem:[#allocation97_spill] sm:$0xff]  ;;  %v14523_v10 = vld [vmem:[#allocation95_spill] sm:$0xff] }
 0x47c   : > { %v5407_v30 = vmul.f32 %v14475_v48, %v12079_v43  ;;  %v5608_v26 = vmul.f32 %v14519_v17, %v14479_v60  ;;  %v3101_v32 = vadd.f32 %v3069_v49, %v2899_v50  ;;  %v3102_v27 = vadd.f32 %v3070_v3, %v2900_v36  ;;  %v14524_v43 = vld [vmem:[#allocation98_spill] sm:$0xff]  ;;  %v14531_v41 = vld [vmem:[#allocation101_spill] sm:$0xff] }
 0x47d   : > { %v3473_v31 = vmul.f32 %v13759_v21, %v14521_v33  ;;  %v3474_v15 = vmul.f32 %v13759_v21, %v14522_v25  ;;  %v5236_v9 = vadd.f32 %v5204_v57, %v5034_v38  ;;  %v5237_v8 = vadd.f32 %v5205_v46, %v5035_v28  ;;  %v14525_v36 = vld [vmem:[#allocation114_spill] sm:$0xff]  ;;  %v14526_v46 = vld [vmem:[#allocation103_spill] sm:$0xff] }
 0x47e   : > { %v5609_v24 = vmul.f32 %v14523_v10, %v14479_v60  ;;  %v5810_v2 = vmul.f32 %v14481_v18, %v12089_v63  ;;  %v3303_v45 = vadd.f32 %v3271_v39, %v3101_v32  ;;  %v3304_v17 = vadd.f32 %v3272_v16, %v3102_v27  ;;  %v14527_v10 = vld [vmem:[#allocation105_spill] sm:$0xff]  ;;  %v14533_v60 = vld [vmem:[#allocation107_spill] sm:$0xff] }
 0x47f   : > { %v3675_v50 = vmul.f32 %v13763_v13, %v14524_v43  ;;  %v3676_v49 = vmul.f32 %v13763_v13, %v14525_v36  ;;  %v5438_v3 = vadd.f32 %v5406_v34, %v5236_v9  ;;  %v5439_v33 = vadd.f32 %v5407_v30, %v5237_v8  ;;  %v14528_v27 = vld [vmem:[#allocation61_spill] sm:$0xff]  ;;  %v14530_v8 = vld [vmem:[#allocation100_spill] sm:$0xff] }
 0x480   : > { %v5811_v57 = vmul.f32 %v14481_v18, %v12099_v53  ;;  %v3875_v38 = vmul.f32 %v13768_v62, %v14526_v46  ;;  %v3505_v28 = vadd.f32 %v3473_v31, %v3303_v45  ;;  %v3506_v25 = vadd.f32 %v3474_v15, %v3304_v17  ;;  %v14532_v15 = vld [vmem:[#allocation70_spill] sm:$0xff] }
 0x481   : > { %v3876_v39 = vmul.f32 %v13768_v62, %v14527_v10  ;;  %v4077_v16 = vmul.f32 %v14220_v20, %v14528_v27  ;;  %v5640_v32 = vadd.f32 %v5608_v26, %v5438_v3  ;;  %v5641_v63 = vadd.f32 %v5609_v24, %v5439_v33  ;;  %v14534_v24 = vld [vmem:[#allocation72_spill] sm:$0xff] }
 0x482   : > { %v4078_v9 = vmul.f32 %v14220_v20, %v14529_v42  ;;  %v4279_v34 = vmul.f32 %v14359_v12, %v14530_v8  ;;  %v3707_v30 = vadd.f32 %v3675_v50, %v3505_v28  ;;  %v3708_v53 = vadd.f32 %v3676_v49, %v3506_v25  ;;  %v5947_v28 = vld [vmem:[#allocation9] sm:$0xff] }
 0x483   : > { %v4280_v31 = vmul.f32 %v14359_v12, %v14531_v41  ;;  %v4481_v45 = vmul.f32 %v14364_v35, %v14532_v15  ;;  %v5842_v17 = vadd.f32 %v5810_v2, %v5640_v32  ;;  %v5843_v18 = vadd.f32 %v5811_v57, %v5641_v63  ;;  %6710 = vmatprep.mubr.msk.f32.mxu1 %vm455_vm0, %v5947_v28 }
 0x484   : > { %v4482_v26 = vmul.f32 %v14364_v35, %v14533_v60  ;;  %v4683_v3 = vmul.f32 %v14370_v44, %v14534_v24  ;;  %v3907_v33 = vadd.f32 %v3875_v38, %v3707_v30  ;;  %v3908_v48 = vadd.f32 %v3876_v39, %v3708_v53  ;;  %v14535_v39 = vld [vmem:[#allocation74_spill] sm:$0xff]  ;;  %6670 = vmatprep.mubr.msk.f32.mxu0 %vm455_vm0, %v5947_v28  ;;  %v12165_v28 = vld [vmem:[#allocation3 + $0x178] sm:$0xff] }
 0x485   : > { %v1875_v50 = vmul.f32 %v14524_v43, %v14486_v29  ;;  %v1876_v49 = vmul.f32 %v14525_v36, %v14486_v29  ;;  %v6754_v25 = vpack.c.bf16 %v5843_v18, %v5842_v17  ;;  %v2077_v2 = vmul.f32 %v14526_v46, %v14490_v55  ;;  %v12151_v18 = vld [vmem:[#allocation3 + $0x160] sm:$0xff]  ;;  %v12153_v46 = vld [vmem:[#allocation3 + $0x168] sm:$0xff]  ;;  %14540 = vst [vmem:[#allocation56_spill] sm:$0xff] %v12165_v28 }
 0x486   : > { %v2078_v63 = vmul.f32 %v14527_v10, %v14490_v55  ;;  %v2279_v57 = vmul.f32 %v14528_v27, %v14493_v5  ;;  %v4109_v53 = vadd.f32 %v4077_v16, %v3907_v33  ;;  %v4110_v38 = vadd.f32 %v4078_v9, %v3908_v48  ;;  %14536 = vst [vmem:[#allocation58_spill] sm:$0xff] %v12151_v18  ;;  %v14538_v30 = vld [vmem:[#allocation54_spill] sm:$0xff]  ;;  %v12163_v33 = vld [vmem:[#allocation3 + $0x170] sm:$0xff] }
 0x487   : > { %v4684_v43 = vmul.f32 %v14370_v44, %v14535_v39  ;;  %v2280_v36 = vmul.f32 %v14529_v42, %v14493_v5  ;;  %6756 = vmatprep.subr.msk.bf16.mxu0 %vm9262_vm1, %v6754_v25  ;;  %14537 = vst [vmem:[#allocation140_spill] sm:$0xff] %v12153_v46  ;;  %v2109_v10 = vadd.f32 %v2077_v2, %v1875_v50  ;;  %14539 = vst [vmem:[#allocation83_spill] sm:$0xff] %v12163_v33 }
 0x488   : > { %v2110_v27 = vadd.f32 %v2078_v63, %v1876_v49  ;;  %v2481_v48 = vmul.f32 %v14530_v8, %v14497_v51  ;;  %v2482_v16 = vmul.f32 %v14531_v41, %v14497_v51  ;;  %v4311_v32 = vadd.f32 %v4279_v34, %v4109_v53 }
 0x489   : > { %v4312_v9 = vadd.f32 %v4280_v31, %v4110_v38  ;;  %v4885_v42 = vmul.f32 %v14378_v47, %v11701_v37  ;;  %v4886_v17 = vmul.f32 %v14378_v47, %v14538_v30  ;;  %v2311_v50 = vadd.f32 %v2279_v57, %v2109_v10 }
 0x48a   : > { %v2312_v49 = vadd.f32 %v2280_v36, %v2110_v27  ;;  %v2683_v8 = vmul.f32 %v14532_v15, %v14504_v19  ;;  %v2684_v41 = vmul.f32 %v14533_v60, %v14504_v19  ;;  %v4513_v34 = vadd.f32 %v4481_v45, %v4311_v32 }
 0x48b   : > { %v4514_v31 = vadd.f32 %v4482_v26, %v4312_v9  ;;  %v5087_v25 = vmul.f32 %v14383_v58, %v12151_v18  ;;  %v5088_v2 = vmul.f32 %v14383_v58, %v12153_v46  ;;  %v2513_v63 = vadd.f32 %v2481_v48, %v2311_v50 }
 0x48c   : > { %v2514_v53 = vadd.f32 %v2482_v16, %v2312_v49  ;;  %v2885_v57 = vmul.f32 %v14534_v24, %v14511_v59  ;;  %v2886_v38 = vmul.f32 %v14535_v39, %v14511_v59  ;;  %v4715_v15 = vadd.f32 %v4683_v3, %v4513_v34  ;;  %v14541_v39 = vld [vmem:[#allocation55_spill] sm:$0xff] }
 0x48d   : > { %v4716_v36 = vadd.f32 %v4684_v43, %v4514_v31  ;;  %v5289_v60 = vmul.f32 %v14389_v4, %v12163_v33  ;;  %v5290_v45 = vmul.f32 %v14389_v4, %v12165_v28  ;;  %v2715_v26 = vadd.f32 %v2683_v8, %v2513_v63  ;;  %v12201_v34 = vld [vmem:[#allocation3 + $0x188] sm:$0xff] }
 0x48e   : > { %v2716_v10 = vadd.f32 %v2684_v41, %v2514_v53  ;;  %v3087_v27 = vmul.f32 %v11701_v37, %v14516_v1  ;;  %v3088_v48 = vmul.f32 %v14538_v30, %v14516_v1  ;;  %v4917_v24 = vadd.f32 %v4885_v42, %v4715_v15  ;;  %v14542_v30 = vld [vmem:[#allocation60_spill] sm:$0xff]  ;;  %14545 = vst [vmem:[#allocation62_spill] sm:$0xff] %v12201_v34 }
 0x48f   : > { %v4918_v16 = vadd.f32 %v4886_v17, %v4716_v36  ;;  %v5491_v3 = vmul.f32 %v11705_v14, %v14394_v22  ;;  %v5492_v43 = vmul.f32 %v14541_v39, %v14394_v22  ;;  %v2917_v32 = vadd.f32 %v2885_v57, %v2715_v26  ;;  %v14543_v17 = vld [vmem:[#allocation84_spill] sm:$0xff]  ;;  %v12199_v14 = vld [vmem:[#allocation3 + $0x180] sm:$0xff] }
 0x490   : > { %v2918_v9 = vadd.f32 %v2886_v38, %v2716_v10  ;;  %v3289_v50 = vmul.f32 %v12151_v18, %v14070_v40  ;;  %v3290_v49 = vmul.f32 %v12153_v46, %v14070_v40  ;;  %v5119_v37 = vadd.f32 %v5087_v25, %v4917_v24  ;;  %14544 = vst [vmem:[#allocation59_spill] sm:$0xff] %v12199_v14  ;;  %v12207_v25 = vld [vmem:[#allocation3 + $0x190] sm:$0xff]  ;;  %v14548_v36 = vld [vmem:[#allocation85_spill] sm:$0xff] }
 0x491   : > { %v5120_v8 = vadd.f32 %v5088_v2, %v4918_v16  ;;  %v5693_v42 = vmul.f32 %v14542_v30, %v14398_v23  ;;  %v5694_v41 = vmul.f32 %v14543_v17, %v14398_v23  ;;  %v3119_v31 = vadd.f32 %v3087_v27, %v2917_v32  ;;  %14546 = vst [vmem:[#allocation57_spill] sm:$0xff] %v12207_v25  ;;  %v12209_v2 = vld [vmem:[#allocation3 + $0x198] sm:$0xff]  ;;  %v1721_v17 = vld [vmem:[#allocation2 + $0x60] sm:$0xff] }
 0x492   : > { %v3120_v63 = vadd.f32 %v3088_v48, %v2918_v9  ;;  %v3491_v53 = vmul.f32 %v12163_v33, %v13759_v21  ;;  %v3492_v57 = vmul.f32 %v12165_v28, %v13759_v21  ;;  %14547 = vst [vmem:[#allocation63_spill] sm:$0xff] %v12209_v2  ;;  %v5321_v38 = vadd.f32 %v5289_v60, %v5119_v37  ;;  %v14549_v26 = vld [vmem:[#allocation92_spill] sm:$0xff]  ;;  %v12272_v33 = vld [vmem:[#allocation2 + $0xc0] sm:$0xff] }
 0x493   : > { %v5322_v15 = vadd.f32 %v5290_v45, %v5120_v8  ;;  %v5895_v10 = vmul.f32 %v14549_v26, %v14548_v36  ;;  %v14550_v24 = vld [vmem:[#allocation24_spill] sm:$0xff]  ;;  %v3321_v27 = vadd.f32 %v3289_v50, %v3119_v31  ;;  %v3693_v39 = vmul.f32 %v13763_v13, %v12199_v14  ;;  %14569 = vst [vmem:[#allocation65_spill] sm:$0xff] %v12272_v33 }
 0x494   : > { %v5896_v16 = vmul.f32 %v14549_v26, %v14550_v24  ;;  %v3322_v48 = vadd.f32 %v3290_v49, %v3120_v63  ;;  %v3694_v32 = vmul.f32 %v13763_v13, %v12201_v34  ;;  %v5523_v9 = vadd.f32 %v5491_v3, %v5321_v38  ;;  %v14551_v3 = vld [vmem:[#allocation25_spill] sm:$0xff]  ;;  %v14552_v38 = vld [vmem:[#allocation26_spill] sm:$0xff]  ;;  %v12231_v34 = vld [vmem:[#allocation2 + $0x70] sm:$0xff] }
 0x495   : > { %v5524_v30 = vadd.f32 %v5492_v43, %v5322_v15  ;;  %v3893_v60 = vmul.f32 %v13768_v62, %v12207_v25  ;;  %v3894_v45 = vmul.f32 %v13768_v62, %v12209_v2  ;;  %v3523_v37 = vadd.f32 %v3491_v53, %v3321_v27  ;;  %v1722_v25 = vld [vmem:[#allocation2 + $0x68] sm:$0xff]  ;;  %14553 = vst [vmem:[#allocation67_spill] sm:$0xff] %v12231_v34  ;;  %v12237_v2 = vld [vmem:[#allocation2 + $0x78] sm:$0xff] }
 0x496   : > { %v3524_v8 = vadd.f32 %v3492_v57, %v3322_v48  ;;  %v4095_v50 = vmul.f32 %v14548_v36, %v14220_v20  ;;  %v4096_v49 = vmul.f32 %v14550_v24, %v14220_v20  ;;  %v5725_v31 = vadd.f32 %v5693_v42, %v5523_v9  ;;  %v14554_v27 = vld [vmem:[#allocation27_spill] sm:$0xff]  ;;  %v14555_v48 = vld [vmem:[#allocation29_spill] sm:$0xff]  ;;  %14556 = vst [vmem:[#allocation64_spill] sm:$0xff] %v12237_v2  ;;  %v14557_v9 = vld [vmem:[#allocation30_spill] sm:$0xff] }
 0x497   : > { %v5726_v63 = vadd.f32 %v5694_v41, %v5524_v30  ;;  %v4297_v43 = vmul.f32 %v14551_v3, %v14359_v12  ;;  %v4298_v15 = vmul.f32 %v14552_v38, %v14359_v12  ;;  %v3725_v53 = vadd.f32 %v3693_v39, %v3523_v37  ;;  %v12287_v46 = vld [vmem:[#allocation2 + $0xd8] sm:$0xff] }
 0x498   : > { %v3726_v57 = vadd.f32 %v3694_v32, %v3524_v8  ;;  %v4499_v36 = vmul.f32 %v14554_v27, %v14364_v35  ;;  %v4500_v24 = vmul.f32 %v14555_v48, %v14364_v35  ;;  %v5927_v42 = vadd.f32 %v5895_v10, %v5725_v31  ;;  %v14558_v27 = vld [vmem:[#allocation28_spill] sm:$0xff]  ;;  %14574 = vst [vmem:[#allocation93_spill] sm:$0xff] %v12287_v46 }
 0x499   : > { %v5928_v41 = vadd.f32 %v5896_v16, %v5726_v63  ;;  %v4701_v30 = vmul.f32 %v14557_v9, %v14370_v44  ;;  %v1757_v3 = vmul.f32 %v13707_v52, %v1721_v17  ;;  %v3925_v38 = vadd.f32 %v3893_v60, %v3725_v53  ;;  %v14559_v16 = vld [vmem:[#allocation33_spill] sm:$0xff]  ;;  %v5069_v17 = vld [vmem:[#allocation3 + $0x1f0] sm:$0xff] }
 0x49a   : > { %v3926_v14 = vadd.f32 %v3894_v45, %v3726_v57  ;;  %v1758_v39 = vmul.f32 %v13707_v52, %v1722_v25  ;;  %v1958_v32 = vmul.f32 %v13708_v6, %v12231_v34  ;;  %v1959_v8 = vmul.f32 %v13708_v6, %v12237_v2  ;;  %v14560_v45 = vld [vmem:[#allocation31_spill] sm:$0xff]  ;;  %v14593_v2 = vld [vmem:[#allocation18_spill] sm:$0xff]  ;;  %v14598_v34 = vld [vmem:[#allocation41_spill] sm:$0xff] }
 0x49b   : > { %v6805_v37 = vpack.c.bf16 %v5928_v41, %v5927_v42  ;;  %v2160_v10 = vmul.f32 %v14558_v27, %v13634_v0  ;;  %v2161_v31 = vmul.f32 %v14559_v16, %v13634_v0  ;;  %v4127_v63 = vadd.f32 %v4095_v50, %v3925_v38  ;;  %v14561_v53 = vld [vmem:[#allocation35_spill] sm:$0xff]  ;;  %v14562_v42 = vld [vmem:[#allocation36_spill] sm:$0xff]  ;;  %v14563_v27 = vld [vmem:[#allocation37_spill] sm:$0xff] }
 0x49c   : > { %v4128_v48 = vadd.f32 %v4096_v49, %v3926_v14  ;;  %v1990_v60 = vadd.f32 %v1958_v32, %v1757_v3  ;;  %v2362_v25 = vmul.f32 %v14560_v45, %v13636_v61  ;;  %v4702_v57 = vmul.f32 %v14561_v53, %v14370_v44  ;;  %v12261_v50 = vld [vmem:[#allocation2 + $0xb0] sm:$0xff]  ;;  %v5070_v3 = vld [vmem:[#allocation3 + $0x1f8] sm:$0xff] }
 0x49d   : > { %6807 = vmatpush3.bf16.xpose.msk.msra.mxu1 %vm9262_vm1, %v6805_v37  ;;  %v4903_v41 = vmul.f32 %v14562_v42, %v14378_v47  ;;  %v1991_v9 = vadd.f32 %v1959_v8, %v1758_v39  ;;  %v2363_v16 = vmul.f32 %v14563_v27, %v13636_v61  ;;  %14564 = vst [vmem:[#allocation68_spill] sm:$0xff] %v12261_v50  ;;  %v14565_v32 = vld [vmem:[#allocation39_spill] sm:$0xff]  ;;  %v12265_v37 = vld [vmem:[#allocation2 + $0xb8] sm:$0xff]  ;;  %v14568_v8 = vld [vmem:[#allocation42_spill] sm:$0xff] }
 0x49e   : > { %v4329_v14 = vadd.f32 %v4297_v43, %v4127_v63  ;;  %v4330_v49 = vadd.f32 %v4298_v15, %v4128_v48  ;;  %v2192_v38 = vadd.f32 %v2160_v10, %v1990_v60  ;;  %v2564_v45 = vmul.f32 %v14565_v32, %v13641_v56  ;;  %14566 = vst [vmem:[#allocation22_spill] sm:$0xff] %v12265_v37  ;;  %v14567_v53 = vld [vmem:[#allocation40_spill] sm:$0xff]  ;;  %v12276_v60 = vld [vmem:[#allocation2 + $0xc8] sm:$0xff] }
 0x49f   : > { %v4904_v28 = vmul.f32 %v14567_v53, %v14378_v47  ;;  %v5105_v42 = vmul.f32 %v14383_v58, %v5069_v17  ;;  %v2193_v39 = vadd.f32 %v2161_v31, %v1991_v9  ;;  %v2565_v27 = vmul.f32 %v14568_v8, %v13641_v56  ;;  %v5473_v63 = vld [vmem:[#allocation3 + $0x210] sm:$0xff]  ;;  %14570 = vst [vmem:[#allocation75_spill] sm:$0xff] %v12276_v60 }
 0x4a0   : > { %v4531_v43 = vadd.f32 %v4499_v36, %v4329_v14  ;;  %v4532_v15 = vadd.f32 %v4500_v24, %v4330_v49  ;;  %v2394_v10 = vadd.f32 %v2362_v25, %v2192_v38  ;;  %v2766_v48 = vmul.f32 %v13643_v7, %v12261_v50  ;;  %v14571_v53 = vld [vmem:[#allocation43_spill] sm:$0xff]  ;;  %v5474_v14 = vld [vmem:[#allocation3 + $0x218] sm:$0xff] }
 0x4a1   : > { %v5106_v32 = vmul.f32 %v14383_v58, %v5070_v3  ;;  %v5307_v17 = vmul.f32 %v14571_v53, %v14389_v4  ;;  %v2395_v31 = vadd.f32 %v2363_v16, %v2193_v39  ;;  %v2767_v9 = vmul.f32 %v13643_v7, %v12265_v37  ;;  %v12283_v8 = vld [vmem:[#allocation2 + $0xd0] sm:$0xff]  ;;  %v14575_v3 = vld [vmem:[#allocation49_spill] sm:$0xff] }
 0x4a2   : > { %14572 = vst [vmem:[#allocation23_spill] sm:$0xff] %v12283_v8  ;;  %v4733_v36 = vadd.f32 %v4701_v30, %v4531_v43  ;;  %v4734_v24 = vadd.f32 %v4702_v57, %v4532_v15  ;;  %v2596_v25 = vadd.f32 %v2564_v45, %v2394_v10  ;;  %v14573_v49 = vld [vmem:[#allocation99_spill] sm:$0xff]  ;;  %v5308_v58 = vmul.f32 %v14575_v3, %v14389_v4  ;;  %v14576_v45 = vld [vmem:[#allocation102_spill] sm:$0xff]  ;;  %v5878_v3 = vld [vmem:[#allocation3 + $0x238] sm:$0xff] }
 0x4a3   : > { %v2968_v38 = vmul.f32 %v14573_v49, %v12272_v33  ;;  %v5509_v53 = vmul.f32 %v14394_v22, %v5473_v63  ;;  %v2597_v16 = vadd.f32 %v2565_v27, %v2395_v31  ;;  %v2969_v39 = vmul.f32 %v14573_v49, %v12276_v60  ;;  %v5877_v30 = vld [vmem:[#allocation3 + $0x230] sm:$0xff]  ;;  %v14577_v10 = vld [vmem:[#allocation50_spill] sm:$0xff] }
 0x4a4   : > { %v4935_v18 = vadd.f32 %v4903_v41, %v4733_v36  ;;  %v4936_v47 = vadd.f32 %v4904_v28, %v4734_v24  ;;  %v2798_v57 = vadd.f32 %v2766_v48, %v2596_v25  ;;  %v3170_v43 = vmul.f32 %v14576_v45, %v12283_v8  ;;  %v14578_v41 = vld [vmem:[#allocation14_spill] sm:$0xff]  ;;  %v14579_v28 = vld [vmem:[#allocation104_spill] sm:$0xff]  ;;  %v14587_v60 = vld [vmem:[#allocation47_spill] sm:$0xff] }
 0x4a5   : > { %v5510_v15 = vmul.f32 %v14394_v22, %v5474_v14  ;;  %v5711_v33 = vmul.f32 %v14577_v10, %v14398_v23  ;;  %v2799_v37 = vadd.f32 %v2767_v9, %v2597_v16  ;;  %v3171_v63 = vmul.f32 %v14576_v45, %v12287_v46  ;;  %v14580_v48 = vld [vmem:[#allocation52_spill] sm:$0xff]  ;;  %v14582_v46 = vld [vmem:[#allocation77_spill] sm:$0xff] }
 0x4a6   : > { %v5137_v27 = vadd.f32 %v5105_v42, %v4935_v18  ;;  %v5138_v31 = vadd.f32 %v5106_v32, %v4936_v47  ;;  %v3000_v4 = vadd.f32 %v2968_v38, %v2798_v57  ;;  %v3372_v36 = vmul.f32 %v14579_v28, %v14578_v41  ;;  %v14581_v22 = vld [vmem:[#allocation76_spill] sm:$0xff]  ;;  %v14583_v18 = vld [vmem:[#allocation106_spill] sm:$0xff]  ;;  %v14584_v38 = vld [vmem:[#allocation45_spill] sm:$0xff] }
 0x4a7   : > { %v5712_v24 = vmul.f32 %v14580_v48, %v14398_v23  ;;  %v5913_v25 = vmul.f32 %v14549_v26, %v5877_v30  ;;  %v3001_v14 = vadd.f32 %v2969_v39, %v2799_v37  ;;  %v3373_v10 = vmul.f32 %v14579_v28, %v14581_v22  ;;  %v14585_v41 = vld [vmem:[#allocation46_spill] sm:$0xff]  ;;  %v14586_v48 = vld [vmem:[#allocation108_spill] sm:$0xff] }
 0x4a8   : > { %v5339_v9 = vadd.f32 %v5307_v17, %v5137_v27  ;;  %v5340_v16 = vadd.f32 %v5308_v58, %v5138_v31  ;;  %v3202_v8 = vadd.f32 %v3170_v43, %v3000_v4  ;;  %v3574_v47 = vmul.f32 %v14583_v18, %v14582_v46  ;;  %v14588_v4 = vld [vmem:[#allocation48_spill] sm:$0xff] }
 0x4a9   : > { %v5914_v42 = vmul.f32 %v14549_v26, %v5878_v3  ;;  %v3203_v32 = vadd.f32 %v3171_v63, %v3001_v14  ;;  %v3575_v57 = vmul.f32 %v14583_v18, %v14584_v38  ;;  %v3775_v23 = vmul.f32 %v14586_v48, %v14585_v41  ;;  %v14589_v17 = vld [vmem:[#allocation32_spill] sm:$0xff]  ;;  %v14591_v63 = vld [vmem:[#allocation17_spill] sm:$0xff]  ;;  %v14592_v3 = vld [vmem:[#allocation34_spill] sm:$0xff] }
 0x4aa   : > { %v5541_v30 = vadd.f32 %v5509_v53, %v5339_v9  ;;  %v5542_v37 = vadd.f32 %v5510_v15, %v5340_v16  ;;  %v3404_v39 = vadd.f32 %v3372_v36, %v3202_v8  ;;  %v3776_v22 = vmul.f32 %v14586_v48, %v14587_v60  ;;  %v14590_v27 = vld [vmem:[#allocation16_spill] sm:$0xff]  ;;  %v14594_v15 = vld [vmem:[#allocation19_spill] sm:$0xff]  ;;  %v14595_v36 = vld [vmem:[#allocation38_spill] sm:$0xff] }
 0x4ab   : > { %v3405_v58 = vadd.f32 %v3373_v10, %v3203_v32  ;;  %v3976_v43 = vmul.f32 %v14589_v17, %v14588_v4  ;;  %v3977_v31 = vmul.f32 %v14589_v17, %v14590_v27  ;;  %v4178_v14 = vmul.f32 %v14592_v3, %v14591_v63  ;;  %v14596_v10 = vld [vmem:[#allocation20_spill] sm:$0xff]  ;;  %v14597_v32 = vld [vmem:[#allocation115_spill] sm:$0xff] }
 0x4ac   : > { %v5743_v26 = vadd.f32 %v5711_v33, %v5541_v30  ;;  %v5744_v50 = vadd.f32 %v5712_v24, %v5542_v37  ;;  %v3606_v44 = vadd.f32 %v3574_v47, %v3404_v39  ;;  %v4179_v53 = vmul.f32 %v14592_v3, %v14593_v2 }
 0x4ad   : > { %v3607_v8 = vadd.f32 %v3575_v57, %v3405_v58  ;;  %v4380_v9 = vmul.f32 %v14595_v36, %v14594_v15  ;;  %v4381_v16 = vmul.f32 %v14595_v36, %v14596_v10  ;;  %v4582_v35 = vmul.f32 %v14598_v34, %v14597_v32 }
 0x4ae   : > { %v5945_v12 = vadd.f32 %v5913_v25, %v5743_v26  ;;  %v5946_v20 = vadd.f32 %v5914_v42, %v5744_v50  ;;  %v3807_v62 = vadd.f32 %v3775_v23, %v3606_v44  ;;  %v1775_v33 = vmul.f32 %v14582_v46, %v13707_v52 }
 0x4af   : > { %v3808_v24 = vadd.f32 %v3776_v22, %v3607_v8  ;;  %v1776_v47 = vmul.f32 %v14584_v38, %v13707_v52  ;;  %v1976_v57 = vmul.f32 %v14585_v41, %v13708_v6  ;;  %v1977_v30 = vmul.f32 %v14587_v60, %v13708_v6  ;;  %v14599_v38 = vld [vmem:[#allocation116_spill] sm:$0xff]  ;;  %v12353_v41 = vld [vmem:[#allocation2 + $0x160] sm:$0xff]  ;;  %v12355_v22 = vld [vmem:[#allocation2 + $0x168] sm:$0xff] }
 0x4b0   : > { %v6808_v37 = vpack.c.bf16 %v5946_v20, %v5945_v12  ;;  %v4008_v39 = vadd.f32 %v3976_v43, %v3807_v62  ;;  %v2178_v26 = vmul.f32 %v14588_v4, %v13634_v0  ;;  %v2179_v44 = vmul.f32 %v14590_v27, %v13634_v0  ;;  %14600 = vst [vmem:[#allocation69_spill] sm:$0xff] %v12353_v41  ;;  %v14604_v8 = vld [vmem:[#allocation118_spill] sm:$0xff] }
 0x4b1   : > { %v4009_v23 = vadd.f32 %v3977_v31, %v3808_v24  ;;  %v2008_v46 = vadd.f32 %v1976_v57, %v1775_v33  ;;  %v2009_v50 = vadd.f32 %v1977_v30, %v1776_v47  ;;  %v2380_v25 = vmul.f32 %v14591_v63, %v13636_v61  ;;  %14601 = vst [vmem:[#allocation111_spill] sm:$0xff] %v12355_v22  ;;  %v14602_v31 = vld [vmem:[#allocation117_spill] sm:$0xff]  ;;  %v14603_v63 = vld [vmem:[#allocation44_spill] sm:$0xff]  ;;  %v14607_v30 = vld [vmem:[#allocation51_spill] sm:$0xff] }
 0x4b2   : > { %6810 = vmatprep.subr.msk.bf16.mxu1 %vm9262_vm1, %v6808_v37  ;;  %v4210_v42 = vadd.f32 %v4178_v14, %v4008_v39  ;;  %v4583_v20 = vmul.f32 %v14598_v34, %v14599_v38  ;;  %v2381_v62 = vmul.f32 %v14593_v2, %v13636_v61  ;;  %v2582_v12 = vmul.f32 %v14594_v15, %v13641_v56  ;;  %v12365_v33 = vld [vmem:[#allocation2 + $0x170] sm:$0xff]  ;;  %v12367_v24 = vld [vmem:[#allocation2 + $0x178] sm:$0xff] }
 0x4b3   : > { %v4211_v60 = vadd.f32 %v4179_v53, %v4009_v23  ;;  %v2210_v58 = vadd.f32 %v2178_v26, %v2008_v46  ;;  %v2211_v4 = vadd.f32 %v2179_v44, %v2009_v50  ;;  %v2583_v43 = vmul.f32 %v14596_v10, %v13641_v56  ;;  %14605 = vst [vmem:[#allocation109_spill] sm:$0xff] %v12365_v33 }
 0x4b4   : > { %v4412_v27 = vadd.f32 %v4380_v9, %v4210_v42  ;;  %v4784_v14 = vmul.f32 %v14603_v63, %v14602_v31  ;;  %v4785_v2 = vmul.f32 %v14603_v63, %v14604_v8  ;;  %v2784_v15 = vmul.f32 %v14597_v32, %v13643_v7  ;;  %14606 = vst [vmem:[#allocation96_spill] sm:$0xff] %v12367_v24 }
 0x4b5   : > { %v4413_v53 = vadd.f32 %v4381_v16, %v4211_v60  ;;  %v2412_v47 = vadd.f32 %v2380_v25, %v2210_v58  ;;  %v2413_v57 = vadd.f32 %v2381_v62, %v2211_v4  ;;  %v2785_v10 = vmul.f32 %v14599_v38, %v13643_v7  ;;  %v14609_v58 = vld [vmem:[#allocation15_spill] sm:$0xff] }
 0x4b6   : > { %v4614_v9 = vadd.f32 %v4582_v35, %v4412_v27  ;;  %v4986_v37 = vmul.f32 %v14607_v30, %v12353_v41  ;;  %v4987_v39 = vmul.f32 %v14607_v30, %v12355_v22  ;;  %v2986_v32 = vmul.f32 %v14602_v31, %v14573_v49  ;;  %v14610_v4 = vld [vmem:[#allocation119_spill] sm:$0xff]  ;;  %v14611_v27 = vld [vmem:[#allocation120_spill] sm:$0xff] }
 0x4b7   : > { %v4615_v16 = vadd.f32 %v4583_v20, %v4413_v53  ;;  %v2614_v26 = vadd.f32 %v2582_v12, %v2412_v47  ;;  %v2615_v44 = vadd.f32 %v2583_v43, %v2413_v57  ;;  %v2987_v23 = vmul.f32 %v14604_v8, %v14573_v49  ;;  %v12387_v12 = vld [vmem:[#allocation2 + $0x180] sm:$0xff]  ;;  %v12395_v8 = vld [vmem:[#allocation2 + $0x188] sm:$0xff]  ;;  %v12399_v57 = vld [vmem:[#allocation2 + $0x190] sm:$0xff] }
 0x4b8   : > { %v4816_v46 = vadd.f32 %v4784_v14, %v4614_v9  ;;  %v5188_v50 = vmul.f32 %v14470_v54, %v12365_v33  ;;  %v5189_v35 = vmul.f32 %v14470_v54, %v12367_v24  ;;  %v3188_v25 = vmul.f32 %v12353_v41, %v14576_v45  ;;  %14608 = vst [vmem:[#allocation71_spill] sm:$0xff] %v12387_v12  ;;  %v14614_v9 = vld [vmem:[#allocation21_spill] sm:$0xff] }
 0x4b9   : > { %v4817_v42 = vadd.f32 %v4785_v2, %v4615_v16  ;;  %v2816_v38 = vadd.f32 %v2784_v15, %v2614_v26  ;;  %v2817_v62 = vadd.f32 %v2785_v10, %v2615_v44  ;;  %v3189_v20 = vmul.f32 %v12355_v22, %v14576_v45  ;;  %14612 = vst [vmem:[#allocation110_spill] sm:$0xff] %v12395_v8  ;;  %v14616_v26 = vld [vmem:[#allocation122_spill] sm:$0xff]  ;;  %v2228_v22 = vld [vmem:[#allocation3 + $0x98] sm:$0xff] }
 0x4ba   : > { %v5018_v60 = vadd.f32 %v4986_v37, %v4816_v46  ;;  %v5390_v43 = vmul.f32 %v14610_v4, %v14609_v58  ;;  %v5391_v31 = vmul.f32 %v14611_v27, %v14609_v58  ;;  %v3390_v14 = vmul.f32 %v12365_v33, %v14579_v28  ;;  %14613 = vst [vmem:[#allocation73_spill] sm:$0xff] %v12399_v57  ;;  %v14615_v37 = vld [vmem:[#allocation121_spill] sm:$0xff]  ;;  %v14620_v27 = vld [vmem:[#allocation124_spill] sm:$0xff] }
 0x4bb   : > { %v5019_v2 = vadd.f32 %v4987_v39, %v4817_v42  ;;  %v3018_v15 = vadd.f32 %v2986_v32, %v2816_v38  ;;  %v3019_v53 = vadd.f32 %v2987_v23, %v2817_v62  ;;  %v3391_v47 = vmul.f32 %v12367_v24, %v14579_v28  ;;  %v12407_v4 = vld [vmem:[#allocation2 + $0x198] sm:$0xff]  ;;  %v14618_v62 = vld [vmem:[#allocation123_spill] sm:$0xff] }
 0x4bc   : > { %v5220_v10 = vadd.f32 %v5188_v50, %v5018_v60  ;;  %v5592_v16 = vmul.f32 %v14615_v37, %v14614_v9  ;;  %v5593_v44 = vmul.f32 %v14616_v26, %v14614_v9  ;;  %v3592_v46 = vmul.f32 %v14583_v18, %v12387_v12  ;;  %14617 = vst [vmem:[#allocation94_spill] sm:$0xff] %v12407_v4  ;;  %v14619_v50 = vld [vmem:[#allocation80_spill] sm:$0xff] }
 0x4bd   : > { %v5221_v39 = vadd.f32 %v5189_v35, %v5019_v2  ;;  %v3220_v32 = vadd.f32 %v3188_v25, %v3018_v15  ;;  %v3221_v23 = vadd.f32 %v3189_v20, %v3019_v53  ;;  %v3593_v42 = vmul.f32 %v14583_v18, %v12395_v8  ;;  %v1823_v2 = vld [vmem:[#allocation3 + $0x70] sm:$0xff]  ;;  %v1824_v15 = vld [vmem:[#allocation3 + $0x78] sm:$0xff] }
 0x4be   : > { %v5422_v38 = vadd.f32 %v5390_v43, %v5220_v10  ;;  %v5794_v60 = vmul.f32 %v14619_v50, %v14618_v62  ;;  %v5795_v37 = vmul.f32 %v14619_v50, %v14620_v27  ;;  %v3793_v26 = vmul.f32 %v14586_v48, %v12399_v57  ;;  %v14621_v57 = vld [vmem:[#allocation125_spill] sm:$0xff] }
 0x4bf   : > { %v5423_v24 = vadd.f32 %v5391_v31, %v5221_v39  ;;  %v3422_v12 = vadd.f32 %v3390_v14, %v3220_v32  ;;  %v3423_v33 = vadd.f32 %v3391_v47, %v3221_v23  ;;  %v3794_v35 = vmul.f32 %v14586_v48, %v12407_v4  ;;  %v2025_v14 = vld [vmem:[#allocation3 + $0x80] sm:$0xff]  ;;  %v2026_v47 = vld [vmem:[#allocation3 + $0x88] sm:$0xff]  ;;  %v2227_v39 = vld [vmem:[#allocation3 + $0x90] sm:$0xff] }
 0x4c0   : > { %v5624_v25 = vadd.f32 %v5592_v16, %v5422_v38  ;;  %v3994_v20 = vmul.f32 %v14618_v62, %v14589_v17  ;;  %v3995_v43 = vmul.f32 %v14620_v27, %v14589_v17  ;;  %v4196_v31 = vmul.f32 %v14621_v57, %v14592_v3  ;;  %v14622_v16 = vld [vmem:[#allocation126_spill] sm:$0xff]  ;;  %v14623_v38 = vld [vmem:[#allocation127_spill] sm:$0xff]  ;;  %v14624_v27 = vld [vmem:[#allocation128_spill] sm:$0xff] }
 0x4c1   : > { %v5625_v53 = vadd.f32 %v5593_v44, %v5423_v24  ;;  %v3624_v10 = vadd.f32 %v3592_v46, %v3422_v12  ;;  %v3625_v8 = vadd.f32 %v3593_v42, %v3423_v33  ;;  %v4197_v23 = vmul.f32 %v14622_v16, %v14592_v3  ;;  %v2429_v57 = vld [vmem:[#allocation3 + $0xa0] sm:$0xff]  ;;  %v2430_v46 = vld [vmem:[#allocation3 + $0xa8] sm:$0xff]  ;;  %v4564_v42 = vld [vmem:[#allocation2 + $0x1d0] sm:$0xff] }
 0x4c2   : > { %v5826_v32 = vadd.f32 %v5794_v60, %v5624_v25  ;;  %v4398_v62 = vmul.f32 %v14623_v38, %v14595_v36  ;;  %v4399_v4 = vmul.f32 %v14624_v27, %v14595_v36  ;;  %v1859_v44 = vmul.f32 %v14486_v29, %v1823_v2  ;;  %v4565_v41 = vld [vmem:[#allocation2 + $0x1d8] sm:$0xff] }
 0x4c3   : > { %v5827_v24 = vadd.f32 %v5795_v37, %v5625_v53  ;;  %v3825_v12 = vadd.f32 %v3793_v26, %v3624_v10  ;;  %v3826_v33 = vadd.f32 %v3794_v35, %v3625_v8  ;;  %v1860_v60 = vmul.f32 %v14486_v29, %v1824_v15  ;;  %v4968_v10 = vld [vmem:[#allocation2 + $0x1f0] sm:$0xff] }
 0x4c4   : > { %v2061_v25 = vmul.f32 %v14490_v55, %v2025_v14  ;;  %v2062_v16 = vmul.f32 %v14490_v55, %v2026_v47  ;;  %v2263_v38 = vmul.f32 %v14493_v5, %v2227_v39  ;;  %v2264_v37 = vmul.f32 %v14493_v5, %v2228_v22  ;;  %v14625_v5 = vld [vmem:[#allocation130_spill] sm:$0xff]  ;;  %v14626_v47 = vld [vmem:[#allocation131_spill] sm:$0xff] }
 0x4c5   : > { %v6757_v3 = vpack.c.bf16 %v5827_v24, %v5826_v32  ;;  %v4026_v27 = vadd.f32 %v3994_v20, %v3825_v12  ;;  %v4027_v36 = vadd.f32 %v3995_v43, %v3826_v33  ;;  %v2465_v35 = vmul.f32 %v14497_v51, %v2429_v57  ;;  %v4969_v20 = vld [vmem:[#allocation2 + $0x1f8] sm:$0xff] }
 0x4c6   : > { %v2093_v8 = vadd.f32 %v2061_v25, %v1859_v44  ;;  %v2094_v26 = vadd.f32 %v2062_v16, %v1860_v60  ;;  %v2466_v2 = vmul.f32 %v14497_v51, %v2430_v46  ;;  %v4600_v55 = vmul.f32 %v14598_v34, %v4564_v42  ;;  %v14629_v12 = vld [vmem:[#allocation133_spill] sm:$0xff]  ;;  %v14630_v44 = vld [vmem:[#allocation134_spill] sm:$0xff]  ;;  %v5372_v25 = vld [vmem:[#allocation2 + $0x210] sm:$0xff] }
 0x4c7   : > { %6759 = vmatpush3.bf16.xpose.msk.msra.mxu0 %vm9262_vm1, %v6757_v3  ;;  %v4228_v29 = vadd.f32 %v4196_v31, %v4026_v27  ;;  %v4229_v15 = vadd.f32 %v4197_v23, %v4027_v36  ;;  %v4601_v53 = vmul.f32 %v14598_v34, %v4565_v41  ;;  %v2667_v22 = vmul.f32 %v14625_v5, %v14504_v19  ;;  %v14627_v3 = vld [vmem:[#allocation129_spill] sm:$0xff]  ;;  %v14628_v36 = vld [vmem:[#allocation132_spill] sm:$0xff]  ;;  %v3238_v60 = vld [vmem:[#allocation3 + $0xe8] sm:$0xff] }
 0x4c8   : > { %v2295_v43 = vadd.f32 %v2263_v38, %v2093_v8  ;;  %v2296_v14 = vadd.f32 %v2264_v37, %v2094_v26  ;;  %v2668_v39 = vmul.f32 %v14626_v47, %v14504_v19  ;;  %v4802_v31 = vmul.f32 %v14627_v3, %v14603_v63  ;;  %v5373_v16 = vld [vmem:[#allocation2 + $0x218] sm:$0xff]  ;;  %v3642_v3 = vld [vmem:[#allocation3 + $0x108] sm:$0xff] }
 0x4c9   : > { %v4430_v51 = vadd.f32 %v4398_v62, %v4228_v29  ;;  %v4431_v32 = vadd.f32 %v4399_v4, %v4229_v15  ;;  %v4803_v23 = vmul.f32 %v14628_v36, %v14603_v63  ;;  %v2869_v33 = vmul.f32 %v14629_v12, %v14511_v59  ;;  %v3237_v62 = vld [vmem:[#allocation3 + $0xe0] sm:$0xff]  ;;  %v14631_v37 = vld [vmem:[#allocation136_spill] sm:$0xff]  ;;  %v14633_v29 = vld [vmem:[#allocation135_spill] sm:$0xff] }
 0x4ca   : > { %v2497_v24 = vadd.f32 %v2465_v35, %v2295_v43  ;;  %v2498_v41 = vadd.f32 %v2466_v2, %v2296_v14  ;;  %v2870_v57 = vmul.f32 %v14630_v44, %v14511_v59  ;;  %v5004_v19 = vmul.f32 %v14607_v30, %v4968_v10  ;;  %v14632_v26 = vld [vmem:[#allocation137_spill] sm:$0xff]  ;;  %v3439_v10 = vld [vmem:[#allocation3 + $0xf0] sm:$0xff] }
 0x4cb   : > { %v4632_v46 = vadd.f32 %v4600_v55, %v4430_v51  ;;  %v4633_v42 = vadd.f32 %v4601_v53, %v4431_v32  ;;  %v5005_v4 = vmul.f32 %v14607_v30, %v4969_v20  ;;  %v3071_v8 = vmul.f32 %v14631_v37, %v14516_v1  ;;  %v14634_v55 = vld [vmem:[#allocation138_spill] sm:$0xff]  ;;  %v3440_v20 = vld [vmem:[#allocation3 + $0xf8] sm:$0xff] }
 0x4cc   : > { %v2699_v38 = vadd.f32 %v2667_v22, %v2497_v24  ;;  %v2700_v27 = vadd.f32 %v2668_v39, %v2498_v41  ;;  %v3072_v35 = vmul.f32 %v14632_v26, %v14516_v1  ;;  %v5206_v15 = vmul.f32 %v14633_v29, %v14470_v54  ;;  %v3641_v32 = vld [vmem:[#allocation3 + $0x100] sm:$0xff]  ;;  %v5777_v36 = vld [vmem:[#allocation2 + $0x238] sm:$0xff]  ;;  %v4044_v26 = vld [vmem:[#allocation3 + $0x128] sm:$0xff] }
 0x4cd   : > { %v4834_v2 = vadd.f32 %v4802_v31, %v4632_v46  ;;  %v4835_v59 = vadd.f32 %v4803_v23, %v4633_v42  ;;  %v5207_v53 = vmul.f32 %v14634_v55, %v14470_v54  ;;  %v3273_v5 = vmul.f32 %v14070_v40, %v3237_v62  ;;  %v5776_v31 = vld [vmem:[#allocation2 + $0x230] sm:$0xff]  ;;  %v14636_v46 = vld [vmem:[#allocation53_spill] sm:$0xff]  ;;  %v14637_v29 = vld [vmem:[#allocation78_spill] sm:$0xff] }
 0x4ce   : > { %v2901_v43 = vadd.f32 %v2869_v33, %v2699_v38  ;;  %v2902_v14 = vadd.f32 %v2870_v57, %v2700_v27  ;;  %v3274_v22 = vmul.f32 %v14070_v40, %v3238_v60  ;;  %v5408_v1 = vmul.f32 %v14609_v58, %v5372_v25  ;;  %v14635_v40 = vld [vmem:[#allocation139_spill] sm:$0xff]  ;;  %v4043_v38 = vld [vmem:[#allocation3 + $0x120] sm:$0xff] }
 0x4cf   : > { %v5036_v47 = vadd.f32 %v5004_v19, %v4834_v2  ;;  %v5037_v39 = vadd.f32 %v5005_v4, %v4835_v59  ;;  %v5409_v51 = vmul.f32 %v14609_v58, %v5373_v16  ;;  %v3475_v41 = vmul.f32 %v13759_v21, %v3439_v10  ;;  %v3841_v19 = vld [vmem:[#allocation3 + $0x110] sm:$0xff]  ;;  %v3842_v4 = vld [vmem:[#allocation3 + $0x118] sm:$0xff]  ;;  %v4447_v10 = vld [vmem:[#allocation3 + $0x140] sm:$0xff] }
 0x4d0   : > { %v3103_v23 = vadd.f32 %v3071_v8, %v2901_v43  ;;  %v3104_v24 = vadd.f32 %v3072_v35, %v2902_v14  ;;  %v3476_v12 = vmul.f32 %v13759_v21, %v3440_v20  ;;  %v5610_v57 = vmul.f32 %v14635_v40, %v14614_v9  ;;  %v4245_v35 = vld [vmem:[#allocation3 + $0x130] sm:$0xff] }
 0x4d1   : > { %v5238_v33 = vadd.f32 %v5206_v15, %v5036_v47  ;;  %v5239_v44 = vadd.f32 %v5207_v53, %v5037_v39  ;;  %v5611_v42 = vmul.f32 %v14636_v46, %v14614_v9  ;;  %v3677_v25 = vmul.f32 %v13763_v13, %v3641_v32  ;;  %v4246_v53 = vld [vmem:[#allocation3 + $0x138] sm:$0xff]  ;;  %v1925_v32 = vld [vmem:[#allocation2 + $0x88] sm:$0xff] }
 0x4d2   : > { %v3305_v62 = vadd.f32 %v3273_v5, %v3103_v23  ;;  %v3306_v60 = vadd.f32 %v3274_v22, %v3104_v24  ;;  %v3678_v16 = vmul.f32 %v13763_v13, %v3642_v3  ;;  %v5812_v21 = vmul.f32 %v14619_v50, %v5776_v31  ;;  %v14638_v13 = vld [vmem:[#allocation79_spill] sm:$0xff]  ;;  %v14639_v39 = vld [vmem:[#allocation81_spill] sm:$0xff] }
 0x4d3   : > { %v5440_v27 = vadd.f32 %v5408_v1, %v5238_v33  ;;  %v5441_v37 = vadd.f32 %v5409_v51, %v5239_v44  ;;  %v5813_v8 = vmul.f32 %v14619_v50, %v5777_v36  ;;  %v3877_v15 = vmul.f32 %v14637_v29, %v3841_v19  ;;  %v1924_v51 = vld [vmem:[#allocation2 + $0x80] sm:$0xff]  ;;  %v2126_v3 = vld [vmem:[#allocation2 + $0x90] sm:$0xff]  ;;  %v4448_v24 = vld [vmem:[#allocation3 + $0x148] sm:$0xff] }
 0x4d4   : > { %v3507_v2 = vadd.f32 %v3475_v41, %v3305_v62  ;;  %v3508_v59 = vadd.f32 %v3476_v12, %v3306_v60  ;;  %v3878_v55 = vmul.f32 %v14637_v29, %v3842_v4  ;;  %v4079_v14 = vmul.f32 %v14638_v13, %v4043_v38  ;;  %v14640_v41 = vld [vmem:[#allocation82_spill] sm:$0xff]  ;;  %v2127_v33 = vld [vmem:[#allocation2 + $0x98] sm:$0xff] }
 0x4d5   : > { %v5642_v20 = vadd.f32 %v5610_v57, %v5440_v27  ;;  %v5643_v43 = vadd.f32 %v5611_v42, %v5441_v37  ;;  %v4080_v47 = vmul.f32 %v14638_v13, %v4044_v26  ;;  %v4281_v1 = vmul.f32 %v14639_v39, %v4245_v35  ;;  %v14641_v57 = vld [vmem:[#allocation67_spill] sm:$0xff]  ;;  %v14642_v42 = vld [vmem:[#allocation64_spill] sm:$0xff]  ;;  %v2328_v4 = vld [vmem:[#allocation2 + $0xa0] sm:$0xff] }
 0x4d6   : > { %v3709_v5 = vadd.f32 %v3677_v25, %v3507_v2  ;;  %v3710_v22 = vadd.f32 %v3678_v16, %v3508_v59  ;;  %v4282_v23 = vmul.f32 %v14639_v39, %v4246_v53  ;;  %v4483_v12 = vmul.f32 %v14640_v41, %v4447_v10  ;;  %v2329_v62 = vld [vmem:[#allocation2 + $0xa8] sm:$0xff]  ;;  %v4649_v25 = vld [vmem:[#allocation3 + $0x150] sm:$0xff]  ;;  %v4650_v16 = vld [vmem:[#allocation3 + $0x158] sm:$0xff] }
 0x4d7   : > { %v5844_v31 = vadd.f32 %v5812_v21, %v5642_v20  ;;  %v5845_v36 = vadd.f32 %v5813_v8, %v5643_v43  ;;  %v1759_v46 = vmul.f32 %v14641_v57, %v13707_v52  ;;  %v1760_v19 = vmul.f32 %v14642_v42, %v13707_v52  ;;  %v14644_v13 = vld [vmem:[#allocation68_spill] sm:$0xff]  ;;  %v14646_v39 = vld [vmem:[#allocation87_spill] sm:$0xff]  ;;  %v3136_v42 = vld [vmem:[#allocation2 + $0xe0] sm:$0xff] }
 0x4d8   : > { %v3909_v44 = vadd.f32 %v3877_v15, %v3709_v5  ;;  %v3910_v40 = vadd.f32 %v3878_v55, %v3710_v22  ;;  %v1960_v38 = vmul.f32 %v13708_v6, %v1924_v51  ;;  %v1961_v27 = vmul.f32 %v13708_v6, %v1925_v32  ;;  %v14643_v6 = vld [vmem:[#allocation86_spill] sm:$0xff]  ;;  %v14653_v57 = vld [vmem:[#allocation56_spill] sm:$0xff] }
 0x4d9   : > { %v6760_v60 = vpack.c.bf16 %v5845_v36, %v5844_v31  ;;  %v2162_v37 = vmul.f32 %v13634_v0, %v2126_v3  ;;  %v4484_v26 = vmul.f32 %v14640_v41, %v4448_v24  ;;  %v2163_v35 = vmul.f32 %v13634_v0, %v2127_v33  ;;  %v14647_v51 = vld [vmem:[#allocation58_spill] sm:$0xff]  ;;  %v14649_v36 = vld [vmem:[#allocation65_spill] sm:$0xff]  ;;  %v14650_v24 = vld [vmem:[#allocation75_spill] sm:$0xff] }
 0x4da   : > { %v4111_v21 = vadd.f32 %v4079_v14, %v3909_v44  ;;  %v4112_v8 = vadd.f32 %v4080_v47, %v3910_v40  ;;  %v1992_v52 = vadd.f32 %v1960_v38, %v1759_v46  ;;  %v1993_v2 = vadd.f32 %v1961_v27, %v1760_v19  ;;  %v14645_v14 = vld [vmem:[#allocation22_spill] sm:$0xff]  ;;  %v14651_v40 = vld [vmem:[#allocation88_spill] sm:$0xff] }
 0x4db   : > { %6762 = vmatprep.subr.msk.bf16.mxu0 %vm9262_vm1, %v6760_v60  ;;  %v2364_v59 = vmul.f32 %v13636_v61, %v2328_v4  ;;  %v2365_v29 = vmul.f32 %v13636_v61, %v2329_v62  ;;  %v4685_v53 = vmul.f32 %v14643_v6, %v4649_v25  ;;  %v4686_v10 = vmul.f32 %v14643_v6, %v4650_v16  ;;  %v14648_v61 = vld [vmem:[#allocation140_spill] sm:$0xff]  ;;  %v3137_v19 = vld [vmem:[#allocation2 + $0xe8] sm:$0xff]  ;;  %v14655_v16 = vld [vmem:[#allocation93_spill] sm:$0xff] }
 0x4dc   : > { %v4313_v15 = vadd.f32 %v4281_v1, %v4111_v21  ;;  %v4314_v55 = vadd.f32 %v4282_v23, %v4112_v8  ;;  %v2194_v20 = vadd.f32 %v2162_v37, %v1992_v52  ;;  %v2195_v43 = vadd.f32 %v2163_v35, %v1993_v2  ;;  %v14654_v60 = vld [vmem:[#allocation23_spill] sm:$0xff]  ;;  %v14657_v21 = vld [vmem:[#allocation89_spill] sm:$0xff] }
 0x4dd   : > { %v2566_v0 = vmul.f32 %v14644_v13, %v13641_v56  ;;  %v2567_v5 = vmul.f32 %v14645_v14, %v13641_v56  ;;  %v4887_v32 = vmul.f32 %v14647_v51, %v14646_v39  ;;  %v4888_v1 = vmul.f32 %v14648_v61, %v14646_v39  ;;  %v14652_v56 = vld [vmem:[#allocation83_spill] sm:$0xff]  ;;  %v3339_v2 = vld [vmem:[#allocation2 + $0xf8] sm:$0xff] }
 0x4de   : > { %v4515_v22 = vadd.f32 %v4483_v12, %v4313_v15  ;;  %v4516_v47 = vadd.f32 %v4484_v26, %v4314_v55  ;;  %v2396_v3 = vadd.f32 %v2364_v59, %v2194_v20  ;;  %v2397_v31 = vadd.f32 %v2365_v29, %v2195_v43  ;;  %v14656_v37 = vld [vmem:[#allocation59_spill] sm:$0xff]  ;;  %v14658_v26 = vld [vmem:[#allocation62_spill] sm:$0xff]  ;;  %v14659_v20 = vld [vmem:[#allocation57_spill] sm:$0xff] }
 0x4df   : > { %v2768_v23 = vmul.f32 %v14649_v36, %v13643_v7  ;;  %v2769_v41 = vmul.f32 %v14650_v24, %v13643_v7  ;;  %v5089_v12 = vmul.f32 %v14652_v56, %v14651_v40  ;;  %v5090_v46 = vmul.f32 %v14653_v57, %v14651_v40  ;;  %v3338_v52 = vld [vmem:[#allocation2 + $0xf0] sm:$0xff]  ;;  %v5659_v59 = vld [vmem:[#allocation3 + $0x1a0] sm:$0xff]  ;;  %v5660_v29 = vld [vmem:[#allocation3 + $0x1a8] sm:$0xff] }
 0x4e0   : > { %v4717_v33 = vadd.f32 %v4685_v53, %v4515_v22  ;;  %v4718_v44 = vadd.f32 %v4686_v10, %v4516_v47  ;;  %v2598_v4 = vadd.f32 %v2566_v0, %v2396_v3  ;;  %v2599_v62 = vadd.f32 %v2567_v5, %v2397_v31  ;;  %v14660_v43 = vld [vmem:[#allocation90_spill] sm:$0xff]  ;;  %v14661_v0 = vld [vmem:[#allocation63_spill] sm:$0xff]  ;;  %v5862_v39 = vld [vmem:[#allocation3 + $0x1b8] sm:$0xff] }
 0x4e1   : > { %v2970_v25 = vmul.f32 %v14654_v60, %v14573_v49  ;;  %v2971_v38 = vmul.f32 %v14655_v16, %v14573_v49  ;;  %v5291_v8 = vmul.f32 %v14657_v21, %v14656_v37  ;;  %v5292_v35 = vmul.f32 %v14657_v21, %v14658_v26  ;;  %v3540_v5 = vld [vmem:[#allocation2 + $0x100] sm:$0xff]  ;;  %v3541_v22 = vld [vmem:[#allocation2 + $0x108] sm:$0xff]  ;;  %v5861_v47 = vld [vmem:[#allocation3 + $0x1b0] sm:$0xff] }
 0x4e2   : > { %v4919_v27 = vadd.f32 %v4887_v32, %v4717_v33  ;;  %v4920_v7 = vadd.f32 %v4888_v1, %v4718_v44  ;;  %v2800_v15 = vadd.f32 %v2768_v23, %v2598_v4  ;;  %v2801_v55 = vadd.f32 %v2769_v41, %v2599_v62  ;;  %v14662_v31 = vld [vmem:[#allocation91_spill] sm:$0xff]  ;;  %v3742_v41 = vld [vmem:[#allocation2 + $0x118] sm:$0xff] }
 0x4e3   : > { %v3172_v6 = vmul.f32 %v14576_v45, %v3136_v42  ;;  %v3173_v53 = vmul.f32 %v14576_v45, %v3137_v19  ;;  %v5493_v13 = vmul.f32 %v14660_v43, %v14659_v20  ;;  %v5494_v14 = vmul.f32 %v14660_v43, %v14661_v0  ;;  %v3741_v24 = vld [vmem:[#allocation2 + $0x110] sm:$0xff]  ;;  %v3942_v19 = vld [vmem:[#allocation2 + $0x120] sm:$0xff]  ;;  %v3943_v4 = vld [vmem:[#allocation2 + $0x128] sm:$0xff] }
 0x4e4   : > { %v5121_v10 = vadd.f32 %v5089_v12, %v4919_v27  ;;  %v5122_v49 = vadd.f32 %v5090_v46, %v4920_v7  ;;  %v3002_v51 = vadd.f32 %v2970_v25, %v2800_v15  ;;  %v3003_v32 = vadd.f32 %v2971_v38, %v2801_v55  ;;  %v14663_v46 = vld [vmem:[#allocation92_spill] sm:$0xff]  ;;  %v4346_v15 = vld [vmem:[#allocation2 + $0x140] sm:$0xff]  ;;  %v4347_v55 = vld [vmem:[#allocation2 + $0x148] sm:$0xff] }
 0x4e5   : > { %v3374_v61 = vmul.f32 %v14579_v28, %v3338_v52  ;;  %v3375_v1 = vmul.f32 %v14579_v28, %v3339_v2  ;;  %v5695_v36 = vmul.f32 %v14662_v31, %v5659_v59  ;;  %v5696_v23 = vmul.f32 %v14662_v31, %v5660_v29  ;;  %v4144_v38 = vld [vmem:[#allocation2 + $0x130] sm:$0xff]  ;;  %v4145_v37 = vld [vmem:[#allocation2 + $0x138] sm:$0xff]  ;;  %v5951_v52 = vld [vmem:[%s12642_s7] sm:$0xff] }
 0x4e6   : > { %v5323_v3 = vadd.f32 %v5291_v8, %v5121_v10  ;;  %v5324_v45 = vadd.f32 %v5292_v35, %v5122_v49  ;;  %v3204_v33 = vadd.f32 %v3172_v6, %v3002_v51  ;;  %v3205_v44 = vadd.f32 %v3173_v53, %v3003_v32  ;;  %v5952_v35 = vld [vmem:[%s12642_s7 + $0x8] sm:$0xff]  ;;  %v4548_v20 = vld [vmem:[#allocation2 + $0x150] sm:$0xff]  ;;  %v4549_v43 = vld [vmem:[#allocation2 + $0x158] sm:$0xff] }
 0x4e7   : > { %v3576_v40 = vmul.f32 %v14583_v18, %v3540_v5  ;;  %v3577_v56 = vmul.f32 %v14583_v18, %v3541_v22  ;;  %v5897_v42 = vmul.f32 %v14663_v46, %v5861_v47  ;;  %v5898_v28 = vmul.f32 %v14663_v46, %v5862_v39  ;;  %v14664_v59 = vld [vmem:[#allocation34_spill] sm:$0xff]  ;;  %v5953_v47 = vld [vmem:[%s12642_s7 + $0x10] sm:$0xff] }
 0x4e8   : > { %v5525_v12 = vadd.f32 %v5493_v13, %v5323_v3  ;;  %v5526_v57 = vadd.f32 %v5494_v14, %v5324_v45  ;;  %v3406_v62 = vadd.f32 %v3374_v61, %v3204_v33  ;;  %v3407_v60 = vadd.f32 %v3375_v1, %v3205_v44  ;;  %v14665_v14 = vld [vmem:[#allocation38_spill] sm:$0xff]  ;;  %v14666_v45 = vld [vmem:[#allocation69_spill] sm:$0xff] }
 0x4e9   : > { %v3777_v25 = vmul.f32 %v14586_v48, %v3741_v24  ;;  %v3778_v16 = vmul.f32 %v14586_v48, %v3742_v41  ;;  %v3978_v8 = vmul.f32 %v14589_v17, %v3942_v19  ;;  %v3979_v26 = vmul.f32 %v14589_v17, %v3943_v4  ;;  %v5954_v24 = vld [vmem:[%s12642_s7 + $0x18] sm:$0xff]  ;;  %v7045_v4 = vld [vmem:[#allocation9] sm:$0xff] }
 0x4ea   : > { %v5727_v27 = vadd.f32 %v5695_v36, %v5525_v12  ;;  %v5728_v7 = vadd.f32 %v5696_v23, %v5526_v57  ;;  %v3608_v21 = vadd.f32 %v3576_v40, %v3406_v62  ;;  %v3609_v18 = vadd.f32 %v3577_v56, %v3407_v60  ;;  %v14667_v36 = vld [vmem:[#allocation111_spill] sm:$0xff]  ;;  %v14668_v44 = vld [vmem:[#allocation109_spill] sm:$0xff] }
 0x4eb   : > { %v4180_v29 = vmul.f32 %v14664_v59, %v4144_v38  ;;  %v4181_v10 = vmul.f32 %v14664_v59, %v4145_v37  ;;  %v7211_v49 = vmov 0   ;;  %v4382_v5 = vmul.f32 %v14665_v14, %v4346_v15  ;;  %v5948_v12 = vld [vmem:[#allocation9 + $0x8] sm:$0xff]  ;;  %v6172_v62 = vld [vmem:[%s12643_s8] sm:$0xff] }
 0x4ec   : > { %v5929_v2 = vadd.f32 %v5897_v42, %v5727_v27  ;;  %v5930_v48 = vadd.f32 %v5898_v28, %v5728_v7  ;;  %v3809_v6 = vadd.f32 %v3777_v25, %v3608_v21  ;;  %v3810_v53 = vadd.f32 %v3778_v16, %v3609_v18  ;;  %6889 = vset.pattern.permute.xlu1 %v7211_v49  ;;  %v14670_v42 = vld [vmem:[#allocation71_spill] sm:$0xff]  ;;  %v5558_v60 = vld [vmem:[#allocation2 + $0x1a0] sm:$0xff]  ;;  %v5761_v18 = vld [vmem:[#allocation2 + $0x1b8] sm:$0xff] }
 0x4ed   : > { %6888 = vset.pattern.permute.xlu0 %v7211_v49  ;;  %5962 = vperm.xlu1 %6889, %v5952_v35   ;;  %v4383_v22 = vmul.f32 %v14665_v14, %v4347_v55  ;;  %v4584_v32 = vmul.f32 %v14598_v34, %v4548_v20  ;;  %v4585_v61 = vmul.f32 %v14598_v34, %v4549_v43  ;;  %v14669_v34 = vld [vmem:[#allocation96_spill] sm:$0xff]  ;;  %v5559_v25 = vld [vmem:[#allocation2 + $0x1a8] sm:$0xff]  ;;  %v14672_v38 = vld [vmem:[#allocation73_spill] sm:$0xff] }
 0x4ee   : > { %v6811_v17 = vpack.c.bf16 %v5930_v48, %v5929_v2  ;;  %5957 = vperm.xlu0 %6888, %v5951_v52   ;;  %v4010_v13 = vadd.f32 %v3978_v8, %v3809_v6  ;;  %v4011_v0 = vadd.f32 %v3979_v26, %v3810_v53  ;;  %v4786_v31 = vmul.f32 %v14666_v45, %v14603_v63  ;;  %v14673_v7 = vld [vmem:[#allocation94_spill] sm:$0xff]  ;;  %v5760_v21 = vld [vmem:[#allocation2 + $0x1b0] sm:$0xff]  ;;  %v5950_v15 = vld [vmem:[#allocation9 + $0x18] sm:$0xff] }
 0x4ef   : > { %v4787_v23 = vmul.f32 %v14667_v36, %v14603_v63  ;;  %v4988_v40 = vmul.f32 %v14668_v44, %v14607_v30  ;;  %v4989_v56 = vmul.f32 %v14669_v34, %v14607_v30  ;;  %v5190_v28 = vmul.f32 %v14470_v54, %v14670_v42  ;;  %v14671_v63 = vld [vmem:[#allocation110_spill] sm:$0xff] }
 0x4f0   : > { %6813 = vmatpush3.bf16.xpose.msk.msra.mxu1 %vm9262_vm1, %v6811_v17  ;;  %v4212_v39 = vadd.f32 %v4180_v29, %v4010_v13  ;;  %v4213_v51 = vadd.f32 %v4181_v10, %v4011_v0  ;;  %v5191_v19 = vmul.f32 %v14470_v54, %v14671_v63  ;;  %v5392_v27 = vmul.f32 %v14609_v58, %v14672_v38  ;;  %v5949_v54 = vld [vmem:[#allocation9 + $0x10] sm:$0xff]  ;;  %v6173_v2 = vld [vmem:[%s12643_s8 + $0x8] sm:$0xff] }
 0x4f1   : > { %5967 = vperm.xlu1 %6889, %v5953_v47   ;;  %v5393_v37 = vmul.f32 %v14609_v58, %v14673_v7  ;;  %v5594_v35 = vmul.f32 %v14614_v9, %v5558_v60  ;;  %v5595_v52 = vmul.f32 %v14614_v9, %v5559_v25  ;;  %v5796_v59 = vmul.f32 %v14619_v50, %v5760_v21  ;;  %v6174_v9 = vld [vmem:[%s12643_s8 + $0x10] sm:$0xff] }
 0x4f2   : > { %v4414_v1 = vadd.f32 %v4382_v5, %v4212_v39  ;;  %v4415_v3 = vadd.f32 %v4383_v22, %v4213_v51  ;;  %v5797_v29 = vmul.f32 %v14619_v50, %v5761_v18  ;;  %v6175_v50 = vld [vmem:[%s12643_s8 + $0x18] sm:$0xff] }
 0x4f4   : > { %v4616_v41 = vadd.f32 %v4584_v32, %v4414_v1  ;;  %v4617_v33 = vadd.f32 %v4585_v61, %v4415_v3 }
 0x4f5   : > { %5972 = vperm.xlu1 %6889, %v5954_v24  }
 0x4f6   : > { %v4818_v57 = vadd.f32 %v4786_v31, %v4616_v41  ;;  %v4819_v46 = vadd.f32 %v4787_v23, %v4617_v33 }
 0x4f7   : > { %6711 = vmatmul.mubr.msk.f32.vlgmr.msra.gmra.mrb[0].mxu1 %vm455_vm0, %v7045_v4 }
 0x4f8   : > { %6712 = vmatprep.mubr.msk.f32.mxu1 %vm455_vm0, %v5948_v12  ;;  %v5020_v30 = vadd.f32 %v4988_v40, %v4818_v57  ;;  %v5021_v16 = vadd.f32 %v4989_v56, %v4819_v46 }
 0x4f9   : > { %6178 = vperm.xlu1 %6889, %v6172_v62  }
 0x4fa   : > { %v5222_v8 = vadd.f32 %v5190_v28, %v5020_v30  ;;  %v5223_v26 = vadd.f32 %v5191_v19, %v5021_v16 }
 0x4fb   : > { %6713 = vmatmul.mubr.msk.f32.gmra.mrb[2].mxu1 %vm455_vm0, %v5948_v12 }
 0x4fc   : > { %6714 = vmatprep.mubr.msk.f32.mxu1 %vm455_vm0, %v5949_v54  ;;  %v5424_v48 = vadd.f32 %v5392_v27, %v5222_v8  ;;  %v5425_v58 = vadd.f32 %v5393_v37, %v5223_v26 }
 0x4fd   : > { %6183 = vperm.xlu1 %6889, %v6173_v2  }
 0x4fe   : > { %v5626_v55 = vadd.f32 %v5594_v35, %v5424_v48  ;;  %v5627_v6 = vadd.f32 %v5595_v52, %v5425_v58 }
 0x4ff   : > { %6715 = vmatmul.mubr.msk.f32.gmra.mrb[4].mxu1 %vm455_vm0, %v5949_v54 }
 0x500   : > { %6716 = vmatprep.mubr.msk.f32.mxu1 %vm455_vm0, %v5950_v15  ;;  %v5828_v53 = vadd.f32 %v5796_v59, %v5626_v55  ;;  %v5829_v10 = vadd.f32 %v5797_v29, %v5627_v6 }
 0x501   : > { %6188 = vperm.xlu1 %6889, %v6174_v9  }
 0x502   : > { %v6763_v49 = vpack.c.bf16 %v5829_v10, %v5828_v53 }
 0x503   : > { %6717 = vmatmul.mubr.msk.f32.gmra.mrb[6].mxu1 %vm455_vm0, %v5950_v15 }
 0x504   : > { %6765 = vmatpush3.bf16.xpose.msk.msra.mxu0 %vm9262_vm1, %v6763_v49 }
 0x505   : > { %6193 = vperm.xlu1 %6889, %v6175_v50  }
 0x50b   : > { %6671 = vmatmul.mubr.msk.f32.vlgmr.msra.gmra.mrb[0].mxu0 %vm455_vm0, %v7045_v4 }
 0x50c   : > { %6672 = vmatprep.mubr.msk.f32.mxu0 %vm455_vm0, %v5948_v12 }
 0x50f   : > { %6673 = vmatmul.mubr.msk.f32.gmra.mrb[2].mxu0 %vm455_vm0, %v5948_v12 }
 0x510   : > { %6674 = vmatprep.mubr.msk.f32.mxu0 %vm455_vm0, %v5949_v54 }
 0x513   : > { %6675 = vmatmul.mubr.msk.f32.gmra.mrb[4].mxu0 %vm455_vm0, %v5949_v54 }
 0x514   : > { %6676 = vmatprep.mubr.msk.f32.mxu0 %vm455_vm0, %v5950_v15 }
 0x517   : > { %6677 = vmatmul.mubr.msk.f32.gmra.mrb[6].mxu0 %vm455_vm0, %v5950_v15 }
 0x56c   : > { %v5963_v17 = vpop.permute.xlu1 %5962 }
 0x56d   : > { %v5958_v44 = vpop.permute.xlu0 %5957 }
 0x570   : > { %v5968_v20 = vpop.permute.xlu1 %5967 }
 0x574   : > { %v5973_v11 = vpop.permute.xlu1 %5972 }
 0x578   : > { %v6179_v43 = vpop.permute.xlu1 %6178 }
 0x57c   : > { %v6184_v13 = vpop.permute.xlu1 %6183 }
 0x580   : > { %v6189_v32 = vpop.permute.xlu1 %6188 }
 0x584   : > { %v6194_v36 = vpop.permute.xlu1 %6193 }
 0x5ca   : > { %v6358_v0 = vpop.f32.mrb[0].mxu1 }
 0x5cb   : > { %v6359_v14 = vadd.f32 %v6358_v0, %v6179_v43  ;;  %v6360_v5 = vpop.f32.mrb[1].mxu1 }
 0x5cc   : > { %v6361_v22 = vadd.f32 %v6360_v5, %v6179_v43 }
 0x5cd   : > { %6389 = vst [vmem:[%s452_s16] sm:$0xff] %v6359_v14 }
 0x5ce   : > { %6390 = vst [vmem:[%s452_s16 + $0x8] sm:$0xff] %v6361_v22  ;;  %v6364_v47 = vpop.f32.mrb[2].mxu1 }
 0x5cf   : > { %v6365_v39 = vadd.f32 %v6364_v47, %v6184_v13  ;;  %v6366_v51 = vpop.f32.mrb[3].mxu1 }
 0x5d0   : > { %v6367_v61 = vadd.f32 %v6366_v51, %v6184_v13 }
 0x5d1   : > { %6391 = vst [vmem:[%s452_s16 + $0x10] sm:$0xff] %v6365_v39 }
 0x5d2   : > { %6392 = vst [vmem:[%s452_s16 + $0x18] sm:$0xff] %v6367_v61  ;;  %v6370_v1 = vpop.f32.mrb[4].mxu1 }
 0x5d3   : > { %v6371_v3 = vadd.f32 %v6370_v1, %v6189_v32  ;;  %v6372_v45 = vpop.f32.mrb[5].mxu1 }
 0x5d4   : > { %v6373_v31 = vadd.f32 %v6372_v45, %v6189_v32 }
 0x5d5   : > { %6393 = vst [vmem:[%s452_s16 + $0x20] sm:$0xff] %v6371_v3 }
 0x5d6   : > { %6394 = vst [vmem:[%s452_s16 + $0x28] sm:$0xff] %v6373_v31  ;;  %v6376_v23 = vpop.f32.mrb[6].mxu1 }
 0x5d7   : > { %v6377_v24 = vadd.f32 %v6376_v23, %v6194_v36  ;;  %v6378_v41 = vpop.f32.mrb[7].mxu1 }
 0x5d8   : > { %v6379_v33 = vadd.f32 %v6378_v41, %v6194_v36 }
 0x5d9   : > { %6395 = vst [vmem:[%s452_s16 + $0x30] sm:$0xff] %v6377_v24 }
 0x5da   : > { %6396 = vst [vmem:[%s452_s16 + $0x38] sm:$0xff] %v6379_v33 }
 0x5de   : > { %v6149_v40 = vpop.f32.mrb[0].mxu0 }
 0x5df   : > { %v6150_v34 = vadd.f32 %v6149_v40, %v5958_v44  ;;  %v6151_v56 = vpop.f32.mrb[1].mxu0 }
 0x5e0   : > { %v6152_v12 = vadd.f32 %v6151_v56, %v5958_v44 }
 0x5e1   : > { %6381 = vst [vmem:[%s447_s23] sm:$0xff] %v6150_v34 }
 0x5e2   : > { %6382 = vst [vmem:[%s447_s23 + $0x8] sm:$0xff] %v6152_v12  ;;  %v6155_v57 = vpop.f32.mrb[2].mxu0 }
 0x5e3   : > { %v6156_v46 = vadd.f32 %v6155_v57, %v5963_v17  ;;  %v6157_v42 = vpop.f32.mrb[3].mxu0 }
 0x5e4   : > { %v6158_v28 = vadd.f32 %v6157_v42, %v5963_v17 }
 0x5e5   : > { %6383 = vst [vmem:[%s447_s23 + $0x10] sm:$0xff] %v6156_v46 }
 0x5e6   : > { %6384 = vst [vmem:[%s447_s23 + $0x18] sm:$0xff] %v6158_v28  ;;  %v6161_v63 = vpop.f32.mrb[4].mxu0 }
 0x5e7   : > { %v6162_v19 = vadd.f32 %v6161_v63, %v5968_v20  ;;  %v6163_v4 = vpop.f32.mrb[5].mxu0 }
 0x5e8   : > { %v6164_v62 = vadd.f32 %v6163_v4, %v5968_v20 }
 0x5e9   : > { %6385 = vst [vmem:[%s447_s23 + $0x20] sm:$0xff] %v6162_v19 }
 0x5ea   : > { %6386 = vst [vmem:[%s447_s23 + $0x28] sm:$0xff] %v6164_v62  ;;  %v6167_v60 = vpop.f32.mrb[6].mxu0 }
 0x5eb   : > { %v6168_v25 = vadd.f32 %v6167_v60, %v5973_v11  ;;  %v6169_v30 = vpop.f32.mrb[7].mxu0 }
 0x5ec   : > { %v6170_v16 = vadd.f32 %v6169_v30, %v5973_v11 }
 0x5ed   : > { %6387 = vst [vmem:[%s447_s23 + $0x30] sm:$0xff] %v6168_v25 }
 0x5ee   : > { %6388 = vst [vmem:[%s447_s23 + $0x38] sm:$0xff] %v6170_v16 }
 0x5ef PF: > { %p23_p10 = scmp.ge.s32.totalorder %s7389_s30, 4   ;;  %s14674_s13 = smov %s7194_s14 }
 0x5f0   : > { %s14675_s14 = smov %s7198_s15  ;;  %s14676_s15 = smov %s7399_s20 }
 0x5f1   : > { %s14677_s16 = smov %s7389_s30  ;;  %25 = sbr.rel (!%p23_p10) target bundleno = 5 (0x5), region = 163 }
 0x5f8   :  { %6434 = vsyncpa [#allocation5], 1 }
 0x5f9   :  { %6436 = vsyncpa [#allocation5 + $0x1], 1 }
 0x5fa   :  { %6437 = vsyncpa [#allocation7], 1 }
 0x5fb   :  { %6438 = vsyncpa [#allocation10], 1 }

// kernel: msca_forward.7
= control target key start
LH: loop header
LB: loop body
LE: loop exit
PB: predicated region body
PF: predicated region fallthrough
CT: control target
= control target key end

     0   :  { %s652_s18 = smov 0   ;;  %s744_s0 = inlined_call_operand.vmem [shape: f32[128,128], index: 0, kind: input, shape index: {}]   ;;  %s745_s1 = inlined_call_operand.vmem [shape: f32[128,128], index: 1, kind: input, shape index: {}]   ;;  %s746_s2 = inlined_call_operand.vmem [shape: f32[128,128], index: 2, kind: input, shape index: {}]   ;;  %s747_s3 = inlined_call_operand.vmem [shape: f32[128,128], index: 3, kind: input, shape index: {}]   ;;  %s748_s4 = inlined_call_operand.vmem [shape: f32[1,128], index: 4, kind: input, shape index: {}]   ;;  %s749_s5 = inlined_call_operand.vmem [shape: f32[128,128], index: 5, kind: output, shape index: {}]  }
   0x1 LB: > { %s484_s19 = sadd.s32 4294967295, %s620_s18   ;;  %p488_p0 = scmp.ge.s32.totalorder %s620_s18, 1  ;;  %s620_s18 = sphi %s652_s18, %s15_s18  }
   0x2   : > { %p210_p1 = scmp.lt.s32.totalorder %s620_s18, 5 }
   0x4   : > { %p211_p2 = pnand %p488_p0, %p210_p1 }
   0x5   : > { %v284_v0 = vld [vmem:[%s747_s3] sm:$0xff] (!%p211_p2)  ;;  %v285_v1 = vld [vmem:[%s747_s3 + $0x8] sm:$0xff] (!%p211_p2)  ;;  %v286_v2 = vld [vmem:[%s747_s3 + $0x10] sm:$0xff] (!%p211_p2)  ;;  %s489_s26 = sshll.u32 (!%p211_p2), %s484_s19, 2 }
   0x6   : > { %214 = sbr.rel (%p211_p2) target bundleno = 258 (0x102), region = 40  ;;  %v558_v3 = vpack.c.bf16 (!%p211_p2), %v285_v1, %v284_v0  ;;  %v287_v4 = vld [vmem:[%s747_s3 + $0x18] sm:$0xff] (!%p211_p2)  ;;  %p249_p3 = scmp.lt.s32.totalorder (!%p211_p2), %s489_s26, 15  ;;  %v288_v6 = vld [vmem:[%s747_s3 + $0x20] sm:$0xff] (!%p211_p2)  ;;  %v289_v7 = vld [vmem:[%s747_s3 + $0x28] sm:$0xff] (!%p211_p2) }
   0x7   : > { %v562_v5 = vpack.c.bf16 (!%p211_p2), %v287_v4, %v286_v2  ;;  %v566_v8 = vpack.c.bf16 (!%p211_p2), %v289_v7, %v288_v6  ;;  %v290_v9 = vld [vmem:[%s747_s3 + $0x30] sm:$0xff] (!%p211_p2)  ;;  %v291_v10 = vld [vmem:[%s747_s3 + $0x38] sm:$0xff] (!%p211_p2)  ;;  %v292_v18 = vld [vmem:[%s747_s3 + $0x40] sm:$0xff] (!%p211_p2) }
   0x8   : > { %559 = vmatprep.subr.bf16.mxu0 (!%p211_p2), %v558_v3  ;;  %590 = vmatprep.subr.bf16.mxu1 (!%p211_p2), %v558_v3  ;;  %v570_v16 = vpack.c.bf16 (!%p211_p2), %v291_v10, %v290_v9  ;;  %v293_v19 = vld [vmem:[%s747_s3 + $0x48] sm:$0xff] (!%p211_p2)  ;;  %v294_v21 = vld [vmem:[%s747_s3 + $0x50] sm:$0xff] (!%p211_p2)  ;;  %v295_v22 = vld [vmem:[%s747_s3 + $0x58] sm:$0xff] (!%p211_p2) }
   0x9   : > { %561 = vmatpush3.bf16.msra.mxu0 (!%p211_p2), %v558_v3  ;;  %598 = vmatpush3.bf16.msra.mxu1 (!%p211_p2), %v558_v3  ;;  %v574_v20 = vpack.c.bf16 (!%p211_p2), %v293_v19, %v292_v18  ;;  %v578_v23 = vpack.c.bf16 (!%p211_p2), %v295_v22, %v294_v21  ;;  %v296_v24 = vld [vmem:[%s747_s3 + $0x60] sm:$0xff] (!%p211_p2)  ;;  %v297_v25 = vld [vmem:[%s747_s3 + $0x68] sm:$0xff] (!%p211_p2)  ;;  %v298_v27 = vld [vmem:[%s747_s3 + $0x70] sm:$0xff] (!%p211_p2) }
   0xa   : > { %563 = vmatprep.subr.bf16.mxu0 (!%p211_p2), %v562_v5  ;;  %591 = vmatprep.subr.bf16.mxu1 (!%p211_p2), %v562_v5  ;;  %v582_v26 = vpack.c.bf16 (!%p211_p2), %v297_v25, %v296_v24  ;;  %v299_v28 = vld [vmem:[%s747_s3 + $0x78] sm:$0xff] (!%p211_p2)  ;;  %v497_v36 = vld [vmem:[%s748_s4] ss:$0 sm:$0xff] (!%p211_p2) }
   0xb   : > { %v586_v29 = vpack.c.bf16 (!%p211_p2), %v299_v28, %v298_v27 }
   0xd   : > { %s751_s26 = smov (!%p249_p3, %s489_s26), 15  ;;  %565 = vmatpush3.bf16.msra.mxu0 %v562_v5  ;;  %599 = vmatpush3.bf16.msra.mxu1 %v562_v5 }
   0xe   : > { %s678_s8 = sshll.u32 %s751_s26, 3  ;;  %567 = vmatprep.subr.bf16.mxu0 %v566_v8  ;;  %592 = vmatprep.subr.bf16.mxu1 %v566_v8 }
   0xf   : > { %s690_s15 = scalar_lea.vmem %s744_s0, %s678_s8  ;;  %s696_s19 = scalar_lea.vmem %s745_s1, %s678_s8 }
  0x10   : > { %v272_v11 = vld [vmem:[%s690_s15] sm:$0xff]  ;;  %v274_v13 = vld [vmem:[%s690_s15 + $0x10] sm:$0xff]  ;;  %v273_v30 = vld [vmem:[%s690_s15 + $0x8] sm:$0xff]  ;;  %s264_s14 = scalar_lea.vmem %s746_s2, %s678_s8  ;;  %s270_s20 = scalar_lea.vmem %s749_s5, %s678_s8 }
  0x11   : > { %v276_v12 = vld [vmem:[%s696_s19] sm:$0xff]  ;;  %v278_v15 = vld [vmem:[%s696_s19 + $0x10] sm:$0xff]  ;;  %569 = vmatpush3.bf16.msra.mxu0 %v566_v8  ;;  %600 = vmatpush3.bf16.msra.mxu1 %v566_v8  ;;  %v277_v31 = vld [vmem:[%s696_s19 + $0x8] sm:$0xff] }
  0x12   : > { %v280_v14 = vadd.f32 %v276_v12, %v272_v11  ;;  %v282_v17 = vadd.f32 %v278_v15, %v274_v13  ;;  %571 = vmatprep.subr.bf16.mxu0 %v570_v16  ;;  %593 = vmatprep.subr.bf16.mxu1 %v570_v16  ;;  %v275_v32 = vld [vmem:[%s690_s15 + $0x18] sm:$0xff]  ;;  %v281_v34 = vadd.f32 %v277_v31, %v273_v30  ;;  %v393_v38 = vld [vmem:[%s264_s14 + $0x8] sm:$0xff]  ;;  %v392_v44 = vld [vmem:[%s264_s14] sm:$0xff] }
  0x13   : > { %v279_v33 = vld [vmem:[%s696_s19 + $0x18] sm:$0xff]  ;;  %v394_v46 = vld [vmem:[%s264_s14 + $0x10] sm:$0xff] }
  0x14   : > { %552 = vmatprep.mubr.f32.mxu0 %v280_v14  ;;  %555 = vmatprep.mubr.f32.mxu1 %v282_v17  ;;  %v283_v35 = vadd.f32 %v279_v33, %v275_v32  ;;  %v395_v40 = vld [vmem:[%s264_s14 + $0x18] sm:$0xff] }
  0x15   : > { %573 = vmatpush3.bf16.msra.mxu0 %v570_v16  ;;  %601 = vmatpush3.bf16.msra.mxu1 %v570_v16 }
  0x16   : > { %575 = vmatprep.subr.bf16.mxu0 %v574_v20  ;;  %594 = vmatprep.subr.bf16.mxu1 %v574_v20 }
  0x19   : > { %577 = vmatpush3.bf16.msra.mxu0 %v574_v20  ;;  %602 = vmatpush3.bf16.msra.mxu1 %v574_v20 }
  0x1a   : > { %579 = vmatprep.subr.bf16.mxu0 %v578_v23  ;;  %595 = vmatprep.subr.bf16.mxu1 %v578_v23 }
  0x1d   : > { %581 = vmatpush3.bf16.msra.mxu0 %v578_v23  ;;  %603 = vmatpush3.bf16.msra.mxu1 %v578_v23 }
  0x1e   : > { %583 = vmatprep.subr.bf16.mxu0 %v582_v26  ;;  %596 = vmatprep.subr.bf16.mxu1 %v582_v26 }
  0x21   : > { %585 = vmatpush3.bf16.msra.mxu0 %v582_v26  ;;  %604 = vmatpush3.bf16.msra.mxu1 %v582_v26 }
  0x22   : > { %587 = vmatprep.subr.bf16.mxu0 %v586_v29  ;;  %597 = vmatprep.subr.bf16.mxu1 %v586_v29 }
  0x25   : > { %589 = vmatpush3.bf16.msra.mxu0 %v586_v29  ;;  %605 = vmatpush3.bf16.msra.mxu1 %v586_v29 }
  0x28   : > { %553 = vmatmul.mubr.f32.vlgmr.msra.gmra.mrb[0].mxu0 %v281_v34  ;;  %556 = vmatmul.mubr.f32.vlgmr.msra.gmra.mrb[0].mxu1 %v283_v35 }
  0xfb   : > { %v554_v37 = vpop.f32.mrb[0].mxu0  ;;  %v557_v39 = vpop.f32.mrb[0].mxu1 }
  0xfc   : > { %v379_v41 = vadd.f32 %v554_v37, %v497_v36  ;;  %v389_v42 = vadd.f32 %v557_v39, %v497_v36  ;;  %v373_v43 = vpop.f32.mrb[1].mxu0  ;;  %v383_v45 = vpop.f32.mrb[1].mxu1 }
  0xfd   : > { %v374_v47 = vadd.f32 %v497_v36, %v373_v43  ;;  %v384_v48 = vadd.f32 %v497_v36, %v383_v45 }
  0xfe   : > { %v397_v49 = vadd.f32 %v393_v38, %v379_v41  ;;  %v399_v50 = vadd.f32 %v395_v40, %v389_v42 }
  0xff   : > { %v396_v51 = vadd.f32 %v392_v44, %v374_v47  ;;  %v398_v52 = vadd.f32 %v394_v46, %v384_v48 }
 0x100   : > { %401 = vst [vmem:[%s270_s20 + $0x8] sm:$0xff] %v397_v49  ;;  %403 = vst [vmem:[%s270_s20 + $0x18] sm:$0xff] %v399_v50 }
 0x101   : > { %400 = vst [vmem:[%s270_s20] sm:$0xff] %v396_v51  ;;  %402 = vst [vmem:[%s270_s20 + $0x10] sm:$0xff] %v398_v52 }
 0x102 PF: > { %s15_s18 = sadd.s32 1, %s620_s18  }
 0x103   : > { %p12_p4 = scmp.ge.s32.totalorder %s15_s18, 6  }
 0x105   :  { %14 = sbr.rel (!%p12_p4) target bundleno = 1 (0x1), region = 76 }

</bundles_post_ra>
